<compile_context>
chip_gen: v5e
topology: v5e:2x2
jax: 0.10.0
libtpu: 0.0.40
codegen_flags: <defaults>
</compile_context>

<pallas_src>
import functools

import jax
import jax.numpy as jnp
from jax.experimental import pallas as pl
from jax.experimental.pallas import tpu as pltpu

_VMEM_LIMIT_BYTES = 32 * 1024 * 1024


# ------------------------------ Pallas kernels ------------------------------

def _conv9tap_relu_chanmean_kernel(taps_ref, w_ref, b_ref, o_ref, *, n_feat):
    """Cin=1 3x3 conv as 9 VPU FMAs + ReLU, channel mean fused into the epilogue.

    taps_ref: (9, Nb, oh, ow) VMEM  -- stride-shifted input taps
    w_ref:    (n_feat, 9) SMEM      -- conv weights (scalar table)
    b_ref:    (n_feat,)   SMEM      -- conv bias
    o_ref:    (Nb, oh, ow) VMEM     -- mean over the n_feat output channels
    """
    taps = taps_ref[...]
    acc = None
    for co in range(n_feat):
        a = taps[0] * w_ref[co, 0] + b_ref[co]
        for t in range(1, 9):
            a = a + taps[t] * w_ref[co, t]
        a = jnp.maximum(a, 0.0)                       # ReLU
        acc = a if acc is None else acc + a
    o_ref[...] = acc * (1.0 / n_feat)                 # torch.mean(dim=1)


def _neck_head_kernel(taps_ref, w_ref, b_ref, w1_ref, b1_ref, g_ref, be_ref,
                      rm_ref, rv_ref, w2_ref, b2_ref, o_ref, *, n_out, n_pix):
    """Fused neck + head for one sample.

    Cin=1 3x3 conv (9 VPU FMAs) + ReLU + AdaptiveAvgPool2d(1), then
    feat_2(relu(bn(feat_1(pooled)))) -- dropout is identity in eval mode.

    taps_ref: (9, 1, sh, sw) VMEM   -- upsample-gathered taps, lane-dense spatial slab
    w_ref:    (n_out, 9) SMEM       -- neck conv weights (scalar table)
    b_ref:    (n_out,)   SMEM       -- neck conv bias
    w1/b1, gamma/beta/rmean/rvar, w2/b2: head parameters (VMEM, grid-resident)
    o_ref:    (1, 1, n_classes) VMEM
    """
    taps = taps_ref[...]
    inv = 1.0 / n_pix
    lane = jax.lax.broadcasted_iota(jnp.int32, (1, n_out), 1)
    pooled = jnp.zeros((1, n_out), jnp.float32)
    for co in range(n_out):
        a = taps[0, 0] * w_ref[co, 0] + b_ref[co]
        for t in range(1, 9):
            a = a + taps[t, 0] * w_ref[co, t]
        p = jnp.sum(jnp.maximum(a, 0.0)) * inv        # ReLU + global avg pool
        pooled = jnp.where(lane == co, p, pooled)
    # feat_1 -> BatchNorm1d (eval mode, running stats, eps=1e-5) -> ReLU -> feat_2
    h = jnp.dot(pooled, w1_ref[...], preferred_element_type=jnp.float32) + b1_ref[...]
    h = (h - rm_ref[...]) * jax.lax.rsqrt(rv_ref[...] + 1e-5) * g_ref[...] + be_ref[...]
    h = jnp.maximum(h, 0.0)
    out2 = (jnp.dot(h, w2_ref[...], preferred_element_type=jnp.float32)
            + b2_ref[...]).astype(o_ref.dtype)        # (1, n_classes)
    o_ref[0] = out2


# ------------------------------ call wrappers --------------------------------

def _smem_spec():
    return pl.BlockSpec(memory_space=pltpu.MemorySpace.SMEM)


def _conv_taps(x, *, k=3, stride=4, pad=1):
    """(N, H, W) -> (k*k, N, oh, ow) stride-shifted taps (strided slices only,
    stacked on a leading axis: no transpose, ~k*k/stride^2 of the input bytes)."""
    N, H, W = x.shape
    oh = (H + 2 * pad - k) // stride + 1
    ow = (W + 2 * pad - k) // stride + 1
    xp = jnp.pad(x, ((0, 0), (pad, pad), (pad, pad)))
    taps = [xp[:, di:di + stride * (oh - 1) + 1:stride,
               dj:dj + stride * (ow - 1) + 1:stride]
            for di in range(k) for dj in range(k)]
    return jnp.stack(taps, axis=0), oh, ow


def backbone_stage(x, w, b):
    """Stand-in backbone stage: Conv2d(1, nf, 3, stride=4, pad=1) + ReLU with the
    channel-mean fused into the kernel.  x: (N, H, W) -> (N, oh, ow)."""
    n_feat = w.shape[0]
    taps, oh, ow = _conv_taps(x)
    N = x.shape[0]
    n_blocks = 2 if (N % 2 == 0 and N >= 2) else 1    # >=2 parallel steps for v7x's 2 TCs
    nb = N // n_blocks
    out = pl.pallas_call(
        functools.partial(_conv9tap_relu_chanmean_kernel, n_feat=n_feat),
        out_shape=jax.ShapeDtypeStruct((N, oh, ow), jnp.float32),
        grid=(n_blocks,),
        in_specs=[
            pl.BlockSpec((9, nb, oh, ow), lambda i: (0, i, 0, 0)),
            _smem_spec(),
            _smem_spec(),
        ],
        out_specs=pl.BlockSpec((nb, oh, ow), lambda i: (i, 0, 0)),
        compiler_params=pltpu.CompilerParams(
            dimension_semantics=("parallel",),
            vmem_limit_bytes=_VMEM_LIMIT_BYTES),
    )(taps, w.reshape(n_feat, 9), b)
    return out, oh, ow


def neck_head(tiled, p, *, up_size=256, k=3, stride=4, pad=1):
    """Stand-in neck + fused head: nearest-upsample to (256,256) folded into the
    tap gather, Conv2d(1, C, 3, stride=4, pad=1) + ReLU + AdaptiveAvgPool2d(1)
    + feat_1 + BN(eval) + ReLU + feat_2 all in one kernel.

    tiled: (B, Ht, Wt) -> (B, n_classes) logits.
    """
    B, Ht, Wt = tiled.shape
    w, bconv = p["nk_w"], p["nk_b"]
    n_out = w.shape[0]
    n_hid = p["w1"].shape[1]
    n_cls = p["w2"].shape[1]
    oh = (up_size + 2 * pad - k) // stride + 1        # 64
    ow = oh
    o_idx = jnp.arange(oh)
    taps = []
    for di in range(k):
        r = stride * o_idx + di - pad                 # conv-input row (unpadded coords)
        r_mask = ((r >= 0) & (r < up_size)).astype(jnp.float32)
        r_src = jnp.clip((r * Ht) // up_size, 0, Ht - 1)   # F.interpolate 'nearest' rule
        rows = tiled[:, r_src, :] * r_mask[None, :, None]  # (B, oh, Wt) -- tiny gather
        for dj in range(k):
            c = stride * o_idx + dj - pad
            c_mask = ((c >= 0) & (c < up_size)).astype(jnp.float32)
            c_src = jnp.clip((c * Wt) // up_size, 0, Wt - 1)
            taps.append(rows[:, :, c_src] * c_mask[None, None, :])   # (B, oh, ow)
    n_pix = oh * ow
    if n_pix % 128 == 0:
        sh, sw = n_pix // 128, 128                    # lane-dense spatial slab
    else:
        sh, sw = oh, ow
    taps = jnp.stack(taps, axis=0).reshape(k * k, B, sh, sw)

    def full(shape):
        n = len(shape)
        return pl.BlockSpec(shape, lambda i, _n=n: (0,) * _n)

    out = pl.pallas_call(
        functools.partial(_neck_head_kernel, n_out=n_out, n_pix=n_pix),
        out_shape=jax.ShapeDtypeStruct((B, 1, n_cls), jnp.float32),
        grid=(B,),
        in_specs=[
            pl.BlockSpec((k * k, 1, sh, sw), lambda i: (0, i, 0, 0)),
            _smem_spec(),
            _smem_spec(),
            full((n_out, n_hid)), full((1, n_hid)),
            full((1, n_hid)), full((1, n_hid)), full((1, n_hid)), full((1, n_hid)),
            full((n_hid, n_cls)), full((1, n_cls)),
        ],
        out_specs=pl.BlockSpec((1, 1, n_cls), lambda i: (i, 0, 0)),
        compiler_params=pltpu.CompilerParams(
            dimension_semantics=("parallel",),
            vmem_limit_bytes=_VMEM_LIMIT_BYTES),
    )(taps, w.reshape(n_out, k * k), bconv,
      p["w1"], p["b1"], p["gamma"], p["beta"], p["rmean"], p["rvar"],
      p["w2"], p["b2"])
    return out.reshape(B, n_cls)


# ------------------------------- JAX glue ------------------------------------

def tiling(xm):
    """Exact HMS2DModelV3.tiling layout: (b, c, h, w) -> (b, 4*h, (c//4)*w)."""
    b, c, h, w = xm.shape
    assert c % 4 == 0
    n_cols = c // 4
    xr = xm.reshape(b, n_cols, 4, h, w).transpose(0, 2, 3, 1, 4)   # (b, i, h, j, w)
    return xr.reshape(b, 4 * h, n_cols * w)


# ----------------------------- model forward ---------------------------------

def hms2d_v3_forward(x, params):
    """HMS2DModelV3 ver_4 forward, eval mode, manifold_mixup=False.  x: (b,c,h,w)."""
    b, c, h, w = x.shape
    assert c > 3
    x = x.reshape(b * c, h, w)                        # x.reshape(-1, 1, h, w), Cin squeezed

    # TODO(synk): stand-in for the timm features_only backbone (stage-4 output):
    # a single Conv2d(1, n_features, 3, stride=4, pad=1) + ReLU, with the
    # subsequent torch.mean(dim=1, keepdims=True) fused into the kernel epilogue.
    fm, mh, mw = backbone_stage(x, params["bb_w"], params["bb_b"])   # (b*c, mh, mw)

    xm = fm.reshape(b, c, mh, mw)
    xt = tiling(xm)                                   # (b, 4*mh, (c//4)*mw)

    # TODO(synk): stand-in for the timm neck forward_features: a single
    # Conv2d(1, neck_features, 3, stride=4, pad=1) + ReLU.  The 256x256 nearest
    # interpolation is folded into the tap gather, and AdaptiveAvgPool2d(1) plus
    # the feat_1 / BatchNorm1d(eval) / ReLU / feat_2 head (dropout = identity in
    # eval mode) are fused into the same kernel, so only the (b, n_classes)
    # logits ever reach HBM.
    return neck_head(xt, params)                      # (b, n_classes)


def init_params(key, *, n_features=8, neck_features=16, n_hiddens=32, n_classes=2):
    ks = jax.random.split(key, 10)

    def rn(k, shape, scale):
        return jax.random.normal(k, shape, jnp.float32) * scale

    return {
        # backbone stand-in: Conv2d(1, n_features, 3, stride=4, pad=1)
        "bb_w": rn(ks[0], (n_features, 1, 3, 3), 0.3),
        "bb_b": rn(ks[1], (n_features,), 0.05),
        # neck stand-in: Conv2d(1, neck_features, 3, stride=4, pad=1)
        "nk_w": rn(ks[2], (neck_features, 1, 3, 3), 0.3),
        "nk_b": rn(ks[3], (neck_features,), 0.05),
        # feat_1: LazyLinear(neck_features -> n_hiddens)
        "w1": rn(ks[4], (neck_features, n_hiddens), 0.2),
        "b1": rn(ks[5], (1, n_hiddens), 0.05),
        # BatchNorm1d(n_hiddens), eval-mode parameters / running stats
        "gamma": jnp.ones((1, n_hiddens), jnp.float32),
        "beta": jnp.zeros((1, n_hiddens), jnp.float32),
        "rmean": rn(ks[6], (1, n_hiddens), 0.05),
        "rvar": jnp.abs(rn(ks[7], (1, n_hiddens), 0.1)) + 1.0,
        # feat_2: LazyLinear(n_hiddens -> n_classes)
        "w2": rn(ks[8], (n_hiddens, n_classes), 0.2),
        "b2": rn(ks[9], (1, n_classes), 0.05),
    }


if __name__ == "__main__":
    key = jax.random.PRNGKey(0)
    kx, kp = jax.random.split(key)

    b, c, h, w = 2, 4, 16, 16          # small NCHW input, c > 3 as the module asserts
    x = jax.random.normal(kx, (b, c, h, w), jnp.float32)
    params = init_params(kp, n_hiddens=32, n_classes=2)

    out = jax.jit(hms2d_v3_forward)(x, params)
    jax.block_until_ready(out)
    assert out.shape == (b, 2) and out.dtype == jnp.float32
    print("KERNEL_OK")
</pallas_src>

<mosaic_0001>
module attributes {stable_mosaic.version = 11 : i64} {
  func.func @_conv9tap_relu_chanmean_kernel(%arg0: i32, %arg1: memref<9x4x4x4xf32, #tpu.memory_space<vmem>>, %arg2: memref<8x9xf32, #tpu.memory_space<smem>>, %arg3: memref<8xf32, #tpu.memory_space<smem>>, %arg4: memref<4x4x4xf32, #tpu.memory_space<vmem>>) attributes {dimension_semantics = [#tpu.dimension_semantics<parallel>], iteration_bounds = array<i64: 2>, scalar_prefetch = 0 : i64, scratch_operands = 0 : i64, tpu.core_type = #tpu.core_type<tc>, window_params = [{transform_indices = @transform_0, window_bounds = array<i64: 9, 4, 4, 4>}, {transform_indices = @transform_1, window_bounds = array<i64: 8, 9>}, {transform_indices = @transform_2, window_bounds = array<i64: 8>}, {transform_indices = @transform_3, window_bounds = array<i64: 4, 4, 4>}]} {
    %c0 = arith.constant 0 : index
    %c0_0 = arith.constant 0 : index
    %c0_1 = arith.constant 0 : index
    %c0_2 = arith.constant 0 : index
    %0 = vector.load %arg1[%c0, %c0_0, %c0_1, %c0_2] : memref<9x4x4x4xf32, #tpu.memory_space<vmem>>, vector<9x4x4x4xf32>
    %1 = vector.extract_strided_slice %0 {offsets = [0, 0, 0, 0], sizes = [1, 4, 4, 4], strides = [1, 1, 1, 1]} : vector<9x4x4x4xf32> to vector<1x4x4x4xf32>
    %2 = vector.shape_cast %1 : vector<1x4x4x4xf32> to vector<4x4x4xf32>
    %c0_3 = arith.constant 0 : index
    %c0_4 = arith.constant 0 : index
    %3 = memref.load %arg2[%c0_3, %c0_4] : memref<8x9xf32, #tpu.memory_space<smem>>
    %4 = vector.broadcast %3 : f32 to vector<4x4x4xf32>
    %5 = arith.mulf %2, %4 : vector<4x4x4xf32>
    %c0_5 = arith.constant 0 : index
    %6 = memref.load %arg3[%c0_5] : memref<8xf32, #tpu.memory_space<smem>>
    %7 = vector.broadcast %6 : f32 to vector<4x4x4xf32>
    %8 = arith.addf %5, %7 : vector<4x4x4xf32>
    %9 = vector.extract_strided_slice %0 {offsets = [1, 0, 0, 0], sizes = [1, 4, 4, 4], strides = [1, 1, 1, 1]} : vector<9x4x4x4xf32> to vector<1x4x4x4xf32>
    %10 = vector.shape_cast %9 : vector<1x4x4x4xf32> to vector<4x4x4xf32>
    %c0_6 = arith.constant 0 : index
    %c1 = arith.constant 1 : index
    %11 = memref.load %arg2[%c0_6, %c1] : memref<8x9xf32, #tpu.memory_space<smem>>
    %12 = vector.broadcast %11 : f32 to vector<4x4x4xf32>
    %13 = arith.mulf %10, %12 : vector<4x4x4xf32>
    %14 = arith.addf %8, %13 : vector<4x4x4xf32>
    %15 = vector.extract_strided_slice %0 {offsets = [2, 0, 0, 0], sizes = [1, 4, 4, 4], strides = [1, 1, 1, 1]} : vector<9x4x4x4xf32> to vector<1x4x4x4xf32>
    %16 = vector.shape_cast %15 : vector<1x4x4x4xf32> to vector<4x4x4xf32>
    %c0_7 = arith.constant 0 : index
    %c2 = arith.constant 2 : index
    %17 = memref.load %arg2[%c0_7, %c2] : memref<8x9xf32, #tpu.memory_space<smem>>
    %18 = vector.broadcast %17 : f32 to vector<4x4x4xf32>
    %19 = arith.mulf %16, %18 : vector<4x4x4xf32>
    %20 = arith.addf %14, %19 : vector<4x4x4xf32>
    %21 = vector.extract_strided_slice %0 {offsets = [3, 0, 0, 0], sizes = [1, 4, 4, 4], strides = [1, 1, 1, 1]} : vector<9x4x4x4xf32> to vector<1x4x4x4xf32>
    %22 = vector.shape_cast %21 : vector<1x4x4x4xf32> to vector<4x4x4xf32>
    %c0_8 = arith.constant 0 : index
    %c3 = arith.constant 3 : index
    %23 = memref.load %arg2[%c0_8, %c3] : memref<8x9xf32, #tpu.memory_space<smem>>
    %24 = vector.broadcast %23 : f32 to vector<4x4x4xf32>
    %25 = arith.mulf %22, %24 : vector<4x4x4xf32>
    %26 = arith.addf %20, %25 : vector<4x4x4xf32>
    %27 = vector.extract_strided_slice %0 {offsets = [4, 0, 0, 0], sizes = [1, 4, 4, 4], strides = [1, 1, 1, 1]} : vector<9x4x4x4xf32> to vector<1x4x4x4xf32>
    %28 = vector.shape_cast %27 : vector<1x4x4x4xf32> to vector<4x4x4xf32>
    %c0_9 = arith.constant 0 : index
    %c4 = arith.constant 4 : index
    %29 = memref.load %arg2[%c0_9, %c4] : memref<8x9xf32, #tpu.memory_space<smem>>
    %30 = vector.broadcast %29 : f32 to vector<4x4x4xf32>
    %31 = arith.mulf %28, %30 : vector<4x4x4xf32>
    %32 = arith.addf %26, %31 : vector<4x4x4xf32>
    %33 = vector.extract_strided_slice %0 {offsets = [5, 0, 0, 0], sizes = [1, 4, 4, 4], strides = [1, 1, 1, 1]} : vector<9x4x4x4xf32> to vector<1x4x4x4xf32>
    %34 = vector.shape_cast %33 : vector<1x4x4x4xf32> to vector<4x4x4xf32>
    %c0_10 = arith.constant 0 : index
    %c5 = arith.constant 5 : index
    %35 = memref.load %arg2[%c0_10, %c5] : memref<8x9xf32, #tpu.memory_space<smem>>
    %36 = vector.broadcast %35 : f32 to vector<4x4x4xf32>
    %37 = arith.mulf %34, %36 : vector<4x4x4xf32>
    %38 = arith.addf %32, %37 : vector<4x4x4xf32>
    %39 = vector.extract_strided_slice %0 {offsets = [6, 0, 0, 0], sizes = [1, 4, 4, 4], strides = [1, 1, 1, 1]} : vector<9x4x4x4xf32> to vector<1x4x4x4xf32>
    %40 = vector.shape_cast %39 : vector<1x4x4x4xf32> to vector<4x4x4xf32>
    %c0_11 = arith.constant 0 : index
    %c6 = arith.constant 6 : index
    %41 = memref.load %arg2[%c0_11, %c6] : memref<8x9xf32, #tpu.memory_space<smem>>
    %42 = vector.broadcast %41 : f32 to vector<4x4x4xf32>
    %43 = arith.mulf %40, %42 : vector<4x4x4xf32>
    %44 = arith.addf %38, %43 : vector<4x4x4xf32>
    %45 = vector.extract_strided_slice %0 {offsets = [7, 0, 0, 0], sizes = [1, 4, 4, 4], strides = [1, 1, 1, 1]} : vector<9x4x4x4xf32> to vector<1x4x4x4xf32>
    %46 = vector.shape_cast %45 : vector<1x4x4x4xf32> to vector<4x4x4xf32>
    %c0_12 = arith.constant 0 : index
    %c7 = arith.constant 7 : index
    %47 = memref.load %arg2[%c0_12, %c7] : memref<8x9xf32, #tpu.memory_space<smem>>
    %48 = vector.broadcast %47 : f32 to vector<4x4x4xf32>
    %49 = arith.mulf %46, %48 : vector<4x4x4xf32>
    %50 = arith.addf %44, %49 : vector<4x4x4xf32>
    %51 = vector.extract_strided_slice %0 {offsets = [8, 0, 0, 0], sizes = [1, 4, 4, 4], strides = [1, 1, 1, 1]} : vector<9x4x4x4xf32> to vector<1x4x4x4xf32>
    %52 = vector.shape_cast %51 : vector<1x4x4x4xf32> to vector<4x4x4xf32>
    %c0_13 = arith.constant 0 : index
    %c8 = arith.constant 8 : index
    %53 = memref.load %arg2[%c0_13, %c8] : memref<8x9xf32, #tpu.memory_space<smem>>
    %54 = vector.broadcast %53 : f32 to vector<4x4x4xf32>
    %55 = arith.mulf %52, %54 : vector<4x4x4xf32>
    %56 = arith.addf %50, %55 : vector<4x4x4xf32>
    %cst = arith.constant 0.000000e+00 : f32
    %57 = vector.broadcast %cst : f32 to vector<4x4x4xf32>
    %58 = arith.maximumf %56, %57 : vector<4x4x4xf32>
    %59 = vector.extract_strided_slice %0 {offsets = [0, 0, 0, 0], sizes = [1, 4, 4, 4], strides = [1, 1, 1, 1]} : vector<9x4x4x4xf32> to vector<1x4x4x4xf32>
    %60 = vector.shape_cast %59 : vector<1x4x4x4xf32> to vector<4x4x4xf32>
    %c1_14 = arith.constant 1 : index
    %c0_15 = arith.constant 0 : index
    %61 = memref.load %arg2[%c1_14, %c0_15] : memref<8x9xf32, #tpu.memory_space<smem>>
    %62 = vector.broadcast %61 : f32 to vector<4x4x4xf32>
    %63 = arith.mulf %60, %62 : vector<4x4x4xf32>
    %c1_16 = arith.constant 1 : index
    %64 = memref.load %arg3[%c1_16] : memref<8xf32, #tpu.memory_space<smem>>
    %65 = vector.broadcast %64 : f32 to vector<4x4x4xf32>
    %66 = arith.addf %63, %65 : vector<4x4x4xf32>
    %67 = vector.extract_strided_slice %0 {offsets = [1, 0, 0, 0], sizes = [1, 4, 4, 4], strides = [1, 1, 1, 1]} : vector<9x4x4x4xf32> to vector<1x4x4x4xf32>
    %68 = vector.shape_cast %67 : vector<1x4x4x4xf32> to vector<4x4x4xf32>
    %c1_17 = arith.constant 1 : index
    %c1_18 = arith.constant 1 : index
    %69 = memref.load %arg2[%c1_17, %c1_18] : memref<8x9xf32, #tpu.memory_space<smem>>
    %70 = vector.broadcast %69 : f32 to vector<4x4x4xf32>
    %71 = arith.mulf %68, %70 : vector<4x4x4xf32>
    %72 = arith.addf %66, %71 : vector<4x4x4xf32>
    %73 = vector.extract_strided_slice %0 {offsets = [2, 0, 0, 0], sizes = [1, 4, 4, 4], strides = [1, 1, 1, 1]} : vector<9x4x4x4xf32> to vector<1x4x4x4xf32>
    %74 = vector.shape_cast %73 : vector<1x4x4x4xf32> to vector<4x4x4xf32>
    %c1_19 = arith.constant 1 : index
    %c2_20 = arith.constant 2 : index
    %75 = memref.load %arg2[%c1_19, %c2_20] : memref<8x9xf32, #tpu.memory_space<smem>>
    %76 = vector.broadcast %75 : f32 to vector<4x4x4xf32>
    %77 = arith.mulf %74, %76 : vector<4x4x4xf32>
    %78 = arith.addf %72, %77 : vector<4x4x4xf32>
    %79 = vector.extract_strided_slice %0 {offsets = [3, 0, 0, 0], sizes = [1, 4, 4, 4], strides = [1, 1, 1, 1]} : vector<9x4x4x4xf32> to vector<1x4x4x4xf32>
    %80 = vector.shape_cast %79 : vector<1x4x4x4xf32> to vector<4x4x4xf32>
    %c1_21 = arith.constant 1 : index
    %c3_22 = arith.constant 3 : index
    %81 = memref.load %arg2[%c1_21, %c3_22] : memref<8x9xf32, #tpu.memory_space<smem>>
    %82 = vector.broadcast %81 : f32 to vector<4x4x4xf32>
    %83 = arith.mulf %80, %82 : vector<4x4x4xf32>
    %84 = arith.addf %78, %83 : vector<4x4x4xf32>
    %85 = vector.extract_strided_slice %0 {offsets = [4, 0, 0, 0], sizes = [1, 4, 4, 4], strides = [1, 1, 1, 1]} : vector<9x4x4x4xf32> to vector<1x4x4x4xf32>
    %86 = vector.shape_cast %85 : vector<1x4x4x4xf32> to vector<4x4x4xf32>
    %c1_23 = arith.constant 1 : index
    %c4_24 = arith.constant 4 : index
    %87 = memref.load %arg2[%c1_23, %c4_24] : memref<8x9xf32, #tpu.memory_space<smem>>
    %88 = vector.broadcast %87 : f32 to vector<4x4x4xf32>
    %89 = arith.mulf %86, %88 : vector<4x4x4xf32>
    %90 = arith.addf %84, %89 : vector<4x4x4xf32>
    %91 = vector.extract_strided_slice %0 {offsets = [5, 0, 0, 0], sizes = [1, 4, 4, 4], strides = [1, 1, 1, 1]} : vector<9x4x4x4xf32> to vector<1x4x4x4xf32>
    %92 = vector.shape_cast %91 : vector<1x4x4x4xf32> to vector<4x4x4xf32>
    %c1_25 = arith.constant 1 : index
    %c5_26 = arith.constant 5 : index
    %93 = memref.load %arg2[%c1_25, %c5_26] : memref<8x9xf32, #tpu.memory_space<smem>>
    %94 = vector.broadcast %93 : f32 to vector<4x4x4xf32>
    %95 = arith.mulf %92, %94 : vector<4x4x4xf32>
    %96 = arith.addf %90, %95 : vector<4x4x4xf32>
    %97 = vector.extract_strided_slice %0 {offsets = [6, 0, 0, 0], sizes = [1, 4, 4, 4], strides = [1, 1, 1, 1]} : vector<9x4x4x4xf32> to vector<1x4x4x4xf32>
    %98 = vector.shape_cast %97 : vector<1x4x4x4xf32> to vector<4x4x4xf32>
    %c1_27 = arith.constant 1 : index
    %c6_28 = arith.constant 6 : index
    %99 = memref.load %arg2[%c1_27, %c6_28] : memref<8x9xf32, #tpu.memory_space<smem>>
    %100 = vector.broadcast %99 : f32 to vector<4x4x4xf32>
    %101 = arith.mulf %98, %100 : vector<4x4x4xf32>
    %102 = arith.addf %96, %101 : vector<4x4x4xf32>
    %103 = vector.extract_strided_slice %0 {offsets = [7, 0, 0, 0], sizes = [1, 4, 4, 4], strides = [1, 1, 1, 1]} : vector<9x4x4x4xf32> to vector<1x4x4x4xf32>
    %104 = vector.shape_cast %103 : vector<1x4x4x4xf32> to vector<4x4x4xf32>
    %c1_29 = arith.constant 1 : index
    %c7_30 = arith.constant 7 : index
    %105 = memref.load %arg2[%c1_29, %c7_30] : memref<8x9xf32, #tpu.memory_space<smem>>
    %106 = vector.broadcast %105 : f32 to vector<4x4x4xf32>
    %107 = arith.mulf %104, %106 : vector<4x4x4xf32>
    %108 = arith.addf %102, %107 : vector<4x4x4xf32>
    %109 = vector.extract_strided_slice %0 {offsets = [8, 0, 0, 0], sizes = [1, 4, 4, 4], strides = [1, 1, 1, 1]} : vector<9x4x4x4xf32> to vector<1x4x4x4xf32>
    %110 = vector.shape_cast %109 : vector<1x4x4x4xf32> to vector<4x4x4xf32>
    %c1_31 = arith.constant 1 : index
    %c8_32 = arith.constant 8 : index
    %111 = memref.load %arg2[%c1_31, %c8_32] : memref<8x9xf32, #tpu.memory_space<smem>>
    %112 = vector.broadcast %111 : f32 to vector<4x4x4xf32>
    %113 = arith.mulf %110, %112 : vector<4x4x4xf32>
    %114 = arith.addf %108, %113 : vector<4x4x4xf32>
    %cst_33 = arith.constant 0.000000e+00 : f32
    %115 = vector.broadcast %cst_33 : f32 to vector<4x4x4xf32>
    %116 = arith.maximumf %114, %115 : vector<4x4x4xf32>
    %117 = arith.addf %58, %116 : vector<4x4x4xf32>
    %118 = vector.extract_strided_slice %0 {offsets = [0, 0, 0, 0], sizes = [1, 4, 4, 4], strides = [1, 1, 1, 1]} : vector<9x4x4x4xf32> to vector<1x4x4x4xf32>
    %119 = vector.shape_cast %118 : vector<1x4x4x4xf32> to vector<4x4x4xf32>
    %c2_34 = arith.constant 2 : index
    %c0_35 = arith.constant 0 : index
    %120 = memref.load %arg2[%c2_34, %c0_35] : memref<8x9xf32, #tpu.memory_space<smem>>
    %121 = vector.broadcast %120 : f32 to vector<4x4x4xf32>
    %122 = arith.mulf %119, %121 : vector<4x4x4xf32>
    %c2_36 = arith.constant 2 : index
    %123 = memref.load %arg3[%c2_36] : memref<8xf32, #tpu.memory_space<smem>>
    %124 = vector.broadcast %123 : f32 to vector<4x4x4xf32>
    %125 = arith.addf %122, %124 : vector<4x4x4xf32>
    %126 = vector.extract_strided_slice %0 {offsets = [1, 0, 0, 0], sizes = [1, 4, 4, 4], strides = [1, 1, 1, 1]} : vector<9x4x4x4xf32> to vector<1x4x4x4xf32>
    %127 = vector.shape_cast %126 : vector<1x4x4x4xf32> to vector<4x4x4xf32>
    %c2_37 = arith.constant 2 : index
    %c1_38 = arith.constant 1 : index
    %128 = memref.load %arg2[%c2_37, %c1_38] : memref<8x9xf32, #tpu.memory_space<smem>>
    %129 = vector.broadcast %128 : f32 to vector<4x4x4xf32>
    %130 = arith.mulf %127, %129 : vector<4x4x4xf32>
    %131 = arith.addf %125, %130 : vector<4x4x4xf32>
    %132 = vector.extract_strided_slice %0 {offsets = [2, 0, 0, 0], sizes = [1, 4, 4, 4], strides = [1, 1, 1, 1]} : vector<9x4x4x4xf32> to vector<1x4x4x4xf32>
    %133 = vector.shape_cast %132 : vector<1x4x4x4xf32> to vector<4x4x4xf32>
    %c2_39 = arith.constant 2 : index
    %c2_40 = arith.constant 2 : index
    %134 = memref.load %arg2[%c2_39, %c2_40] : memref<8x9xf32, #tpu.memory_space<smem>>
    %135 = vector.broadcast %134 : f32 to vector<4x4x4xf32>
    %136 = arith.mulf %133, %135 : vector<4x4x4xf32>
    %137 = arith.addf %131, %136 : vector<4x4x4xf32>
    %138 = vector.extract_strided_slice %0 {offsets = [3, 0, 0, 0], sizes = [1, 4, 4, 4], strides = [1, 1, 1, 1]} : vector<9x4x4x4xf32> to vector<1x4x4x4xf32>
    %139 = vector.shape_cast %138 : vector<1x4x4x4xf32> to vector<4x4x4xf32>
    %c2_41 = arith.constant 2 : index
    %c3_42 = arith.constant 3 : index
    %140 = memref.load %arg2[%c2_41, %c3_42] : memref<8x9xf32, #tpu.memory_space<smem>>
    %141 = vector.broadcast %140 : f32 to vector<4x4x4xf32>
    %142 = arith.mulf %139, %141 : vector<4x4x4xf32>
    %143 = arith.addf %137, %142 : vector<4x4x4xf32>
    %144 = vector.extract_strided_slice %0 {offsets = [4, 0, 0, 0], sizes = [1, 4, 4, 4], strides = [1, 1, 1, 1]} : vector<9x4x4x4xf32> to vector<1x4x4x4xf32>
    %145 = vector.shape_cast %144 : vector<1x4x4x4xf32> to vector<4x4x4xf32>
    %c2_43 = arith.constant 2 : index
    %c4_44 = arith.constant 4 : index
    %146 = memref.load %arg2[%c2_43, %c4_44] : memref<8x9xf32, #tpu.memory_space<smem>>
    %147 = vector.broadcast %146 : f32 to vector<4x4x4xf32>
    %148 = arith.mulf %145, %147 : vector<4x4x4xf32>
    %149 = arith.addf %143, %148 : vector<4x4x4xf32>
    %150 = vector.extract_strided_slice %0 {offsets = [5, 0, 0, 0], sizes = [1, 4, 4, 4], strides = [1, 1, 1, 1]} : vector<9x4x4x4xf32> to vector<1x4x4x4xf32>
    %151 = vector.shape_cast %150 : vector<1x4x4x4xf32> to vector<4x4x4xf32>
    %c2_45 = arith.constant 2 : index
    %c5_46 = arith.constant 5 : index
    %152 = memref.load %arg2[%c2_45, %c5_46] : memref<8x9xf32, #tpu.memory_space<smem>>
    %153 = vector.broadcast %152 : f32 to vector<4x4x4xf32>
    %154 = arith.mulf %151, %153 : vector<4x4x4xf32>
    %155 = arith.addf %149, %154 : vector<4x4x4xf32>
    %156 = vector.extract_strided_slice %0 {offsets = [6, 0, 0, 0], sizes = [1, 4, 4, 4], strides = [1, 1, 1, 1]} : vector<9x4x4x4xf32> to vector<1x4x4x4xf32>
    %157 = vector.shape_cast %156 : vector<1x4x4x4xf32> to vector<4x4x4xf32>
    %c2_47 = arith.constant 2 : index
    %c6_48 = arith.constant 6 : index
    %158 = memref.load %arg2[%c2_47, %c6_48] : memref<8x9xf32, #tpu.memory_space<smem>>
    %159 = vector.broadcast %158 : f32 to vector<4x4x4xf32>
    %160 = arith.mulf %157, %159 : vector<4x4x4xf32>
    %161 = arith.addf %155, %160 : vector<4x4x4xf32>
    %162 = vector.extract_strided_slice %0 {offsets = [7, 0, 0, 0], sizes = [1, 4, 4, 4], strides = [1, 1, 1, 1]} : vector<9x4x4x4xf32> to vector<1x4x4x4xf32>
    %163 = vector.shape_cast %162 : vector<1x4x4x4xf32> to vector<4x4x4xf32>
    %c2_49 = arith.constant 2 : index
    %c7_50 = arith.constant 7 : index
    %164 = memref.load %arg2[%c2_49, %c7_50] : memref<8x9xf32, #tpu.memory_space<smem>>
    %165 = vector.broadcast %164 : f32 to vector<4x4x4xf32>
    %166 = arith.mulf %163, %165 : vector<4x4x4xf32>
    %167 = arith.addf %161, %166 : vector<4x4x4xf32>
    %168 = vector.extract_strided_slice %0 {offsets = [8, 0, 0, 0], sizes = [1, 4, 4, 4], strides = [1, 1, 1, 1]} : vector<9x4x4x4xf32> to vector<1x4x4x4xf32>
    %169 = vector.shape_cast %168 : vector<1x4x4x4xf32> to vector<4x4x4xf32>
    %c2_51 = arith.constant 2 : index
    %c8_52 = arith.constant 8 : index
    %170 = memref.load %arg2[%c2_51, %c8_52] : memref<8x9xf32, #tpu.memory_space<smem>>
    %171 = vector.broadcast %170 : f32 to vector<4x4x4xf32>
    %172 = arith.mulf %169, %171 : vector<4x4x4xf32>
    %173 = arith.addf %167, %172 : vector<4x4x4xf32>
    %cst_53 = arith.constant 0.000000e+00 : f32
    %174 = vector.broadcast %cst_53 : f32 to vector<4x4x4xf32>
    %175 = arith.maximumf %173, %174 : vector<4x4x4xf32>
    %176 = arith.addf %117, %175 : vector<4x4x4xf32>
    %177 = vector.extract_strided_slice %0 {offsets = [0, 0, 0, 0], sizes = [1, 4, 4, 4], strides = [1, 1, 1, 1]} : vector<9x4x4x4xf32> to vector<1x4x4x4xf32>
    %178 = vector.shape_cast %177 : vector<1x4x4x4xf32> to vector<4x4x4xf32>
    %c3_54 = arith.constant 3 : index
    %c0_55 = arith.constant 0 : index
    %179 = memref.load %arg2[%c3_54, %c0_55] : memref<8x9xf32, #tpu.memory_space<smem>>
    %180 = vector.broadcast %179 : f32 to vector<4x4x4xf32>
    %181 = arith.mulf %178, %180 : vector<4x4x4xf32>
    %c3_56 = arith.constant 3 : index
    %182 = memref.load %arg3[%c3_56] : memref<8xf32, #tpu.memory_space<smem>>
    %183 = vector.broadcast %182 : f32 to vector<4x4x4xf32>
    %184 = arith.addf %181, %183 : vector<4x4x4xf32>
    %185 = vector.extract_strided_slice %0 {offsets = [1, 0, 0, 0], sizes = [1, 4, 4, 4], strides = [1, 1, 1, 1]} : vector<9x4x4x4xf32> to vector<1x4x4x4xf32>
    %186 = vector.shape_cast %185 : vector<1x4x4x4xf32> to vector<4x4x4xf32>
    %c3_57 = arith.constant 3 : index
    %c1_58 = arith.constant 1 : index
    %187 = memref.load %arg2[%c3_57, %c1_58] : memref<8x9xf32, #tpu.memory_space<smem>>
    %188 = vector.broadcast %187 : f32 to vector<4x4x4xf32>
    %189 = arith.mulf %186, %188 : vector<4x4x4xf32>
    %190 = arith.addf %184, %189 : vector<4x4x4xf32>
    %191 = vector.extract_strided_slice %0 {offsets = [2, 0, 0, 0], sizes = [1, 4, 4, 4], strides = [1, 1, 1, 1]} : vector<9x4x4x4xf32> to vector<1x4x4x4xf32>
    %192 = vector.shape_cast %191 : vector<1x4x4x4xf32> to vector<4x4x4xf32>
    %c3_59 = arith.constant 3 : index
    %c2_60 = arith.constant 2 : index
    %193 = memref.load %arg2[%c3_59, %c2_60] : memref<8x9xf32, #tpu.memory_space<smem>>
    %194 = vector.broadcast %193 : f32 to vector<4x4x4xf32>
    %195 = arith.mulf %192, %194 : vector<4x4x4xf32>
    %196 = arith.addf %190, %195 : vector<4x4x4xf32>
    %197 = vector.extract_strided_slice %0 {offsets = [3, 0, 0, 0], sizes = [1, 4, 4, 4], strides = [1, 1, 1, 1]} : vector<9x4x4x4xf32> to vector<1x4x4x4xf32>
    %198 = vector.shape_cast %197 : vector<1x4x4x4xf32> to vector<4x4x4xf32>
    %c3_61 = arith.constant 3 : index
    %c3_62 = arith.constant 3 : index
    %199 = memref.load %arg2[%c3_61, %c3_62] : memref<8x9xf32, #tpu.memory_space<smem>>
    %200 = vector.broadcast %199 : f32 to vector<4x4x4xf32>
    %201 = arith.mulf %198, %200 : vector<4x4x4xf32>
    %202 = arith.addf %196, %201 : vector<4x4x4xf32>
    %203 = vector.extract_strided_slice %0 {offsets = [4, 0, 0, 0], sizes = [1, 4, 4, 4], strides = [1, 1, 1, 1]} : vector<9x4x4x4xf32> to vector<1x4x4x4xf32>
    %204 = vector.shape_cast %203 : vector<1x4x4x4xf32> to vector<4x4x4xf32>
    %c3_63 = arith.constant 3 : index
    %c4_64 = arith.constant 4 : index
    %205 = memref.load %arg2[%c3_63, %c4_64] : memref<8x9xf32, #tpu.memory_space<smem>>
    %206 = vector.broadcast %205 : f32 to vector<4x4x4xf32>
    %207 = arith.mulf %204, %206 : vector<4x4x4xf32>
    %208 = arith.addf %202, %207 : vector<4x4x4xf32>
    %209 = vector.extract_strided_slice %0 {offsets = [5, 0, 0, 0], sizes = [1, 4, 4, 4], strides = [1, 1, 1, 1]} : vector<9x4x4x4xf32> to vector<1x4x4x4xf32>
    %210 = vector.shape_cast %209 : vector<1x4x4x4xf32> to vector<4x4x4xf32>
    %c3_65 = arith.constant 3 : index
    %c5_66 = arith.constant 5 : index
    %211 = memref.load %arg2[%c3_65, %c5_66] : memref<8x9xf32, #tpu.memory_space<smem>>
    %212 = vector.broadcast %211 : f32 to vector<4x4x4xf32>
    %213 = arith.mulf %210, %212 : vector<4x4x4xf32>
    %214 = arith.addf %208, %213 : vector<4x4x4xf32>
    %215 = vector.extract_strided_slice %0 {offsets = [6, 0, 0, 0], sizes = [1, 4, 4, 4], strides = [1, 1, 1, 1]} : vector<9x4x4x4xf32> to vector<1x4x4x4xf32>
    %216 = vector.shape_cast %215 : vector<1x4x4x4xf32> to vector<4x4x4xf32>
    %c3_67 = arith.constant 3 : index
    %c6_68 = arith.constant 6 : index
    %217 = memref.load %arg2[%c3_67, %c6_68] : memref<8x9xf32, #tpu.memory_space<smem>>
    %218 = vector.broadcast %217 : f32 to vector<4x4x4xf32>
    %219 = arith.mulf %216, %218 : vector<4x4x4xf32>
    %220 = arith.addf %214, %219 : vector<4x4x4xf32>
    %221 = vector.extract_strided_slice %0 {offsets = [7, 0, 0, 0], sizes = [1, 4, 4, 4], strides = [1, 1, 1, 1]} : vector<9x4x4x4xf32> to vector<1x4x4x4xf32>
    %222 = vector.shape_cast %221 : vector<1x4x4x4xf32> to vector<4x4x4xf32>
    %c3_69 = arith.constant 3 : index
    %c7_70 = arith.constant 7 : index
    %223 = memref.load %arg2[%c3_69, %c7_70] : memref<8x9xf32, #tpu.memory_space<smem>>
    %224 = vector.broadcast %223 : f32 to vector<4x4x4xf32>
    %225 = arith.mulf %222, %224 : vector<4x4x4xf32>
    %226 = arith.addf %220, %225 : vector<4x4x4xf32>
    %227 = vector.extract_strided_slice %0 {offsets = [8, 0, 0, 0], sizes = [1, 4, 4, 4], strides = [1, 1, 1, 1]} : vector<9x4x4x4xf32> to vector<1x4x4x4xf32>
    %228 = vector.shape_cast %227 : vector<1x4x4x4xf32> to vector<4x4x4xf32>
    %c3_71 = arith.constant 3 : index
    %c8_72 = arith.constant 8 : index
    %229 = memref.load %arg2[%c3_71, %c8_72] : memref<8x9xf32, #tpu.memory_space<smem>>
    %230 = vector.broadcast %229 : f32 to vector<4x4x4xf32>
    %231 = arith.mulf %228, %230 : vector<4x4x4xf32>
    %232 = arith.addf %226, %231 : vector<4x4x4xf32>
    %cst_73 = arith.constant 0.000000e+00 : f32
    %233 = vector.broadcast %cst_73 : f32 to vector<4x4x4xf32>
    %234 = arith.maximumf %232, %233 : vector<4x4x4xf32>
    %235 = arith.addf %176, %234 : vector<4x4x4xf32>
    %236 = vector.extract_strided_slice %0 {offsets = [0, 0, 0, 0], sizes = [1, 4, 4, 4], strides = [1, 1, 1, 1]} : vector<9x4x4x4xf32> to vector<1x4x4x4xf32>
    %237 = vector.shape_cast %236 : vector<1x4x4x4xf32> to vector<4x4x4xf32>
    %c4_74 = arith.constant 4 : index
    %c0_75 = arith.constant 0 : index
    %238 = memref.load %arg2[%c4_74, %c0_75] : memref<8x9xf32, #tpu.memory_space<smem>>
    %239 = vector.broadcast %238 : f32 to vector<4x4x4xf32>
    %240 = arith.mulf %237, %239 : vector<4x4x4xf32>
    %c4_76 = arith.constant 4 : index
    %241 = memref.load %arg3[%c4_76] : memref<8xf32, #tpu.memory_space<smem>>
    %242 = vector.broadcast %241 : f32 to vector<4x4x4xf32>
    %243 = arith.addf %240, %242 : vector<4x4x4xf32>
    %244 = vector.extract_strided_slice %0 {offsets = [1, 0, 0, 0], sizes = [1, 4, 4, 4], strides = [1, 1, 1, 1]} : vector<9x4x4x4xf32> to vector<1x4x4x4xf32>
    %245 = vector.shape_cast %244 : vector<1x4x4x4xf32> to vector<4x4x4xf32>
    %c4_77 = arith.constant 4 : index
    %c1_78 = arith.constant 1 : index
    %246 = memref.load %arg2[%c4_77, %c1_78] : memref<8x9xf32, #tpu.memory_space<smem>>
    %247 = vector.broadcast %246 : f32 to vector<4x4x4xf32>
    %248 = arith.mulf %245, %247 : vector<4x4x4xf32>
    %249 = arith.addf %243, %248 : vector<4x4x4xf32>
    %250 = vector.extract_strided_slice %0 {offsets = [2, 0, 0, 0], sizes = [1, 4, 4, 4], strides = [1, 1, 1, 1]} : vector<9x4x4x4xf32> to vector<1x4x4x4xf32>
    %251 = vector.shape_cast %250 : vector<1x4x4x4xf32> to vector<4x4x4xf32>
    %c4_79 = arith.constant 4 : index
    %c2_80 = arith.constant 2 : index
    %252 = memref.load %arg2[%c4_79, %c2_80] : memref<8x9xf32, #tpu.memory_space<smem>>
    %253 = vector.broadcast %252 : f32 to vector<4x4x4xf32>
    %254 = arith.mulf %251, %253 : vector<4x4x4xf32>
    %255 = arith.addf %249, %254 : vector<4x4x4xf32>
    %256 = vector.extract_strided_slice %0 {offsets = [3, 0, 0, 0], sizes = [1, 4, 4, 4], strides = [1, 1, 1, 1]} : vector<9x4x4x4xf32> to vector<1x4x4x4xf32>
    %257 = vector.shape_cast %256 : vector<1x4x4x4xf32> to vector<4x4x4xf32>
    %c4_81 = arith.constant 4 : index
    %c3_82 = arith.constant 3 : index
    %258 = memref.load %arg2[%c4_81, %c3_82] : memref<8x9xf32, #tpu.memory_space<smem>>
    %259 = vector.broadcast %258 : f32 to vector<4x4x4xf32>
    %260 = arith.mulf %257, %259 : vector<4x4x4xf32>
    %261 = arith.addf %255, %260 : vector<4x4x4xf32>
    %262 = vector.extract_strided_slice %0 {offsets = [4, 0, 0, 0], sizes = [1, 4, 4, 4], strides = [1, 1, 1, 1]} : vector<9x4x4x4xf32> to vector<1x4x4x4xf32>
    %263 = vector.shape_cast %262 : vector<1x4x4x4xf32> to vector<4x4x4xf32>
    %c4_83 = arith.constant 4 : index
    %c4_84 = arith.constant 4 : index
    %264 = memref.load %arg2[%c4_83, %c4_84] : memref<8x9xf32, #tpu.memory_space<smem>>
    %265 = vector.broadcast %264 : f32 to vector<4x4x4xf32>
    %266 = arith.mulf %263, %265 : vector<4x4x4xf32>
    %267 = arith.addf %261, %266 : vector<4x4x4xf32>
    %268 = vector.extract_strided_slice %0 {offsets = [5, 0, 0, 0], sizes = [1, 4, 4, 4], strides = [1, 1, 1, 1]} : vector<9x4x4x4xf32> to vector<1x4x4x4xf32>
    %269 = vector.shape_cast %268 : vector<1x4x4x4xf32> to vector<4x4x4xf32>
    %c4_85 = arith.constant 4 : index
    %c5_86 = arith.constant 5 : index
    %270 = memref.load %arg2[%c4_85, %c5_86] : memref<8x9xf32, #tpu.memory_space<smem>>
    %271 = vector.broadcast %270 : f32 to vector<4x4x4xf32>
    %272 = arith.mulf %269, %271 : vector<4x4x4xf32>
    %273 = arith.addf %267, %272 : vector<4x4x4xf32>
    %274 = vector.extract_strided_slice %0 {offsets = [6, 0, 0, 0], sizes = [1, 4, 4, 4], strides = [1, 1, 1, 1]} : vector<9x4x4x4xf32> to vector<1x4x4x4xf32>
    %275 = vector.shape_cast %274 : vector<1x4x4x4xf32> to vector<4x4x4xf32>
    %c4_87 = arith.constant 4 : index
    %c6_88 = arith.constant 6 : index
    %276 = memref.load %arg2[%c4_87, %c6_88] : memref<8x9xf32, #tpu.memory_space<smem>>
    %277 = vector.broadcast %276 : f32 to vector<4x4x4xf32>
    %278 = arith.mulf %275, %277 : vector<4x4x4xf32>
    %279 = arith.addf %273, %278 : vector<4x4x4xf32>
    %280 = vector.extract_strided_slice %0 {offsets = [7, 0, 0, 0], sizes = [1, 4, 4, 4], strides = [1, 1, 1, 1]} : vector<9x4x4x4xf32> to vector<1x4x4x4xf32>
    %281 = vector.shape_cast %280 : vector<1x4x4x4xf32> to vector<4x4x4xf32>
    %c4_89 = arith.constant 4 : index
    %c7_90 = arith.constant 7 : index
    %282 = memref.load %arg2[%c4_89, %c7_90] : memref<8x9xf32, #tpu.memory_space<smem>>
    %283 = vector.broadcast %282 : f32 to vector<4x4x4xf32>
    %284 = arith.mulf %281, %283 : vector<4x4x4xf32>
    %285 = arith.addf %279, %284 : vector<4x4x4xf32>
    %286 = vector.extract_strided_slice %0 {offsets = [8, 0, 0, 0], sizes = [1, 4, 4, 4], strides = [1, 1, 1, 1]} : vector<9x4x4x4xf32> to vector<1x4x4x4xf32>
    %287 = vector.shape_cast %286 : vector<1x4x4x4xf32> to vector<4x4x4xf32>
    %c4_91 = arith.constant 4 : index
    %c8_92 = arith.constant 8 : index
    %288 = memref.load %arg2[%c4_91, %c8_92] : memref<8x9xf32, #tpu.memory_space<smem>>
    %289 = vector.broadcast %288 : f32 to vector<4x4x4xf32>
    %290 = arith.mulf %287, %289 : vector<4x4x4xf32>
    %291 = arith.addf %285, %290 : vector<4x4x4xf32>
    %cst_93 = arith.constant 0.000000e+00 : f32
    %292 = vector.broadcast %cst_93 : f32 to vector<4x4x4xf32>
    %293 = arith.maximumf %291, %292 : vector<4x4x4xf32>
    %294 = arith.addf %235, %293 : vector<4x4x4xf32>
    %295 = vector.extract_strided_slice %0 {offsets = [0, 0, 0, 0], sizes = [1, 4, 4, 4], strides = [1, 1, 1, 1]} : vector<9x4x4x4xf32> to vector<1x4x4x4xf32>
    %296 = vector.shape_cast %295 : vector<1x4x4x4xf32> to vector<4x4x4xf32>
    %c5_94 = arith.constant 5 : index
    %c0_95 = arith.constant 0 : index
    %297 = memref.load %arg2[%c5_94, %c0_95] : memref<8x9xf32, #tpu.memory_space<smem>>
    %298 = vector.broadcast %297 : f32 to vector<4x4x4xf32>
    %299 = arith.mulf %296, %298 : vector<4x4x4xf32>
    %c5_96 = arith.constant 5 : index
    %300 = memref.load %arg3[%c5_96] : memref<8xf32, #tpu.memory_space<smem>>
    %301 = vector.broadcast %300 : f32 to vector<4x4x4xf32>
    %302 = arith.addf %299, %301 : vector<4x4x4xf32>
    %303 = vector.extract_strided_slice %0 {offsets = [1, 0, 0, 0], sizes = [1, 4, 4, 4], strides = [1, 1, 1, 1]} : vector<9x4x4x4xf32> to vector<1x4x4x4xf32>
    %304 = vector.shape_cast %303 : vector<1x4x4x4xf32> to vector<4x4x4xf32>
    %c5_97 = arith.constant 5 : index
    %c1_98 = arith.constant 1 : index
    %305 = memref.load %arg2[%c5_97, %c1_98] : memref<8x9xf32, #tpu.memory_space<smem>>
    %306 = vector.broadcast %305 : f32 to vector<4x4x4xf32>
    %307 = arith.mulf %304, %306 : vector<4x4x4xf32>
    %308 = arith.addf %302, %307 : vector<4x4x4xf32>
    %309 = vector.extract_strided_slice %0 {offsets = [2, 0, 0, 0], sizes = [1, 4, 4, 4], strides = [1, 1, 1, 1]} : vector<9x4x4x4xf32> to vector<1x4x4x4xf32>
    %310 = vector.shape_cast %309 : vector<1x4x4x4xf32> to vector<4x4x4xf32>
    %c5_99 = arith.constant 5 : index
    %c2_100 = arith.constant 2 : index
    %311 = memref.load %arg2[%c5_99, %c2_100] : memref<8x9xf32, #tpu.memory_space<smem>>
    %312 = vector.broadcast %311 : f32 to vector<4x4x4xf32>
    %313 = arith.mulf %310, %312 : vector<4x4x4xf32>
    %314 = arith.addf %308, %313 : vector<4x4x4xf32>
    %315 = vector.extract_strided_slice %0 {offsets = [3, 0, 0, 0], sizes = [1, 4, 4, 4], strides = [1, 1, 1, 1]} : vector<9x4x4x4xf32> to vector<1x4x4x4xf32>
    %316 = vector.shape_cast %315 : vector<1x4x4x4xf32> to vector<4x4x4xf32>
    %c5_101 = arith.constant 5 : index
    %c3_102 = arith.constant 3 : index
    %317 = memref.load %arg2[%c5_101, %c3_102] : memref<8x9xf32, #tpu.memory_space<smem>>
    %318 = vector.broadcast %317 : f32 to vector<4x4x4xf32>
    %319 = arith.mulf %316, %318 : vector<4x4x4xf32>
    %320 = arith.addf %314, %319 : vector<4x4x4xf32>
    %321 = vector.extract_strided_slice %0 {offsets = [4, 0, 0, 0], sizes = [1, 4, 4, 4], strides = [1, 1, 1, 1]} : vector<9x4x4x4xf32> to vector<1x4x4x4xf32>
    %322 = vector.shape_cast %321 : vector<1x4x4x4xf32> to vector<4x4x4xf32>
    %c5_103 = arith.constant 5 : index
    %c4_104 = arith.constant 4 : index
    %323 = memref.load %arg2[%c5_103, %c4_104] : memref<8x9xf32, #tpu.memory_space<smem>>
    %324 = vector.broadcast %323 : f32 to vector<4x4x4xf32>
    %325 = arith.mulf %322, %324 : vector<4x4x4xf32>
    %326 = arith.addf %320, %325 : vector<4x4x4xf32>
    %327 = vector.extract_strided_slice %0 {offsets = [5, 0, 0, 0], sizes = [1, 4, 4, 4], strides = [1, 1, 1, 1]} : vector<9x4x4x4xf32> to vector<1x4x4x4xf32>
    %328 = vector.shape_cast %327 : vector<1x4x4x4xf32> to vector<4x4x4xf32>
    %c5_105 = arith.constant 5 : index
    %c5_106 = arith.constant 5 : index
    %329 = memref.load %arg2[%c5_105, %c5_106] : memref<8x9xf32, #tpu.memory_space<smem>>
    %330 = vector.broadcast %329 : f32 to vector<4x4x4xf32>
    %331 = arith.mulf %328, %330 : vector<4x4x4xf32>
    %332 = arith.addf %326, %331 : vector<4x4x4xf32>
    %333 = vector.extract_strided_slice %0 {offsets = [6, 0, 0, 0], sizes = [1, 4, 4, 4], strides = [1, 1, 1, 1]} : vector<9x4x4x4xf32> to vector<1x4x4x4xf32>
    %334 = vector.shape_cast %333 : vector<1x4x4x4xf32> to vector<4x4x4xf32>
    %c5_107 = arith.constant 5 : index
    %c6_108 = arith.constant 6 : index
    %335 = memref.load %arg2[%c5_107, %c6_108] : memref<8x9xf32, #tpu.memory_space<smem>>
    %336 = vector.broadcast %335 : f32 to vector<4x4x4xf32>
    %337 = arith.mulf %334, %336 : vector<4x4x4xf32>
    %338 = arith.addf %332, %337 : vector<4x4x4xf32>
    %339 = vector.extract_strided_slice %0 {offsets = [7, 0, 0, 0], sizes = [1, 4, 4, 4], strides = [1, 1, 1, 1]} : vector<9x4x4x4xf32> to vector<1x4x4x4xf32>
    %340 = vector.shape_cast %339 : vector<1x4x4x4xf32> to vector<4x4x4xf32>
    %c5_109 = arith.constant 5 : index
    %c7_110 = arith.constant 7 : index
    %341 = memref.load %arg2[%c5_109, %c7_110] : memref<8x9xf32, #tpu.memory_space<smem>>
    %342 = vector.broadcast %341 : f32 to vector<4x4x4xf32>
    %343 = arith.mulf %340, %342 : vector<4x4x4xf32>
    %344 = arith.addf %338, %343 : vector<4x4x4xf32>
    %345 = vector.extract_strided_slice %0 {offsets = [8, 0, 0, 0], sizes = [1, 4, 4, 4], strides = [1, 1, 1, 1]} : vector<9x4x4x4xf32> to vector<1x4x4x4xf32>
    %346 = vector.shape_cast %345 : vector<1x4x4x4xf32> to vector<4x4x4xf32>
    %c5_111 = arith.constant 5 : index
    %c8_112 = arith.constant 8 : index
    %347 = memref.load %arg2[%c5_111, %c8_112] : memref<8x9xf32, #tpu.memory_space<smem>>
    %348 = vector.broadcast %347 : f32 to vector<4x4x4xf32>
    %349 = arith.mulf %346, %348 : vector<4x4x4xf32>
    %350 = arith.addf %344, %349 : vector<4x4x4xf32>
    %cst_113 = arith.constant 0.000000e+00 : f32
    %351 = vector.broadcast %cst_113 : f32 to vector<4x4x4xf32>
    %352 = arith.maximumf %350, %351 : vector<4x4x4xf32>
    %353 = arith.addf %294, %352 : vector<4x4x4xf32>
    %354 = vector.extract_strided_slice %0 {offsets = [0, 0, 0, 0], sizes = [1, 4, 4, 4], strides = [1, 1, 1, 1]} : vector<9x4x4x4xf32> to vector<1x4x4x4xf32>
    %355 = vector.shape_cast %354 : vector<1x4x4x4xf32> to vector<4x4x4xf32>
    %c6_114 = arith.constant 6 : index
    %c0_115 = arith.constant 0 : index
    %356 = memref.load %arg2[%c6_114, %c0_115] : memref<8x9xf32, #tpu.memory_space<smem>>
    %357 = vector.broadcast %356 : f32 to vector<4x4x4xf32>
    %358 = arith.mulf %355, %357 : vector<4x4x4xf32>
    %c6_116 = arith.constant 6 : index
    %359 = memref.load %arg3[%c6_116] : memref<8xf32, #tpu.memory_space<smem>>
    %360 = vector.broadcast %359 : f32 to vector<4x4x4xf32>
    %361 = arith.addf %358, %360 : vector<4x4x4xf32>
    %362 = vector.extract_strided_slice %0 {offsets = [1, 0, 0, 0], sizes = [1, 4, 4, 4], strides = [1, 1, 1, 1]} : vector<9x4x4x4xf32> to vector<1x4x4x4xf32>
    %363 = vector.shape_cast %362 : vector<1x4x4x4xf32> to vector<4x4x4xf32>
    %c6_117 = arith.constant 6 : index
    %c1_118 = arith.constant 1 : index
    %364 = memref.load %arg2[%c6_117, %c1_118] : memref<8x9xf32, #tpu.memory_space<smem>>
    %365 = vector.broadcast %364 : f32 to vector<4x4x4xf32>
    %366 = arith.mulf %363, %365 : vector<4x4x4xf32>
    %367 = arith.addf %361, %366 : vector<4x4x4xf32>
    %368 = vector.extract_strided_slice %0 {offsets = [2, 0, 0, 0], sizes = [1, 4, 4, 4], strides = [1, 1, 1, 1]} : vector<9x4x4x4xf32> to vector<1x4x4x4xf32>
    %369 = vector.shape_cast %368 : vector<1x4x4x4xf32> to vector<4x4x4xf32>
    %c6_119 = arith.constant 6 : index
    %c2_120 = arith.constant 2 : index
    %370 = memref.load %arg2[%c6_119, %c2_120] : memref<8x9xf32, #tpu.memory_space<smem>>
    %371 = vector.broadcast %370 : f32 to vector<4x4x4xf32>
    %372 = arith.mulf %369, %371 : vector<4x4x4xf32>
    %373 = arith.addf %367, %372 : vector<4x4x4xf32>
    %374 = vector.extract_strided_slice %0 {offsets = [3, 0, 0, 0], sizes = [1, 4, 4, 4], strides = [1, 1, 1, 1]} : vector<9x4x4x4xf32> to vector<1x4x4x4xf32>
    %375 = vector.shape_cast %374 : vector<1x4x4x4xf32> to vector<4x4x4xf32>
    %c6_121 = arith.constant 6 : index
    %c3_122 = arith.constant 3 : index
    %376 = memref.load %arg2[%c6_121, %c3_122] : memref<8x9xf32, #tpu.memory_space<smem>>
    %377 = vector.broadcast %376 : f32 to vector<4x4x4xf32>
    %378 = arith.mulf %375, %377 : vector<4x4x4xf32>
    %379 = arith.addf %373, %378 : vector<4x4x4xf32>
    %380 = vector.extract_strided_slice %0 {offsets = [4, 0, 0, 0], sizes = [1, 4, 4, 4], strides = [1, 1, 1, 1]} : vector<9x4x4x4xf32> to vector<1x4x4x4xf32>
    %381 = vector.shape_cast %380 : vector<1x4x4x4xf32> to vector<4x4x4xf32>
    %c6_123 = arith.constant 6 : index
    %c4_124 = arith.constant 4 : index
    %382 = memref.load %arg2[%c6_123, %c4_124] : memref<8x9xf32, #tpu.memory_space<smem>>
    %383 = vector.broadcast %382 : f32 to vector<4x4x4xf32>
    %384 = arith.mulf %381, %383 : vector<4x4x4xf32>
    %385 = arith.addf %379, %384 : vector<4x4x4xf32>
    %386 = vector.extract_strided_slice %0 {offsets = [5, 0, 0, 0], sizes = [1, 4, 4, 4], strides = [1, 1, 1, 1]} : vector<9x4x4x4xf32> to vector<1x4x4x4xf32>
    %387 = vector.shape_cast %386 : vector<1x4x4x4xf32> to vector<4x4x4xf32>
    %c6_125 = arith.constant 6 : index
    %c5_126 = arith.constant 5 : index
    %388 = memref.load %arg2[%c6_125, %c5_126] : memref<8x9xf32, #tpu.memory_space<smem>>
    %389 = vector.broadcast %388 : f32 to vector<4x4x4xf32>
    %390 = arith.mulf %387, %389 : vector<4x4x4xf32>
    %391 = arith.addf %385, %390 : vector<4x4x4xf32>
    %392 = vector.extract_strided_slice %0 {offsets = [6, 0, 0, 0], sizes = [1, 4, 4, 4], strides = [1, 1, 1, 1]} : vector<9x4x4x4xf32> to vector<1x4x4x4xf32>
    %393 = vector.shape_cast %392 : vector<1x4x4x4xf32> to vector<4x4x4xf32>
    %c6_127 = arith.constant 6 : index
    %c6_128 = arith.constant 6 : index
    %394 = memref.load %arg2[%c6_127, %c6_128] : memref<8x9xf32, #tpu.memory_space<smem>>
    %395 = vector.broadcast %394 : f32 to vector<4x4x4xf32>
    %396 = arith.mulf %393, %395 : vector<4x4x4xf32>
    %397 = arith.addf %391, %396 : vector<4x4x4xf32>
    %398 = vector.extract_strided_slice %0 {offsets = [7, 0, 0, 0], sizes = [1, 4, 4, 4], strides = [1, 1, 1, 1]} : vector<9x4x4x4xf32> to vector<1x4x4x4xf32>
    %399 = vector.shape_cast %398 : vector<1x4x4x4xf32> to vector<4x4x4xf32>
    %c6_129 = arith.constant 6 : index
    %c7_130 = arith.constant 7 : index
    %400 = memref.load %arg2[%c6_129, %c7_130] : memref<8x9xf32, #tpu.memory_space<smem>>
    %401 = vector.broadcast %400 : f32 to vector<4x4x4xf32>
    %402 = arith.mulf %399, %401 : vector<4x4x4xf32>
    %403 = arith.addf %397, %402 : vector<4x4x4xf32>
    %404 = vector.extract_strided_slice %0 {offsets = [8, 0, 0, 0], sizes = [1, 4, 4, 4], strides = [1, 1, 1, 1]} : vector<9x4x4x4xf32> to vector<1x4x4x4xf32>
    %405 = vector.shape_cast %404 : vector<1x4x4x4xf32> to vector<4x4x4xf32>
    %c6_131 = arith.constant 6 : index
    %c8_132 = arith.constant 8 : index
    %406 = memref.load %arg2[%c6_131, %c8_132] : memref<8x9xf32, #tpu.memory_space<smem>>
    %407 = vector.broadcast %406 : f32 to vector<4x4x4xf32>
    %408 = arith.mulf %405, %407 : vector<4x4x4xf32>
    %409 = arith.addf %403, %408 : vector<4x4x4xf32>
    %cst_133 = arith.constant 0.000000e+00 : f32
    %410 = vector.broadcast %cst_133 : f32 to vector<4x4x4xf32>
    %411 = arith.maximumf %409, %410 : vector<4x4x4xf32>
    %412 = arith.addf %353, %411 : vector<4x4x4xf32>
    %413 = vector.extract_strided_slice %0 {offsets = [0, 0, 0, 0], sizes = [1, 4, 4, 4], strides = [1, 1, 1, 1]} : vector<9x4x4x4xf32> to vector<1x4x4x4xf32>
    %414 = vector.shape_cast %413 : vector<1x4x4x4xf32> to vector<4x4x4xf32>
    %c7_134 = arith.constant 7 : index
    %c0_135 = arith.constant 0 : index
    %415 = memref.load %arg2[%c7_134, %c0_135] : memref<8x9xf32, #tpu.memory_space<smem>>
    %416 = vector.broadcast %415 : f32 to vector<4x4x4xf32>
    %417 = arith.mulf %414, %416 : vector<4x4x4xf32>
    %c7_136 = arith.constant 7 : index
    %418 = memref.load %arg3[%c7_136] : memref<8xf32, #tpu.memory_space<smem>>
    %419 = vector.broadcast %418 : f32 to vector<4x4x4xf32>
    %420 = arith.addf %417, %419 : vector<4x4x4xf32>
    %421 = vector.extract_strided_slice %0 {offsets = [1, 0, 0, 0], sizes = [1, 4, 4, 4], strides = [1, 1, 1, 1]} : vector<9x4x4x4xf32> to vector<1x4x4x4xf32>
    %422 = vector.shape_cast %421 : vector<1x4x4x4xf32> to vector<4x4x4xf32>
    %c7_137 = arith.constant 7 : index
    %c1_138 = arith.constant 1 : index
    %423 = memref.load %arg2[%c7_137, %c1_138] : memref<8x9xf32, #tpu.memory_space<smem>>
    %424 = vector.broadcast %423 : f32 to vector<4x4x4xf32>
    %425 = arith.mulf %422, %424 : vector<4x4x4xf32>
    %426 = arith.addf %420, %425 : vector<4x4x4xf32>
    %427 = vector.extract_strided_slice %0 {offsets = [2, 0, 0, 0], sizes = [1, 4, 4, 4], strides = [1, 1, 1, 1]} : vector<9x4x4x4xf32> to vector<1x4x4x4xf32>
    %428 = vector.shape_cast %427 : vector<1x4x4x4xf32> to vector<4x4x4xf32>
    %c7_139 = arith.constant 7 : index
    %c2_140 = arith.constant 2 : index
    %429 = memref.load %arg2[%c7_139, %c2_140] : memref<8x9xf32, #tpu.memory_space<smem>>
    %430 = vector.broadcast %429 : f32 to vector<4x4x4xf32>
    %431 = arith.mulf %428, %430 : vector<4x4x4xf32>
    %432 = arith.addf %426, %431 : vector<4x4x4xf32>
    %433 = vector.extract_strided_slice %0 {offsets = [3, 0, 0, 0], sizes = [1, 4, 4, 4], strides = [1, 1, 1, 1]} : vector<9x4x4x4xf32> to vector<1x4x4x4xf32>
    %434 = vector.shape_cast %433 : vector<1x4x4x4xf32> to vector<4x4x4xf32>
    %c7_141 = arith.constant 7 : index
    %c3_142 = arith.constant 3 : index
    %435 = memref.load %arg2[%c7_141, %c3_142] : memref<8x9xf32, #tpu.memory_space<smem>>
    %436 = vector.broadcast %435 : f32 to vector<4x4x4xf32>
    %437 = arith.mulf %434, %436 : vector<4x4x4xf32>
    %438 = arith.addf %432, %437 : vector<4x4x4xf32>
    %439 = vector.extract_strided_slice %0 {offsets = [4, 0, 0, 0], sizes = [1, 4, 4, 4], strides = [1, 1, 1, 1]} : vector<9x4x4x4xf32> to vector<1x4x4x4xf32>
    %440 = vector.shape_cast %439 : vector<1x4x4x4xf32> to vector<4x4x4xf32>
    %c7_143 = arith.constant 7 : index
    %c4_144 = arith.constant 4 : index
    %441 = memref.load %arg2[%c7_143, %c4_144] : memref<8x9xf32, #tpu.memory_space<smem>>
    %442 = vector.broadcast %441 : f32 to vector<4x4x4xf32>
    %443 = arith.mulf %440, %442 : vector<4x4x4xf32>
    %444 = arith.addf %438, %443 : vector<4x4x4xf32>
    %445 = vector.extract_strided_slice %0 {offsets = [5, 0, 0, 0], sizes = [1, 4, 4, 4], strides = [1, 1, 1, 1]} : vector<9x4x4x4xf32> to vector<1x4x4x4xf32>
    %446 = vector.shape_cast %445 : vector<1x4x4x4xf32> to vector<4x4x4xf32>
    %c7_145 = arith.constant 7 : index
    %c5_146 = arith.constant 5 : index
    %447 = memref.load %arg2[%c7_145, %c5_146] : memref<8x9xf32, #tpu.memory_space<smem>>
    %448 = vector.broadcast %447 : f32 to vector<4x4x4xf32>
    %449 = arith.mulf %446, %448 : vector<4x4x4xf32>
    %450 = arith.addf %444, %449 : vector<4x4x4xf32>
    %451 = vector.extract_strided_slice %0 {offsets = [6, 0, 0, 0], sizes = [1, 4, 4, 4], strides = [1, 1, 1, 1]} : vector<9x4x4x4xf32> to vector<1x4x4x4xf32>
    %452 = vector.shape_cast %451 : vector<1x4x4x4xf32> to vector<4x4x4xf32>
    %c7_147 = arith.constant 7 : index
    %c6_148 = arith.constant 6 : index
    %453 = memref.load %arg2[%c7_147, %c6_148] : memref<8x9xf32, #tpu.memory_space<smem>>
    %454 = vector.broadcast %453 : f32 to vector<4x4x4xf32>
    %455 = arith.mulf %452, %454 : vector<4x4x4xf32>
    %456 = arith.addf %450, %455 : vector<4x4x4xf32>
    %457 = vector.extract_strided_slice %0 {offsets = [7, 0, 0, 0], sizes = [1, 4, 4, 4], strides = [1, 1, 1, 1]} : vector<9x4x4x4xf32> to vector<1x4x4x4xf32>
    %458 = vector.shape_cast %457 : vector<1x4x4x4xf32> to vector<4x4x4xf32>
    %c7_149 = arith.constant 7 : index
    %c7_150 = arith.constant 7 : index
    %459 = memref.load %arg2[%c7_149, %c7_150] : memref<8x9xf32, #tpu.memory_space<smem>>
    %460 = vector.broadcast %459 : f32 to vector<4x4x4xf32>
    %461 = arith.mulf %458, %460 : vector<4x4x4xf32>
    %462 = arith.addf %456, %461 : vector<4x4x4xf32>
    %463 = vector.extract_strided_slice %0 {offsets = [8, 0, 0, 0], sizes = [1, 4, 4, 4], strides = [1, 1, 1, 1]} : vector<9x4x4x4xf32> to vector<1x4x4x4xf32>
    %464 = vector.shape_cast %463 : vector<1x4x4x4xf32> to vector<4x4x4xf32>
    %c7_151 = arith.constant 7 : index
    %c8_152 = arith.constant 8 : index
    %465 = memref.load %arg2[%c7_151, %c8_152] : memref<8x9xf32, #tpu.memory_space<smem>>
    %466 = vector.broadcast %465 : f32 to vector<4x4x4xf32>
    %467 = arith.mulf %464, %466 : vector<4x4x4xf32>
    %468 = arith.addf %462, %467 : vector<4x4x4xf32>
    %cst_153 = arith.constant 0.000000e+00 : f32
    %469 = vector.broadcast %cst_153 : f32 to vector<4x4x4xf32>
    %470 = arith.maximumf %468, %469 : vector<4x4x4xf32>
    %471 = arith.addf %412, %470 : vector<4x4x4xf32>
    %cst_154 = arith.constant 1.250000e-01 : f32
    %472 = vector.broadcast %cst_154 : f32 to vector<4x4x4xf32>
    %473 = arith.mulf %471, %472 : vector<4x4x4xf32>
    %c0_155 = arith.constant 0 : index
    %c0_156 = arith.constant 0 : index
    %c0_157 = arith.constant 0 : index
    %474 = vector.load %arg4[%c0_155, %c0_156, %c0_157] : memref<4x4x4xf32, #tpu.memory_space<vmem>>, vector<4x4x4xf32>
    tpu.vector_store %arg4[%c0_155, %c0_156, %c0_157], %473 {strides = array<i32>} : memref<4x4x4xf32, #tpu.memory_space<vmem>>, vector<4x4x4xf32>,
    return
  }
  func.func @transform_0(%arg0: i32) -> (i32, i32, i32, i32) {
    %c0_i32 = arith.constant 0 : i32
    %c0_i32_0 = arith.constant 0 : i32
    %c0_i32_1 = arith.constant 0 : i32
    %c0_i32_2 = arith.constant 0 : i32
    return %c0_i32, %arg0, %c0_i32_0, %c0_i32_1 : i32, i32, i32, i32
  }
  func.func @transform_1(%arg0: i32) -> (i32, i32) {
    %c0_i32 = arith.constant 0 : i32
    %c0_i32_0 = arith.constant 0 : i32
    %c0_i32_1 = arith.constant 0 : i32
    return %c0_i32, %c0_i32_0 : i32, i32
  }
  func.func @transform_2(%arg0: i32) -> i32 {
    %c0_i32 = arith.constant 0 : i32
    %c0_i32_0 = arith.constant 0 : i32
    return %c0_i32 : i32
  }
  func.func @transform_3(%arg0: i32) -> (i32, i32, i32) {
    %c0_i32 = arith.constant 0 : i32
    %c0_i32_0 = arith.constant 0 : i32
    %c0_i32_1 = arith.constant 0 : i32
    return %arg0, %c0_i32, %c0_i32_0 : i32, i32, i32
  }
}

module attributes {stable_mosaic.version = 11 : i64} {
  func.func @_neck_head_kernel(%arg0: i32, %arg1: memref<9x1x32x128xf32, #tpu.memory_space<vmem>>, %arg2: memref<16x9xf32, #tpu.memory_space<smem>>, %arg3: memref<16xf32, #tpu.memory_space<smem>>, %arg4: memref<16x32xf32, #tpu.memory_space<vmem>>, %arg5: memref<1x32xf32, #tpu.memory_space<vmem>>, %arg6: memref<1x32xf32, #tpu.memory_space<vmem>>, %arg7: memref<1x32xf32, #tpu.memory_space<vmem>>, %arg8: memref<1x32xf32, #tpu.memory_space<vmem>>, %arg9: memref<1x32xf32, #tpu.memory_space<vmem>>, %arg10: memref<32x2xf32, #tpu.memory_space<vmem>>, %arg11: memref<1x2xf32, #tpu.memory_space<vmem>>, %arg12: memref<1x1x2xf32, #tpu.memory_space<vmem>>) attributes {dimension_semantics = [#tpu.dimension_semantics<parallel>], iteration_bounds = array<i64: 2>, scalar_prefetch = 0 : i64, scratch_operands = 0 : i64, tpu.core_type = #tpu.core_type<tc>, window_params = [{transform_indices = @transform_0, window_bounds = array<i64: 9, 1, 32, 128>}, {transform_indices = @transform_1, window_bounds = array<i64: 16, 9>}, {transform_indices = @transform_2, window_bounds = array<i64: 16>}, {pipeline_mode = #tpu.pipeline_mode<synchronous>, transform_indices = @transform_3, window_bounds = array<i64: 16, 32>}, {pipeline_mode = #tpu.pipeline_mode<synchronous>, transform_indices = @transform_4, window_bounds = array<i64: 1, 32>}, {pipeline_mode = #tpu.pipeline_mode<synchronous>, transform_indices = @transform_5, window_bounds = array<i64: 1, 32>}, {pipeline_mode = #tpu.pipeline_mode<synchronous>, transform_indices = @transform_6, window_bounds = array<i64: 1, 32>}, {pipeline_mode = #tpu.pipeline_mode<synchronous>, transform_indices = @transform_7, window_bounds = array<i64: 1, 32>}, {pipeline_mode = #tpu.pipeline_mode<synchronous>, transform_indices = @transform_8, window_bounds = array<i64: 1, 32>}, {pipeline_mode = #tpu.pipeline_mode<synchronous>, transform_indices = @transform_9, window_bounds = array<i64: 32, 2>}, {pipeline_mode = #tpu.pipeline_mode<synchronous>, transform_indices = @transform_10, window_bounds = array<i64: 1, 2>}, {transform_indices = @transform_11, window_bounds = array<i64: 1, 1, 2>}]} {
    %c0 = arith.constant 0 : index
    %c0_0 = arith.constant 0 : index
    %c0_1 = arith.constant 0 : index
    %c0_2 = arith.constant 0 : index
    %0 = vector.load %arg1[%c0, %c0_0, %c0_1, %c0_2] : memref<9x1x32x128xf32, #tpu.memory_space<vmem>>, vector<9x1x32x128xf32>
    %1 = tpu.iota {dimensions = array<i32: 1>} : vector<1x16xi32>
    %cst = arith.constant 0.000000e+00 : f32
    %2 = vector.broadcast %cst : f32 to vector<1x16xf32>
    %3 = vector.extract_strided_slice %0 {offsets = [0, 0, 0, 0], sizes = [1, 1, 32, 128], strides = [1, 1, 1, 1]} : vector<9x1x32x128xf32> to vector<1x1x32x128xf32>
    %4 = vector.shape_cast %3 : vector<1x1x32x128xf32> to vector<32x128xf32>
    %c0_3 = arith.constant 0 : index
    %c0_4 = arith.constant 0 : index
    %5 = memref.load %arg2[%c0_3, %c0_4] : memref<16x9xf32, #tpu.memory_space<smem>>
    %6 = vector.broadcast %5 : f32 to vector<32x128xf32>
    %7 = arith.mulf %4, %6 : vector<32x128xf32>
    %c0_5 = arith.constant 0 : index
    %8 = memref.load %arg3[%c0_5] : memref<16xf32, #tpu.memory_space<smem>>
    %9 = vector.broadcast %8 : f32 to vector<32x128xf32>
    %10 = arith.addf %7, %9 : vector<32x128xf32>
    %11 = vector.extract_strided_slice %0 {offsets = [1, 0, 0, 0], sizes = [1, 1, 32, 128], strides = [1, 1, 1, 1]} : vector<9x1x32x128xf32> to vector<1x1x32x128xf32>
    %12 = vector.shape_cast %11 : vector<1x1x32x128xf32> to vector<32x128xf32>
    %c0_6 = arith.constant 0 : index
    %c1 = arith.constant 1 : index
    %13 = memref.load %arg2[%c0_6, %c1] : memref<16x9xf32, #tpu.memory_space<smem>>
    %14 = vector.broadcast %13 : f32 to vector<32x128xf32>
    %15 = arith.mulf %12, %14 : vector<32x128xf32>
    %16 = arith.addf %10, %15 : vector<32x128xf32>
    %17 = vector.extract_strided_slice %0 {offsets = [2, 0, 0, 0], sizes = [1, 1, 32, 128], strides = [1, 1, 1, 1]} : vector<9x1x32x128xf32> to vector<1x1x32x128xf32>
    %18 = vector.shape_cast %17 : vector<1x1x32x128xf32> to vector<32x128xf32>
    %c0_7 = arith.constant 0 : index
    %c2 = arith.constant 2 : index
    %19 = memref.load %arg2[%c0_7, %c2] : memref<16x9xf32, #tpu.memory_space<smem>>
    %20 = vector.broadcast %19 : f32 to vector<32x128xf32>
    %21 = arith.mulf %18, %20 : vector<32x128xf32>
    %22 = arith.addf %16, %21 : vector<32x128xf32>
    %23 = vector.extract_strided_slice %0 {offsets = [3, 0, 0, 0], sizes = [1, 1, 32, 128], strides = [1, 1, 1, 1]} : vector<9x1x32x128xf32> to vector<1x1x32x128xf32>
    %24 = vector.shape_cast %23 : vector<1x1x32x128xf32> to vector<32x128xf32>
    %c0_8 = arith.constant 0 : index
    %c3 = arith.constant 3 : index
    %25 = memref.load %arg2[%c0_8, %c3] : memref<16x9xf32, #tpu.memory_space<smem>>
    %26 = vector.broadcast %25 : f32 to vector<32x128xf32>
    %27 = arith.mulf %24, %26 : vector<32x128xf32>
    %28 = arith.addf %22, %27 : vector<32x128xf32>
    %29 = vector.extract_strided_slice %0 {offsets = [4, 0, 0, 0], sizes = [1, 1, 32, 128], strides = [1, 1, 1, 1]} : vector<9x1x32x128xf32> to vector<1x1x32x128xf32>
    %30 = vector.shape_cast %29 : vector<1x1x32x128xf32> to vector<32x128xf32>
    %c0_9 = arith.constant 0 : index
    %c4 = arith.constant 4 : index
    %31 = memref.load %arg2[%c0_9, %c4] : memref<16x9xf32, #tpu.memory_space<smem>>
    %32 = vector.broadcast %31 : f32 to vector<32x128xf32>
    %33 = arith.mulf %30, %32 : vector<32x128xf32>
    %34 = arith.addf %28, %33 : vector<32x128xf32>
    %35 = vector.extract_strided_slice %0 {offsets = [5, 0, 0, 0], sizes = [1, 1, 32, 128], strides = [1, 1, 1, 1]} : vector<9x1x32x128xf32> to vector<1x1x32x128xf32>
    %36 = vector.shape_cast %35 : vector<1x1x32x128xf32> to vector<32x128xf32>
    %c0_10 = arith.constant 0 : index
    %c5 = arith.constant 5 : index
    %37 = memref.load %arg2[%c0_10, %c5] : memref<16x9xf32, #tpu.memory_space<smem>>
    %38 = vector.broadcast %37 : f32 to vector<32x128xf32>
    %39 = arith.mulf %36, %38 : vector<32x128xf32>
    %40 = arith.addf %34, %39 : vector<32x128xf32>
    %41 = vector.extract_strided_slice %0 {offsets = [6, 0, 0, 0], sizes = [1, 1, 32, 128], strides = [1, 1, 1, 1]} : vector<9x1x32x128xf32> to vector<1x1x32x128xf32>
    %42 = vector.shape_cast %41 : vector<1x1x32x128xf32> to vector<32x128xf32>
    %c0_11 = arith.constant 0 : index
    %c6 = arith.constant 6 : index
    %43 = memref.load %arg2[%c0_11, %c6] : memref<16x9xf32, #tpu.memory_space<smem>>
    %44 = vector.broadcast %43 : f32 to vector<32x128xf32>
    %45 = arith.mulf %42, %44 : vector<32x128xf32>
    %46 = arith.addf %40, %45 : vector<32x128xf32>
    %47 = vector.extract_strided_slice %0 {offsets = [7, 0, 0, 0], sizes = [1, 1, 32, 128], strides = [1, 1, 1, 1]} : vector<9x1x32x128xf32> to vector<1x1x32x128xf32>
    %48 = vector.shape_cast %47 : vector<1x1x32x128xf32> to vector<32x128xf32>
    %c0_12 = arith.constant 0 : index
    %c7 = arith.constant 7 : index
    %49 = memref.load %arg2[%c0_12, %c7] : memref<16x9xf32, #tpu.memory_space<smem>>
    %50 = vector.broadcast %49 : f32 to vector<32x128xf32>
    %51 = arith.mulf %48, %50 : vector<32x128xf32>
    %52 = arith.addf %46, %51 : vector<32x128xf32>
    %53 = vector.extract_strided_slice %0 {offsets = [8, 0, 0, 0], sizes = [1, 1, 32, 128], strides = [1, 1, 1, 1]} : vector<9x1x32x128xf32> to vector<1x1x32x128xf32>
    %54 = vector.shape_cast %53 : vector<1x1x32x128xf32> to vector<32x128xf32>
    %c0_13 = arith.constant 0 : index
    %c8 = arith.constant 8 : index
    %55 = memref.load %arg2[%c0_13, %c8] : memref<16x9xf32, #tpu.memory_space<smem>>
    %56 = vector.broadcast %55 : f32 to vector<32x128xf32>
    %57 = arith.mulf %54, %56 : vector<32x128xf32>
    %58 = arith.addf %52, %57 : vector<32x128xf32>
    %cst_14 = arith.constant 0.000000e+00 : f32
    %59 = vector.broadcast %cst_14 : f32 to vector<32x128xf32>
    %60 = arith.maximumf %58, %59 : vector<32x128xf32>
    %61 = vector.shape_cast %60 : vector<32x128xf32> to vector<1x32x128xf32>
    %cst_15 = arith.constant dense<0.000000e+00> : vector<1xf32>
    %62 = vector.multi_reduction <add>, %61, %cst_15 [1, 2] : vector<1x32x128xf32> to vector<1xf32>
    %63 = vector.shape_cast %62 : vector<1xf32> to vector<1x1x1xf32>
    %64 = vector.extract %63[0, 0, 0] : f32 from vector<1x1x1xf32>
    %cst_16 = arith.constant 2.44140625E-4 : f32
    %65 = arith.mulf %64, %cst_16 : f32
    %c0_i32 = arith.constant 0 : i32
    %66 = vector.broadcast %c0_i32 : i32 to vector<1x16xi32>
    %67 = arith.cmpi eq, %1, %66 : vector<1x16xi32>
    %68 = vector.broadcast %65 : f32 to vector<1x16xf32>
    %69 = arith.select %67, %68, %2 : vector<1x16xi1>, vector<1x16xf32>
    %70 = vector.extract_strided_slice %0 {offsets = [0, 0, 0, 0], sizes = [1, 1, 32, 128], strides = [1, 1, 1, 1]} : vector<9x1x32x128xf32> to vector<1x1x32x128xf32>
    %71 = vector.shape_cast %70 : vector<1x1x32x128xf32> to vector<32x128xf32>
    %c1_17 = arith.constant 1 : index
    %c0_18 = arith.constant 0 : index
    %72 = memref.load %arg2[%c1_17, %c0_18] : memref<16x9xf32, #tpu.memory_space<smem>>
    %73 = vector.broadcast %72 : f32 to vector<32x128xf32>
    %74 = arith.mulf %71, %73 : vector<32x128xf32>
    %c1_19 = arith.constant 1 : index
    %75 = memref.load %arg3[%c1_19] : memref<16xf32, #tpu.memory_space<smem>>
    %76 = vector.broadcast %75 : f32 to vector<32x128xf32>
    %77 = arith.addf %74, %76 : vector<32x128xf32>
    %78 = vector.extract_strided_slice %0 {offsets = [1, 0, 0, 0], sizes = [1, 1, 32, 128], strides = [1, 1, 1, 1]} : vector<9x1x32x128xf32> to vector<1x1x32x128xf32>
    %79 = vector.shape_cast %78 : vector<1x1x32x128xf32> to vector<32x128xf32>
    %c1_20 = arith.constant 1 : index
    %c1_21 = arith.constant 1 : index
    %80 = memref.load %arg2[%c1_20, %c1_21] : memref<16x9xf32, #tpu.memory_space<smem>>
    %81 = vector.broadcast %80 : f32 to vector<32x128xf32>
    %82 = arith.mulf %79, %81 : vector<32x128xf32>
    %83 = arith.addf %77, %82 : vector<32x128xf32>
    %84 = vector.extract_strided_slice %0 {offsets = [2, 0, 0, 0], sizes = [1, 1, 32, 128], strides = [1, 1, 1, 1]} : vector<9x1x32x128xf32> to vector<1x1x32x128xf32>
    %85 = vector.shape_cast %84 : vector<1x1x32x128xf32> to vector<32x128xf32>
    %c1_22 = arith.constant 1 : index
    %c2_23 = arith.constant 2 : index
    %86 = memref.load %arg2[%c1_22, %c2_23] : memref<16x9xf32, #tpu.memory_space<smem>>
    %87 = vector.broadcast %86 : f32 to vector<32x128xf32>
    %88 = arith.mulf %85, %87 : vector<32x128xf32>
    %89 = arith.addf %83, %88 : vector<32x128xf32>
    %90 = vector.extract_strided_slice %0 {offsets = [3, 0, 0, 0], sizes = [1, 1, 32, 128], strides = [1, 1, 1, 1]} : vector<9x1x32x128xf32> to vector<1x1x32x128xf32>
    %91 = vector.shape_cast %90 : vector<1x1x32x128xf32> to vector<32x128xf32>
    %c1_24 = arith.constant 1 : index
    %c3_25 = arith.constant 3 : index
    %92 = memref.load %arg2[%c1_24, %c3_25] : memref<16x9xf32, #tpu.memory_space<smem>>
    %93 = vector.broadcast %92 : f32 to vector<32x128xf32>
    %94 = arith.mulf %91, %93 : vector<32x128xf32>
    %95 = arith.addf %89, %94 : vector<32x128xf32>
    %96 = vector.extract_strided_slice %0 {offsets = [4, 0, 0, 0], sizes = [1, 1, 32, 128], strides = [1, 1, 1, 1]} : vector<9x1x32x128xf32> to vector<1x1x32x128xf32>
    %97 = vector.shape_cast %96 : vector<1x1x32x128xf32> to vector<32x128xf32>
    %c1_26 = arith.constant 1 : index
    %c4_27 = arith.constant 4 : index
    %98 = memref.load %arg2[%c1_26, %c4_27] : memref<16x9xf32, #tpu.memory_space<smem>>
    %99 = vector.broadcast %98 : f32 to vector<32x128xf32>
    %100 = arith.mulf %97, %99 : vector<32x128xf32>
    %101 = arith.addf %95, %100 : vector<32x128xf32>
    %102 = vector.extract_strided_slice %0 {offsets = [5, 0, 0, 0], sizes = [1, 1, 32, 128], strides = [1, 1, 1, 1]} : vector<9x1x32x128xf32> to vector<1x1x32x128xf32>
    %103 = vector.shape_cast %102 : vector<1x1x32x128xf32> to vector<32x128xf32>
    %c1_28 = arith.constant 1 : index
    %c5_29 = arith.constant 5 : index
    %104 = memref.load %arg2[%c1_28, %c5_29] : memref<16x9xf32, #tpu.memory_space<smem>>
    %105 = vector.broadcast %104 : f32 to vector<32x128xf32>
    %106 = arith.mulf %103, %105 : vector<32x128xf32>
    %107 = arith.addf %101, %106 : vector<32x128xf32>
    %108 = vector.extract_strided_slice %0 {offsets = [6, 0, 0, 0], sizes = [1, 1, 32, 128], strides = [1, 1, 1, 1]} : vector<9x1x32x128xf32> to vector<1x1x32x128xf32>
    %109 = vector.shape_cast %108 : vector<1x1x32x128xf32> to vector<32x128xf32>
    %c1_30 = arith.constant 1 : index
    %c6_31 = arith.constant 6 : index
    %110 = memref.load %arg2[%c1_30, %c6_31] : memref<16x9xf32, #tpu.memory_space<smem>>
    %111 = vector.broadcast %110 : f32 to vector<32x128xf32>
    %112 = arith.mulf %109, %111 : vector<32x128xf32>
    %113 = arith.addf %107, %112 : vector<32x128xf32>
    %114 = vector.extract_strided_slice %0 {offsets = [7, 0, 0, 0], sizes = [1, 1, 32, 128], strides = [1, 1, 1, 1]} : vector<9x1x32x128xf32> to vector<1x1x32x128xf32>
    %115 = vector.shape_cast %114 : vector<1x1x32x128xf32> to vector<32x128xf32>
    %c1_32 = arith.constant 1 : index
    %c7_33 = arith.constant 7 : index
    %116 = memref.load %arg2[%c1_32, %c7_33] : memref<16x9xf32, #tpu.memory_space<smem>>
    %117 = vector.broadcast %116 : f32 to vector<32x128xf32>
    %118 = arith.mulf %115, %117 : vector<32x128xf32>
    %119 = arith.addf %113, %118 : vector<32x128xf32>
    %120 = vector.extract_strided_slice %0 {offsets = [8, 0, 0, 0], sizes = [1, 1, 32, 128], strides = [1, 1, 1, 1]} : vector<9x1x32x128xf32> to vector<1x1x32x128xf32>
    %121 = vector.shape_cast %120 : vector<1x1x32x128xf32> to vector<32x128xf32>
    %c1_34 = arith.constant 1 : index
    %c8_35 = arith.constant 8 : index
    %122 = memref.load %arg2[%c1_34, %c8_35] : memref<16x9xf32, #tpu.memory_space<smem>>
    %123 = vector.broadcast %122 : f32 to vector<32x128xf32>
    %124 = arith.mulf %121, %123 : vector<32x128xf32>
    %125 = arith.addf %119, %124 : vector<32x128xf32>
    %cst_36 = arith.constant 0.000000e+00 : f32
    %126 = vector.broadcast %cst_36 : f32 to vector<32x128xf32>
    %127 = arith.maximumf %125, %126 : vector<32x128xf32>
    %128 = vector.shape_cast %127 : vector<32x128xf32> to vector<1x32x128xf32>
    %cst_37 = arith.constant dense<0.000000e+00> : vector<1xf32>
    %129 = vector.multi_reduction <add>, %128, %cst_37 [1, 2] : vector<1x32x128xf32> to vector<1xf32>
    %130 = vector.shape_cast %129 : vector<1xf32> to vector<1x1x1xf32>
    %131 = vector.extract %130[0, 0, 0] : f32 from vector<1x1x1xf32>
    %cst_38 = arith.constant 2.44140625E-4 : f32
    %132 = arith.mulf %131, %cst_38 : f32
    %c1_i32 = arith.constant 1 : i32
    %133 = vector.broadcast %c1_i32 : i32 to vector<1x16xi32>
    %134 = arith.cmpi eq, %1, %133 : vector<1x16xi32>
    %135 = vector.broadcast %132 : f32 to vector<1x16xf32>
    %136 = arith.select %134, %135, %69 : vector<1x16xi1>, vector<1x16xf32>
    %137 = vector.extract_strided_slice %0 {offsets = [0, 0, 0, 0], sizes = [1, 1, 32, 128], strides = [1, 1, 1, 1]} : vector<9x1x32x128xf32> to vector<1x1x32x128xf32>
    %138 = vector.shape_cast %137 : vector<1x1x32x128xf32> to vector<32x128xf32>
    %c2_39 = arith.constant 2 : index
    %c0_40 = arith.constant 0 : index
    %139 = memref.load %arg2[%c2_39, %c0_40] : memref<16x9xf32, #tpu.memory_space<smem>>
    %140 = vector.broadcast %139 : f32 to vector<32x128xf32>
    %141 = arith.mulf %138, %140 : vector<32x128xf32>
    %c2_41 = arith.constant 2 : index
    %142 = memref.load %arg3[%c2_41] : memref<16xf32, #tpu.memory_space<smem>>
    %143 = vector.broadcast %142 : f32 to vector<32x128xf32>
    %144 = arith.addf %141, %143 : vector<32x128xf32>
    %145 = vector.extract_strided_slice %0 {offsets = [1, 0, 0, 0], sizes = [1, 1, 32, 128], strides = [1, 1, 1, 1]} : vector<9x1x32x128xf32> to vector<1x1x32x128xf32>
    %146 = vector.shape_cast %145 : vector<1x1x32x128xf32> to vector<32x128xf32>
    %c2_42 = arith.constant 2 : index
    %c1_43 = arith.constant 1 : index
    %147 = memref.load %arg2[%c2_42, %c1_43] : memref<16x9xf32, #tpu.memory_space<smem>>
    %148 = vector.broadcast %147 : f32 to vector<32x128xf32>
    %149 = arith.mulf %146, %148 : vector<32x128xf32>
    %150 = arith.addf %144, %149 : vector<32x128xf32>
    %151 = vector.extract_strided_slice %0 {offsets = [2, 0, 0, 0], sizes = [1, 1, 32, 128], strides = [1, 1, 1, 1]} : vector<9x1x32x128xf32> to vector<1x1x32x128xf32>
    %152 = vector.shape_cast %151 : vector<1x1x32x128xf32> to vector<32x128xf32>
    %c2_44 = arith.constant 2 : index
    %c2_45 = arith.constant 2 : index
    %153 = memref.load %arg2[%c2_44, %c2_45] : memref<16x9xf32, #tpu.memory_space<smem>>
    %154 = vector.broadcast %153 : f32 to vector<32x128xf32>
    %155 = arith.mulf %152, %154 : vector<32x128xf32>
    %156 = arith.addf %150, %155 : vector<32x128xf32>
    %157 = vector.extract_strided_slice %0 {offsets = [3, 0, 0, 0], sizes = [1, 1, 32, 128], strides = [1, 1, 1, 1]} : vector<9x1x32x128xf32> to vector<1x1x32x128xf32>
    %158 = vector.shape_cast %157 : vector<1x1x32x128xf32> to vector<32x128xf32>
    %c2_46 = arith.constant 2 : index
    %c3_47 = arith.constant 3 : index
    %159 = memref.load %arg2[%c2_46, %c3_47] : memref<16x9xf32, #tpu.memory_space<smem>>
    %160 = vector.broadcast %159 : f32 to vector<32x128xf32>
    %161 = arith.mulf %158, %160 : vector<32x128xf32>
    %162 = arith.addf %156, %161 : vector<32x128xf32>
    %163 = vector.extract_strided_slice %0 {offsets = [4, 0, 0, 0], sizes = [1, 1, 32, 128], strides = [1, 1, 1, 1]} : vector<9x1x32x128xf32> to vector<1x1x32x128xf32>
    %164 = vector.shape_cast %163 : vector<1x1x32x128xf32> to vector<32x128xf32>
    %c2_48 = arith.constant 2 : index
    %c4_49 = arith.constant 4 : index
    %165 = memref.load %arg2[%c2_48, %c4_49] : memref<16x9xf32, #tpu.memory_space<smem>>
    %166 = vector.broadcast %165 : f32 to vector<32x128xf32>
    %167 = arith.mulf %164, %166 : vector<32x128xf32>
    %168 = arith.addf %162, %167 : vector<32x128xf32>
    %169 = vector.extract_strided_slice %0 {offsets = [5, 0, 0, 0], sizes = [1, 1, 32, 128], strides = [1, 1, 1, 1]} : vector<9x1x32x128xf32> to vector<1x1x32x128xf32>
    %170 = vector.shape_cast %169 : vector<1x1x32x128xf32> to vector<32x128xf32>
    %c2_50 = arith.constant 2 : index
    %c5_51 = arith.constant 5 : index
    %171 = memref.load %arg2[%c2_50, %c5_51] : memref<16x9xf32, #tpu.memory_space<smem>>
    %172 = vector.broadcast %171 : f32 to vector<32x128xf32>
    %173 = arith.mulf %170, %172 : vector<32x128xf32>
    %174 = arith.addf %168, %173 : vector<32x128xf32>
    %175 = vector.extract_strided_slice %0 {offsets = [6, 0, 0, 0], sizes = [1, 1, 32, 128], strides = [1, 1, 1, 1]} : vector<9x1x32x128xf32> to vector<1x1x32x128xf32>
    %176 = vector.shape_cast %175 : vector<1x1x32x128xf32> to vector<32x128xf32>
    %c2_52 = arith.constant 2 : index
    %c6_53 = arith.constant 6 : index
    %177 = memref.load %arg2[%c2_52, %c6_53] : memref<16x9xf32, #tpu.memory_space<smem>>
    %178 = vector.broadcast %177 : f32 to vector<32x128xf32>
    %179 = arith.mulf %176, %178 : vector<32x128xf32>
    %180 = arith.addf %174, %179 : vector<32x128xf32>
    %181 = vector.extract_strided_slice %0 {offsets = [7, 0, 0, 0], sizes = [1, 1, 32, 128], strides = [1, 1, 1, 1]} : vector<9x1x32x128xf32> to vector<1x1x32x128xf32>
    %182 = vector.shape_cast %181 : vector<1x1x32x128xf32> to vector<32x128xf32>
    %c2_54 = arith.constant 2 : index
    %c7_55 = arith.constant 7 : index
    %183 = memref.load %arg2[%c2_54, %c7_55] : memref<16x9xf32, #tpu.memory_space<smem>>
    %184 = vector.broadcast %183 : f32 to vector<32x128xf32>
    %185 = arith.mulf %182, %184 : vector<32x128xf32>
    %186 = arith.addf %180, %185 : vector<32x128xf32>
    %187 = vector.extract_strided_slice %0 {offsets = [8, 0, 0, 0], sizes = [1, 1, 32, 128], strides = [1, 1, 1, 1]} : vector<9x1x32x128xf32> to vector<1x1x32x128xf32>
    %188 = vector.shape_cast %187 : vector<1x1x32x128xf32> to vector<32x128xf32>
    %c2_56 = arith.constant 2 : index
    %c8_57 = arith.constant 8 : index
    %189 = memref.load %arg2[%c2_56, %c8_57] : memref<16x9xf32, #tpu.memory_space<smem>>
    %190 = vector.broadcast %189 : f32 to vector<32x128xf32>
    %191 = arith.mulf %188, %190 : vector<32x128xf32>
    %192 = arith.addf %186, %191 : vector<32x128xf32>
    %cst_58 = arith.constant 0.000000e+00 : f32
    %193 = vector.broadcast %cst_58 : f32 to vector<32x128xf32>
    %194 = arith.maximumf %192, %193 : vector<32x128xf32>
    %195 = vector.shape_cast %194 : vector<32x128xf32> to vector<1x32x128xf32>
    %cst_59 = arith.constant dense<0.000000e+00> : vector<1xf32>
    %196 = vector.multi_reduction <add>, %195, %cst_59 [1, 2] : vector<1x32x128xf32> to vector<1xf32>
    %197 = vector.shape_cast %196 : vector<1xf32> to vector<1x1x1xf32>
    %198 = vector.extract %197[0, 0, 0] : f32 from vector<1x1x1xf32>
    %cst_60 = arith.constant 2.44140625E-4 : f32
    %199 = arith.mulf %198, %cst_60 : f32
    %c2_i32 = arith.constant 2 : i32
    %200 = vector.broadcast %c2_i32 : i32 to vector<1x16xi32>
    %201 = arith.cmpi eq, %1, %200 : vector<1x16xi32>
    %202 = vector.broadcast %199 : f32 to vector<1x16xf32>
    %203 = arith.select %201, %202, %136 : vector<1x16xi1>, vector<1x16xf32>
    %204 = vector.extract_strided_slice %0 {offsets = [0, 0, 0, 0], sizes = [1, 1, 32, 128], strides = [1, 1, 1, 1]} : vector<9x1x32x128xf32> to vector<1x1x32x128xf32>
    %205 = vector.shape_cast %204 : vector<1x1x32x128xf32> to vector<32x128xf32>
    %c3_61 = arith.constant 3 : index
    %c0_62 = arith.constant 0 : index
    %206 = memref.load %arg2[%c3_61, %c0_62] : memref<16x9xf32, #tpu.memory_space<smem>>
    %207 = vector.broadcast %206 : f32 to vector<32x128xf32>
    %208 = arith.mulf %205, %207 : vector<32x128xf32>
    %c3_63 = arith.constant 3 : index
    %209 = memref.load %arg3[%c3_63] : memref<16xf32, #tpu.memory_space<smem>>
    %210 = vector.broadcast %209 : f32 to vector<32x128xf32>
    %211 = arith.addf %208, %210 : vector<32x128xf32>
    %212 = vector.extract_strided_slice %0 {offsets = [1, 0, 0, 0], sizes = [1, 1, 32, 128], strides = [1, 1, 1, 1]} : vector<9x1x32x128xf32> to vector<1x1x32x128xf32>
    %213 = vector.shape_cast %212 : vector<1x1x32x128xf32> to vector<32x128xf32>
    %c3_64 = arith.constant 3 : index
    %c1_65 = arith.constant 1 : index
    %214 = memref.load %arg2[%c3_64, %c1_65] : memref<16x9xf32, #tpu.memory_space<smem>>
    %215 = vector.broadcast %214 : f32 to vector<32x128xf32>
    %216 = arith.mulf %213, %215 : vector<32x128xf32>
    %217 = arith.addf %211, %216 : vector<32x128xf32>
    %218 = vector.extract_strided_slice %0 {offsets = [2, 0, 0, 0], sizes = [1, 1, 32, 128], strides = [1, 1, 1, 1]} : vector<9x1x32x128xf32> to vector<1x1x32x128xf32>
    %219 = vector.shape_cast %218 : vector<1x1x32x128xf32> to vector<32x128xf32>
    %c3_66 = arith.constant 3 : index
    %c2_67 = arith.constant 2 : index
    %220 = memref.load %arg2[%c3_66, %c2_67] : memref<16x9xf32, #tpu.memory_space<smem>>
    %221 = vector.broadcast %220 : f32 to vector<32x128xf32>
    %222 = arith.mulf %219, %221 : vector<32x128xf32>
    %223 = arith.addf %217, %222 : vector<32x128xf32>
    %224 = vector.extract_strided_slice %0 {offsets = [3, 0, 0, 0], sizes = [1, 1, 32, 128], strides = [1, 1, 1, 1]} : vector<9x1x32x128xf32> to vector<1x1x32x128xf32>
    %225 = vector.shape_cast %224 : vector<1x1x32x128xf32> to vector<32x128xf32>
    %c3_68 = arith.constant 3 : index
    %c3_69 = arith.constant 3 : index
    %226 = memref.load %arg2[%c3_68, %c3_69] : memref<16x9xf32, #tpu.memory_space<smem>>
    %227 = vector.broadcast %226 : f32 to vector<32x128xf32>
    %228 = arith.mulf %225, %227 : vector<32x128xf32>
    %229 = arith.addf %223, %228 : vector<32x128xf32>
    %230 = vector.extract_strided_slice %0 {offsets = [4, 0, 0, 0], sizes = [1, 1, 32, 128], strides = [1, 1, 1, 1]} : vector<9x1x32x128xf32> to vector<1x1x32x128xf32>
    %231 = vector.shape_cast %230 : vector<1x1x32x128xf32> to vector<32x128xf32>
    %c3_70 = arith.constant 3 : index
    %c4_71 = arith.constant 4 : index
    %232 = memref.load %arg2[%c3_70, %c4_71] : memref<16x9xf32, #tpu.memory_space<smem>>
    %233 = vector.broadcast %232 : f32 to vector<32x128xf32>
    %234 = arith.mulf %231, %233 : vector<32x128xf32>
    %235 = arith.addf %229, %234 : vector<32x128xf32>
    %236 = vector.extract_strided_slice %0 {offsets = [5, 0, 0, 0], sizes = [1, 1, 32, 128], strides = [1, 1, 1, 1]} : vector<9x1x32x128xf32> to vector<1x1x32x128xf32>
    %237 = vector.shape_cast %236 : vector<1x1x32x128xf32> to vector<32x128xf32>
    %c3_72 = arith.constant 3 : index
    %c5_73 = arith.constant 5 : index
    %238 = memref.load %arg2[%c3_72, %c5_73] : memref<16x9xf32, #tpu.memory_space<smem>>
    %239 = vector.broadcast %238 : f32 to vector<32x128xf32>
    %240 = arith.mulf %237, %239 : vector<32x128xf32>
    %241 = arith.addf %235, %240 : vector<32x128xf32>
    %242 = vector.extract_strided_slice %0 {offsets = [6, 0, 0, 0], sizes = [1, 1, 32, 128], strides = [1, 1, 1, 1]} : vector<9x1x32x128xf32> to vector<1x1x32x128xf32>
    %243 = vector.shape_cast %242 : vector<1x1x32x128xf32> to vector<32x128xf32>
    %c3_74 = arith.constant 3 : index
    %c6_75 = arith.constant 6 : index
    %244 = memref.load %arg2[%c3_74, %c6_75] : memref<16x9xf32, #tpu.memory_space<smem>>
    %245 = vector.broadcast %244 : f32 to vector<32x128xf32>
    %246 = arith.mulf %243, %245 : vector<32x128xf32>
    %247 = arith.addf %241, %246 : vector<32x128xf32>
    %248 = vector.extract_strided_slice %0 {offsets = [7, 0, 0, 0], sizes = [1, 1, 32, 128], strides = [1, 1, 1, 1]} : vector<9x1x32x128xf32> to vector<1x1x32x128xf32>
    %249 = vector.shape_cast %248 : vector<1x1x32x128xf32> to vector<32x128xf32>
    %c3_76 = arith.constant 3 : index
    %c7_77 = arith.constant 7 : index
    %250 = memref.load %arg2[%c3_76, %c7_77] : memref<16x9xf32, #tpu.memory_space<smem>>
    %251 = vector.broadcast %250 : f32 to vector<32x128xf32>
    %252 = arith.mulf %249, %251 : vector<32x128xf32>
    %253 = arith.addf %247, %252 : vector<32x128xf32>
    %254 = vector.extract_strided_slice %0 {offsets = [8, 0, 0, 0], sizes = [1, 1, 32, 128], strides = [1, 1, 1, 1]} : vector<9x1x32x128xf32> to vector<1x1x32x128xf32>
    %255 = vector.shape_cast %254 : vector<1x1x32x128xf32> to vector<32x128xf32>
    %c3_78 = arith.constant 3 : index
    %c8_79 = arith.constant 8 : index
    %256 = memref.load %arg2[%c3_78, %c8_79] : memref<16x9xf32, #tpu.memory_space<smem>>
    %257 = vector.broadcast %256 : f32 to vector<32x128xf32>
    %258 = arith.mulf %255, %257 : vector<32x128xf32>
    %259 = arith.addf %253, %258 : vector<32x128xf32>
    %cst_80 = arith.constant 0.000000e+00 : f32
    %260 = vector.broadcast %cst_80 : f32 to vector<32x128xf32>
    %261 = arith.maximumf %259, %260 : vector<32x128xf32>
    %262 = vector.shape_cast %261 : vector<32x128xf32> to vector<1x32x128xf32>
    %cst_81 = arith.constant dense<0.000000e+00> : vector<1xf32>
    %263 = vector.multi_reduction <add>, %262, %cst_81 [1, 2] : vector<1x32x128xf32> to vector<1xf32>
    %264 = vector.shape_cast %263 : vector<1xf32> to vector<1x1x1xf32>
    %265 = vector.extract %264[0, 0, 0] : f32 from vector<1x1x1xf32>
    %cst_82 = arith.constant 2.44140625E-4 : f32
    %266 = arith.mulf %265, %cst_82 : f32
    %c3_i32 = arith.constant 3 : i32
    %267 = vector.broadcast %c3_i32 : i32 to vector<1x16xi32>
    %268 = arith.cmpi eq, %1, %267 : vector<1x16xi32>
    %269 = vector.broadcast %266 : f32 to vector<1x16xf32>
    %270 = arith.select %268, %269, %203 : vector<1x16xi1>, vector<1x16xf32>
    %271 = vector.extract_strided_slice %0 {offsets = [0, 0, 0, 0], sizes = [1, 1, 32, 128], strides = [1, 1, 1, 1]} : vector<9x1x32x128xf32> to vector<1x1x32x128xf32>
    %272 = vector.shape_cast %271 : vector<1x1x32x128xf32> to vector<32x128xf32>
    %c4_83 = arith.constant 4 : index
    %c0_84 = arith.constant 0 : index
    %273 = memref.load %arg2[%c4_83, %c0_84] : memref<16x9xf32, #tpu.memory_space<smem>>
    %274 = vector.broadcast %273 : f32 to vector<32x128xf32>
    %275 = arith.mulf %272, %274 : vector<32x128xf32>
    %c4_85 = arith.constant 4 : index
    %276 = memref.load %arg3[%c4_85] : memref<16xf32, #tpu.memory_space<smem>>
    %277 = vector.broadcast %276 : f32 to vector<32x128xf32>
    %278 = arith.addf %275, %277 : vector<32x128xf32>
    %279 = vector.extract_strided_slice %0 {offsets = [1, 0, 0, 0], sizes = [1, 1, 32, 128], strides = [1, 1, 1, 1]} : vector<9x1x32x128xf32> to vector<1x1x32x128xf32>
    %280 = vector.shape_cast %279 : vector<1x1x32x128xf32> to vector<32x128xf32>
    %c4_86 = arith.constant 4 : index
    %c1_87 = arith.constant 1 : index
    %281 = memref.load %arg2[%c4_86, %c1_87] : memref<16x9xf32, #tpu.memory_space<smem>>
    %282 = vector.broadcast %281 : f32 to vector<32x128xf32>
    %283 = arith.mulf %280, %282 : vector<32x128xf32>
    %284 = arith.addf %278, %283 : vector<32x128xf32>
    %285 = vector.extract_strided_slice %0 {offsets = [2, 0, 0, 0], sizes = [1, 1, 32, 128], strides = [1, 1, 1, 1]} : vector<9x1x32x128xf32> to vector<1x1x32x128xf32>
    %286 = vector.shape_cast %285 : vector<1x1x32x128xf32> to vector<32x128xf32>
    %c4_88 = arith.constant 4 : index
    %c2_89 = arith.constant 2 : index
    %287 = memref.load %arg2[%c4_88, %c2_89] : memref<16x9xf32, #tpu.memory_space<smem>>
    %288 = vector.broadcast %287 : f32 to vector<32x128xf32>
    %289 = arith.mulf %286, %288 : vector<32x128xf32>
    %290 = arith.addf %284, %289 : vector<32x128xf32>
    %291 = vector.extract_strided_slice %0 {offsets = [3, 0, 0, 0], sizes = [1, 1, 32, 128], strides = [1, 1, 1, 1]} : vector<9x1x32x128xf32> to vector<1x1x32x128xf32>
    %292 = vector.shape_cast %291 : vector<1x1x32x128xf32> to vector<32x128xf32>
    %c4_90 = arith.constant 4 : index
    %c3_91 = arith.constant 3 : index
    %293 = memref.load %arg2[%c4_90, %c3_91] : memref<16x9xf32, #tpu.memory_space<smem>>
    %294 = vector.broadcast %293 : f32 to vector<32x128xf32>
    %295 = arith.mulf %292, %294 : vector<32x128xf32>
    %296 = arith.addf %290, %295 : vector<32x128xf32>
    %297 = vector.extract_strided_slice %0 {offsets = [4, 0, 0, 0], sizes = [1, 1, 32, 128], strides = [1, 1, 1, 1]} : vector<9x1x32x128xf32> to vector<1x1x32x128xf32>
    %298 = vector.shape_cast %297 : vector<1x1x32x128xf32> to vector<32x128xf32>
    %c4_92 = arith.constant 4 : index
    %c4_93 = arith.constant 4 : index
    %299 = memref.load %arg2[%c4_92, %c4_93] : memref<16x9xf32, #tpu.memory_space<smem>>
    %300 = vector.broadcast %299 : f32 to vector<32x128xf32>
    %301 = arith.mulf %298, %300 : vector<32x128xf32>
    %302 = arith.addf %296, %301 : vector<32x128xf32>
    %303 = vector.extract_strided_slice %0 {offsets = [5, 0, 0, 0], sizes = [1, 1, 32, 128], strides = [1, 1, 1, 1]} : vector<9x1x32x128xf32> to vector<1x1x32x128xf32>
    %304 = vector.shape_cast %303 : vector<1x1x32x128xf32> to vector<32x128xf32>
    %c4_94 = arith.constant 4 : index
    %c5_95 = arith.constant 5 : index
    %305 = memref.load %arg2[%c4_94, %c5_95] : memref<16x9xf32, #tpu.memory_space<smem>>
    %306 = vector.broadcast %305 : f32 to vector<32x128xf32>
    %307 = arith.mulf %304, %306 : vector<32x128xf32>
    %308 = arith.addf %302, %307 : vector<32x128xf32>
    %309 = vector.extract_strided_slice %0 {offsets = [6, 0, 0, 0], sizes = [1, 1, 32, 128], strides = [1, 1, 1, 1]} : vector<9x1x32x128xf32> to vector<1x1x32x128xf32>
    %310 = vector.shape_cast %309 : vector<1x1x32x128xf32> to vector<32x128xf32>
    %c4_96 = arith.constant 4 : index
    %c6_97 = arith.constant 6 : index
    %311 = memref.load %arg2[%c4_96, %c6_97] : memref<16x9xf32, #tpu.memory_space<smem>>
    %312 = vector.broadcast %311 : f32 to vector<32x128xf32>
    %313 = arith.mulf %310, %312 : vector<32x128xf32>
    %314 = arith.addf %308, %313 : vector<32x128xf32>
    %315 = vector.extract_strided_slice %0 {offsets = [7, 0, 0, 0], sizes = [1, 1, 32, 128], strides = [1, 1, 1, 1]} : vector<9x1x32x128xf32> to vector<1x1x32x128xf32>
    %316 = vector.shape_cast %315 : vector<1x1x32x128xf32> to vector<32x128xf32>
    %c4_98 = arith.constant 4 : index
    %c7_99 = arith.constant 7 : index
    %317 = memref.load %arg2[%c4_98, %c7_99] : memref<16x9xf32, #tpu.memory_space<smem>>
    %318 = vector.broadcast %317 : f32 to vector<32x128xf32>
    %319 = arith.mulf %316, %318 : vector<32x128xf32>
    %320 = arith.addf %314, %319 : vector<32x128xf32>
    %321 = vector.extract_strided_slice %0 {offsets = [8, 0, 0, 0], sizes = [1, 1, 32, 128], strides = [1, 1, 1, 1]} : vector<9x1x32x128xf32> to vector<1x1x32x128xf32>
    %322 = vector.shape_cast %321 : vector<1x1x32x128xf32> to vector<32x128xf32>
    %c4_100 = arith.constant 4 : index
    %c8_101 = arith.constant 8 : index
    %323 = memref.load %arg2[%c4_100, %c8_101] : memref<16x9xf32, #tpu.memory_space<smem>>
    %324 = vector.broadcast %323 : f32 to vector<32x128xf32>
    %325 = arith.mulf %322, %324 : vector<32x128xf32>
    %326 = arith.addf %320, %325 : vector<32x128xf32>
    %cst_102 = arith.constant 0.000000e+00 : f32
    %327 = vector.broadcast %cst_102 : f32 to vector<32x128xf32>
    %328 = arith.maximumf %326, %327 : vector<32x128xf32>
    %329 = vector.shape_cast %328 : vector<32x128xf32> to vector<1x32x128xf32>
    %cst_103 = arith.constant dense<0.000000e+00> : vector<1xf32>
    %330 = vector.multi_reduction <add>, %329, %cst_103 [1, 2] : vector<1x32x128xf32> to vector<1xf32>
    %331 = vector.shape_cast %330 : vector<1xf32> to vector<1x1x1xf32>
    %332 = vector.extract %331[0, 0, 0] : f32 from vector<1x1x1xf32>
    %cst_104 = arith.constant 2.44140625E-4 : f32
    %333 = arith.mulf %332, %cst_104 : f32
    %c4_i32 = arith.constant 4 : i32
    %334 = vector.broadcast %c4_i32 : i32 to vector<1x16xi32>
    %335 = arith.cmpi eq, %1, %334 : vector<1x16xi32>
    %336 = vector.broadcast %333 : f32 to vector<1x16xf32>
    %337 = arith.select %335, %336, %270 : vector<1x16xi1>, vector<1x16xf32>
    %338 = vector.extract_strided_slice %0 {offsets = [0, 0, 0, 0], sizes = [1, 1, 32, 128], strides = [1, 1, 1, 1]} : vector<9x1x32x128xf32> to vector<1x1x32x128xf32>
    %339 = vector.shape_cast %338 : vector<1x1x32x128xf32> to vector<32x128xf32>
    %c5_105 = arith.constant 5 : index
    %c0_106 = arith.constant 0 : index
    %340 = memref.load %arg2[%c5_105, %c0_106] : memref<16x9xf32, #tpu.memory_space<smem>>
    %341 = vector.broadcast %340 : f32 to vector<32x128xf32>
    %342 = arith.mulf %339, %341 : vector<32x128xf32>
    %c5_107 = arith.constant 5 : index
    %343 = memref.load %arg3[%c5_107] : memref<16xf32, #tpu.memory_space<smem>>
    %344 = vector.broadcast %343 : f32 to vector<32x128xf32>
    %345 = arith.addf %342, %344 : vector<32x128xf32>
    %346 = vector.extract_strided_slice %0 {offsets = [1, 0, 0, 0], sizes = [1, 1, 32, 128], strides = [1, 1, 1, 1]} : vector<9x1x32x128xf32> to vector<1x1x32x128xf32>
    %347 = vector.shape_cast %346 : vector<1x1x32x128xf32> to vector<32x128xf32>
    %c5_108 = arith.constant 5 : index
    %c1_109 = arith.constant 1 : index
    %348 = memref.load %arg2[%c5_108, %c1_109] : memref<16x9xf32, #tpu.memory_space<smem>>
    %349 = vector.broadcast %348 : f32 to vector<32x128xf32>
    %350 = arith.mulf %347, %349 : vector<32x128xf32>
    %351 = arith.addf %345, %350 : vector<32x128xf32>
    %352 = vector.extract_strided_slice %0 {offsets = [2, 0, 0, 0], sizes = [1, 1, 32, 128], strides = [1, 1, 1, 1]} : vector<9x1x32x128xf32> to vector<1x1x32x128xf32>
    %353 = vector.shape_cast %352 : vector<1x1x32x128xf32> to vector<32x128xf32>
    %c5_110 = arith.constant 5 : index
    %c2_111 = arith.constant 2 : index
    %354 = memref.load %arg2[%c5_110, %c2_111] : memref<16x9xf32, #tpu.memory_space<smem>>
    %355 = vector.broadcast %354 : f32 to vector<32x128xf32>
    %356 = arith.mulf %353, %355 : vector<32x128xf32>
    %357 = arith.addf %351, %356 : vector<32x128xf32>
    %358 = vector.extract_strided_slice %0 {offsets = [3, 0, 0, 0], sizes = [1, 1, 32, 128], strides = [1, 1, 1, 1]} : vector<9x1x32x128xf32> to vector<1x1x32x128xf32>
    %359 = vector.shape_cast %358 : vector<1x1x32x128xf32> to vector<32x128xf32>
    %c5_112 = arith.constant 5 : index
    %c3_113 = arith.constant 3 : index
    %360 = memref.load %arg2[%c5_112, %c3_113] : memref<16x9xf32, #tpu.memory_space<smem>>
    %361 = vector.broadcast %360 : f32 to vector<32x128xf32>
    %362 = arith.mulf %359, %361 : vector<32x128xf32>
    %363 = arith.addf %357, %362 : vector<32x128xf32>
    %364 = vector.extract_strided_slice %0 {offsets = [4, 0, 0, 0], sizes = [1, 1, 32, 128], strides = [1, 1, 1, 1]} : vector<9x1x32x128xf32> to vector<1x1x32x128xf32>
    %365 = vector.shape_cast %364 : vector<1x1x32x128xf32> to vector<32x128xf32>
    %c5_114 = arith.constant 5 : index
    %c4_115 = arith.constant 4 : index
    %366 = memref.load %arg2[%c5_114, %c4_115] : memref<16x9xf32, #tpu.memory_space<smem>>
    %367 = vector.broadcast %366 : f32 to vector<32x128xf32>
    %368 = arith.mulf %365, %367 : vector<32x128xf32>
    %369 = arith.addf %363, %368 : vector<32x128xf32>
    %370 = vector.extract_strided_slice %0 {offsets = [5, 0, 0, 0], sizes = [1, 1, 32, 128], strides = [1, 1, 1, 1]} : vector<9x1x32x128xf32> to vector<1x1x32x128xf32>
    %371 = vector.shape_cast %370 : vector<1x1x32x128xf32> to vector<32x128xf32>
    %c5_116 = arith.constant 5 : index
    %c5_117 = arith.constant 5 : index
    %372 = memref.load %arg2[%c5_116, %c5_117] : memref<16x9xf32, #tpu.memory_space<smem>>
    %373 = vector.broadcast %372 : f32 to vector<32x128xf32>
    %374 = arith.mulf %371, %373 : vector<32x128xf32>
    %375 = arith.addf %369, %374 : vector<32x128xf32>
    %376 = vector.extract_strided_slice %0 {offsets = [6, 0, 0, 0], sizes = [1, 1, 32, 128], strides = [1, 1, 1, 1]} : vector<9x1x32x128xf32> to vector<1x1x32x128xf32>
    %377 = vector.shape_cast %376 : vector<1x1x32x128xf32> to vector<32x128xf32>
    %c5_118 = arith.constant 5 : index
    %c6_119 = arith.constant 6 : index
    %378 = memref.load %arg2[%c5_118, %c6_119] : memref<16x9xf32, #tpu.memory_space<smem>>
    %379 = vector.broadcast %378 : f32 to vector<32x128xf32>
    %380 = arith.mulf %377, %379 : vector<32x128xf32>
    %381 = arith.addf %375, %380 : vector<32x128xf32>
    %382 = vector.extract_strided_slice %0 {offsets = [7, 0, 0, 0], sizes = [1, 1, 32, 128], strides = [1, 1, 1, 1]} : vector<9x1x32x128xf32> to vector<1x1x32x128xf32>
    %383 = vector.shape_cast %382 : vector<1x1x32x128xf32> to vector<32x128xf32>
    %c5_120 = arith.constant 5 : index
    %c7_121 = arith.constant 7 : index
    %384 = memref.load %arg2[%c5_120, %c7_121] : memref<16x9xf32, #tpu.memory_space<smem>>
    %385 = vector.broadcast %384 : f32 to vector<32x128xf32>
    %386 = arith.mulf %383, %385 : vector<32x128xf32>
    %387 = arith.addf %381, %386 : vector<32x128xf32>
    %388 = vector.extract_strided_slice %0 {offsets = [8, 0, 0, 0], sizes = [1, 1, 32, 128], strides = [1, 1, 1, 1]} : vector<9x1x32x128xf32> to vector<1x1x32x128xf32>
    %389 = vector.shape_cast %388 : vector<1x1x32x128xf32> to vector<32x128xf32>
    %c5_122 = arith.constant 5 : index
    %c8_123 = arith.constant 8 : index
    %390 = memref.load %arg2[%c5_122, %c8_123] : memref<16x9xf32, #tpu.memory_space<smem>>
    %391 = vector.broadcast %390 : f32 to vector<32x128xf32>
    %392 = arith.mulf %389, %391 : vector<32x128xf32>
    %393 = arith.addf %387, %392 : vector<32x128xf32>
    %cst_124 = arith.constant 0.000000e+00 : f32
    %394 = vector.broadcast %cst_124 : f32 to vector<32x128xf32>
    %395 = arith.maximumf %393, %394 : vector<32x128xf32>
    %396 = vector.shape_cast %395 : vector<32x128xf32> to vector<1x32x128xf32>
    %cst_125 = arith.constant dense<0.000000e+00> : vector<1xf32>
    %397 = vector.multi_reduction <add>, %396, %cst_125 [1, 2] : vector<1x32x128xf32> to vector<1xf32>
    %398 = vector.shape_cast %397 : vector<1xf32> to vector<1x1x1xf32>
    %399 = vector.extract %398[0, 0, 0] : f32 from vector<1x1x1xf32>
    %cst_126 = arith.constant 2.44140625E-4 : f32
    %400 = arith.mulf %399, %cst_126 : f32
    %c5_i32 = arith.constant 5 : i32
    %401 = vector.broadcast %c5_i32 : i32 to vector<1x16xi32>
    %402 = arith.cmpi eq, %1, %401 : vector<1x16xi32>
    %403 = vector.broadcast %400 : f32 to vector<1x16xf32>
    %404 = arith.select %402, %403, %337 : vector<1x16xi1>, vector<1x16xf32>
    %405 = vector.extract_strided_slice %0 {offsets = [0, 0, 0, 0], sizes = [1, 1, 32, 128], strides = [1, 1, 1, 1]} : vector<9x1x32x128xf32> to vector<1x1x32x128xf32>
    %406 = vector.shape_cast %405 : vector<1x1x32x128xf32> to vector<32x128xf32>
    %c6_127 = arith.constant 6 : index
    %c0_128 = arith.constant 0 : index
    %407 = memref.load %arg2[%c6_127, %c0_128] : memref<16x9xf32, #tpu.memory_space<smem>>
    %408 = vector.broadcast %407 : f32 to vector<32x128xf32>
    %409 = arith.mulf %406, %408 : vector<32x128xf32>
    %c6_129 = arith.constant 6 : index
    %410 = memref.load %arg3[%c6_129] : memref<16xf32, #tpu.memory_space<smem>>
    %411 = vector.broadcast %410 : f32 to vector<32x128xf32>
    %412 = arith.addf %409, %411 : vector<32x128xf32>
    %413 = vector.extract_strided_slice %0 {offsets = [1, 0, 0, 0], sizes = [1, 1, 32, 128], strides = [1, 1, 1, 1]} : vector<9x1x32x128xf32> to vector<1x1x32x128xf32>
    %414 = vector.shape_cast %413 : vector<1x1x32x128xf32> to vector<32x128xf32>
    %c6_130 = arith.constant 6 : index
    %c1_131 = arith.constant 1 : index
    %415 = memref.load %arg2[%c6_130, %c1_131] : memref<16x9xf32, #tpu.memory_space<smem>>
    %416 = vector.broadcast %415 : f32 to vector<32x128xf32>
    %417 = arith.mulf %414, %416 : vector<32x128xf32>
    %418 = arith.addf %412, %417 : vector<32x128xf32>
    %419 = vector.extract_strided_slice %0 {offsets = [2, 0, 0, 0], sizes = [1, 1, 32, 128], strides = [1, 1, 1, 1]} : vector<9x1x32x128xf32> to vector<1x1x32x128xf32>
    %420 = vector.shape_cast %419 : vector<1x1x32x128xf32> to vector<32x128xf32>
    %c6_132 = arith.constant 6 : index
    %c2_133 = arith.constant 2 : index
    %421 = memref.load %arg2[%c6_132, %c2_133] : memref<16x9xf32, #tpu.memory_space<smem>>
    %422 = vector.broadcast %421 : f32 to vector<32x128xf32>
    %423 = arith.mulf %420, %422 : vector<32x128xf32>
    %424 = arith.addf %418, %423 : vector<32x128xf32>
    %425 = vector.extract_strided_slice %0 {offsets = [3, 0, 0, 0], sizes = [1, 1, 32, 128], strides = [1, 1, 1, 1]} : vector<9x1x32x128xf32> to vector<1x1x32x128xf32>
    %426 = vector.shape_cast %425 : vector<1x1x32x128xf32> to vector<32x128xf32>
    %c6_134 = arith.constant 6 : index
    %c3_135 = arith.constant 3 : index
    %427 = memref.load %arg2[%c6_134, %c3_135] : memref<16x9xf32, #tpu.memory_space<smem>>
    %428 = vector.broadcast %427 : f32 to vector<32x128xf32>
    %429 = arith.mulf %426, %428 : vector<32x128xf32>
    %430 = arith.addf %424, %429 : vector<32x128xf32>
    %431 = vector.extract_strided_slice %0 {offsets = [4, 0, 0, 0], sizes = [1, 1, 32, 128], strides = [1, 1, 1, 1]} : vector<9x1x32x128xf32> to vector<1x1x32x128xf32>
    %432 = vector.shape_cast %431 : vector<1x1x32x128xf32> to vector<32x128xf32>
    %c6_136 = arith.constant 6 : index
    %c4_137 = arith.constant 4 : index
    %433 = memref.load %arg2[%c6_136, %c4_137] : memref<16x9xf32, #tpu.memory_space<smem>>
    %434 = vector.broadcast %433 : f32 to vector<32x128xf32>
    %435 = arith.mulf %432, %434 : vector<32x128xf32>
    %436 = arith.addf %430, %435 : vector<32x128xf32>
    %437 = vector.extract_strided_slice %0 {offsets = [5, 0, 0, 0], sizes = [1, 1, 32, 128], strides = [1, 1, 1, 1]} : vector<9x1x32x128xf32> to vector<1x1x32x128xf32>
    %438 = vector.shape_cast %437 : vector<1x1x32x128xf32> to vector<32x128xf32>
    %c6_138 = arith.constant 6 : index
    %c5_139 = arith.constant 5 : index
    %439 = memref.load %arg2[%c6_138, %c5_139] : memref<16x9xf32, #tpu.memory_space<smem>>
    %440 = vector.broadcast %439 : f32 to vector<32x128xf32>
    %441 = arith.mulf %438, %440 : vector<32x128xf32>
    %442 = arith.addf %436, %441 : vector<32x128xf32>
    %443 = vector.extract_strided_slice %0 {offsets = [6, 0, 0, 0], sizes = [1, 1, 32, 128], strides = [1, 1, 1, 1]} : vector<9x1x32x128xf32> to vector<1x1x32x128xf32>
    %444 = vector.shape_cast %443 : vector<1x1x32x128xf32> to vector<32x128xf32>
    %c6_140 = arith.constant 6 : index
    %c6_141 = arith.constant 6 : index
    %445 = memref.load %arg2[%c6_140, %c6_141] : memref<16x9xf32, #tpu.memory_space<smem>>
    %446 = vector.broadcast %445 : f32 to vector<32x128xf32>
    %447 = arith.mulf %444, %446 : vector<32x128xf32>
    %448 = arith.addf %442, %447 : vector<32x128xf32>
    %449 = vector.extract_strided_slice %0 {offsets = [7, 0, 0, 0], sizes = [1, 1, 32, 128], strides = [1, 1, 1, 1]} : vector<9x1x32x128xf32> to vector<1x1x32x128xf32>
    %450 = vector.shape_cast %449 : vector<1x1x32x128xf32> to vector<32x128xf32>
    %c6_142 = arith.constant 6 : index
    %c7_143 = arith.constant 7 : index
    %451 = memref.load %arg2[%c6_142, %c7_143] : memref<16x9xf32, #tpu.memory_space<smem>>
    %452 = vector.broadcast %451 : f32 to vector<32x128xf32>
    %453 = arith.mulf %450, %452 : vector<32x128xf32>
    %454 = arith.addf %448, %453 : vector<32x128xf32>
    %455 = vector.extract_strided_slice %0 {offsets = [8, 0, 0, 0], sizes = [1, 1, 32, 128], strides = [1, 1, 1, 1]} : vector<9x1x32x128xf32> to vector<1x1x32x128xf32>
    %456 = vector.shape_cast %455 : vector<1x1x32x128xf32> to vector<32x128xf32>
    %c6_144 = arith.constant 6 : index
    %c8_145 = arith.constant 8 : index
    %457 = memref.load %arg2[%c6_144, %c8_145] : memref<16x9xf32, #tpu.memory_space<smem>>
    %458 = vector.broadcast %457 : f32 to vector<32x128xf32>
    %459 = arith.mulf %456, %458 : vector<32x128xf32>
    %460 = arith.addf %454, %459 : vector<32x128xf32>
    %cst_146 = arith.constant 0.000000e+00 : f32
    %461 = vector.broadcast %cst_146 : f32 to vector<32x128xf32>
    %462 = arith.maximumf %460, %461 : vector<32x128xf32>
    %463 = vector.shape_cast %462 : vector<32x128xf32> to vector<1x32x128xf32>
    %cst_147 = arith.constant dense<0.000000e+00> : vector<1xf32>
    %464 = vector.multi_reduction <add>, %463, %cst_147 [1, 2] : vector<1x32x128xf32> to vector<1xf32>
    %465 = vector.shape_cast %464 : vector<1xf32> to vector<1x1x1xf32>
    %466 = vector.extract %465[0, 0, 0] : f32 from vector<1x1x1xf32>
    %cst_148 = arith.constant 2.44140625E-4 : f32
    %467 = arith.mulf %466, %cst_148 : f32
    %c6_i32 = arith.constant 6 : i32
    %468 = vector.broadcast %c6_i32 : i32 to vector<1x16xi32>
    %469 = arith.cmpi eq, %1, %468 : vector<1x16xi32>
    %470 = vector.broadcast %467 : f32 to vector<1x16xf32>
    %471 = arith.select %469, %470, %404 : vector<1x16xi1>, vector<1x16xf32>
    %472 = vector.extract_strided_slice %0 {offsets = [0, 0, 0, 0], sizes = [1, 1, 32, 128], strides = [1, 1, 1, 1]} : vector<9x1x32x128xf32> to vector<1x1x32x128xf32>
    %473 = vector.shape_cast %472 : vector<1x1x32x128xf32> to vector<32x128xf32>
    %c7_149 = arith.constant 7 : index
    %c0_150 = arith.constant 0 : index
    %474 = memref.load %arg2[%c7_149, %c0_150] : memref<16x9xf32, #tpu.memory_space<smem>>
    %475 = vector.broadcast %474 : f32 to vector<32x128xf32>
    %476 = arith.mulf %473, %475 : vector<32x128xf32>
    %c7_151 = arith.constant 7 : index
    %477 = memref.load %arg3[%c7_151] : memref<16xf32, #tpu.memory_space<smem>>
    %478 = vector.broadcast %477 : f32 to vector<32x128xf32>
    %479 = arith.addf %476, %478 : vector<32x128xf32>
    %480 = vector.extract_strided_slice %0 {offsets = [1, 0, 0, 0], sizes = [1, 1, 32, 128], strides = [1, 1, 1, 1]} : vector<9x1x32x128xf32> to vector<1x1x32x128xf32>
    %481 = vector.shape_cast %480 : vector<1x1x32x128xf32> to vector<32x128xf32>
    %c7_152 = arith.constant 7 : index
    %c1_153 = arith.constant 1 : index
    %482 = memref.load %arg2[%c7_152, %c1_153] : memref<16x9xf32, #tpu.memory_space<smem>>
    %483 = vector.broadcast %482 : f32 to vector<32x128xf32>
    %484 = arith.mulf %481, %483 : vector<32x128xf32>
    %485 = arith.addf %479, %484 : vector<32x128xf32>
    %486 = vector.extract_strided_slice %0 {offsets = [2, 0, 0, 0], sizes = [1, 1, 32, 128], strides = [1, 1, 1, 1]} : vector<9x1x32x128xf32> to vector<1x1x32x128xf32>
    %487 = vector.shape_cast %486 : vector<1x1x32x128xf32> to vector<32x128xf32>
    %c7_154 = arith.constant 7 : index
    %c2_155 = arith.constant 2 : index
    %488 = memref.load %arg2[%c7_154, %c2_155] : memref<16x9xf32, #tpu.memory_space<smem>>
    %489 = vector.broadcast %488 : f32 to vector<32x128xf32>
    %490 = arith.mulf %487, %489 : vector<32x128xf32>
    %491 = arith.addf %485, %490 : vector<32x128xf32>
    %492 = vector.extract_strided_slice %0 {offsets = [3, 0, 0, 0], sizes = [1, 1, 32, 128], strides = [1, 1, 1, 1]} : vector<9x1x32x128xf32> to vector<1x1x32x128xf32>
    %493 = vector.shape_cast %492 : vector<1x1x32x128xf32> to vector<32x128xf32>
    %c7_156 = arith.constant 7 : index
    %c3_157 = arith.constant 3 : index
    %494 = memref.load %arg2[%c7_156, %c3_157] : memref<16x9xf32, #tpu.memory_space<smem>>
    %495 = vector.broadcast %494 : f32 to vector<32x128xf32>
    %496 = arith.mulf %493, %495 : vector<32x128xf32>
    %497 = arith.addf %491, %496 : vector<32x128xf32>
    %498 = vector.extract_strided_slice %0 {offsets = [4, 0, 0, 0], sizes = [1, 1, 32, 128], strides = [1, 1, 1, 1]} : vector<9x1x32x128xf32> to vector<1x1x32x128xf32>
    %499 = vector.shape_cast %498 : vector<1x1x32x128xf32> to vector<32x128xf32>
    %c7_158 = arith.constant 7 : index
    %c4_159 = arith.constant 4 : index
    %500 = memref.load %arg2[%c7_158, %c4_159] : memref<16x9xf32, #tpu.memory_space<smem>>
    %501 = vector.broadcast %500 : f32 to vector<32x128xf32>
    %502 = arith.mulf %499, %501 : vector<32x128xf32>
    %503 = arith.addf %497, %502 : vector<32x128xf32>
    %504 = vector.extract_strided_slice %0 {offsets = [5, 0, 0, 0], sizes = [1, 1, 32, 128], strides = [1, 1, 1, 1]} : vector<9x1x32x128xf32> to vector<1x1x32x128xf32>
    %505 = vector.shape_cast %504 : vector<1x1x32x128xf32> to vector<32x128xf32>
    %c7_160 = arith.constant 7 : index
    %c5_161 = arith.constant 5 : index
    %506 = memref.load %arg2[%c7_160, %c5_161] : memref<16x9xf32, #tpu.memory_space<smem>>
    %507 = vector.broadcast %506 : f32 to vector<32x128xf32>
    %508 = arith.mulf %505, %507 : vector<32x128xf32>
    %509 = arith.addf %503, %508 : vector<32x128xf32>
    %510 = vector.extract_strided_slice %0 {offsets = [6, 0, 0, 0], sizes = [1, 1, 32, 128], strides = [1, 1, 1, 1]} : vector<9x1x32x128xf32> to vector<1x1x32x128xf32>
    %511 = vector.shape_cast %510 : vector<1x1x32x128xf32> to vector<32x128xf32>
    %c7_162 = arith.constant 7 : index
    %c6_163 = arith.constant 6 : index
    %512 = memref.load %arg2[%c7_162, %c6_163] : memref<16x9xf32, #tpu.memory_space<smem>>
    %513 = vector.broadcast %512 : f32 to vector<32x128xf32>
    %514 = arith.mulf %511, %513 : vector<32x128xf32>
    %515 = arith.addf %509, %514 : vector<32x128xf32>
    %516 = vector.extract_strided_slice %0 {offsets = [7, 0, 0, 0], sizes = [1, 1, 32, 128], strides = [1, 1, 1, 1]} : vector<9x1x32x128xf32> to vector<1x1x32x128xf32>
    %517 = vector.shape_cast %516 : vector<1x1x32x128xf32> to vector<32x128xf32>
    %c7_164 = arith.constant 7 : index
    %c7_165 = arith.constant 7 : index
    %518 = memref.load %arg2[%c7_164, %c7_165] : memref<16x9xf32, #tpu.memory_space<smem>>
    %519 = vector.broadcast %518 : f32 to vector<32x128xf32>
    %520 = arith.mulf %517, %519 : vector<32x128xf32>
    %521 = arith.addf %515, %520 : vector<32x128xf32>
    %522 = vector.extract_strided_slice %0 {offsets = [8, 0, 0, 0], sizes = [1, 1, 32, 128], strides = [1, 1, 1, 1]} : vector<9x1x32x128xf32> to vector<1x1x32x128xf32>
    %523 = vector.shape_cast %522 : vector<1x1x32x128xf32> to vector<32x128xf32>
    %c7_166 = arith.constant 7 : index
    %c8_167 = arith.constant 8 : index
    %524 = memref.load %arg2[%c7_166, %c8_167] : memref<16x9xf32, #tpu.memory_space<smem>>
    %525 = vector.broadcast %524 : f32 to vector<32x128xf32>
    %526 = arith.mulf %523, %525 : vector<32x128xf32>
    %527 = arith.addf %521, %526 : vector<32x128xf32>
    %cst_168 = arith.constant 0.000000e+00 : f32
    %528 = vector.broadcast %cst_168 : f32 to vector<32x128xf32>
    %529 = arith.maximumf %527, %528 : vector<32x128xf32>
    %530 = vector.shape_cast %529 : vector<32x128xf32> to vector<1x32x128xf32>
    %cst_169 = arith.constant dense<0.000000e+00> : vector<1xf32>
    %531 = vector.multi_reduction <add>, %530, %cst_169 [1, 2] : vector<1x32x128xf32> to vector<1xf32>
    %532 = vector.shape_cast %531 : vector<1xf32> to vector<1x1x1xf32>
    %533 = vector.extract %532[0, 0, 0] : f32 from vector<1x1x1xf32>
    %cst_170 = arith.constant 2.44140625E-4 : f32
    %534 = arith.mulf %533, %cst_170 : f32
    %c7_i32 = arith.constant 7 : i32
    %535 = vector.broadcast %c7_i32 : i32 to vector<1x16xi32>
    %536 = arith.cmpi eq, %1, %535 : vector<1x16xi32>
    %537 = vector.broadcast %534 : f32 to vector<1x16xf32>
    %538 = arith.select %536, %537, %471 : vector<1x16xi1>, vector<1x16xf32>
    %539 = vector.extract_strided_slice %0 {offsets = [0, 0, 0, 0], sizes = [1, 1, 32, 128], strides = [1, 1, 1, 1]} : vector<9x1x32x128xf32> to vector<1x1x32x128xf32>
    %540 = vector.shape_cast %539 : vector<1x1x32x128xf32> to vector<32x128xf32>
    %c8_171 = arith.constant 8 : index
    %c0_172 = arith.constant 0 : index
    %541 = memref.load %arg2[%c8_171, %c0_172] : memref<16x9xf32, #tpu.memory_space<smem>>
    %542 = vector.broadcast %541 : f32 to vector<32x128xf32>
    %543 = arith.mulf %540, %542 : vector<32x128xf32>
    %c8_173 = arith.constant 8 : index
    %544 = memref.load %arg3[%c8_173] : memref<16xf32, #tpu.memory_space<smem>>
    %545 = vector.broadcast %544 : f32 to vector<32x128xf32>
    %546 = arith.addf %543, %545 : vector<32x128xf32>
    %547 = vector.extract_strided_slice %0 {offsets = [1, 0, 0, 0], sizes = [1, 1, 32, 128], strides = [1, 1, 1, 1]} : vector<9x1x32x128xf32> to vector<1x1x32x128xf32>
    %548 = vector.shape_cast %547 : vector<1x1x32x128xf32> to vector<32x128xf32>
    %c8_174 = arith.constant 8 : index
    %c1_175 = arith.constant 1 : index
    %549 = memref.load %arg2[%c8_174, %c1_175] : memref<16x9xf32, #tpu.memory_space<smem>>
    %550 = vector.broadcast %549 : f32 to vector<32x128xf32>
    %551 = arith.mulf %548, %550 : vector<32x128xf32>
    %552 = arith.addf %546, %551 : vector<32x128xf32>
    %553 = vector.extract_strided_slice %0 {offsets = [2, 0, 0, 0], sizes = [1, 1, 32, 128], strides = [1, 1, 1, 1]} : vector<9x1x32x128xf32> to vector<1x1x32x128xf32>
    %554 = vector.shape_cast %553 : vector<1x1x32x128xf32> to vector<32x128xf32>
    %c8_176 = arith.constant 8 : index
    %c2_177 = arith.constant 2 : index
    %555 = memref.load %arg2[%c8_176, %c2_177] : memref<16x9xf32, #tpu.memory_space<smem>>
    %556 = vector.broadcast %555 : f32 to vector<32x128xf32>
    %557 = arith.mulf %554, %556 : vector<32x128xf32>
    %558 = arith.addf %552, %557 : vector<32x128xf32>
    %559 = vector.extract_strided_slice %0 {offsets = [3, 0, 0, 0], sizes = [1, 1, 32, 128], strides = [1, 1, 1, 1]} : vector<9x1x32x128xf32> to vector<1x1x32x128xf32>
    %560 = vector.shape_cast %559 : vector<1x1x32x128xf32> to vector<32x128xf32>
    %c8_178 = arith.constant 8 : index
    %c3_179 = arith.constant 3 : index
    %561 = memref.load %arg2[%c8_178, %c3_179] : memref<16x9xf32, #tpu.memory_space<smem>>
    %562 = vector.broadcast %561 : f32 to vector<32x128xf32>
    %563 = arith.mulf %560, %562 : vector<32x128xf32>
    %564 = arith.addf %558, %563 : vector<32x128xf32>
    %565 = vector.extract_strided_slice %0 {offsets = [4, 0, 0, 0], sizes = [1, 1, 32, 128], strides = [1, 1, 1, 1]} : vector<9x1x32x128xf32> to vector<1x1x32x128xf32>
    %566 = vector.shape_cast %565 : vector<1x1x32x128xf32> to vector<32x128xf32>
    %c8_180 = arith.constant 8 : index
    %c4_181 = arith.constant 4 : index
    %567 = memref.load %arg2[%c8_180, %c4_181] : memref<16x9xf32, #tpu.memory_space<smem>>
    %568 = vector.broadcast %567 : f32 to vector<32x128xf32>
    %569 = arith.mulf %566, %568 : vector<32x128xf32>
    %570 = arith.addf %564, %569 : vector<32x128xf32>
    %571 = vector.extract_strided_slice %0 {offsets = [5, 0, 0, 0], sizes = [1, 1, 32, 128], strides = [1, 1, 1, 1]} : vector<9x1x32x128xf32> to vector<1x1x32x128xf32>
    %572 = vector.shape_cast %571 : vector<1x1x32x128xf32> to vector<32x128xf32>
    %c8_182 = arith.constant 8 : index
    %c5_183 = arith.constant 5 : index
    %573 = memref.load %arg2[%c8_182, %c5_183] : memref<16x9xf32, #tpu.memory_space<smem>>
    %574 = vector.broadcast %573 : f32 to vector<32x128xf32>
    %575 = arith.mulf %572, %574 : vector<32x128xf32>
    %576 = arith.addf %570, %575 : vector<32x128xf32>
    %577 = vector.extract_strided_slice %0 {offsets = [6, 0, 0, 0], sizes = [1, 1, 32, 128], strides = [1, 1, 1, 1]} : vector<9x1x32x128xf32> to vector<1x1x32x128xf32>
    %578 = vector.shape_cast %577 : vector<1x1x32x128xf32> to vector<32x128xf32>
    %c8_184 = arith.constant 8 : index
    %c6_185 = arith.constant 6 : index
    %579 = memref.load %arg2[%c8_184, %c6_185] : memref<16x9xf32, #tpu.memory_space<smem>>
    %580 = vector.broadcast %579 : f32 to vector<32x128xf32>
    %581 = arith.mulf %578, %580 : vector<32x128xf32>
    %582 = arith.addf %576, %581 : vector<32x128xf32>
    %583 = vector.extract_strided_slice %0 {offsets = [7, 0, 0, 0], sizes = [1, 1, 32, 128], strides = [1, 1, 1, 1]} : vector<9x1x32x128xf32> to vector<1x1x32x128xf32>
    %584 = vector.shape_cast %583 : vector<1x1x32x128xf32> to vector<32x128xf32>
    %c8_186 = arith.constant 8 : index
    %c7_187 = arith.constant 7 : index
    %585 = memref.load %arg2[%c8_186, %c7_187] : memref<16x9xf32, #tpu.memory_space<smem>>
    %586 = vector.broadcast %585 : f32 to vector<32x128xf32>
    %587 = arith.mulf %584, %586 : vector<32x128xf32>
    %588 = arith.addf %582, %587 : vector<32x128xf32>
    %589 = vector.extract_strided_slice %0 {offsets = [8, 0, 0, 0], sizes = [1, 1, 32, 128], strides = [1, 1, 1, 1]} : vector<9x1x32x128xf32> to vector<1x1x32x128xf32>
    %590 = vector.shape_cast %589 : vector<1x1x32x128xf32> to vector<32x128xf32>
    %c8_188 = arith.constant 8 : index
    %c8_189 = arith.constant 8 : index
    %591 = memref.load %arg2[%c8_188, %c8_189] : memref<16x9xf32, #tpu.memory_space<smem>>
    %592 = vector.broadcast %591 : f32 to vector<32x128xf32>
    %593 = arith.mulf %590, %592 : vector<32x128xf32>
    %594 = arith.addf %588, %593 : vector<32x128xf32>
    %cst_190 = arith.constant 0.000000e+00 : f32
    %595 = vector.broadcast %cst_190 : f32 to vector<32x128xf32>
    %596 = arith.maximumf %594, %595 : vector<32x128xf32>
    %597 = vector.shape_cast %596 : vector<32x128xf32> to vector<1x32x128xf32>
    %cst_191 = arith.constant dense<0.000000e+00> : vector<1xf32>
    %598 = vector.multi_reduction <add>, %597, %cst_191 [1, 2] : vector<1x32x128xf32> to vector<1xf32>
    %599 = vector.shape_cast %598 : vector<1xf32> to vector<1x1x1xf32>
    %600 = vector.extract %599[0, 0, 0] : f32 from vector<1x1x1xf32>
    %cst_192 = arith.constant 2.44140625E-4 : f32
    %601 = arith.mulf %600, %cst_192 : f32
    %c8_i32 = arith.constant 8 : i32
    %602 = vector.broadcast %c8_i32 : i32 to vector<1x16xi32>
    %603 = arith.cmpi eq, %1, %602 : vector<1x16xi32>
    %604 = vector.broadcast %601 : f32 to vector<1x16xf32>
    %605 = arith.select %603, %604, %538 : vector<1x16xi1>, vector<1x16xf32>
    %606 = vector.extract_strided_slice %0 {offsets = [0, 0, 0, 0], sizes = [1, 1, 32, 128], strides = [1, 1, 1, 1]} : vector<9x1x32x128xf32> to vector<1x1x32x128xf32>
    %607 = vector.shape_cast %606 : vector<1x1x32x128xf32> to vector<32x128xf32>
    %c9 = arith.constant 9 : index
    %c0_193 = arith.constant 0 : index
    %608 = memref.load %arg2[%c9, %c0_193] : memref<16x9xf32, #tpu.memory_space<smem>>
    %609 = vector.broadcast %608 : f32 to vector<32x128xf32>
    %610 = arith.mulf %607, %609 : vector<32x128xf32>
    %c9_194 = arith.constant 9 : index
    %611 = memref.load %arg3[%c9_194] : memref<16xf32, #tpu.memory_space<smem>>
    %612 = vector.broadcast %611 : f32 to vector<32x128xf32>
    %613 = arith.addf %610, %612 : vector<32x128xf32>
    %614 = vector.extract_strided_slice %0 {offsets = [1, 0, 0, 0], sizes = [1, 1, 32, 128], strides = [1, 1, 1, 1]} : vector<9x1x32x128xf32> to vector<1x1x32x128xf32>
    %615 = vector.shape_cast %614 : vector<1x1x32x128xf32> to vector<32x128xf32>
    %c9_195 = arith.constant 9 : index
    %c1_196 = arith.constant 1 : index
    %616 = memref.load %arg2[%c9_195, %c1_196] : memref<16x9xf32, #tpu.memory_space<smem>>
    %617 = vector.broadcast %616 : f32 to vector<32x128xf32>
    %618 = arith.mulf %615, %617 : vector<32x128xf32>
    %619 = arith.addf %613, %618 : vector<32x128xf32>
    %620 = vector.extract_strided_slice %0 {offsets = [2, 0, 0, 0], sizes = [1, 1, 32, 128], strides = [1, 1, 1, 1]} : vector<9x1x32x128xf32> to vector<1x1x32x128xf32>
    %621 = vector.shape_cast %620 : vector<1x1x32x128xf32> to vector<32x128xf32>
    %c9_197 = arith.constant 9 : index
    %c2_198 = arith.constant 2 : index
    %622 = memref.load %arg2[%c9_197, %c2_198] : memref<16x9xf32, #tpu.memory_space<smem>>
    %623 = vector.broadcast %622 : f32 to vector<32x128xf32>
    %624 = arith.mulf %621, %623 : vector<32x128xf32>
    %625 = arith.addf %619, %624 : vector<32x128xf32>
    %626 = vector.extract_strided_slice %0 {offsets = [3, 0, 0, 0], sizes = [1, 1, 32, 128], strides = [1, 1, 1, 1]} : vector<9x1x32x128xf32> to vector<1x1x32x128xf32>
    %627 = vector.shape_cast %626 : vector<1x1x32x128xf32> to vector<32x128xf32>
    %c9_199 = arith.constant 9 : index
    %c3_200 = arith.constant 3 : index
    %628 = memref.load %arg2[%c9_199, %c3_200] : memref<16x9xf32, #tpu.memory_space<smem>>
    %629 = vector.broadcast %628 : f32 to vector<32x128xf32>
    %630 = arith.mulf %627, %629 : vector<32x128xf32>
    %631 = arith.addf %625, %630 : vector<32x128xf32>
    %632 = vector.extract_strided_slice %0 {offsets = [4, 0, 0, 0], sizes = [1, 1, 32, 128], strides = [1, 1, 1, 1]} : vector<9x1x32x128xf32> to vector<1x1x32x128xf32>
    %633 = vector.shape_cast %632 : vector<1x1x32x128xf32> to vector<32x128xf32>
    %c9_201 = arith.constant 9 : index
    %c4_202 = arith.constant 4 : index
    %634 = memref.load %arg2[%c9_201, %c4_202] : memref<16x9xf32, #tpu.memory_space<smem>>
    %635 = vector.broadcast %634 : f32 to vector<32x128xf32>
    %636 = arith.mulf %633, %635 : vector<32x128xf32>
    %637 = arith.addf %631, %636 : vector<32x128xf32>
    %638 = vector.extract_strided_slice %0 {offsets = [5, 0, 0, 0], sizes = [1, 1, 32, 128], strides = [1, 1, 1, 1]} : vector<9x1x32x128xf32> to vector<1x1x32x128xf32>
    %639 = vector.shape_cast %638 : vector<1x1x32x128xf32> to vector<32x128xf32>
    %c9_203 = arith.constant 9 : index
    %c5_204 = arith.constant 5 : index
    %640 = memref.load %arg2[%c9_203, %c5_204] : memref<16x9xf32, #tpu.memory_space<smem>>
    %641 = vector.broadcast %640 : f32 to vector<32x128xf32>
    %642 = arith.mulf %639, %641 : vector<32x128xf32>
    %643 = arith.addf %637, %642 : vector<32x128xf32>
    %644 = vector.extract_strided_slice %0 {offsets = [6, 0, 0, 0], sizes = [1, 1, 32, 128], strides = [1, 1, 1, 1]} : vector<9x1x32x128xf32> to vector<1x1x32x128xf32>
    %645 = vector.shape_cast %644 : vector<1x1x32x128xf32> to vector<32x128xf32>
    %c9_205 = arith.constant 9 : index
    %c6_206 = arith.constant 6 : index
    %646 = memref.load %arg2[%c9_205, %c6_206] : memref<16x9xf32, #tpu.memory_space<smem>>
    %647 = vector.broadcast %646 : f32 to vector<32x128xf32>
    %648 = arith.mulf %645, %647 : vector<32x128xf32>
    %649 = arith.addf %643, %648 : vector<32x128xf32>
    %650 = vector.extract_strided_slice %0 {offsets = [7, 0, 0, 0], sizes = [1, 1, 32, 128], strides = [1, 1, 1, 1]} : vector<9x1x32x128xf32> to vector<1x1x32x128xf32>
    %651 = vector.shape_cast %650 : vector<1x1x32x128xf32> to vector<32x128xf32>
    %c9_207 = arith.constant 9 : index
    %c7_208 = arith.constant 7 : index
    %652 = memref.load %arg2[%c9_207, %c7_208] : memref<16x9xf32, #tpu.memory_space<smem>>
    %653 = vector.broadcast %652 : f32 to vector<32x128xf32>
    %654 = arith.mulf %651, %653 : vector<32x128xf32>
    %655 = arith.addf %649, %654 : vector<32x128xf32>
    %656 = vector.extract_strided_slice %0 {offsets = [8, 0, 0, 0], sizes = [1, 1, 32, 128], strides = [1, 1, 1, 1]} : vector<9x1x32x128xf32> to vector<1x1x32x128xf32>
    %657 = vector.shape_cast %656 : vector<1x1x32x128xf32> to vector<32x128xf32>
    %c9_209 = arith.constant 9 : index
    %c8_210 = arith.constant 8 : index
    %658 = memref.load %arg2[%c9_209, %c8_210] : memref<16x9xf32, #tpu.memory_space<smem>>
    %659 = vector.broadcast %658 : f32 to vector<32x128xf32>
    %660 = arith.mulf %657, %659 : vector<32x128xf32>
    %661 = arith.addf %655, %660 : vector<32x128xf32>
    %cst_211 = arith.constant 0.000000e+00 : f32
    %662 = vector.broadcast %cst_211 : f32 to vector<32x128xf32>
    %663 = arith.maximumf %661, %662 : vector<32x128xf32>
    %664 = vector.shape_cast %663 : vector<32x128xf32> to vector<1x32x128xf32>
    %cst_212 = arith.constant dense<0.000000e+00> : vector<1xf32>
    %665 = vector.multi_reduction <add>, %664, %cst_212 [1, 2] : vector<1x32x128xf32> to vector<1xf32>
    %666 = vector.shape_cast %665 : vector<1xf32> to vector<1x1x1xf32>
    %667 = vector.extract %666[0, 0, 0] : f32 from vector<1x1x1xf32>
    %cst_213 = arith.constant 2.44140625E-4 : f32
    %668 = arith.mulf %667, %cst_213 : f32
    %c9_i32 = arith.constant 9 : i32
    %669 = vector.broadcast %c9_i32 : i32 to vector<1x16xi32>
    %670 = arith.cmpi eq, %1, %669 : vector<1x16xi32>
    %671 = vector.broadcast %668 : f32 to vector<1x16xf32>
    %672 = arith.select %670, %671, %605 : vector<1x16xi1>, vector<1x16xf32>
    %673 = vector.extract_strided_slice %0 {offsets = [0, 0, 0, 0], sizes = [1, 1, 32, 128], strides = [1, 1, 1, 1]} : vector<9x1x32x128xf32> to vector<1x1x32x128xf32>
    %674 = vector.shape_cast %673 : vector<1x1x32x128xf32> to vector<32x128xf32>
    %c10 = arith.constant 10 : index
    %c0_214 = arith.constant 0 : index
    %675 = memref.load %arg2[%c10, %c0_214] : memref<16x9xf32, #tpu.memory_space<smem>>
    %676 = vector.broadcast %675 : f32 to vector<32x128xf32>
    %677 = arith.mulf %674, %676 : vector<32x128xf32>
    %c10_215 = arith.constant 10 : index
    %678 = memref.load %arg3[%c10_215] : memref<16xf32, #tpu.memory_space<smem>>
    %679 = vector.broadcast %678 : f32 to vector<32x128xf32>
    %680 = arith.addf %677, %679 : vector<32x128xf32>
    %681 = vector.extract_strided_slice %0 {offsets = [1, 0, 0, 0], sizes = [1, 1, 32, 128], strides = [1, 1, 1, 1]} : vector<9x1x32x128xf32> to vector<1x1x32x128xf32>
    %682 = vector.shape_cast %681 : vector<1x1x32x128xf32> to vector<32x128xf32>
    %c10_216 = arith.constant 10 : index
    %c1_217 = arith.constant 1 : index
    %683 = memref.load %arg2[%c10_216, %c1_217] : memref<16x9xf32, #tpu.memory_space<smem>>
    %684 = vector.broadcast %683 : f32 to vector<32x128xf32>
    %685 = arith.mulf %682, %684 : vector<32x128xf32>
    %686 = arith.addf %680, %685 : vector<32x128xf32>
    %687 = vector.extract_strided_slice %0 {offsets = [2, 0, 0, 0], sizes = [1, 1, 32, 128], strides = [1, 1, 1, 1]} : vector<9x1x32x128xf32> to vector<1x1x32x128xf32>
    %688 = vector.shape_cast %687 : vector<1x1x32x128xf32> to vector<32x128xf32>
    %c10_218 = arith.constant 10 : index
    %c2_219 = arith.constant 2 : index
    %689 = memref.load %arg2[%c10_218, %c2_219] : memref<16x9xf32, #tpu.memory_space<smem>>
    %690 = vector.broadcast %689 : f32 to vector<32x128xf32>
    %691 = arith.mulf %688, %690 : vector<32x128xf32>
    %692 = arith.addf %686, %691 : vector<32x128xf32>
    %693 = vector.extract_strided_slice %0 {offsets = [3, 0, 0, 0], sizes = [1, 1, 32, 128], strides = [1, 1, 1, 1]} : vector<9x1x32x128xf32> to vector<1x1x32x128xf32>
    %694 = vector.shape_cast %693 : vector<1x1x32x128xf32> to vector<32x128xf32>
    %c10_220 = arith.constant 10 : index
    %c3_221 = arith.constant 3 : index
    %695 = memref.load %arg2[%c10_220, %c3_221] : memref<16x9xf32, #tpu.memory_space<smem>>
    %696 = vector.broadcast %695 : f32 to vector<32x128xf32>
    %697 = arith.mulf %694, %696 : vector<32x128xf32>
    %698 = arith.addf %692, %697 : vector<32x128xf32>
    %699 = vector.extract_strided_slice %0 {offsets = [4, 0, 0, 0], sizes = [1, 1, 32, 128], strides = [1, 1, 1, 1]} : vector<9x1x32x128xf32> to vector<1x1x32x128xf32>
    %700 = vector.shape_cast %699 : vector<1x1x32x128xf32> to vector<32x128xf32>
    %c10_222 = arith.constant 10 : index
    %c4_223 = arith.constant 4 : index
    %701 = memref.load %arg2[%c10_222, %c4_223] : memref<16x9xf32, #tpu.memory_space<smem>>
    %702 = vector.broadcast %701 : f32 to vector<32x128xf32>
    %703 = arith.mulf %700, %702 : vector<32x128xf32>
    %704 = arith.addf %698, %703 : vector<32x128xf32>
    %705 = vector.extract_strided_slice %0 {offsets = [5, 0, 0, 0], sizes = [1, 1, 32, 128], strides = [1, 1, 1, 1]} : vector<9x1x32x128xf32> to vector<1x1x32x128xf32>
    %706 = vector.shape_cast %705 : vector<1x1x32x128xf32> to vector<32x128xf32>
    %c10_224 = arith.constant 10 : index
    %c5_225 = arith.constant 5 : index
    %707 = memref.load %arg2[%c10_224, %c5_225] : memref<16x9xf32, #tpu.memory_space<smem>>
    %708 = vector.broadcast %707 : f32 to vector<32x128xf32>
    %709 = arith.mulf %706, %708 : vector<32x128xf32>
    %710 = arith.addf %704, %709 : vector<32x128xf32>
    %711 = vector.extract_strided_slice %0 {offsets = [6, 0, 0, 0], sizes = [1, 1, 32, 128], strides = [1, 1, 1, 1]} : vector<9x1x32x128xf32> to vector<1x1x32x128xf32>
    %712 = vector.shape_cast %711 : vector<1x1x32x128xf32> to vector<32x128xf32>
    %c10_226 = arith.constant 10 : index
    %c6_227 = arith.constant 6 : index
    %713 = memref.load %arg2[%c10_226, %c6_227] : memref<16x9xf32, #tpu.memory_space<smem>>
    %714 = vector.broadcast %713 : f32 to vector<32x128xf32>
    %715 = arith.mulf %712, %714 : vector<32x128xf32>
    %716 = arith.addf %710, %715 : vector<32x128xf32>
    %717 = vector.extract_strided_slice %0 {offsets = [7, 0, 0, 0], sizes = [1, 1, 32, 128], strides = [1, 1, 1, 1]} : vector<9x1x32x128xf32> to vector<1x1x32x128xf32>
    %718 = vector.shape_cast %717 : vector<1x1x32x128xf32> to vector<32x128xf32>
    %c10_228 = arith.constant 10 : index
    %c7_229 = arith.constant 7 : index
    %719 = memref.load %arg2[%c10_228, %c7_229] : memref<16x9xf32, #tpu.memory_space<smem>>
    %720 = vector.broadcast %719 : f32 to vector<32x128xf32>
    %721 = arith.mulf %718, %720 : vector<32x128xf32>
    %722 = arith.addf %716, %721 : vector<32x128xf32>
    %723 = vector.extract_strided_slice %0 {offsets = [8, 0, 0, 0], sizes = [1, 1, 32, 128], strides = [1, 1, 1, 1]} : vector<9x1x32x128xf32> to vector<1x1x32x128xf32>
    %724 = vector.shape_cast %723 : vector<1x1x32x128xf32> to vector<32x128xf32>
    %c10_230 = arith.constant 10 : index
    %c8_231 = arith.constant 8 : index
    %725 = memref.load %arg2[%c10_230, %c8_231] : memref<16x9xf32, #tpu.memory_space<smem>>
    %726 = vector.broadcast %725 : f32 to vector<32x128xf32>
    %727 = arith.mulf %724, %726 : vector<32x128xf32>
    %728 = arith.addf %722, %727 : vector<32x128xf32>
    %cst_232 = arith.constant 0.000000e+00 : f32
    %729 = vector.broadcast %cst_232 : f32 to vector<32x128xf32>
    %730 = arith.maximumf %728, %729 : vector<32x128xf32>
    %731 = vector.shape_cast %730 : vector<32x128xf32> to vector<1x32x128xf32>
    %cst_233 = arith.constant dense<0.000000e+00> : vector<1xf32>
    %732 = vector.multi_reduction <add>, %731, %cst_233 [1, 2] : vector<1x32x128xf32> to vector<1xf32>
    %733 = vector.shape_cast %732 : vector<1xf32> to vector<1x1x1xf32>
    %734 = vector.extract %733[0, 0, 0] : f32 from vector<1x1x1xf32>
    %cst_234 = arith.constant 2.44140625E-4 : f32
    %735 = arith.mulf %734, %cst_234 : f32
    %c10_i32 = arith.constant 10 : i32
    %736 = vector.broadcast %c10_i32 : i32 to vector<1x16xi32>
    %737 = arith.cmpi eq, %1, %736 : vector<1x16xi32>
    %738 = vector.broadcast %735 : f32 to vector<1x16xf32>
    %739 = arith.select %737, %738, %672 : vector<1x16xi1>, vector<1x16xf32>
    %740 = vector.extract_strided_slice %0 {offsets = [0, 0, 0, 0], sizes = [1, 1, 32, 128], strides = [1, 1, 1, 1]} : vector<9x1x32x128xf32> to vector<1x1x32x128xf32>
    %741 = vector.shape_cast %740 : vector<1x1x32x128xf32> to vector<32x128xf32>
    %c11 = arith.constant 11 : index
    %c0_235 = arith.constant 0 : index
    %742 = memref.load %arg2[%c11, %c0_235] : memref<16x9xf32, #tpu.memory_space<smem>>
    %743 = vector.broadcast %742 : f32 to vector<32x128xf32>
    %744 = arith.mulf %741, %743 : vector<32x128xf32>
    %c11_236 = arith.constant 11 : index
    %745 = memref.load %arg3[%c11_236] : memref<16xf32, #tpu.memory_space<smem>>
    %746 = vector.broadcast %745 : f32 to vector<32x128xf32>
    %747 = arith.addf %744, %746 : vector<32x128xf32>
    %748 = vector.extract_strided_slice %0 {offsets = [1, 0, 0, 0], sizes = [1, 1, 32, 128], strides = [1, 1, 1, 1]} : vector<9x1x32x128xf32> to vector<1x1x32x128xf32>
    %749 = vector.shape_cast %748 : vector<1x1x32x128xf32> to vector<32x128xf32>
    %c11_237 = arith.constant 11 : index
    %c1_238 = arith.constant 1 : index
    %750 = memref.load %arg2[%c11_237, %c1_238] : memref<16x9xf32, #tpu.memory_space<smem>>
    %751 = vector.broadcast %750 : f32 to vector<32x128xf32>
    %752 = arith.mulf %749, %751 : vector<32x128xf32>
    %753 = arith.addf %747, %752 : vector<32x128xf32>
    %754 = vector.extract_strided_slice %0 {offsets = [2, 0, 0, 0], sizes = [1, 1, 32, 128], strides = [1, 1, 1, 1]} : vector<9x1x32x128xf32> to vector<1x1x32x128xf32>
    %755 = vector.shape_cast %754 : vector<1x1x32x128xf32> to vector<32x128xf32>
    %c11_239 = arith.constant 11 : index
    %c2_240 = arith.constant 2 : index
    %756 = memref.load %arg2[%c11_239, %c2_240] : memref<16x9xf32, #tpu.memory_space<smem>>
    %757 = vector.broadcast %756 : f32 to vector<32x128xf32>
    %758 = arith.mulf %755, %757 : vector<32x128xf32>
    %759 = arith.addf %753, %758 : vector<32x128xf32>
    %760 = vector.extract_strided_slice %0 {offsets = [3, 0, 0, 0], sizes = [1, 1, 32, 128], strides = [1, 1, 1, 1]} : vector<9x1x32x128xf32> to vector<1x1x32x128xf32>
    %761 = vector.shape_cast %760 : vector<1x1x32x128xf32> to vector<32x128xf32>
    %c11_241 = arith.constant 11 : index
    %c3_242 = arith.constant 3 : index
    %762 = memref.load %arg2[%c11_241, %c3_242] : memref<16x9xf32, #tpu.memory_space<smem>>
    %763 = vector.broadcast %762 : f32 to vector<32x128xf32>
    %764 = arith.mulf %761, %763 : vector<32x128xf32>
    %765 = arith.addf %759, %764 : vector<32x128xf32>
    %766 = vector.extract_strided_slice %0 {offsets = [4, 0, 0, 0], sizes = [1, 1, 32, 128], strides = [1, 1, 1, 1]} : vector<9x1x32x128xf32> to vector<1x1x32x128xf32>
    %767 = vector.shape_cast %766 : vector<1x1x32x128xf32> to vector<32x128xf32>
    %c11_243 = arith.constant 11 : index
    %c4_244 = arith.constant 4 : index
    %768 = memref.load %arg2[%c11_243, %c4_244] : memref<16x9xf32, #tpu.memory_space<smem>>
    %769 = vector.broadcast %768 : f32 to vector<32x128xf32>
    %770 = arith.mulf %767, %769 : vector<32x128xf32>
    %771 = arith.addf %765, %770 : vector<32x128xf32>
    %772 = vector.extract_strided_slice %0 {offsets = [5, 0, 0, 0], sizes = [1, 1, 32, 128], strides = [1, 1, 1, 1]} : vector<9x1x32x128xf32> to vector<1x1x32x128xf32>
    %773 = vector.shape_cast %772 : vector<1x1x32x128xf32> to vector<32x128xf32>
    %c11_245 = arith.constant 11 : index
    %c5_246 = arith.constant 5 : index
    %774 = memref.load %arg2[%c11_245, %c5_246] : memref<16x9xf32, #tpu.memory_space<smem>>
    %775 = vector.broadcast %774 : f32 to vector<32x128xf32>
    %776 = arith.mulf %773, %775 : vector<32x128xf32>
    %777 = arith.addf %771, %776 : vector<32x128xf32>
    %778 = vector.extract_strided_slice %0 {offsets = [6, 0, 0, 0], sizes = [1, 1, 32, 128], strides = [1, 1, 1, 1]} : vector<9x1x32x128xf32> to vector<1x1x32x128xf32>
    %779 = vector.shape_cast %778 : vector<1x1x32x128xf32> to vector<32x128xf32>
    %c11_247 = arith.constant 11 : index
    %c6_248 = arith.constant 6 : index
    %780 = memref.load %arg2[%c11_247, %c6_248] : memref<16x9xf32, #tpu.memory_space<smem>>
    %781 = vector.broadcast %780 : f32 to vector<32x128xf32>
    %782 = arith.mulf %779, %781 : vector<32x128xf32>
    %783 = arith.addf %777, %782 : vector<32x128xf32>
    %784 = vector.extract_strided_slice %0 {offsets = [7, 0, 0, 0], sizes = [1, 1, 32, 128], strides = [1, 1, 1, 1]} : vector<9x1x32x128xf32> to vector<1x1x32x128xf32>
    %785 = vector.shape_cast %784 : vector<1x1x32x128xf32> to vector<32x128xf32>
    %c11_249 = arith.constant 11 : index
    %c7_250 = arith.constant 7 : index
    %786 = memref.load %arg2[%c11_249, %c7_250] : memref<16x9xf32, #tpu.memory_space<smem>>
    %787 = vector.broadcast %786 : f32 to vector<32x128xf32>
    %788 = arith.mulf %785, %787 : vector<32x128xf32>
    %789 = arith.addf %783, %788 : vector<32x128xf32>
    %790 = vector.extract_strided_slice %0 {offsets = [8, 0, 0, 0], sizes = [1, 1, 32, 128], strides = [1, 1, 1, 1]} : vector<9x1x32x128xf32> to vector<1x1x32x128xf32>
    %791 = vector.shape_cast %790 : vector<1x1x32x128xf32> to vector<32x128xf32>
    %c11_251 = arith.constant 11 : index
    %c8_252 = arith.constant 8 : index
    %792 = memref.load %arg2[%c11_251, %c8_252] : memref<16x9xf32, #tpu.memory_space<smem>>
    %793 = vector.broadcast %792 : f32 to vector<32x128xf32>
    %794 = arith.mulf %791, %793 : vector<32x128xf32>
    %795 = arith.addf %789, %794 : vector<32x128xf32>
    %cst_253 = arith.constant 0.000000e+00 : f32
    %796 = vector.broadcast %cst_253 : f32 to vector<32x128xf32>
    %797 = arith.maximumf %795, %796 : vector<32x128xf32>
    %798 = vector.shape_cast %797 : vector<32x128xf32> to vector<1x32x128xf32>
    %cst_254 = arith.constant dense<0.000000e+00> : vector<1xf32>
    %799 = vector.multi_reduction <add>, %798, %cst_254 [1, 2] : vector<1x32x128xf32> to vector<1xf32>
    %800 = vector.shape_cast %799 : vector<1xf32> to vector<1x1x1xf32>
    %801 = vector.extract %800[0, 0, 0] : f32 from vector<1x1x1xf32>
    %cst_255 = arith.constant 2.44140625E-4 : f32
    %802 = arith.mulf %801, %cst_255 : f32
    %c11_i32 = arith.constant 11 : i32
    %803 = vector.broadcast %c11_i32 : i32 to vector<1x16xi32>
    %804 = arith.cmpi eq, %1, %803 : vector<1x16xi32>
    %805 = vector.broadcast %802 : f32 to vector<1x16xf32>
    %806 = arith.select %804, %805, %739 : vector<1x16xi1>, vector<1x16xf32>
    %807 = vector.extract_strided_slice %0 {offsets = [0, 0, 0, 0], sizes = [1, 1, 32, 128], strides = [1, 1, 1, 1]} : vector<9x1x32x128xf32> to vector<1x1x32x128xf32>
    %808 = vector.shape_cast %807 : vector<1x1x32x128xf32> to vector<32x128xf32>
    %c12 = arith.constant 12 : index
    %c0_256 = arith.constant 0 : index
    %809 = memref.load %arg2[%c12, %c0_256] : memref<16x9xf32, #tpu.memory_space<smem>>
    %810 = vector.broadcast %809 : f32 to vector<32x128xf32>
    %811 = arith.mulf %808, %810 : vector<32x128xf32>
    %c12_257 = arith.constant 12 : index
    %812 = memref.load %arg3[%c12_257] : memref<16xf32, #tpu.memory_space<smem>>
    %813 = vector.broadcast %812 : f32 to vector<32x128xf32>
    %814 = arith.addf %811, %813 : vector<32x128xf32>
    %815 = vector.extract_strided_slice %0 {offsets = [1, 0, 0, 0], sizes = [1, 1, 32, 128], strides = [1, 1, 1, 1]} : vector<9x1x32x128xf32> to vector<1x1x32x128xf32>
    %816 = vector.shape_cast %815 : vector<1x1x32x128xf32> to vector<32x128xf32>
    %c12_258 = arith.constant 12 : index
    %c1_259 = arith.constant 1 : index
    %817 = memref.load %arg2[%c12_258, %c1_259] : memref<16x9xf32, #tpu.memory_space<smem>>
    %818 = vector.broadcast %817 : f32 to vector<32x128xf32>
    %819 = arith.mulf %816, %818 : vector<32x128xf32>
    %820 = arith.addf %814, %819 : vector<32x128xf32>
    %821 = vector.extract_strided_slice %0 {offsets = [2, 0, 0, 0], sizes = [1, 1, 32, 128], strides = [1, 1, 1, 1]} : vector<9x1x32x128xf32> to vector<1x1x32x128xf32>
    %822 = vector.shape_cast %821 : vector<1x1x32x128xf32> to vector<32x128xf32>
    %c12_260 = arith.constant 12 : index
    %c2_261 = arith.constant 2 : index
    %823 = memref.load %arg2[%c12_260, %c2_261] : memref<16x9xf32, #tpu.memory_space<smem>>
    %824 = vector.broadcast %823 : f32 to vector<32x128xf32>
    %825 = arith.mulf %822, %824 : vector<32x128xf32>
    %826 = arith.addf %820, %825 : vector<32x128xf32>
    %827 = vector.extract_strided_slice %0 {offsets = [3, 0, 0, 0], sizes = [1, 1, 32, 128], strides = [1, 1, 1, 1]} : vector<9x1x32x128xf32> to vector<1x1x32x128xf32>
    %828 = vector.shape_cast %827 : vector<1x1x32x128xf32> to vector<32x128xf32>
    %c12_262 = arith.constant 12 : index
    %c3_263 = arith.constant 3 : index
    %829 = memref.load %arg2[%c12_262, %c3_263] : memref<16x9xf32, #tpu.memory_space<smem>>
    %830 = vector.broadcast %829 : f32 to vector<32x128xf32>
    %831 = arith.mulf %828, %830 : vector<32x128xf32>
    %832 = arith.addf %826, %831 : vector<32x128xf32>
    %833 = vector.extract_strided_slice %0 {offsets = [4, 0, 0, 0], sizes = [1, 1, 32, 128], strides = [1, 1, 1, 1]} : vector<9x1x32x128xf32> to vector<1x1x32x128xf32>
    %834 = vector.shape_cast %833 : vector<1x1x32x128xf32> to vector<32x128xf32>
    %c12_264 = arith.constant 12 : index
    %c4_265 = arith.constant 4 : index
    %835 = memref.load %arg2[%c12_264, %c4_265] : memref<16x9xf32, #tpu.memory_space<smem>>
    %836 = vector.broadcast %835 : f32 to vector<32x128xf32>
    %837 = arith.mulf %834, %836 : vector<32x128xf32>
    %838 = arith.addf %832, %837 : vector<32x128xf32>
    %839 = vector.extract_strided_slice %0 {offsets = [5, 0, 0, 0], sizes = [1, 1, 32, 128], strides = [1, 1, 1, 1]} : vector<9x1x32x128xf32> to vector<1x1x32x128xf32>
    %840 = vector.shape_cast %839 : vector<1x1x32x128xf32> to vector<32x128xf32>
    %c12_266 = arith.constant 12 : index
    %c5_267 = arith.constant 5 : index
    %841 = memref.load %arg2[%c12_266, %c5_267] : memref<16x9xf32, #tpu.memory_space<smem>>
    %842 = vector.broadcast %841 : f32 to vector<32x128xf32>
    %843 = arith.mulf %840, %842 : vector<32x128xf32>
    %844 = arith.addf %838, %843 : vector<32x128xf32>
    %845 = vector.extract_strided_slice %0 {offsets = [6, 0, 0, 0], sizes = [1, 1, 32, 128], strides = [1, 1, 1, 1]} : vector<9x1x32x128xf32> to vector<1x1x32x128xf32>
    %846 = vector.shape_cast %845 : vector<1x1x32x128xf32> to vector<32x128xf32>
    %c12_268 = arith.constant 12 : index
    %c6_269 = arith.constant 6 : index
    %847 = memref.load %arg2[%c12_268, %c6_269] : memref<16x9xf32, #tpu.memory_space<smem>>
    %848 = vector.broadcast %847 : f32 to vector<32x128xf32>
    %849 = arith.mulf %846, %848 : vector<32x128xf32>
    %850 = arith.addf %844, %849 : vector<32x128xf32>
    %851 = vector.extract_strided_slice %0 {offsets = [7, 0, 0, 0], sizes = [1, 1, 32, 128], strides = [1, 1, 1, 1]} : vector<9x1x32x128xf32> to vector<1x1x32x128xf32>
    %852 = vector.shape_cast %851 : vector<1x1x32x128xf32> to vector<32x128xf32>
    %c12_270 = arith.constant 12 : index
    %c7_271 = arith.constant 7 : index
    %853 = memref.load %arg2[%c12_270, %c7_271] : memref<16x9xf32, #tpu.memory_space<smem>>
    %854 = vector.broadcast %853 : f32 to vector<32x128xf32>
    %855 = arith.mulf %852, %854 : vector<32x128xf32>
    %856 = arith.addf %850, %855 : vector<32x128xf32>
    %857 = vector.extract_strided_slice %0 {offsets = [8, 0, 0, 0], sizes = [1, 1, 32, 128], strides = [1, 1, 1, 1]} : vector<9x1x32x128xf32> to vector<1x1x32x128xf32>
    %858 = vector.shape_cast %857 : vector<1x1x32x128xf32> to vector<32x128xf32>
    %c12_272 = arith.constant 12 : index
    %c8_273 = arith.constant 8 : index
    %859 = memref.load %arg2[%c12_272, %c8_273] : memref<16x9xf32, #tpu.memory_space<smem>>
    %860 = vector.broadcast %859 : f32 to vector<32x128xf32>
    %861 = arith.mulf %858, %860 : vector<32x128xf32>
    %862 = arith.addf %856, %861 : vector<32x128xf32>
    %cst_274 = arith.constant 0.000000e+00 : f32
    %863 = vector.broadcast %cst_274 : f32 to vector<32x128xf32>
    %864 = arith.maximumf %862, %863 : vector<32x128xf32>
    %865 = vector.shape_cast %864 : vector<32x128xf32> to vector<1x32x128xf32>
    %cst_275 = arith.constant dense<0.000000e+00> : vector<1xf32>
    %866 = vector.multi_reduction <add>, %865, %cst_275 [1, 2] : vector<1x32x128xf32> to vector<1xf32>
    %867 = vector.shape_cast %866 : vector<1xf32> to vector<1x1x1xf32>
    %868 = vector.extract %867[0, 0, 0] : f32 from vector<1x1x1xf32>
    %cst_276 = arith.constant 2.44140625E-4 : f32
    %869 = arith.mulf %868, %cst_276 : f32
    %c12_i32 = arith.constant 12 : i32
    %870 = vector.broadcast %c12_i32 : i32 to vector<1x16xi32>
    %871 = arith.cmpi eq, %1, %870 : vector<1x16xi32>
    %872 = vector.broadcast %869 : f32 to vector<1x16xf32>
    %873 = arith.select %871, %872, %806 : vector<1x16xi1>, vector<1x16xf32>
    %874 = vector.extract_strided_slice %0 {offsets = [0, 0, 0, 0], sizes = [1, 1, 32, 128], strides = [1, 1, 1, 1]} : vector<9x1x32x128xf32> to vector<1x1x32x128xf32>
    %875 = vector.shape_cast %874 : vector<1x1x32x128xf32> to vector<32x128xf32>
    %c13 = arith.constant 13 : index
    %c0_277 = arith.constant 0 : index
    %876 = memref.load %arg2[%c13, %c0_277] : memref<16x9xf32, #tpu.memory_space<smem>>
    %877 = vector.broadcast %876 : f32 to vector<32x128xf32>
    %878 = arith.mulf %875, %877 : vector<32x128xf32>
    %c13_278 = arith.constant 13 : index
    %879 = memref.load %arg3[%c13_278] : memref<16xf32, #tpu.memory_space<smem>>
    %880 = vector.broadcast %879 : f32 to vector<32x128xf32>
    %881 = arith.addf %878, %880 : vector<32x128xf32>
    %882 = vector.extract_strided_slice %0 {offsets = [1, 0, 0, 0], sizes = [1, 1, 32, 128], strides = [1, 1, 1, 1]} : vector<9x1x32x128xf32> to vector<1x1x32x128xf32>
    %883 = vector.shape_cast %882 : vector<1x1x32x128xf32> to vector<32x128xf32>
    %c13_279 = arith.constant 13 : index
    %c1_280 = arith.constant 1 : index
    %884 = memref.load %arg2[%c13_279, %c1_280] : memref<16x9xf32, #tpu.memory_space<smem>>
    %885 = vector.broadcast %884 : f32 to vector<32x128xf32>
    %886 = arith.mulf %883, %885 : vector<32x128xf32>
    %887 = arith.addf %881, %886 : vector<32x128xf32>
    %888 = vector.extract_strided_slice %0 {offsets = [2, 0, 0, 0], sizes = [1, 1, 32, 128], strides = [1, 1, 1, 1]} : vector<9x1x32x128xf32> to vector<1x1x32x128xf32>
    %889 = vector.shape_cast %888 : vector<1x1x32x128xf32> to vector<32x128xf32>
    %c13_281 = arith.constant 13 : index
    %c2_282 = arith.constant 2 : index
    %890 = memref.load %arg2[%c13_281, %c2_282] : memref<16x9xf32, #tpu.memory_space<smem>>
    %891 = vector.broadcast %890 : f32 to vector<32x128xf32>
    %892 = arith.mulf %889, %891 : vector<32x128xf32>
    %893 = arith.addf %887, %892 : vector<32x128xf32>
    %894 = vector.extract_strided_slice %0 {offsets = [3, 0, 0, 0], sizes = [1, 1, 32, 128], strides = [1, 1, 1, 1]} : vector<9x1x32x128xf32> to vector<1x1x32x128xf32>
    %895 = vector.shape_cast %894 : vector<1x1x32x128xf32> to vector<32x128xf32>
    %c13_283 = arith.constant 13 : index
    %c3_284 = arith.constant 3 : index
    %896 = memref.load %arg2[%c13_283, %c3_284] : memref<16x9xf32, #tpu.memory_space<smem>>
    %897 = vector.broadcast %896 : f32 to vector<32x128xf32>
    %898 = arith.mulf %895, %897 : vector<32x128xf32>
    %899 = arith.addf %893, %898 : vector<32x128xf32>
    %900 = vector.extract_strided_slice %0 {offsets = [4, 0, 0, 0], sizes = [1, 1, 32, 128], strides = [1, 1, 1, 1]} : vector<9x1x32x128xf32> to vector<1x1x32x128xf32>
    %901 = vector.shape_cast %900 : vector<1x1x32x128xf32> to vector<32x128xf32>
    %c13_285 = arith.constant 13 : index
    %c4_286 = arith.constant 4 : index
    %902 = memref.load %arg2[%c13_285, %c4_286] : memref<16x9xf32, #tpu.memory_space<smem>>
    %903 = vector.broadcast %902 : f32 to vector<32x128xf32>
    %904 = arith.mulf %901, %903 : vector<32x128xf32>
    %905 = arith.addf %899, %904 : vector<32x128xf32>
    %906 = vector.extract_strided_slice %0 {offsets = [5, 0, 0, 0], sizes = [1, 1, 32, 128], strides = [1, 1, 1, 1]} : vector<9x1x32x128xf32> to vector<1x1x32x128xf32>
    %907 = vector.shape_cast %906 : vector<1x1x32x128xf32> to vector<32x128xf32>
    %c13_287 = arith.constant 13 : index
    %c5_288 = arith.constant 5 : index
    %908 = memref.load %arg2[%c13_287, %c5_288] : memref<16x9xf32, #tpu.memory_space<smem>>
    %909 = vector.broadcast %908 : f32 to vector<32x128xf32>
    %910 = arith.mulf %907, %909 : vector<32x128xf32>
    %911 = arith.addf %905, %910 : vector<32x128xf32>
    %912 = vector.extract_strided_slice %0 {offsets = [6, 0, 0, 0], sizes = [1, 1, 32, 128], strides = [1, 1, 1, 1]} : vector<9x1x32x128xf32> to vector<1x1x32x128xf32>
    %913 = vector.shape_cast %912 : vector<1x1x32x128xf32> to vector<32x128xf32>
    %c13_289 = arith.constant 13 : index
    %c6_290 = arith.constant 6 : index
    %914 = memref.load %arg2[%c13_289, %c6_290] : memref<16x9xf32, #tpu.memory_space<smem>>
    %915 = vector.broadcast %914 : f32 to vector<32x128xf32>
    %916 = arith.mulf %913, %915 : vector<32x128xf32>
    %917 = arith.addf %911, %916 : vector<32x128xf32>
    %918 = vector.extract_strided_slice %0 {offsets = [7, 0, 0, 0], sizes = [1, 1, 32, 128], strides = [1, 1, 1, 1]} : vector<9x1x32x128xf32> to vector<1x1x32x128xf32>
    %919 = vector.shape_cast %918 : vector<1x1x32x128xf32> to vector<32x128xf32>
    %c13_291 = arith.constant 13 : index
    %c7_292 = arith.constant 7 : index
    %920 = memref.load %arg2[%c13_291, %c7_292] : memref<16x9xf32, #tpu.memory_space<smem>>
    %921 = vector.broadcast %920 : f32 to vector<32x128xf32>
    %922 = arith.mulf %919, %921 : vector<32x128xf32>
    %923 = arith.addf %917, %922 : vector<32x128xf32>
    %924 = vector.extract_strided_slice %0 {offsets = [8, 0, 0, 0], sizes = [1, 1, 32, 128], strides = [1, 1, 1, 1]} : vector<9x1x32x128xf32> to vector<1x1x32x128xf32>
    %925 = vector.shape_cast %924 : vector<1x1x32x128xf32> to vector<32x128xf32>
    %c13_293 = arith.constant 13 : index
    %c8_294 = arith.constant 8 : index
    %926 = memref.load %arg2[%c13_293, %c8_294] : memref<16x9xf32, #tpu.memory_space<smem>>
    %927 = vector.broadcast %926 : f32 to vector<32x128xf32>
    %928 = arith.mulf %925, %927 : vector<32x128xf32>
    %929 = arith.addf %923, %928 : vector<32x128xf32>
    %cst_295 = arith.constant 0.000000e+00 : f32
    %930 = vector.broadcast %cst_295 : f32 to vector<32x128xf32>
    %931 = arith.maximumf %929, %930 : vector<32x128xf32>
    %932 = vector.shape_cast %931 : vector<32x128xf32> to vector<1x32x128xf32>
    %cst_296 = arith.constant dense<0.000000e+00> : vector<1xf32>
    %933 = vector.multi_reduction <add>, %932, %cst_296 [1, 2] : vector<1x32x128xf32> to vector<1xf32>
    %934 = vector.shape_cast %933 : vector<1xf32> to vector<1x1x1xf32>
    %935 = vector.extract %934[0, 0, 0] : f32 from vector<1x1x1xf32>
    %cst_297 = arith.constant 2.44140625E-4 : f32
    %936 = arith.mulf %935, %cst_297 : f32
    %c13_i32 = arith.constant 13 : i32
    %937 = vector.broadcast %c13_i32 : i32 to vector<1x16xi32>
    %938 = arith.cmpi eq, %1, %937 : vector<1x16xi32>
    %939 = vector.broadcast %936 : f32 to vector<1x16xf32>
    %940 = arith.select %938, %939, %873 : vector<1x16xi1>, vector<1x16xf32>
    %941 = vector.extract_strided_slice %0 {offsets = [0, 0, 0, 0], sizes = [1, 1, 32, 128], strides = [1, 1, 1, 1]} : vector<9x1x32x128xf32> to vector<1x1x32x128xf32>
    %942 = vector.shape_cast %941 : vector<1x1x32x128xf32> to vector<32x128xf32>
    %c14 = arith.constant 14 : index
    %c0_298 = arith.constant 0 : index
    %943 = memref.load %arg2[%c14, %c0_298] : memref<16x9xf32, #tpu.memory_space<smem>>
    %944 = vector.broadcast %943 : f32 to vector<32x128xf32>
    %945 = arith.mulf %942, %944 : vector<32x128xf32>
    %c14_299 = arith.constant 14 : index
    %946 = memref.load %arg3[%c14_299] : memref<16xf32, #tpu.memory_space<smem>>
    %947 = vector.broadcast %946 : f32 to vector<32x128xf32>
    %948 = arith.addf %945, %947 : vector<32x128xf32>
    %949 = vector.extract_strided_slice %0 {offsets = [1, 0, 0, 0], sizes = [1, 1, 32, 128], strides = [1, 1, 1, 1]} : vector<9x1x32x128xf32> to vector<1x1x32x128xf32>
    %950 = vector.shape_cast %949 : vector<1x1x32x128xf32> to vector<32x128xf32>
    %c14_300 = arith.constant 14 : index
    %c1_301 = arith.constant 1 : index
    %951 = memref.load %arg2[%c14_300, %c1_301] : memref<16x9xf32, #tpu.memory_space<smem>>
    %952 = vector.broadcast %951 : f32 to vector<32x128xf32>
    %953 = arith.mulf %950, %952 : vector<32x128xf32>
    %954 = arith.addf %948, %953 : vector<32x128xf32>
    %955 = vector.extract_strided_slice %0 {offsets = [2, 0, 0, 0], sizes = [1, 1, 32, 128], strides = [1, 1, 1, 1]} : vector<9x1x32x128xf32> to vector<1x1x32x128xf32>
    %956 = vector.shape_cast %955 : vector<1x1x32x128xf32> to vector<32x128xf32>
    %c14_302 = arith.constant 14 : index
    %c2_303 = arith.constant 2 : index
    %957 = memref.load %arg2[%c14_302, %c2_303] : memref<16x9xf32, #tpu.memory_space<smem>>
    %958 = vector.broadcast %957 : f32 to vector<32x128xf32>
    %959 = arith.mulf %956, %958 : vector<32x128xf32>
    %960 = arith.addf %954, %959 : vector<32x128xf32>
    %961 = vector.extract_strided_slice %0 {offsets = [3, 0, 0, 0], sizes = [1, 1, 32, 128], strides = [1, 1, 1, 1]} : vector<9x1x32x128xf32> to vector<1x1x32x128xf32>
    %962 = vector.shape_cast %961 : vector<1x1x32x128xf32> to vector<32x128xf32>
    %c14_304 = arith.constant 14 : index
    %c3_305 = arith.constant 3 : index
    %963 = memref.load %arg2[%c14_304, %c3_305] : memref<16x9xf32, #tpu.memory_space<smem>>
    %964 = vector.broadcast %963 : f32 to vector<32x128xf32>
    %965 = arith.mulf %962, %964 : vector<32x128xf32>
    %966 = arith.addf %960, %965 : vector<32x128xf32>
    %967 = vector.extract_strided_slice %0 {offsets = [4, 0, 0, 0], sizes = [1, 1, 32, 128], strides = [1, 1, 1, 1]} : vector<9x1x32x128xf32> to vector<1x1x32x128xf32>
    %968 = vector.shape_cast %967 : vector<1x1x32x128xf32> to vector<32x128xf32>
    %c14_306 = arith.constant 14 : index
    %c4_307 = arith.constant 4 : index
    %969 = memref.load %arg2[%c14_306, %c4_307] : memref<16x9xf32, #tpu.memory_space<smem>>
    %970 = vector.broadcast %969 : f32 to vector<32x128xf32>
    %971 = arith.mulf %968, %970 : vector<32x128xf32>
    %972 = arith.addf %966, %971 : vector<32x128xf32>
    %973 = vector.extract_strided_slice %0 {offsets = [5, 0, 0, 0], sizes = [1, 1, 32, 128], strides = [1, 1, 1, 1]} : vector<9x1x32x128xf32> to vector<1x1x32x128xf32>
    %974 = vector.shape_cast %973 : vector<1x1x32x128xf32> to vector<32x128xf32>
    %c14_308 = arith.constant 14 : index
    %c5_309 = arith.constant 5 : index
    %975 = memref.load %arg2[%c14_308, %c5_309] : memref<16x9xf32, #tpu.memory_space<smem>>
    %976 = vector.broadcast %975 : f32 to vector<32x128xf32>
    %977 = arith.mulf %974, %976 : vector<32x128xf32>
    %978 = arith.addf %972, %977 : vector<32x128xf32>
    %979 = vector.extract_strided_slice %0 {offsets = [6, 0, 0, 0], sizes = [1, 1, 32, 128], strides = [1, 1, 1, 1]} : vector<9x1x32x128xf32> to vector<1x1x32x128xf32>
    %980 = vector.shape_cast %979 : vector<1x1x32x128xf32> to vector<32x128xf32>
    %c14_310 = arith.constant 14 : index
    %c6_311 = arith.constant 6 : index
    %981 = memref.load %arg2[%c14_310, %c6_311] : memref<16x9xf32, #tpu.memory_space<smem>>
    %982 = vector.broadcast %981 : f32 to vector<32x128xf32>
    %983 = arith.mulf %980, %982 : vector<32x128xf32>
    %984 = arith.addf %978, %983 : vector<32x128xf32>
    %985 = vector.extract_strided_slice %0 {offsets = [7, 0, 0, 0], sizes = [1, 1, 32, 128], strides = [1, 1, 1, 1]} : vector<9x1x32x128xf32> to vector<1x1x32x128xf32>
    %986 = vector.shape_cast %985 : vector<1x1x32x128xf32> to vector<32x128xf32>
    %c14_312 = arith.constant 14 : index
    %c7_313 = arith.constant 7 : index
    %987 = memref.load %arg2[%c14_312, %c7_313] : memref<16x9xf32, #tpu.memory_space<smem>>
    %988 = vector.broadcast %987 : f32 to vector<32x128xf32>
    %989 = arith.mulf %986, %988 : vector<32x128xf32>
    %990 = arith.addf %984, %989 : vector<32x128xf32>
    %991 = vector.extract_strided_slice %0 {offsets = [8, 0, 0, 0], sizes = [1, 1, 32, 128], strides = [1, 1, 1, 1]} : vector<9x1x32x128xf32> to vector<1x1x32x128xf32>
    %992 = vector.shape_cast %991 : vector<1x1x32x128xf32> to vector<32x128xf32>
    %c14_314 = arith.constant 14 : index
    %c8_315 = arith.constant 8 : index
    %993 = memref.load %arg2[%c14_314, %c8_315] : memref<16x9xf32, #tpu.memory_space<smem>>
    %994 = vector.broadcast %993 : f32 to vector<32x128xf32>
    %995 = arith.mulf %992, %994 : vector<32x128xf32>
    %996 = arith.addf %990, %995 : vector<32x128xf32>
    %cst_316 = arith.constant 0.000000e+00 : f32
    %997 = vector.broadcast %cst_316 : f32 to vector<32x128xf32>
    %998 = arith.maximumf %996, %997 : vector<32x128xf32>
    %999 = vector.shape_cast %998 : vector<32x128xf32> to vector<1x32x128xf32>
    %cst_317 = arith.constant dense<0.000000e+00> : vector<1xf32>
    %1000 = vector.multi_reduction <add>, %999, %cst_317 [1, 2] : vector<1x32x128xf32> to vector<1xf32>
    %1001 = vector.shape_cast %1000 : vector<1xf32> to vector<1x1x1xf32>
    %1002 = vector.extract %1001[0, 0, 0] : f32 from vector<1x1x1xf32>
    %cst_318 = arith.constant 2.44140625E-4 : f32
    %1003 = arith.mulf %1002, %cst_318 : f32
    %c14_i32 = arith.constant 14 : i32
    %1004 = vector.broadcast %c14_i32 : i32 to vector<1x16xi32>
    %1005 = arith.cmpi eq, %1, %1004 : vector<1x16xi32>
    %1006 = vector.broadcast %1003 : f32 to vector<1x16xf32>
    %1007 = arith.select %1005, %1006, %940 : vector<1x16xi1>, vector<1x16xf32>
    %1008 = vector.extract_strided_slice %0 {offsets = [0, 0, 0, 0], sizes = [1, 1, 32, 128], strides = [1, 1, 1, 1]} : vector<9x1x32x128xf32> to vector<1x1x32x128xf32>
    %1009 = vector.shape_cast %1008 : vector<1x1x32x128xf32> to vector<32x128xf32>
    %c15 = arith.constant 15 : index
    %c0_319 = arith.constant 0 : index
    %1010 = memref.load %arg2[%c15, %c0_319] : memref<16x9xf32, #tpu.memory_space<smem>>
    %1011 = vector.broadcast %1010 : f32 to vector<32x128xf32>
    %1012 = arith.mulf %1009, %1011 : vector<32x128xf32>
    %c15_320 = arith.constant 15 : index
    %1013 = memref.load %arg3[%c15_320] : memref<16xf32, #tpu.memory_space<smem>>
    %1014 = vector.broadcast %1013 : f32 to vector<32x128xf32>
    %1015 = arith.addf %1012, %1014 : vector<32x128xf32>
    %1016 = vector.extract_strided_slice %0 {offsets = [1, 0, 0, 0], sizes = [1, 1, 32, 128], strides = [1, 1, 1, 1]} : vector<9x1x32x128xf32> to vector<1x1x32x128xf32>
    %1017 = vector.shape_cast %1016 : vector<1x1x32x128xf32> to vector<32x128xf32>
    %c15_321 = arith.constant 15 : index
    %c1_322 = arith.constant 1 : index
    %1018 = memref.load %arg2[%c15_321, %c1_322] : memref<16x9xf32, #tpu.memory_space<smem>>
    %1019 = vector.broadcast %1018 : f32 to vector<32x128xf32>
    %1020 = arith.mulf %1017, %1019 : vector<32x128xf32>
    %1021 = arith.addf %1015, %1020 : vector<32x128xf32>
    %1022 = vector.extract_strided_slice %0 {offsets = [2, 0, 0, 0], sizes = [1, 1, 32, 128], strides = [1, 1, 1, 1]} : vector<9x1x32x128xf32> to vector<1x1x32x128xf32>
    %1023 = vector.shape_cast %1022 : vector<1x1x32x128xf32> to vector<32x128xf32>
    %c15_323 = arith.constant 15 : index
    %c2_324 = arith.constant 2 : index
    %1024 = memref.load %arg2[%c15_323, %c2_324] : memref<16x9xf32, #tpu.memory_space<smem>>
    %1025 = vector.broadcast %1024 : f32 to vector<32x128xf32>
    %1026 = arith.mulf %1023, %1025 : vector<32x128xf32>
    %1027 = arith.addf %1021, %1026 : vector<32x128xf32>
    %1028 = vector.extract_strided_slice %0 {offsets = [3, 0, 0, 0], sizes = [1, 1, 32, 128], strides = [1, 1, 1, 1]} : vector<9x1x32x128xf32> to vector<1x1x32x128xf32>
    %1029 = vector.shape_cast %1028 : vector<1x1x32x128xf32> to vector<32x128xf32>
    %c15_325 = arith.constant 15 : index
    %c3_326 = arith.constant 3 : index
    %1030 = memref.load %arg2[%c15_325, %c3_326] : memref<16x9xf32, #tpu.memory_space<smem>>
    %1031 = vector.broadcast %1030 : f32 to vector<32x128xf32>
    %1032 = arith.mulf %1029, %1031 : vector<32x128xf32>
    %1033 = arith.addf %1027, %1032 : vector<32x128xf32>
    %1034 = vector.extract_strided_slice %0 {offsets = [4, 0, 0, 0], sizes = [1, 1, 32, 128], strides = [1, 1, 1, 1]} : vector<9x1x32x128xf32> to vector<1x1x32x128xf32>
    %1035 = vector.shape_cast %1034 : vector<1x1x32x128xf32> to vector<32x128xf32>
    %c15_327 = arith.constant 15 : index
    %c4_328 = arith.constant 4 : index
    %1036 = memref.load %arg2[%c15_327, %c4_328] : memref<16x9xf32, #tpu.memory_space<smem>>
    %1037 = vector.broadcast %1036 : f32 to vector<32x128xf32>
    %1038 = arith.mulf %1035, %1037 : vector<32x128xf32>
    %1039 = arith.addf %1033, %1038 : vector<32x128xf32>
    %1040 = vector.extract_strided_slice %0 {offsets = [5, 0, 0, 0], sizes = [1, 1, 32, 128], strides = [1, 1, 1, 1]} : vector<9x1x32x128xf32> to vector<1x1x32x128xf32>
    %1041 = vector.shape_cast %1040 : vector<1x1x32x128xf32> to vector<32x128xf32>
    %c15_329 = arith.constant 15 : index
    %c5_330 = arith.constant 5 : index
    %1042 = memref.load %arg2[%c15_329, %c5_330] : memref<16x9xf32, #tpu.memory_space<smem>>
    %1043 = vector.broadcast %1042 : f32 to vector<32x128xf32>
    %1044 = arith.mulf %1041, %1043 : vector<32x128xf32>
    %1045 = arith.addf %1039, %1044 : vector<32x128xf32>
    %1046 = vector.extract_strided_slice %0 {offsets = [6, 0, 0, 0], sizes = [1, 1, 32, 128], strides = [1, 1, 1, 1]} : vector<9x1x32x128xf32> to vector<1x1x32x128xf32>
    %1047 = vector.shape_cast %1046 : vector<1x1x32x128xf32> to vector<32x128xf32>
    %c15_331 = arith.constant 15 : index
    %c6_332 = arith.constant 6 : index
    %1048 = memref.load %arg2[%c15_331, %c6_332] : memref<16x9xf32, #tpu.memory_space<smem>>
    %1049 = vector.broadcast %1048 : f32 to vector<32x128xf32>
    %1050 = arith.mulf %1047, %1049 : vector<32x128xf32>
    %1051 = arith.addf %1045, %1050 : vector<32x128xf32>
    %1052 = vector.extract_strided_slice %0 {offsets = [7, 0, 0, 0], sizes = [1, 1, 32, 128], strides = [1, 1, 1, 1]} : vector<9x1x32x128xf32> to vector<1x1x32x128xf32>
    %1053 = vector.shape_cast %1052 : vector<1x1x32x128xf32> to vector<32x128xf32>
    %c15_333 = arith.constant 15 : index
    %c7_334 = arith.constant 7 : index
    %1054 = memref.load %arg2[%c15_333, %c7_334] : memref<16x9xf32, #tpu.memory_space<smem>>
    %1055 = vector.broadcast %1054 : f32 to vector<32x128xf32>
    %1056 = arith.mulf %1053, %1055 : vector<32x128xf32>
    %1057 = arith.addf %1051, %1056 : vector<32x128xf32>
    %1058 = vector.extract_strided_slice %0 {offsets = [8, 0, 0, 0], sizes = [1, 1, 32, 128], strides = [1, 1, 1, 1]} : vector<9x1x32x128xf32> to vector<1x1x32x128xf32>
    %1059 = vector.shape_cast %1058 : vector<1x1x32x128xf32> to vector<32x128xf32>
    %c15_335 = arith.constant 15 : index
    %c8_336 = arith.constant 8 : index
    %1060 = memref.load %arg2[%c15_335, %c8_336] : memref<16x9xf32, #tpu.memory_space<smem>>
    %1061 = vector.broadcast %1060 : f32 to vector<32x128xf32>
    %1062 = arith.mulf %1059, %1061 : vector<32x128xf32>
    %1063 = arith.addf %1057, %1062 : vector<32x128xf32>
    %cst_337 = arith.constant 0.000000e+00 : f32
    %1064 = vector.broadcast %cst_337 : f32 to vector<32x128xf32>
    %1065 = arith.maximumf %1063, %1064 : vector<32x128xf32>
    %1066 = vector.shape_cast %1065 : vector<32x128xf32> to vector<1x32x128xf32>
    %cst_338 = arith.constant dense<0.000000e+00> : vector<1xf32>
    %1067 = vector.multi_reduction <add>, %1066, %cst_338 [1, 2] : vector<1x32x128xf32> to vector<1xf32>
    %1068 = vector.shape_cast %1067 : vector<1xf32> to vector<1x1x1xf32>
    %1069 = vector.extract %1068[0, 0, 0] : f32 from vector<1x1x1xf32>
    %cst_339 = arith.constant 2.44140625E-4 : f32
    %1070 = arith.mulf %1069, %cst_339 : f32
    %c15_i32 = arith.constant 15 : i32
    %1071 = vector.broadcast %c15_i32 : i32 to vector<1x16xi32>
    %1072 = arith.cmpi eq, %1, %1071 : vector<1x16xi32>
    %1073 = vector.broadcast %1070 : f32 to vector<1x16xf32>
    %1074 = arith.select %1072, %1073, %1007 : vector<1x16xi1>, vector<1x16xf32>
    %c0_340 = arith.constant 0 : index
    %c0_341 = arith.constant 0 : index
    %1075 = vector.load %arg4[%c0_340, %c0_341] : memref<16x32xf32, #tpu.memory_space<vmem>>, vector<16x32xf32>
    %cst_342 = arith.constant dense<0.000000e+00> : vector<1x32xf32>
    %1076 = tpu.matmul %1074, %1075, %cst_342 {dimension_numbers = #tpu.dot_dimension_numbers<[1], [0], [0], [1], [0, 0, 1, 1], [], []>} : vector<1x16xf32>, vector<16x32xf32>, vector<1x32xf32> -> vector<1x32xf32>
    %c0_343 = arith.constant 0 : index
    %c0_344 = arith.constant 0 : index
    %1077 = vector.load %arg5[%c0_343, %c0_344] : memref<1x32xf32, #tpu.memory_space<vmem>>, vector<1x32xf32>
    %1078 = arith.addf %1076, %1077 : vector<1x32xf32>
    %c0_345 = arith.constant 0 : index
    %c0_346 = arith.constant 0 : index
    %1079 = vector.load %arg8[%c0_345, %c0_346] : memref<1x32xf32, #tpu.memory_space<vmem>>, vector<1x32xf32>
    %1080 = arith.subf %1078, %1079 : vector<1x32xf32>
    %c0_347 = arith.constant 0 : index
    %c0_348 = arith.constant 0 : index
    %1081 = vector.load %arg9[%c0_347, %c0_348] : memref<1x32xf32, #tpu.memory_space<vmem>>, vector<1x32xf32>
    %cst_349 = arith.constant 9.99999974E-6 : f32
    %1082 = vector.broadcast %cst_349 : f32 to vector<1x32xf32>
    %1083 = arith.addf %1081, %1082 : vector<1x32xf32>
    %1084 = math.rsqrt %1083 : vector<1x32xf32>
    %1085 = arith.mulf %1080, %1084 : vector<1x32xf32>
    %c0_350 = arith.constant 0 : index
    %c0_351 = arith.constant 0 : index
    %1086 = vector.load %arg6[%c0_350, %c0_351] : memref<1x32xf32, #tpu.memory_space<vmem>>, vector<1x32xf32>
    %1087 = arith.mulf %1085, %1086 : vector<1x32xf32>
    %c0_352 = arith.constant 0 : index
    %c0_353 = arith.constant 0 : index
    %1088 = vector.load %arg7[%c0_352, %c0_353] : memref<1x32xf32, #tpu.memory_space<vmem>>, vector<1x32xf32>
    %1089 = arith.addf %1087, %1088 : vector<1x32xf32>
    %cst_354 = arith.constant 0.000000e+00 : f32
    %1090 = vector.broadcast %cst_354 : f32 to vector<1x32xf32>
    %1091 = arith.maximumf %1089, %1090 : vector<1x32xf32>
    %c0_355 = arith.constant 0 : index
    %c0_356 = arith.constant 0 : index
    %1092 = vector.load %arg10[%c0_355, %c0_356] : memref<32x2xf32, #tpu.memory_space<vmem>>, vector<32x2xf32>
    %cst_357 = arith.constant dense<0.000000e+00> : vector<1x2xf32>
    %1093 = tpu.matmul %1091, %1092, %cst_357 {dimension_numbers = #tpu.dot_dimension_numbers<[1], [0], [0], [1], [0, 0, 1, 1], [], []>} : vector<1x32xf32>, vector<32x2xf32>, vector<1x2xf32> -> vector<1x2xf32>
    %c0_358 = arith.constant 0 : index
    %c0_359 = arith.constant 0 : index
    %1094 = vector.load %arg11[%c0_358, %c0_359] : memref<1x2xf32, #tpu.memory_space<vmem>>, vector<1x2xf32>
    %1095 = arith.addf %1093, %1094 : vector<1x2xf32>
    %c0_360 = arith.constant 0 : index
    %c0_361 = arith.constant 0 : index
    %c0_362 = arith.constant 0 : index
    %1096 = vector.load %arg12[%c0_360, %c0_361, %c0_362] : memref<1x1x2xf32, #tpu.memory_space<vmem>>, vector<1x1x2xf32>
    %1097 = vector.shape_cast %1096 : vector<1x1x2xf32> to vector<1x2xf32>
    %1098 = vector.shape_cast %1095 : vector<1x2xf32> to vector<1x1x2xf32>
    tpu.vector_store %arg12[%c0_360, %c0_361, %c0_362], %1098 {strides = array<i32>} : memref<1x1x2xf32, #tpu.memory_space<vmem>>, vector<1x1x2xf32>,
    return
  }
  func.func @transform_0(%arg0: i32) -> (i32, i32, i32, i32) {
    %c0_i32 = arith.constant 0 : i32
    %c0_i32_0 = arith.constant 0 : i32
    %c0_i32_1 = arith.constant 0 : i32
    %c0_i32_2 = arith.constant 0 : i32
    return %c0_i32, %arg0, %c0_i32_0, %c0_i32_1 : i32, i32, i32, i32
  }
  func.func @transform_1(%arg0: i32) -> (i32, i32) {
    %c0_i32 = arith.constant 0 : i32
    %c0_i32_0 = arith.constant 0 : i32
    %c0_i32_1 = arith.constant 0 : i32
    return %c0_i32, %c0_i32_0 : i32, i32
  }
  func.func @transform_2(%arg0: i32) -> i32 {
    %c0_i32 = arith.constant 0 : i32
    %c0_i32_0 = arith.constant 0 : i32
    return %c0_i32 : i32
  }
  func.func @transform_3(%arg0: i32) -> (i32, i32) {
    %c0_i32 = arith.constant 0 : i32
    %c0_i32_0 = arith.constant 0 : i32
    %c0_i32_1 = arith.constant 0 : i32
    return %c0_i32, %c0_i32_0 : i32, i32
  }
  func.func @transform_4(%arg0: i32) -> (i32, i32) {
    %c0_i32 = arith.constant 0 : i32
    %c0_i32_0 = arith.constant 0 : i32
    %c0_i32_1 = arith.constant 0 : i32
    return %c0_i32, %c0_i32_0 : i32, i32
  }
  func.func @transform_5(%arg0: i32) -> (i32, i32) {
    %c0_i32 = arith.constant 0 : i32
    %c0_i32_0 = arith.constant 0 : i32
    %c0_i32_1 = arith.constant 0 : i32
    return %c0_i32, %c0_i32_0 : i32, i32
  }
  func.func @transform_6(%arg0: i32) -> (i32, i32) {
    %c0_i32 = arith.constant 0 : i32
    %c0_i32_0 = arith.constant 0 : i32
    %c0_i32_1 = arith.constant 0 : i32
    return %c0_i32, %c0_i32_0 : i32, i32
  }
  func.func @transform_7(%arg0: i32) -> (i32, i32) {
    %c0_i32 = arith.constant 0 : i32
    %c0_i32_0 = arith.constant 0 : i32
    %c0_i32_1 = arith.constant 0 : i32
    return %c0_i32, %c0_i32_0 : i32, i32
  }
  func.func @transform_8(%arg0: i32) -> (i32, i32) {
    %c0_i32 = arith.constant 0 : i32
    %c0_i32_0 = arith.constant 0 : i32
    %c0_i32_1 = arith.constant 0 : i32
    return %c0_i32, %c0_i32_0 : i32, i32
  }
  func.func @transform_9(%arg0: i32) -> (i32, i32) {
    %c0_i32 = arith.constant 0 : i32
    %c0_i32_0 = arith.constant 0 : i32
    %c0_i32_1 = arith.constant 0 : i32
    return %c0_i32, %c0_i32_0 : i32, i32
  }
  func.func @transform_10(%arg0: i32) -> (i32, i32) {
    %c0_i32 = arith.constant 0 : i32
    %c0_i32_0 = arith.constant 0 : i32
    %c0_i32_1 = arith.constant 0 : i32
    return %c0_i32, %c0_i32_0 : i32, i32
  }
  func.func @transform_11(%arg0: i32) -> (i32, i32, i32) {
    %c0_i32 = arith.constant 0 : i32
    %c0_i32_0 = arith.constant 0 : i32
    %c0_i32_1 = arith.constant 0 : i32
    return %arg0, %c0_i32, %c0_i32_0 : i32, i32, i32
  }
}

</mosaic_0001>

<bundles_post_ra>
// kernel: hms2d_v3_forward.2
= control target key start
LH: loop header
LB: loop body
LE: loop exit
PB: predicated region body
PF: predicated region fallthrough
CT: control target
= control target key end

     0   :  { %8 = vsyncpa [#allocation4], 0  ;;  %s2633_s0 = inlined_call_operand.vmem [shape: f32[9,8,4,4], index: 0, kind: input, shape index: {}]   ;;  %s2634_s1 = inlined_call_operand.vmem [shape: f32[8,9], index: 1, kind: input, shape index: {}]   ;;  %s2635_s2 = inlined_call_operand.vmem [shape: f32[8], index: 2, kind: input, shape index: {}]   ;;  %s2636_s3 = inlined_call_operand.vmem [shape: f32[8,4,4], index: 3, kind: output, shape index: {}]  }
   0x1   :  { %9 = vsyncpa [#allocation6], 0  ;;  %s1570_s12 = smov 0   ;;  %s1572_s13 = smov 0  }
   0x2   :  { %s1574_s14 = smov 0  }
   0x3 LB: > { %s1309_s15 = sadd.s32 4294967295, %s1546_s14   ;;  %s1587_s16 = sadd.s32 1, %s1546_s14   ;;  %s1546_s14 = sphi %s1574_s14, %s2746_s14   ;;  %s1542_s13 = sphi %s1572_s13, %s2745_s13   ;;  %s1538_s12 = sphi %s1570_s12, %s2744_s12  }
   0x4   : > { %s19_s17 = ssub.s32 %s1546_s14, %s1587_s16  ;;  %s22_s18 = sadd.s32 1, %s1542_s13 }
   0x5   : > { %p20_p0 = scmp.eq.s32.totalorder %s19_s17, 0  ;;  %p29_p1 = scmp.ne.s32.totalorder %s1542_s13, %s1538_s12 }
   0x6   : > { %p30_p2 = scmp.eq.s32.totalorder %s1546_s14, 0  ;;  %p1311_p3 = scmp.ge.s32.totalorder %s1546_s14, 1 }
   0x7   : > { %s1597_s19 = scalar_select %p20_p0, %s1542_s13, %s22_s18  }
   0x8   : > { %p1599_p4 = por %p30_p2, %p29_p1  ;;  %p114_p5 = scmp.lt.s32.totalorder %s1546_s14, 3 }
   0x9   : > { %p1606_p6 = scmp.eq.s32.totalorder %s1309_s15, 0  ;;  %s126_s25 = sshll.u32 %s2634_s1, 4  ;;  %s127_s25 = int_to_ptr.vmem [resolvable:$true] %s126_s25 }
   0xa   : > { %p1610_p7 = pnand %p1311_p3, %p114_p5  ;;  %s136_s28 = sshll.u32 %s2635_s2, 4  ;;  %s137_s28 = int_to_ptr.vmem [resolvable:$true] %s136_s28 }
   0xb   : > { %s1548_s29 = smov [#allocation3]   ;;  %s1549_s30 = smov [#allocation5]  }
   0xc   : > { %p1413_p8 = pneg %p1610_p7  ;;  %p1314_p10 = scmp.ge.s32.totalorder %s1546_s14, 2 }
   0xe   : > { %p1414_p9 = pnand %p1606_p6, %p1413_p8  ;;  %143 = sbr.rel (%p1314_p10) target bundleno = 41 (0x29), region = 24 }
  0x10   : > { %1416 = dma.vmem_to_smem (!%p1414_p9), %s127_s25, 128, %s1548_s29, [#allocation4]  }
  0x11   : > { %1419 = dma.vmem_to_smem (!%p1414_p9), %s137_s28, 16, %s1549_s30, [#allocation6]  }
  0x13   : > { %146 = sbr.rel (!%p1599_p4) target bundleno = 41 (0x29), region = 28  ;;  %s148_s4 = sand.u32 (%p1599_p4), 1, %s1542_s13  }
  0x14   : > { %s1402_s5 = sshll.u32 (%p1599_p4), %s1546_s14, 4  ;;  %s1403_s6 = smul.u32 (%p1599_p4), 144, %s148_s4 }
  0x15   : > { %s1632_s9 = scalar_lea.vmem (%p1599_p4), %s2633_s0, %s1402_s5 }
  0x16   : > { %v170_v0 = vld [vmem:[%s1632_s9] sm:$0xff] (%p1599_p4)   ;;  %v174_v1 = vld [vmem:[%s1632_s9 + $0x8] sm:$0xff] (%p1599_p4)   ;;  %s1637_s10 = scalar_lea.vmem (%p1599_p4), [#allocation2], %s1403_s6 }
  0x17   : > { %v178_v2 = vld [vmem:[%s1632_s9 + $0x20] sm:$0xff] (%p1599_p4)   ;;  %171 = vst [vmem:[%s1637_s10] sm:$0xff] (%p1599_p4), %v170_v0   ;;  %v182_v3 = vld [vmem:[%s1632_s9 + $0x28] sm:$0xff] (%p1599_p4)  }
  0x18   : > { %175 = vst [vmem:[%s1637_s10 + $0x8] sm:$0xff] %v174_v1   ;;  %v186_v4 = vld [vmem:[%s1632_s9 + $0x40] sm:$0xff]   ;;  %v190_v5 = vld [vmem:[%s1632_s9 + $0x48] sm:$0xff]  }
  0x19   : > { %179 = vst [vmem:[%s1637_s10 + $0x10] sm:$0xff] %v178_v2   ;;  %v194_v6 = vld [vmem:[%s1632_s9 + $0x60] sm:$0xff]   ;;  %v198_v7 = vld [vmem:[%s1632_s9 + $0x68] sm:$0xff]  }
  0x1a   : > { %183 = vst [vmem:[%s1637_s10 + $0x18] sm:$0xff] %v182_v3   ;;  %v202_v8 = vld [vmem:[%s1632_s9 + $0x80] sm:$0xff]   ;;  %v206_v9 = vld [vmem:[%s1632_s9 + $0x88] sm:$0xff]  }
  0x1b   : > { %187 = vst [vmem:[%s1637_s10 + $0x20] sm:$0xff] %v186_v4   ;;  %v210_v10 = vld [vmem:[%s1632_s9 + $0xa0] sm:$0xff]   ;;  %v214_v11 = vld [vmem:[%s1632_s9 + $0xa8] sm:$0xff]  }
  0x1c   : > { %191 = vst [vmem:[%s1637_s10 + $0x28] sm:$0xff] %v190_v5   ;;  %v218_v12 = vld [vmem:[%s1632_s9 + $0xc0] sm:$0xff]   ;;  %v222_v13 = vld [vmem:[%s1632_s9 + $0xc8] sm:$0xff]  }
  0x1d   : > { %195 = vst [vmem:[%s1637_s10 + $0x30] sm:$0xff] %v194_v6   ;;  %v226_v14 = vld [vmem:[%s1632_s9 + $0xe0] sm:$0xff]   ;;  %v230_v15 = vld [vmem:[%s1632_s9 + $0xe8] sm:$0xff]  }
  0x1e   : > { %199 = vst [vmem:[%s1637_s10 + $0x38] sm:$0xff] %v198_v7   ;;  %v234_v16 = vld [vmem:[%s1632_s9 + $0x100] sm:$0xff]   ;;  %v238_v17 = vld [vmem:[%s1632_s9 + $0x108] sm:$0xff]  }
  0x1f   : > { %203 = vst [vmem:[%s1637_s10 + $0x40] sm:$0xff] %v202_v8  }
  0x20   : > { %207 = vst [vmem:[%s1637_s10 + $0x48] sm:$0xff] %v206_v9  }
  0x21   : > { %211 = vst [vmem:[%s1637_s10 + $0x50] sm:$0xff] %v210_v10  }
  0x22   : > { %215 = vst [vmem:[%s1637_s10 + $0x58] sm:$0xff] %v214_v11  }
  0x23   : > { %219 = vst [vmem:[%s1637_s10 + $0x60] sm:$0xff] %v218_v12  }
  0x24   : > { %223 = vst [vmem:[%s1637_s10 + $0x68] sm:$0xff] %v222_v13  }
  0x25   : > { %227 = vst [vmem:[%s1637_s10 + $0x70] sm:$0xff] %v226_v14  }
  0x26   : > { %231 = vst [vmem:[%s1637_s10 + $0x78] sm:$0xff] %v230_v15  }
  0x27   : > { %235 = vst [vmem:[%s1637_s10 + $0x80] sm:$0xff] %v234_v16  }
  0x28   : > { %239 = vst [vmem:[%s1637_s10 + $0x88] sm:$0xff] %v238_v17  }
  0x29 PF: > { %340 = sbr.rel (%p1610_p7) target bundleno = 250 (0xfa), region = 69 }
  0x2e   : > { %s343_s11 = sand.u32 1, %s1538_s12  }
  0x2f   : > { %s1404_s17 = smul.u32 144, %s343_s11 }
  0x31   : > { %s1675_s18 = scalar_lea.vmem [#allocation2], %s1404_s17 }
  0x32   : > { %1529 = dma.done.wait (%p1606_p6), [#allocation4], 128  }
  0x33   : > { %1531 = vsyncadd (%p1606_p6), [#allocation4], 4294967168 }
  0x34   : > { %1533 = dma.done.wait (%p1606_p6), [#allocation6], 16  }
  0x35   : > { %1535 = vsyncadd (%p1606_p6), [#allocation6], 4294967280 }
  0x36   : > { %359 = sfence }
  0x37   : > { %s420_s20 = sld [smem:[#allocation3]]  ;;  %v1686_v18 = vld [vmem:[%s1675_s18] sm:$0xf]  ;;  %v1689_v19 = vld [vmem:[%s1675_s18 + $0x4] sm:$0xf]  ;;  %vm1220_vm0 = vcmask 27648  }
  0x38   : > { %s426_s12 = sld [smem:[#allocation5]]  ;;  %v1694_v20 = vld [vmem:[%s1675_s18 + $0x8] sm:$0xf]  ;;  %v1697_v21 = vld [vmem:[%s1675_s18 + $0xc] sm:$0xf] }
  0x39   : > { %s1322_s22 = sld [smem:[#allocation3 + $0x1]]  ;;  %v1704_v22 = vld [vmem:[%s1675_s18 + $0x10] sm:$0xf]  ;;  %v1707_v23 = vld [vmem:[%s1675_s18 + $0x14] sm:$0xf] }
  0x3a   : > { %s1691_s23 = sld [smem:[#allocation3 + $0x2]]  ;;  %2678 = vst [vmem:[#allocation9_spill] sm:$0xff] %v1707_v23  ;;  %v1710_v25 = vld [vmem:[%s1675_s18 + $0x18] sm:$0xf]  ;;  %v1713_v26 = vld [vmem:[%s1675_s18 + $0x1c] sm:$0xf] }
  0x3b   : > { %s1699_s21 = sld [smem:[#allocation3 + $0x3]]  ;;  %2679 = vst [vmem:[#allocation10_spill] sm:$0xff] %v1713_v26  ;;  %v1722_v31 = vld [vmem:[%s1675_s18 + $0x20] sm:$0xf]  ;;  %v1725_v32 = vld [vmem:[%s1675_s18 + $0x24] sm:$0xf] }
  0x3c   : > { %s1701_s24 = sld [smem:[#allocation3 + $0x4]]  ;;  %2680 = vst [vmem:[#allocation11_spill] sm:$0xff] %v1722_v31  ;;  %v1728_v33 = vld [vmem:[%s1675_s18 + $0x28] sm:$0xf]  ;;  %v1733_v36 = vld [vmem:[%s1675_s18 + $0x2c] sm:$0xf] }
  0x3d   : > { %v421_v24 = vstv %s420_s20  ;;  %s1719_s25 = sld [smem:[#allocation3 + $0x5]]  ;;  %2681 = vst [vmem:[#allocation12_spill] sm:$0xff] %v1725_v32  ;;  %v1736_v37 = vld [vmem:[%s1675_s18 + $0x30] sm:$0xf]  ;;  %v1741_v42 = vld [vmem:[%s1675_s18 + $0x34] sm:$0xf] }
  0x3e   : > { %v422_v27 = vmul.f32 %v421_v24, %v1686_v18  ;;  %v423_v28 = vmul.f32 %v421_v24, %v1689_v19  ;;  %v424_v29 = vmul.f32 %v421_v24, %v1694_v20  ;;  %v425_v30 = vmul.f32 %v421_v24, %v1697_v21  ;;  %2682 = vst [vmem:[#allocation13_spill] sm:$0xff] %v1728_v33  ;;  %s1730_s26 = sld [smem:[#allocation3 + $0x6]]  ;;  %v1744_v43 = vld [vmem:[%s1675_s18 + $0x38] sm:$0xf]  ;;  %v1753_v48 = vld [vmem:[%s1675_s18 + $0x3c] sm:$0xf] }
  0x3f   : > { %v427_v34 = vstv %s426_s12  ;;  %v433_v35 = vstv %s1322_s22  ;;  %2683 = vst [vmem:[#allocation14_spill] sm:$0xff] %v1733_v36  ;;  %s1738_s27 = sld [smem:[#allocation3 + $0x7]]  ;;  %v1759_v52 = vld [vmem:[%s1675_s18 + $0x40] sm:$0xf]  ;;  %v1762_v57 = vld [vmem:[%s1675_s18 + $0x44] sm:$0xf] }
  0x40   : > { %2684 = vst [vmem:[#allocation15_spill] sm:$0xff] %v1736_v37  ;;  %v428_v38 = vadd.f32 %v427_v34, %v422_v27  ;;  %v429_v39 = vadd.f32 %v427_v34, %v423_v28  ;;  %v430_v40 = vadd.f32 %v427_v34, %v424_v29  ;;  %v431_v41 = vadd.f32 %v427_v34, %v425_v30  ;;  %s1750_s28 = sld [smem:[#allocation3 + $0x8]]  ;;  %v1765_v58 = vld [vmem:[%s1675_s18 + $0x48] sm:$0xf]  ;;  %v1768_v59 = vld [vmem:[%s1675_s18 + $0x4c] sm:$0xf] }
  0x41   : > { %2685 = vst [vmem:[#allocation16_spill] sm:$0xff] %v1741_v42  ;;  %v434_v44 = vmul.f32 %v433_v35, %v1704_v22  ;;  %v435_v45 = vmul.f32 %v433_v35, %v1707_v23  ;;  %v436_v46 = vmul.f32 %v433_v35, %v1710_v25  ;;  %v437_v47 = vmul.f32 %v433_v35, %v1713_v26  ;;  %v1779_v4 = vld [vmem:[%s1675_s18 + $0x50] sm:$0xf]  ;;  %v1782_v5 = vld [vmem:[%s1675_s18 + $0x54] sm:$0xf]  ;;  %s1806_s29 = sld [smem:[#allocation3 + $0x80]] }
  0x42   : > { %2686 = vst [vmem:[#allocation17_spill] sm:$0xff] %v1744_v43  ;;  %v443_v49 = vstv %s1691_s23  ;;  %v453_v50 = vstv %s1699_s21  ;;  %v463_v51 = vstv %s1701_s24  ;;  %v1785_v6 = vld [vmem:[%s1675_s18 + $0x58] sm:$0xf]  ;;  %s1812_s30 = sld [smem:[#allocation5 + $0x1]] }
  0x43   : > { %2687 = vst [vmem:[#allocation18_spill] sm:$0xff] %v1753_v48  ;;  %v438_v53 = vadd.f32 %v434_v44, %v428_v38  ;;  %v439_v54 = vadd.f32 %v435_v45, %v429_v39  ;;  %v440_v55 = vadd.f32 %v436_v46, %v430_v40  ;;  %v441_v56 = vadd.f32 %v437_v47, %v431_v41  ;;  %v1788_v11 = vld [vmem:[%s1675_s18 + $0x5c] sm:$0xf]  ;;  %v1791_v12 = vld [vmem:[%s1675_s18 + $0x60] sm:$0xf]  ;;  %s1820_s4 = sld [smem:[#allocation3 + $0x81]] }
  0x44   : > { %2688 = vst [vmem:[#allocation19_spill] sm:$0xff] %v1759_v52  ;;  %v444_v60 = vmul.f32 %v443_v49, %v1722_v31  ;;  %v445_v61 = vmul.f32 %v443_v49, %v1725_v32  ;;  %v446_v62 = vmul.f32 %v443_v49, %v1728_v33  ;;  %v447_v63 = vmul.f32 %v443_v49, %v1733_v36  ;;  %v1794_v13 = vld [vmem:[%s1675_s18 + $0x64] sm:$0xf]  ;;  %v1801_v24 = vld [vmem:[%s1675_s18 + $0x68] sm:$0xf]  ;;  %s1832_s5 = sld [smem:[#allocation3 + $0x82]] }
  0x45   : > { %2689 = vst [vmem:[#allocation20_spill] sm:$0xff] %v1762_v57  ;;  %v454_v0 = vmul.f32 %v453_v50, %v1736_v37  ;;  %v455_v1 = vmul.f32 %v453_v50, %v1741_v42  ;;  %v456_v2 = vmul.f32 %v453_v50, %v1744_v43  ;;  %v457_v3 = vmul.f32 %v453_v50, %v1753_v48  ;;  %v1804_v27 = vld [vmem:[%s1675_s18 + $0x6c] sm:$0xf]  ;;  %v1815_v41 = vld [vmem:[%s1675_s18 + $0x70] sm:$0xf]  ;;  %s1854_s6 = sld [smem:[#allocation3 + $0x83]] }
  0x46   : > { %2690 = vst [vmem:[#allocation21_spill] sm:$0xff] %v1765_v58  ;;  %v448_v7 = vadd.f32 %v444_v60, %v438_v53  ;;  %v449_v8 = vadd.f32 %v445_v61, %v439_v54  ;;  %v450_v9 = vadd.f32 %v446_v62, %v440_v55  ;;  %v451_v10 = vadd.f32 %v447_v63, %v441_v56  ;;  %v1818_v44 = vld [vmem:[%s1675_s18 + $0x74] sm:$0xf]  ;;  %v1823_v50 = vld [vmem:[%s1675_s18 + $0x78] sm:$0xf]  ;;  %s1860_s7 = sld [smem:[#allocation3 + $0x84]] }
  0x47   : > { %v464_v14 = vmul.f32 %v463_v51, %v1759_v52  ;;  %v465_v15 = vmul.f32 %v463_v51, %v1762_v57  ;;  %v466_v16 = vmul.f32 %v463_v51, %v1765_v58  ;;  %v467_v17 = vmul.f32 %v463_v51, %v1768_v59  ;;  %v1826_v51 = vld [vmem:[%s1675_s18 + $0x7c] sm:$0xf]  ;;  %v1835_v60 = vld [vmem:[%s1675_s18 + $0x80] sm:$0xf]  ;;  %s1862_s8 = sld [smem:[#allocation3 + $0x85]] }
  0x48   : > { %v458_v28 = vadd.f32 %v454_v0, %v448_v7  ;;  %v459_v29 = vadd.f32 %v455_v1, %v449_v8  ;;  %v460_v30 = vadd.f32 %v456_v2, %v450_v9  ;;  %v461_v34 = vadd.f32 %v457_v3, %v451_v10  ;;  %v1842_v1 = vld [vmem:[%s1675_s18 + $0x84] sm:$0xf]  ;;  %v1845_v2 = vld [vmem:[%s1675_s18 + $0x88] sm:$0xf]  ;;  %v1848_v3 = vld [vmem:[%s1675_s18 + $0x8c] sm:$0xf] }
  0x49   : > { %v473_v35 = vstv %s1719_s25  ;;  %v483_v38 = vstv %s1730_s26  ;;  %v493_v39 = vstv %s1738_s27  ;;  %v503_v40 = vstv %s1750_s28  ;;  %s1865_s9 = sld [smem:[#allocation3 + $0x86]] }
  0x4a   : > { %v468_v45 = vadd.f32 %v464_v14, %v458_v28  ;;  %v469_v46 = vadd.f32 %v465_v15, %v459_v29  ;;  %v470_v47 = vadd.f32 %v466_v16, %v460_v30  ;;  %v471_v49 = vadd.f32 %v467_v17, %v461_v34  ;;  %s1890_s10 = sld [smem:[#allocation3 + $0x87]] }
  0x4b   : > { %v474_v53 = vmul.f32 %v473_v35, %v1779_v4  ;;  %v475_v54 = vmul.f32 %v473_v35, %v1782_v5  ;;  %v476_v55 = vmul.f32 %v473_v35, %v1785_v6  ;;  %v477_v56 = vmul.f32 %v473_v35, %v1788_v11  ;;  %s1892_s11 = sld [smem:[#allocation3 + $0x88]] }
  0x4c   : > { %v484_v61 = vmul.f32 %v483_v38, %v1791_v12  ;;  %v485_v62 = vmul.f32 %v483_v38, %v1794_v13  ;;  %v486_v63 = vmul.f32 %v483_v38, %v1801_v24  ;;  %v487_v0 = vmul.f32 %v483_v38, %v1804_v27  ;;  %s1898_s17 = sld [smem:[#allocation3 + $0x100]] }
  0x4d   : > { %v478_v7 = vadd.f32 %v474_v53, %v468_v45  ;;  %v479_v8 = vadd.f32 %v475_v54, %v469_v46  ;;  %v480_v9 = vadd.f32 %v476_v55, %v470_v47  ;;  %v481_v10 = vadd.f32 %v477_v56, %v471_v49  ;;  %s1900_s20 = sld [smem:[#allocation5 + $0x2]] }
  0x4e   : > { %v494_v14 = vmul.f32 %v493_v39, %v1815_v41  ;;  %v495_v15 = vmul.f32 %v493_v39, %v1818_v44  ;;  %v496_v16 = vmul.f32 %v493_v39, %v1823_v50  ;;  %v497_v17 = vmul.f32 %v493_v39, %v1826_v51  ;;  %s1918_s12 = sld [smem:[#allocation3 + $0x101]] }
  0x4f   : > { %v488_v28 = vadd.f32 %v484_v61, %v478_v7  ;;  %v489_v29 = vadd.f32 %v485_v62, %v479_v8  ;;  %v490_v30 = vadd.f32 %v486_v63, %v480_v9  ;;  %v491_v34 = vadd.f32 %v487_v0, %v481_v10  ;;  %s1924_s22 = sld [smem:[#allocation3 + $0x102]] }
  0x50   : > { %v504_v35 = vmul.f32 %v503_v40, %v1835_v60  ;;  %v505_v38 = vmul.f32 %v503_v40, %v1842_v1  ;;  %v506_v45 = vmul.f32 %v503_v40, %v1845_v2  ;;  %v507_v46 = vmul.f32 %v503_v40, %v1848_v3  ;;  %s1926_s23 = sld [smem:[#allocation3 + $0x103]] }
  0x51   : > { %v498_v39 = vadd.f32 %v494_v14, %v488_v28  ;;  %v499_v47 = vadd.f32 %v495_v15, %v489_v29  ;;  %v500_v49 = vadd.f32 %v496_v16, %v490_v30  ;;  %v501_v53 = vadd.f32 %v497_v17, %v491_v34  ;;  %s1932_s21 = sld [smem:[#allocation3 + $0x104]] }
  0x52   : > { %v517_v54 = vstv %s1806_s29  ;;  %v523_v55 = vstv %s1812_s30  ;;  %v529_v56 = vstv %s1820_s4  ;;  %v539_v61 = vstv %s1832_s5  ;;  %s1954_s24 = sld [smem:[#allocation3 + $0x105]] }
  0x53   : > { %v518_v62 = vmul.f32 %v517_v54, %v1686_v18  ;;  %v519_v63 = vmul.f32 %v517_v54, %v1689_v19  ;;  %v520_v40 = vmul.f32 %v517_v54, %v1694_v20  ;;  %v521_v0 = vmul.f32 %v517_v54, %v1697_v21  ;;  %s1956_s25 = sld [smem:[#allocation3 + $0x106]] }
  0x54   : > { %v1874_v7 = vadd.f32 %v504_v35, %v498_v39  ;;  %v1876_v8 = vadd.f32 %v505_v38, %v499_v47  ;;  %v1878_v9 = vadd.f32 %v506_v45, %v500_v49  ;;  %v1880_v10 = vadd.f32 %v507_v46, %v501_v53  ;;  %s1962_s26 = sld [smem:[#allocation3 + $0x107]] }
  0x55   : > { %v524_v14 = vadd.f32 %v523_v55, %v518_v62  ;;  %v525_v15 = vadd.f32 %v523_v55, %v519_v63  ;;  %v526_v16 = vadd.f32 %v523_v55, %v520_v40  ;;  %v527_v17 = vadd.f32 %v523_v55, %v521_v0  ;;  %s1968_s27 = sld [smem:[#allocation3 + $0x108]] }
  0x56   : > { %v530_v28 = vmul.f32 %v529_v56, %v1704_v22  ;;  %v531_v29 = vmul.f32 %v529_v56, %v1707_v23  ;;  %v532_v30 = vmul.f32 %v529_v56, %v1710_v25  ;;  %v533_v34 = vmul.f32 %v529_v56, %v1713_v26  ;;  %s1990_s28 = sld [smem:[#allocation3 + $0x180]] }
  0x57   : > { %v540_v35 = vmul.f32 %v539_v61, %v1722_v31  ;;  %v541_v38 = vmul.f32 %v539_v61, %v1725_v32  ;;  %v542_v45 = vmul.f32 %v539_v61, %v1728_v33  ;;  %v543_v46 = vmul.f32 %v539_v61, %v1733_v36  ;;  %s1992_s29 = sld [smem:[#allocation5 + $0x3]] }
  0x58   : > { %v534_v39 = vadd.f32 %v530_v28, %v524_v14  ;;  %v535_v47 = vadd.f32 %v531_v29, %v525_v15  ;;  %v536_v49 = vadd.f32 %v532_v30, %v526_v16  ;;  %v537_v53 = vadd.f32 %v533_v34, %v527_v17  ;;  %s2002_s30 = sld [smem:[#allocation3 + $0x181]] }
  0x59   : > { %v549_v54 = vstv %s1854_s6  ;;  %v559_v55 = vstv %s1860_s7  ;;  %v569_v62 = vstv %s1862_s8  ;;  %v579_v56 = vstv %s1865_s9  ;;  %s2004_s4 = sld [smem:[#allocation3 + $0x182]] }
  0x5a   : > { %v544_v63 = vadd.f32 %v540_v35, %v534_v39  ;;  %v545_v40 = vadd.f32 %v541_v38, %v535_v47  ;;  %v546_v0 = vadd.f32 %v542_v45, %v536_v49  ;;  %v547_v33 = vadd.f32 %v543_v46, %v537_v53  ;;  %s2014_s5 = sld [smem:[#allocation3 + $0x183]] }
  0x5b   : > { %v550_v61 = vmul.f32 %v549_v54, %v1736_v37  ;;  %v551_v14 = vmul.f32 %v549_v54, %v1741_v42  ;;  %v552_v15 = vmul.f32 %v549_v54, %v1744_v43  ;;  %v553_v16 = vmul.f32 %v549_v54, %v1753_v48  ;;  %s2016_s6 = sld [smem:[#allocation3 + $0x184]] }
  0x5c   : > { %v560_v17 = vmul.f32 %v559_v55, %v1759_v52  ;;  %v561_v28 = vmul.f32 %v559_v55, %v1762_v57  ;;  %v562_v29 = vmul.f32 %v559_v55, %v1765_v58  ;;  %v563_v30 = vmul.f32 %v559_v55, %v1768_v59  ;;  %s2032_s7 = sld [smem:[#allocation3 + $0x185]] }
  0x5d   : > { %v554_v34 = vadd.f32 %v550_v61, %v544_v63  ;;  %v555_v35 = vadd.f32 %v551_v14, %v545_v40  ;;  %v556_v38 = vadd.f32 %v552_v15, %v546_v0  ;;  %v557_v45 = vadd.f32 %v553_v16, %v547_v33  ;;  %s2042_s8 = sld [smem:[#allocation3 + $0x186]] }
  0x5e   : > { %v570_v46 = vmul.f32 %v569_v62, %v1779_v4  ;;  %v571_v39 = vmul.f32 %v569_v62, %v1782_v5  ;;  %v572_v47 = vmul.f32 %v569_v62, %v1785_v6  ;;  %v573_v49 = vmul.f32 %v569_v62, %v1788_v11  ;;  %s2074_s9 = sld [smem:[#allocation3 + $0x187]] }
  0x5f   : > { %v564_v53 = vadd.f32 %v560_v17, %v554_v34  ;;  %v565_v54 = vadd.f32 %v561_v28, %v555_v35  ;;  %v566_v58 = vadd.f32 %v562_v29, %v556_v38  ;;  %v567_v55 = vadd.f32 %v563_v30, %v557_v45 }
  0x60   : > { %v580_v63 = vmul.f32 %v579_v56, %v1791_v12  ;;  %v581_v33 = vmul.f32 %v579_v56, %v1794_v13  ;;  %v582_v40 = vmul.f32 %v579_v56, %v1801_v24  ;;  %v583_v0 = vmul.f32 %v579_v56, %v1804_v27 }
  0x61   : > { %v574_v61 = vadd.f32 %v570_v46, %v564_v53  ;;  %v575_v14 = vadd.f32 %v571_v39, %v565_v54  ;;  %v576_v15 = vadd.f32 %v572_v47, %v566_v58  ;;  %v577_v16 = vadd.f32 %v573_v49, %v567_v55 }
  0x62   : > { %v589_v62 = vstv %s1890_s10  ;;  %v599_v17 = vstv %s1892_s11  ;;  %v617_v34 = vstv %s1898_s17  ;;  %v623_v28 = vstv %s1900_s20  ;;  %s2076_s10 = sld [smem:[#allocation3 + $0x188]] }
  0x63   : > { %v584_v29 = vadd.f32 %v580_v63, %v574_v61  ;;  %v585_v30 = vadd.f32 %v581_v33, %v575_v14  ;;  %v586_v35 = vadd.f32 %v582_v40, %v576_v15  ;;  %v587_v38 = vadd.f32 %v583_v0, %v577_v16  ;;  %s2082_s11 = sld [smem:[#allocation3 + $0x200]] }
  0x64   : > { %v590_v56 = vmul.f32 %v589_v62, %v1815_v41  ;;  %v591_v45 = vmul.f32 %v589_v62, %v1818_v44  ;;  %v592_v58 = vmul.f32 %v589_v62, %v1823_v50  ;;  %v593_v46 = vmul.f32 %v589_v62, %v1826_v51  ;;  %s2084_s17 = sld [smem:[#allocation5 + $0x4]] }
  0x65   : > { %v600_v39 = vmul.f32 %v599_v17, %v1835_v60  ;;  %v601_v47 = vmul.f32 %v599_v17, %v1842_v1  ;;  %v602_v49 = vmul.f32 %v599_v17, %v1845_v2  ;;  %v603_v53 = vmul.f32 %v599_v17, %v1848_v3  ;;  %s2102_s20 = sld [smem:[#allocation3 + $0x201]] }
  0x66   : > { %v594_v54 = vadd.f32 %v590_v56, %v584_v29  ;;  %v595_v55 = vadd.f32 %v591_v45, %v585_v30  ;;  %v596_v63 = vadd.f32 %v592_v58, %v586_v35  ;;  %v597_v33 = vadd.f32 %v593_v46, %v587_v38 }
  0x67   : > { %v618_v40 = vmul.f32 %v617_v34, %v1686_v18  ;;  %v619_v0 = vmul.f32 %v617_v34, %v1689_v19  ;;  %v620_v61 = vmul.f32 %v617_v34, %v1694_v20  ;;  %v621_v14 = vmul.f32 %v617_v34, %v1697_v21  ;;  %v2691_v34 = vld [vmem:[#allocation13_spill] sm:$0xff] }
  0x68   : > { %v1942_v15 = vadd.f32 %v600_v39, %v594_v54  ;;  %v1944_v16 = vadd.f32 %v601_v47, %v595_v55  ;;  %v1946_v62 = vadd.f32 %v602_v49, %v596_v63  ;;  %v1948_v17 = vadd.f32 %v603_v53, %v597_v33 }
  0x69   : > { %v624_v38 = vadd.f32 %v623_v28, %v618_v40  ;;  %v625_v56 = vadd.f32 %v623_v28, %v619_v0  ;;  %v626_v45 = vadd.f32 %v623_v28, %v620_v61  ;;  %v627_v58 = vadd.f32 %v623_v28, %v621_v14 }
  0x6a   : > { %v629_v47 = vstv %s1918_s12  ;;  %v639_v49 = vstv %s1924_s22  ;;  %v649_v55 = vstv %s1926_s23  ;;  %v659_v63 = vstv %s1932_s21  ;;  %s2108_s12 = sld [smem:[#allocation3 + $0x202]] }
  0x6b   : > { %v630_v28 = vmul.f32 %v629_v47, %v1704_v22  ;;  %v631_v33 = vmul.f32 %v629_v47, %v1707_v23  ;;  %v632_v40 = vmul.f32 %v629_v47, %v1710_v25  ;;  %v633_v0 = vmul.f32 %v629_v47, %v1713_v26  ;;  %s2110_s22 = sld [smem:[#allocation3 + $0x203]] }
  0x6c   : > { %v640_v61 = vmul.f32 %v639_v49, %v1722_v31  ;;  %v641_v14 = vmul.f32 %v639_v49, %v1725_v32  ;;  %v642_v53 = vmul.f32 %v639_v49, %v2691_v34  ;;  %v643_v54 = vmul.f32 %v639_v49, %v1733_v36  ;;  %s2116_s23 = sld [smem:[#allocation3 + $0x204]] }
  0x6d   : > { %v634_v35 = vadd.f32 %v630_v28, %v624_v38  ;;  %v635_v39 = vadd.f32 %v631_v33, %v625_v56  ;;  %v636_v30 = vadd.f32 %v632_v40, %v626_v45  ;;  %v637_v46 = vadd.f32 %v633_v0, %v627_v58  ;;  %v2692_v45 = vld [vmem:[#allocation21_spill] sm:$0xff]  ;;  %s2154_s21 = sld [smem:[#allocation3 + $0x205]] }
  0x6e   : > { %v650_v29 = vmul.f32 %v649_v55, %v1736_v37  ;;  %v651_v23 = vmul.f32 %v649_v55, %v1741_v42  ;;  %v652_v47 = vmul.f32 %v649_v55, %v1744_v43  ;;  %v653_v31 = vmul.f32 %v649_v55, %v1753_v48 }
  0x6f   : > { %v644_v32 = vadd.f32 %v640_v61, %v634_v35  ;;  %v645_v34 = vadd.f32 %v641_v14, %v635_v39  ;;  %v646_v26 = vadd.f32 %v642_v53, %v636_v30  ;;  %v647_v49 = vadd.f32 %v643_v54, %v637_v46 }
  0x70   : > { %v660_v38 = vmul.f32 %v659_v63, %v1759_v52  ;;  %v661_v56 = vmul.f32 %v659_v63, %v1762_v57  ;;  %v662_v58 = vmul.f32 %v659_v63, %v2692_v45  ;;  %v663_v28 = vmul.f32 %v659_v63, %v1768_v59 }
  0x71   : > { %v654_v33 = vadd.f32 %v650_v29, %v644_v32  ;;  %v655_v40 = vadd.f32 %v651_v23, %v645_v34  ;;  %v656_v0 = vadd.f32 %v652_v47, %v646_v26  ;;  %v657_v43 = vadd.f32 %v653_v31, %v647_v49 }
  0x72   : > { %v669_v42 = vstv %s1954_s24  ;;  %v679_v37 = vstv %s1956_s25  ;;  %v689_v55 = vstv %s1962_s26  ;;  %v699_v48 = vstv %s1968_s27  ;;  %s2156_s24 = sld [smem:[#allocation3 + $0x206]] }
  0x73   : > { %v664_v30 = vadd.f32 %v660_v38, %v654_v33  ;;  %v665_v35 = vadd.f32 %v661_v56, %v655_v40  ;;  %v666_v46 = vadd.f32 %v662_v58, %v656_v0  ;;  %v667_v39 = vadd.f32 %v663_v28, %v657_v43  ;;  %s2162_s25 = sld [smem:[#allocation3 + $0x207]] }
  0x74   : > { %v670_v53 = vmul.f32 %v669_v42, %v1779_v4  ;;  %v671_v54 = vmul.f32 %v669_v42, %v1782_v5  ;;  %v672_v23 = vmul.f32 %v669_v42, %v1785_v6  ;;  %v673_v26 = vmul.f32 %v669_v42, %v1788_v11  ;;  %s2168_s26 = sld [smem:[#allocation3 + $0x208]] }
  0x75   : > { %v680_v31 = vmul.f32 %v679_v37, %v1791_v12  ;;  %v681_v32 = vmul.f32 %v679_v37, %v1794_v13  ;;  %v682_v29 = vmul.f32 %v679_v37, %v1801_v24  ;;  %v683_v34 = vmul.f32 %v679_v37, %v1804_v27  ;;  %s2190_s27 = sld [smem:[#allocation3 + $0x280]] }
  0x76   : > { %v674_v43 = vadd.f32 %v670_v53, %v664_v30  ;;  %v675_v63 = vadd.f32 %v671_v54, %v665_v35  ;;  %v676_v61 = vadd.f32 %v672_v23, %v666_v46  ;;  %v677_v14 = vadd.f32 %v673_v26, %v667_v39 }
  0x77   : > { %v690_v47 = vmul.f32 %v689_v55, %v1815_v41  ;;  %v691_v42 = vmul.f32 %v689_v55, %v1818_v44  ;;  %v692_v49 = vmul.f32 %v689_v55, %v1823_v50  ;;  %v693_v38 = vmul.f32 %v689_v55, %v1826_v51 }
  0x78   : > { %v684_v56 = vadd.f32 %v680_v31, %v674_v43  ;;  %v685_v58 = vadd.f32 %v681_v32, %v675_v63  ;;  %v686_v37 = vadd.f32 %v682_v29, %v676_v61  ;;  %v687_v28 = vadd.f32 %v683_v34, %v677_v14 }
  0x79   : > { %v700_v33 = vmul.f32 %v699_v48, %v1835_v60  ;;  %v701_v40 = vmul.f32 %v699_v48, %v1842_v1  ;;  %v702_v0 = vmul.f32 %v699_v48, %v1845_v2  ;;  %v703_v30 = vmul.f32 %v699_v48, %v1848_v3 }
  0x7a   : > { %v694_v35 = vadd.f32 %v690_v47, %v684_v56  ;;  %v695_v46 = vadd.f32 %v691_v42, %v685_v58  ;;  %v696_v39 = vadd.f32 %v692_v49, %v686_v37  ;;  %v697_v55 = vadd.f32 %v693_v38, %v687_v28 }
  0x7b   : > { %v2693_v53 = vmax.f32 %v1874_v7, 0.0  ;;  %v2694_v54 = vmax.f32 %v1942_v15, 0.0  ;;  %v2695_v26 = vmax.f32 %v1876_v8, 0.0  ;;  %v2696_v31 = vmax.f32 %v1944_v16, 0.0 }
  0x7c   : > { %v717_v32 = vstv %s1990_s28  ;;  %v723_v29 = vstv %s1992_s29  ;;  %v2034_v34 = vadd.f32 %v700_v33, %v694_v35  ;;  %v2036_v43 = vadd.f32 %v701_v40, %v695_v46  ;;  %s2192_s28 = sld [smem:[#allocation5 + $0x5]] }
  0x7d   : > { %v2022_v23 = vadd.f32 %v2694_v54, %v2693_v53  ;;  %v2028_v48 = vadd.f32 %v2696_v31, %v2695_v26  ;;  %v2038_v7 = vadd.f32 %v702_v0, %v696_v39  ;;  %v2040_v15 = vadd.f32 %v703_v30, %v697_v55  ;;  %v2702_v55 = vld [vmem:[#allocation10_spill] sm:$0xff]  ;;  %v2703_v54 = vld [vmem:[#allocation11_spill] sm:$0xff]  ;;  %v2704_v31 = vld [vmem:[#allocation12_spill] sm:$0xff]  ;;  %s2202_s29 = sld [smem:[#allocation3 + $0x281]] }
  0x7e   : > { %v718_v8 = vmul.f32 %v717_v32, %v1686_v18  ;;  %v719_v16 = vmul.f32 %v717_v32, %v1689_v19  ;;  %v720_v63 = vmul.f32 %v717_v32, %v1694_v20  ;;  %v721_v61 = vmul.f32 %v717_v32, %v1697_v21 }
  0x7f   : > { %v2697_v14 = vmax.f32 %v1878_v9, 0.0  ;;  %v2698_v47 = vmax.f32 %v1946_v62, 0.0  ;;  %v2699_v49 = vmax.f32 %v1880_v10, 0.0  ;;  %v2700_v38 = vmax.f32 %v1948_v17, 0.0  ;;  %v2701_v17 = vld [vmem:[#allocation9_spill] sm:$0xff] }
  0x80   : > { %v729_v58 = vstv %s2002_s30  ;;  %v739_v37 = vstv %s2004_s4  ;;  %v724_v28 = vadd.f32 %v723_v29, %v718_v8  ;;  %v725_v33 = vadd.f32 %v723_v29, %v719_v16  ;;  %s2204_s30 = sld [smem:[#allocation3 + $0x282]] }
  0x81   : > { %v2052_v42 = vadd.f32 %v2698_v47, %v2697_v14  ;;  %v2058_v56 = vadd.f32 %v2700_v38, %v2699_v49  ;;  %v726_v40 = vadd.f32 %v723_v29, %v720_v63  ;;  %v727_v0 = vadd.f32 %v723_v29, %v721_v61  ;;  %v2705_v29 = vld [vmem:[#allocation13_spill] sm:$0xff]  ;;  %s2214_s4 = sld [smem:[#allocation3 + $0x283]] }
  0x82   : > { %v730_v10 = vmul.f32 %v729_v58, %v1704_v22  ;;  %v731_v46 = vmul.f32 %v729_v58, %v2701_v17  ;;  %v732_v39 = vmul.f32 %v729_v58, %v1710_v25  ;;  %v733_v53 = vmul.f32 %v729_v58, %v2702_v55 }
  0x83   : > { %v740_v26 = vmul.f32 %v739_v37, %v2703_v54  ;;  %v741_v32 = vmul.f32 %v739_v37, %v2704_v31  ;;  %v742_v8 = vmul.f32 %v739_v37, %v2705_v29  ;;  %v743_v16 = vmul.f32 %v739_v37, %v1733_v36  ;;  %v2706_v37 = vld [vmem:[#allocation15_spill] sm:$0xff] }
  0x84   : > { %v734_v63 = vadd.f32 %v730_v10, %v724_v28  ;;  %v735_v61 = vadd.f32 %v731_v46, %v725_v33  ;;  %v736_v14 = vadd.f32 %v732_v39, %v726_v40  ;;  %v737_v47 = vadd.f32 %v733_v53, %v727_v0  ;;  %v2707_v28 = vld [vmem:[#allocation16_spill] sm:$0xff]  ;;  %v2708_v40 = vld [vmem:[#allocation17_spill] sm:$0xff]  ;;  %v2709_v10 = vld [vmem:[#allocation18_spill] sm:$0xff] }
  0x85   : > { %v749_v49 = vstv %s2014_s5  ;;  %v759_v38 = vstv %s2016_s6  ;;  %v769_v35 = vstv %s2032_s7  ;;  %v779_v58 = vstv %s2042_s8  ;;  %s2216_s5 = sld [smem:[#allocation3 + $0x284]] }
  0x86   : > { %v744_v62 = vadd.f32 %v740_v26, %v734_v63  ;;  %v745_v9 = vadd.f32 %v741_v32, %v735_v61  ;;  %v746_v30 = vadd.f32 %v742_v8, %v736_v14  ;;  %v747_v29 = vadd.f32 %v743_v16, %v737_v47  ;;  %s2230_s6 = sld [smem:[#allocation3 + $0x285]] }
  0x87   : > { %v750_v36 = vmul.f32 %v749_v49, %v2706_v37  ;;  %v751_v33 = vmul.f32 %v749_v49, %v2707_v28  ;;  %v752_v0 = vmul.f32 %v749_v49, %v2708_v40  ;;  %v753_v46 = vmul.f32 %v749_v49, %v2709_v10  ;;  %s2240_s7 = sld [smem:[#allocation3 + $0x286]] }
  0x88   : > { %v760_v39 = vmul.f32 %v759_v38, %v1759_v52  ;;  %v761_v53 = vmul.f32 %v759_v38, %v1762_v57  ;;  %v762_v31 = vmul.f32 %v759_v38, %v2692_v45  ;;  %v763_v26 = vmul.f32 %v759_v38, %v1768_v59  ;;  %s2306_s8 = sld [smem:[#allocation3 + $0x287]] }
  0x89   : > { %v754_v32 = vadd.f32 %v750_v36, %v744_v62  ;;  %v755_v8 = vadd.f32 %v751_v33, %v745_v9  ;;  %v756_v16 = vadd.f32 %v752_v0, %v746_v30  ;;  %v757_v63 = vadd.f32 %v753_v46, %v747_v29 }
  0x8a   : > { %v770_v61 = vmul.f32 %v769_v35, %v1779_v4  ;;  %v771_v14 = vmul.f32 %v769_v35, %v1782_v5  ;;  %v772_v47 = vmul.f32 %v769_v35, %v1785_v6  ;;  %v773_v49 = vmul.f32 %v769_v35, %v1788_v11 }
  0x8b   : > { %v764_v57 = vadd.f32 %v760_v39, %v754_v32  ;;  %v765_v45 = vadd.f32 %v761_v53, %v755_v8  ;;  %v766_v52 = vadd.f32 %v762_v31, %v756_v16  ;;  %v767_v38 = vadd.f32 %v763_v26, %v757_v63 }
  0x8c   : > { %v780_v36 = vmul.f32 %v779_v58, %v1791_v12  ;;  %v781_v30 = vmul.f32 %v779_v58, %v1794_v13  ;;  %v782_v9 = vmul.f32 %v779_v58, %v1801_v24  ;;  %v783_v62 = vmul.f32 %v779_v58, %v1804_v27 }
  0x8d   : > { %v774_v29 = vadd.f32 %v770_v61, %v764_v57  ;;  %v775_v33 = vadd.f32 %v771_v14, %v765_v45  ;;  %v776_v0 = vadd.f32 %v772_v47, %v766_v52  ;;  %v777_v46 = vadd.f32 %v773_v49, %v767_v38 }
  0x8e   : > { %v789_v35 = vstv %s2074_s9  ;;  %v799_v39 = vstv %s2076_s10  ;;  %v817_v32 = vstv %s2082_s11  ;;  %v823_v53 = vstv %s2084_s17  ;;  %s2308_s9 = sld [smem:[#allocation3 + $0x288]] }
  0x8f   : > { %v784_v31 = vadd.f32 %v780_v36, %v774_v29  ;;  %v785_v26 = vadd.f32 %v781_v30, %v775_v33  ;;  %v786_v8 = vadd.f32 %v782_v9, %v776_v0  ;;  %v787_v16 = vadd.f32 %v783_v62, %v777_v46  ;;  %s2314_s10 = sld [smem:[#allocation3 + $0x300]] }
  0x90   : > { %v790_v58 = vmul.f32 %v789_v35, %v1815_v41  ;;  %v791_v57 = vmul.f32 %v789_v35, %v1818_v44  ;;  %v792_v52 = vmul.f32 %v789_v35, %v1823_v50  ;;  %v793_v45 = vmul.f32 %v789_v35, %v1826_v51  ;;  %s2316_s11 = sld [smem:[#allocation5 + $0x6]] }
  0x91   : > { %v800_v63 = vmul.f32 %v799_v39, %v1835_v60  ;;  %v801_v61 = vmul.f32 %v799_v39, %v1842_v1  ;;  %v802_v14 = vmul.f32 %v799_v39, %v1845_v2  ;;  %v803_v47 = vmul.f32 %v799_v39, %v1848_v3  ;;  %s2382_s17 = sld [smem:[#allocation3 + $0x301]] }
  0x92   : > { %v794_v49 = vadd.f32 %v790_v58, %v784_v31  ;;  %v795_v38 = vadd.f32 %v791_v57, %v785_v26  ;;  %v796_v36 = vadd.f32 %v792_v52, %v786_v8  ;;  %v797_v30 = vadd.f32 %v793_v45, %v787_v16 }
  0x93   : > { %v818_v9 = vmul.f32 %v817_v32, %v1686_v18  ;;  %v819_v62 = vmul.f32 %v817_v32, %v1689_v19  ;;  %v820_v29 = vmul.f32 %v817_v32, %v1694_v20  ;;  %v821_v33 = vmul.f32 %v817_v32, %v1697_v21 }
  0x94   : > { %v2126_v0 = vadd.f32 %v800_v63, %v794_v49  ;;  %v2128_v46 = vadd.f32 %v801_v61, %v795_v38  ;;  %v2130_v35 = vadd.f32 %v802_v14, %v796_v36  ;;  %v2132_v39 = vadd.f32 %v803_v47, %v797_v30  ;;  %v2714_v47 = vld [vmem:[#allocation12_spill] sm:$0xff]  ;;  %v2715_v38 = vld [vmem:[#allocation13_spill] sm:$0xff]  ;;  %v2716_v30 = vld [vmem:[#allocation14_spill] sm:$0xff] }
  0x95   : > { %v2710_v31 = vmax.f32 %v2034_v34, 0.0  ;;  %v2711_v19 = vmax.f32 %v2036_v43, 0.0  ;;  %v2712_v21 = vmax.f32 %v2038_v7, 0.0  ;;  %v2713_v26 = vmax.f32 %v2040_v15, 0.0 }
  0x96   : > { %v825_v34 = vadd.f32 %v823_v53, %v819_v62  ;;  %v826_v16 = vadd.f32 %v823_v53, %v820_v29  ;;  %v827_v43 = vadd.f32 %v823_v53, %v821_v33  ;;  %v809_v7 = vmax.f32 %v2128_v46, 0.0  ;;  %v2243_v46 = vld [vmem:[%s1675_s18] sm:$0xf] }
  0x97   : > { %v2137_v18 = vadd.f32 %v2710_v31, %v2022_v23  ;;  %v2142_v20 = vadd.f32 %v2711_v19, %v2028_v48  ;;  %v2147_v32 = vadd.f32 %v2712_v21, %v2052_v42  ;;  %v2152_v8 = vadd.f32 %v2713_v26, %v2058_v56 }
  0x98   : > { %v824_v23 = vadd.f32 %v823_v53, %v818_v9  ;;  %v808_v48 = vmax.f32 %v2126_v0, 0.0  ;;  %v829_v42 = vstv %s2102_s20  ;;  %v839_v58 = vstv %s2108_s12  ;;  %s2388_s20 = sld [smem:[#allocation3 + $0x302]] }
  0x99   : > { %v810_v15 = vmax.f32 %v2130_v35, 0.0  ;;  %v811_v56 = vmax.f32 %v2132_v39, 0.0  ;;  %v849_v57 = vstv %s2110_s22  ;;  %v859_v52 = vstv %s2116_s23  ;;  %s2390_s12 = sld [smem:[#allocation3 + $0x303]] }
  0x9a   : > { %v830_v53 = vmul.f32 %v829_v42, %v1704_v22  ;;  %v831_v45 = vmul.f32 %v829_v42, %v2701_v17  ;;  %v832_v63 = vmul.f32 %v829_v42, %v1710_v25  ;;  %v833_v61 = vmul.f32 %v829_v42, %v2702_v55  ;;  %v2719_v42 = vld [vmem:[#allocation21_spill] sm:$0xff]  ;;  %s2408_s22 = sld [smem:[#allocation3 + $0x304]] }
  0x9b   : > { %v840_v14 = vmul.f32 %v839_v58, %v2703_v54  ;;  %v841_v49 = vmul.f32 %v839_v58, %v2714_v47  ;;  %v842_v36 = vmul.f32 %v839_v58, %v2715_v38  ;;  %v843_v9 = vmul.f32 %v839_v58, %v2716_v30  ;;  %s2460_s23 = sld [smem:[#allocation3 + $0x306]] }
  0x9c   : > { %v834_v62 = vadd.f32 %v830_v53, %v824_v23  ;;  %v835_v29 = vadd.f32 %v831_v45, %v825_v34  ;;  %v836_v33 = vadd.f32 %v832_v63, %v826_v16  ;;  %v837_v31 = vadd.f32 %v833_v61, %v827_v43  ;;  %v2717_v23 = vld [vmem:[#allocation19_spill] sm:$0xff]  ;;  %v2718_v16 = vld [vmem:[#allocation20_spill] sm:$0xff] }
  0x9d   : > { %v850_v22 = vmul.f32 %v849_v57, %v2706_v37  ;;  %v851_v17 = vmul.f32 %v849_v57, %v2707_v28  ;;  %v852_v25 = vmul.f32 %v849_v57, %v2708_v40  ;;  %v853_v55 = vmul.f32 %v849_v57, %v2709_v10 }
  0x9e   : > { %v844_v54 = vadd.f32 %v840_v14, %v834_v62  ;;  %v845_v19 = vadd.f32 %v841_v49, %v835_v29  ;;  %v846_v21 = vadd.f32 %v842_v36, %v836_v33  ;;  %v847_v26 = vadd.f32 %v843_v9, %v837_v31 }
  0x9f   : > { %v860_v34 = vmul.f32 %v859_v52, %v2717_v23  ;;  %v861_v43 = vmul.f32 %v859_v52, %v2718_v16  ;;  %v862_v37 = vmul.f32 %v859_v52, %v2719_v42  ;;  %v863_v58 = vmul.f32 %v859_v52, %v1768_v59 }
  0xa0   : > { %v854_v28 = vadd.f32 %v850_v22, %v844_v54  ;;  %v855_v53 = vadd.f32 %v851_v17, %v845_v19  ;;  %v856_v45 = vadd.f32 %v852_v25, %v846_v21  ;;  %v857_v40 = vadd.f32 %v853_v55, %v847_v26 }
  0xa1   : > { %v869_v63 = vstv %s2154_s21  ;;  %v879_v61 = vstv %s2156_s24  ;;  %v889_v10 = vstv %s2162_s25  ;;  %v899_v57 = vstv %s2168_s26  ;;  %s2464_s21 = sld [smem:[#allocation3 + $0x307]] }
  0xa2   : > { %v864_v14 = vadd.f32 %v860_v34, %v854_v28  ;;  %v865_v47 = vadd.f32 %v861_v43, %v855_v53  ;;  %v866_v49 = vadd.f32 %v862_v37, %v856_v45  ;;  %v867_v38 = vadd.f32 %v863_v58, %v857_v40  ;;  %v2255_v43 = vld [vmem:[%s1675_s18 + $0xc] sm:$0xf]  ;;  %s2470_s24 = sld [smem:[#allocation3 + $0x308]] }
  0xa3   : > { %v870_v36 = vmul.f32 %v869_v63, %v1779_v4  ;;  %v871_v59 = vmul.f32 %v869_v63, %v1782_v5  ;;  %v872_v52 = vmul.f32 %v869_v63, %v1785_v6  ;;  %v873_v30 = vmul.f32 %v869_v63, %v1788_v11  ;;  %s2492_s25 = sld [smem:[#allocation3 + $0x380]] }
  0xa4   : > { %v880_v9 = vmul.f32 %v879_v61, %v1791_v12  ;;  %v881_v62 = vmul.f32 %v879_v61, %v1794_v13  ;;  %v882_v29 = vmul.f32 %v879_v61, %v1801_v24  ;;  %v883_v33 = vmul.f32 %v879_v61, %v1804_v27  ;;  %s2498_s26 = sld [smem:[#allocation5 + $0x7]] }
  0xa5   : > { %v874_v31 = vadd.f32 %v870_v36, %v864_v14  ;;  %v875_v22 = vadd.f32 %v871_v59, %v865_v47  ;;  %v876_v17 = vadd.f32 %v872_v52, %v866_v49  ;;  %v877_v4 = vadd.f32 %v873_v30, %v867_v38  ;;  %v2283_v14 = vld [vmem:[%s1675_s18 + $0x18] sm:$0xf]  ;;  %v2287_v49 = vld [vmem:[%s1675_s18 + $0x1c] sm:$0xf]  ;;  %v2291_v36 = vld [vmem:[%s1675_s18 + $0x20] sm:$0xf] }
  0xa6   : > { %v890_v5 = vmul.f32 %v889_v10, %v1815_v41  ;;  %v891_v6 = vmul.f32 %v889_v10, %v1818_v44  ;;  %v892_v11 = vmul.f32 %v889_v10, %v1823_v50  ;;  %v893_v12 = vmul.f32 %v889_v10, %v1826_v51  ;;  %v2295_v52 = vld [vmem:[%s1675_s18 + $0x24] sm:$0xf] }
  0xa7   : > { %v884_v13 = vadd.f32 %v880_v9, %v874_v31  ;;  %v885_v24 = vadd.f32 %v881_v62, %v875_v22  ;;  %v886_v27 = vadd.f32 %v882_v29, %v876_v17  ;;  %v887_v25 = vadd.f32 %v883_v33, %v877_v4  ;;  %v2299_v9 = vld [vmem:[%s1675_s18 + $0x28] sm:$0xf]  ;;  %v2303_v29 = vld [vmem:[%s1675_s18 + $0x2c] sm:$0xf] }
  0xa8   : > { %v900_v55 = vmul.f32 %v899_v57, %v1835_v60  ;;  %v901_v54 = vmul.f32 %v899_v57, %v1842_v1  ;;  %v902_v19 = vmul.f32 %v899_v57, %v1845_v2  ;;  %v903_v41 = vmul.f32 %v899_v57, %v1848_v3  ;;  %2720 = vst [vmem:[#allocation9_spill] sm:$0xff] %v2299_v9 }
  0xa9   : > { %v894_v44 = vadd.f32 %v890_v5, %v884_v13  ;;  %v895_v50 = vadd.f32 %v891_v6, %v885_v24  ;;  %v896_v51 = vadd.f32 %v892_v11, %v886_v27  ;;  %v897_v21 = vadd.f32 %v893_v12, %v887_v25 }
  0xaa   : > { %v2221_v60 = vadd.f32 %v808_v48, %v2137_v18  ;;  %v2226_v1 = vadd.f32 %v809_v7, %v2142_v20  ;;  %v917_v2 = vstv %s2190_s27  ;;  %v923_v3 = vstv %s2192_s28  ;;  %v2247_v20 = vld [vmem:[%s1675_s18 + $0x4] sm:$0xf]  ;;  %v2251_v7 = vld [vmem:[%s1675_s18 + $0x8] sm:$0xf]  ;;  %s2504_s27 = sld [smem:[#allocation3 + $0x381]] }
  0xab   : > { %v2232_v26 = vadd.f32 %v900_v55, %v894_v44  ;;  %v2234_v23 = vadd.f32 %v901_v54, %v895_v50  ;;  %v2236_v34 = vadd.f32 %v902_v19, %v896_v51  ;;  %v2238_v0 = vadd.f32 %v903_v41, %v897_v21  ;;  %v2319_v55 = vld [vmem:[%s1675_s18 + $0x30] sm:$0xf]  ;;  %v2323_v19 = vld [vmem:[%s1675_s18 + $0x34] sm:$0xf]  ;;  %v2327_v44 = vld [vmem:[%s1675_s18 + $0x38] sm:$0xf] }
  0xac   : > { %v918_v18 = vmul.f32 %v2243_v46, %v917_v2  ;;  %v919_v48 = vmul.f32 %v2247_v20, %v917_v2  ;;  %v920_v16 = vmul.f32 %v2251_v7, %v917_v2  ;;  %v921_v42 = vmul.f32 %v2255_v43, %v917_v2  ;;  %2721 = vst [vmem:[#allocation10_spill] sm:$0xff] %v2323_v19  ;;  %v2331_v51 = vld [vmem:[%s1675_s18 + $0x3c] sm:$0xf]  ;;  %v2335_v2 = vld [vmem:[%s1675_s18 + $0x40] sm:$0xf]  ;;  %s2506_s28 = sld [smem:[#allocation3 + $0x382]] }
  0xad   : > { %v2261_v37 = vadd.f32 %v810_v15, %v2147_v32  ;;  %v2266_v58 = vadd.f32 %v811_v56, %v2152_v8  ;;  %v929_v28 = vstv %s2202_s29  ;;  %v939_v53 = vstv %s2204_s30  ;;  %v2275_v8 = vld [vmem:[%s1675_s18 + $0x10] sm:$0xf]  ;;  %v2279_v56 = vld [vmem:[%s1675_s18 + $0x14] sm:$0xf]  ;;  %2722 = vst [vmem:[#allocation11_spill] sm:$0xff] %v2327_v44  ;;  %s2516_s29 = sld [smem:[#allocation3 + $0x383]] }
  0xae   : > { %v924_v45 = vadd.f32 %v923_v3, %v918_v18  ;;  %v925_v40 = vadd.f32 %v923_v3, %v919_v48  ;;  %v926_v63 = vadd.f32 %v923_v3, %v920_v16  ;;  %v927_v61 = vadd.f32 %v923_v3, %v921_v42  ;;  %2723 = vst [vmem:[#allocation15_spill] sm:$0xff] %v2331_v51  ;;  %v2339_v18 = vld [vmem:[%s1675_s18 + $0x44] sm:$0xf]  ;;  %v2343_v16 = vld [vmem:[%s1675_s18 + $0x48] sm:$0xf]  ;;  %s2528_s30 = sld [smem:[#allocation3 + $0x384]] }
  0xaf   : > { %v930_v15 = vmul.f32 %v2275_v8, %v929_v28  ;;  %v931_v57 = vmul.f32 %v2279_v56, %v929_v28  ;;  %v932_v47 = vmul.f32 %v2283_v14, %v929_v28  ;;  %v933_v38 = vmul.f32 %v2287_v49, %v929_v28  ;;  %v2347_v28 = vld [vmem:[%s1675_s18 + $0x4c] sm:$0xf] }
  0xb0   : > { %v940_v59 = vmul.f32 %v2291_v36, %v939_v53  ;;  %v941_v30 = vmul.f32 %v2295_v52, %v939_v53  ;;  %v942_v62 = vmul.f32 %v2299_v9, %v939_v53  ;;  %v943_v33 = vmul.f32 %v2303_v29, %v939_v53 }
  0xb1   : > { %v934_v31 = vadd.f32 %v930_v15, %v924_v45  ;;  %v935_v22 = vadd.f32 %v931_v57, %v925_v40  ;;  %v936_v17 = vadd.f32 %v932_v47, %v926_v63  ;;  %v937_v4 = vadd.f32 %v933_v38, %v927_v61  ;;  %v2351_v15 = vld [vmem:[%s1675_s18 + $0x50] sm:$0xf]  ;;  %v2355_v47 = vld [vmem:[%s1675_s18 + $0x54] sm:$0xf] }
  0xb2   : > { %v949_v5 = vstv %s2214_s4  ;;  %v959_v6 = vstv %s2216_s5  ;;  %v969_v11 = vstv %s2230_s6  ;;  %v979_v12 = vstv %s2240_s7  ;;  %s2533_s4 = sld [smem:[#allocation3 + $0x385]] }
  0xb3   : > { %v944_v13 = vadd.f32 %v940_v59, %v934_v31  ;;  %v945_v24 = vadd.f32 %v941_v30, %v935_v22  ;;  %v946_v27 = vadd.f32 %v942_v62, %v936_v17  ;;  %v947_v25 = vadd.f32 %v943_v33, %v937_v4  ;;  %v2359_v59 = vld [vmem:[%s1675_s18 + $0x58] sm:$0xf]  ;;  %v2363_v62 = vld [vmem:[%s1675_s18 + $0x5c] sm:$0xf]  ;;  %s2540_s5 = sld [smem:[#allocation3 + $0x386]] }
  0xb4   : > { %v950_v54 = vmul.f32 %v2319_v55, %v949_v5  ;;  %v951_v41 = vmul.f32 %v2323_v19, %v949_v5  ;;  %v952_v50 = vmul.f32 %v2327_v44, %v949_v5  ;;  %v953_v21 = vmul.f32 %v2331_v51, %v949_v5  ;;  %v2367_v5 = vld [vmem:[%s1675_s18 + $0x60] sm:$0xf]  ;;  %s2572_s6 = sld [smem:[#allocation3 + $0x387]] }
  0xb5   : > { %v960_v3 = vmul.f32 %v2335_v2, %v959_v6  ;;  %v961_v48 = vmul.f32 %v2339_v18, %v959_v6  ;;  %v962_v42 = vmul.f32 %v2343_v16, %v959_v6  ;;  %v963_v53 = vmul.f32 %v2347_v28, %v959_v6  ;;  %s2574_s7 = sld [smem:[#allocation3 + $0x388]] }
  0xb6   : > { %v954_v45 = vadd.f32 %v950_v54, %v944_v13  ;;  %v955_v40 = vadd.f32 %v951_v41, %v945_v24  ;;  %v956_v63 = vadd.f32 %v952_v50, %v946_v27  ;;  %v957_v61 = vadd.f32 %v953_v21, %v947_v25  ;;  %v2371_v13 = vld [vmem:[%s1675_s18 + $0x64] sm:$0xf]  ;;  %v2375_v27 = vld [vmem:[%s1675_s18 + $0x68] sm:$0xf]  ;;  %v2379_v25 = vld [vmem:[%s1675_s18 + $0x6c] sm:$0xf] }
  0xb7   : > { %v970_v57 = vmul.f32 %v2351_v15, %v969_v11  ;;  %v971_v38 = vmul.f32 %v2355_v47, %v969_v11  ;;  %v972_v30 = vmul.f32 %v2359_v59, %v969_v11  ;;  %v973_v33 = vmul.f32 %v2363_v62, %v969_v11 }
  0xb8   : > { %v964_v31 = vadd.f32 %v960_v3, %v954_v45  ;;  %v965_v22 = vadd.f32 %v961_v48, %v955_v40  ;;  %v966_v17 = vadd.f32 %v962_v42, %v956_v63  ;;  %v967_v4 = vadd.f32 %v963_v53, %v957_v61 }
  0xb9   : > { %v980_v6 = vmul.f32 %v2367_v5, %v979_v12  ;;  %v981_v24 = vmul.f32 %v2371_v13, %v979_v12  ;;  %v982_v11 = vmul.f32 %v2375_v27, %v979_v12  ;;  %v983_v54 = vmul.f32 %v2379_v25, %v979_v12 }
  0xba   : > { %v974_v41 = vadd.f32 %v970_v57, %v964_v31  ;;  %v975_v50 = vadd.f32 %v971_v38, %v965_v22  ;;  %v976_v21 = vadd.f32 %v972_v30, %v966_v17  ;;  %v977_v3 = vadd.f32 %v973_v33, %v967_v4  ;;  %v2393_v57 = vld [vmem:[%s1675_s18 + $0x70] sm:$0xf]  ;;  %v2397_v30 = vld [vmem:[%s1675_s18 + $0x74] sm:$0xf]  ;;  %v2401_v31 = vld [vmem:[%s1675_s18 + $0x78] sm:$0xf] }
  0xbb   : > { %v989_v48 = vstv %s2306_s8  ;;  %v999_v42 = vstv %s2308_s9  ;;  %v1017_v53 = vstv %s2314_s10  ;;  %v1023_v45 = vstv %s2316_s11  ;;  %2724 = vst [vmem:[#allocation16_spill] sm:$0xff] %v2401_v31  ;;  %s2590_s8 = sshll.u32 %s1309_s15, 2 }
  0xbc   : > { %v984_v40 = vadd.f32 %v980_v6, %v974_v41  ;;  %v985_v12 = vadd.f32 %v981_v24, %v975_v50  ;;  %v986_v63 = vadd.f32 %v982_v11, %v976_v21  ;;  %v987_v61 = vadd.f32 %v983_v54, %v977_v3  ;;  %v2405_v17 = vld [vmem:[%s1675_s18 + $0x7c] sm:$0xf]  ;;  %v2411_v6 = vld [vmem:[%s1675_s18 + $0x80] sm:$0xf]  ;;  %v2415_v11 = vld [vmem:[%s1675_s18 + $0x84] sm:$0xf] }
  0xbd   : > { %v990_v38 = vmul.f32 %v2393_v57, %v989_v48  ;;  %v991_v33 = vmul.f32 %v2397_v30, %v989_v48  ;;  %v992_v22 = vmul.f32 %v2401_v31, %v989_v48  ;;  %2725 = vst [vmem:[#allocation17_spill] sm:$0xff] %v2405_v17  ;;  %v993_v4 = vmul.f32 %v2405_v17, %v989_v48  ;;  %v2419_v41 = vld [vmem:[%s1675_s18 + $0x88] sm:$0xf]  ;;  %v2423_v21 = vld [vmem:[%s1675_s18 + $0x8c] sm:$0xf]  ;;  %s2454_s18 = sld [smem:[#allocation3 + $0x305]] }
  0xbe   : > { %2726 = vst [vmem:[#allocation18_spill] sm:$0xff] %v2411_v6  ;;  %v1000_v24 = vmul.f32 %v2411_v6, %v999_v42  ;;  %v1001_v54 = vmul.f32 %v2415_v11, %v999_v42  ;;  %v1002_v50 = vmul.f32 %v2419_v41, %v999_v42  ;;  %v1003_v3 = vmul.f32 %v2423_v21, %v999_v42  ;;  %p379_p11 = scmp.lt.s32.totalorder %s2590_s8, 7 }
  0xbf   : > { %2727 = vst [vmem:[#allocation12_spill] sm:$0xff] %v2415_v11  ;;  %v994_v39 = vadd.f32 %v990_v38, %v984_v40  ;;  %v995_v48 = vadd.f32 %v991_v33, %v985_v12  ;;  %v996_v32 = vadd.f32 %v992_v22, %v986_v63  ;;  %v997_v35 = vadd.f32 %v993_v4, %v987_v61 }
  0xc0   : > { %2728 = vst [vmem:[#allocation13_spill] sm:$0xff] %v2419_v41  ;;  %v1018_v10 = vmul.f32 %v2243_v46, %v1017_v53  ;;  %v1019_v6 = vmul.f32 %v2247_v20, %v1017_v53  ;;  %v1020_v17 = vmul.f32 %v2251_v7, %v1017_v53  ;;  %v1021_v11 = vmul.f32 %v2255_v43, %v1017_v53  ;;  %s2748_s8 = smov (!%p379_p11, %s2590_s8), 7 }
  0xc1   : > { %v2430_v31 = vadd.f32 %v1000_v24, %v994_v39  ;;  %v2432_v41 = vadd.f32 %v1001_v54, %v995_v48  ;;  %v2729_v42 = vmax.f32 %v2232_v26, 0.0  ;;  %v2730_v12 = vmax.f32 %v2234_v23, 0.0  ;;  %s1321_s14 = sshll.u32 %s2748_s8, 2 }
  0xc2   : > { %v2731_v61 = vmax.f32 %v2236_v34, 0.0  ;;  %v2732_v39 = vmax.f32 %v2238_v0, 0.0  ;;  %v2458_v26 = vadd.f32 %v1003_v3, %v997_v35  ;;  %v1025_v23 = vadd.f32 %v1023_v45, %v1019_v6  ;;  %s382_s10 = scalar_lea.vmem %s2636_s3, %s1321_s14 }
  0xc3   : > { %v2437_v40 = vadd.f32 %v2729_v42, %v2221_v60  ;;  %v2442_v63 = vadd.f32 %v2730_v12, %v2226_v1  ;;  %v2456_v60 = vadd.f32 %v1002_v50, %v996_v32  ;;  %v1024_v1 = vadd.f32 %v1023_v45, %v1018_v10 }
  0xc4   : > { %v2447_v53 = vadd.f32 %v2731_v61, %v2261_v37  ;;  %v2452_v38 = vadd.f32 %v2732_v39, %v2266_v58  ;;  %v1026_v34 = vadd.f32 %v1023_v45, %v1020_v17  ;;  %v1027_v33 = vadd.f32 %v1023_v45, %v1021_v11 }
  0xc5   : > { %v1029_v37 = vstv %s2382_s17  ;;  %v1039_v22 = vstv %s2388_s20  ;;  %v1049_v4 = vstv %s2390_s12  ;;  %v1059_v24 = vstv %s2408_s22 }
  0xc6   : > { %v1030_v35 = vmul.f32 %v2275_v8, %v1029_v37  ;;  %v1031_v10 = vmul.f32 %v2279_v56, %v1029_v37  ;;  %v1032_v32 = vmul.f32 %v2283_v14, %v1029_v37  ;;  %v1033_v45 = vmul.f32 %v2287_v49, %v1029_v37 }
  0xc7   : > { %v1040_v17 = vmul.f32 %v2291_v36, %v1039_v22  ;;  %v1041_v6 = vmul.f32 %v2295_v52, %v1039_v22  ;;  %v1042_v11 = vmul.f32 %v2299_v9, %v1039_v22  ;;  %v1043_v54 = vmul.f32 %v2303_v29, %v1039_v22 }
  0xc8   : > { %v1034_v50 = vadd.f32 %v1030_v35, %v1024_v1  ;;  %v1035_v3 = vadd.f32 %v1031_v10, %v1025_v23  ;;  %v1036_v48 = vadd.f32 %v1032_v32, %v1026_v34  ;;  %v1037_v42 = vadd.f32 %v1033_v45, %v1027_v33 }
  0xc9   : > { %v1050_v12 = vmul.f32 %v2319_v55, %v1049_v4  ;;  %v1051_v61 = vmul.f32 %v2323_v19, %v1049_v4  ;;  %v1052_v39 = vmul.f32 %v2327_v44, %v1049_v4  ;;  %v1053_v37 = vmul.f32 %v2331_v51, %v1049_v4 }
  0xca   : > { %v1044_v58 = vadd.f32 %v1040_v17, %v1034_v50  ;;  %v1045_v0 = vadd.f32 %v1041_v6, %v1035_v3  ;;  %v1046_v9 = vadd.f32 %v1042_v11, %v1036_v48  ;;  %v1047_v22 = vadd.f32 %v1043_v54, %v1037_v42 }
  0xcb   : > { %v1060_v1 = vmul.f32 %v2335_v2, %v1059_v24  ;;  %v1061_v23 = vmul.f32 %v2339_v18, %v1059_v24  ;;  %v1062_v34 = vmul.f32 %v2343_v16, %v1059_v24  ;;  %v1063_v33 = vmul.f32 %v2347_v28, %v1059_v24 }
  0xcc   : > { %v1054_v35 = vadd.f32 %v1050_v12, %v1044_v58  ;;  %v1055_v10 = vadd.f32 %v1051_v61, %v1045_v0  ;;  %v1056_v32 = vadd.f32 %v1052_v39, %v1046_v9  ;;  %v1057_v45 = vadd.f32 %v1053_v37, %v1047_v22 }
  0xcd   : > { %v1069_v44 = vstv %s2454_s18  ;;  %v1079_v19 = vstv %s2460_s23  ;;  %v1089_v4 = vstv %s2464_s21  ;;  %v1099_v51 = vstv %s2470_s24 }
  0xce   : > { %v1064_v17 = vadd.f32 %v1060_v1, %v1054_v35  ;;  %v1065_v6 = vadd.f32 %v1061_v23, %v1055_v10  ;;  %v1066_v11 = vadd.f32 %v1062_v34, %v1056_v32  ;;  %v1067_v54 = vadd.f32 %v1063_v33, %v1057_v45  ;;  %v2733_v1 = vld [vmem:[#allocation16_spill] sm:$0xff]  ;;  %v2734_v34 = vld [vmem:[#allocation17_spill] sm:$0xff] }
  0xcf   : > { %v1070_v50 = vmul.f32 %v2351_v15, %v1069_v44  ;;  %v1071_v3 = vmul.f32 %v2355_v47, %v1069_v44  ;;  %v1072_v24 = vmul.f32 %v2359_v59, %v1069_v44  ;;  %v1073_v0 = vmul.f32 %v2363_v62, %v1069_v44 }
  0xd0   : > { %v1080_v9 = vmul.f32 %v2367_v5, %v1079_v19  ;;  %v1081_v58 = vmul.f32 %v2371_v13, %v1079_v19  ;;  %v1082_v48 = vmul.f32 %v2375_v27, %v1079_v19  ;;  %v1083_v42 = vmul.f32 %v2379_v25, %v1079_v19 }
  0xd1   : > { %v1074_v12 = vadd.f32 %v1070_v50, %v1064_v17  ;;  %v1075_v61 = vadd.f32 %v1071_v3, %v1065_v6  ;;  %v1076_v39 = vadd.f32 %v1072_v24, %v1066_v11  ;;  %v1077_v37 = vadd.f32 %v1073_v0, %v1067_v54  ;;  %v2735_v6 = vld [vmem:[#allocation18_spill] sm:$0xff]  ;;  %v2736_v54 = vld [vmem:[#allocation12_spill] sm:$0xff] }
  0xd2   : > { %v1090_v44 = vmul.f32 %v2393_v57, %v1089_v4  ;;  %v1091_v22 = vmul.f32 %v2397_v30, %v1089_v4  ;;  %v1092_v23 = vmul.f32 %v2733_v1, %v1089_v4  ;;  %v1093_v33 = vmul.f32 %v2734_v34, %v1089_v4 }
  0xd3   : > { %v1084_v35 = vadd.f32 %v1080_v9, %v1074_v12  ;;  %v1085_v10 = vadd.f32 %v1081_v58, %v1075_v61  ;;  %v1086_v19 = vadd.f32 %v1082_v48, %v1076_v39  ;;  %v1087_v32 = vadd.f32 %v1083_v42, %v1077_v37  ;;  %v2739_v58 = vld [vmem:[#allocation13_spill] sm:$0xff] }
  0xd4   : > { %v1010_v45 = vmax.f32 %v2456_v60, 0.0  ;;  %v1011_v17 = vmax.f32 %v2458_v26, 0.0  ;;  %v1100_v11 = vmul.f32 %v2735_v6, %v1099_v51  ;;  %v1101_v50 = vmul.f32 %v2736_v54, %v1099_v51 }
  0xd5   : > { %v2737_v3 = vmax.f32 %v2430_v31, 0.0  ;;  %v2738_v24 = vmax.f32 %v2432_v41, 0.0  ;;  %v1094_v60 = vadd.f32 %v1090_v44, %v1084_v35  ;;  %v1095_v9 = vadd.f32 %v1091_v22, %v1085_v10 }
  0xd6   : > { %v1096_v26 = vadd.f32 %v1092_v23, %v1086_v19  ;;  %v1102_v48 = vmul.f32 %v2739_v58, %v1099_v51  ;;  %v1103_v42 = vmul.f32 %v2423_v21, %v1099_v51  ;;  %v1117_v12 = vstv %s2492_s25 }
  0xd7   : > { %v2521_v4 = vadd.f32 %v2737_v3, %v2437_v40  ;;  %v2526_v0 = vadd.f32 %v2738_v24, %v2442_v63  ;;  %v1097_v31 = vadd.f32 %v1093_v33, %v1087_v32  ;;  %v2535_v40 = vadd.f32 %v1100_v11, %v1094_v60  ;;  %v2740_v3 = vld [vmem:[#allocation9_spill] sm:$0xff] }
  0xd8   : > { %v2537_v41 = vadd.f32 %v1101_v50, %v1095_v9  ;;  %v1123_v63 = vstv %s2498_s26  ;;  %v1118_v61 = vmul.f32 %v2243_v46, %v1117_v12  ;;  %v1119_v39 = vmul.f32 %v2247_v20, %v1117_v12 }
  0xd9   : > { %v1120_v37 = vmul.f32 %v2251_v7, %v1117_v12  ;;  %v1121_v44 = vmul.f32 %v2255_v43, %v1117_v12  ;;  %v2547_v51 = vadd.f32 %v1010_v45, %v2447_v53  ;;  %v2550_v22 = vadd.f32 %v1011_v17, %v2452_v38 }
  0xda   : > { %v1129_v23 = vstv %s2504_s27  ;;  %v1139_v33 = vstv %s2506_s28  ;;  %v1124_v35 = vadd.f32 %v1123_v63, %v1118_v61  ;;  %v1125_v10 = vadd.f32 %v1123_v63, %v1119_v39  ;;  %v2741_v61 = vld [vmem:[#allocation10_spill] sm:$0xff]  ;;  %v2742_v39 = vld [vmem:[#allocation11_spill] sm:$0xff] }
  0xdb   : > { %v1126_v19 = vadd.f32 %v1123_v63, %v1120_v37  ;;  %v1127_v32 = vadd.f32 %v1123_v63, %v1121_v44  ;;  %v2554_v11 = vadd.f32 %v1102_v48, %v1096_v26  ;;  %v2556_v46 = vadd.f32 %v1103_v42, %v1097_v31  ;;  %v2743_v44 = vld [vmem:[#allocation15_spill] sm:$0xff] }
  0xdc   : > { %v1108_v20 = vmax.f32 %v2535_v40, 0.0  ;;  %v1109_v7 = vmax.f32 %v2537_v41, 0.0  ;;  %v1130_v43 = vmul.f32 %v2275_v8, %v1129_v23  ;;  %v1131_v53 = vmul.f32 %v2279_v56, %v1129_v23 }
  0xdd   : > { %v1132_v38 = vmul.f32 %v2283_v14, %v1129_v23  ;;  %v1133_v45 = vmul.f32 %v2287_v49, %v1129_v23  ;;  %v1140_v17 = vmul.f32 %v2291_v36, %v1139_v33  ;;  %v1141_v50 = vmul.f32 %v2295_v52, %v1139_v33 }
  0xde   : > { %v1142_v24 = vmul.f32 %v2740_v3, %v1139_v33  ;;  %v1143_v60 = vmul.f32 %v2303_v29, %v1139_v33  ;;  %v1134_v9 = vadd.f32 %v1130_v43, %v1124_v35  ;;  %v1135_v26 = vadd.f32 %v1131_v53, %v1125_v10 }
  0xdf   : > { %v1136_v48 = vadd.f32 %v1132_v38, %v1126_v19  ;;  %v1137_v42 = vadd.f32 %v1133_v45, %v1127_v32  ;;  %v1149_v12 = vstv %s2516_s29  ;;  %v1159_v8 = vstv %s2528_s30 }
  0xe0   : > { %v1169_v31 = vstv %s2533_s4  ;;  %v1179_v56 = vstv %s2540_s5  ;;  %v1144_v14 = vadd.f32 %v1140_v17, %v1134_v9  ;;  %v1145_v49 = vadd.f32 %v1141_v50, %v1135_v26 }
  0xe1   : > { %v1146_v63 = vadd.f32 %v1142_v24, %v1136_v48  ;;  %v1147_v36 = vadd.f32 %v1143_v60, %v1137_v42  ;;  %v1150_v52 = vmul.f32 %v2319_v55, %v1149_v12  ;;  %v1151_v29 = vmul.f32 %v2741_v61, %v1149_v12 }
  0xe2   : > { %v1152_v37 = vmul.f32 %v2742_v39, %v1149_v12  ;;  %v1153_v23 = vmul.f32 %v2743_v44, %v1149_v12  ;;  %v1160_v33 = vmul.f32 %v2335_v2, %v1159_v8  ;;  %v1161_v35 = vmul.f32 %v2339_v18, %v1159_v8 }
  0xe3   : > { %v1162_v10 = vmul.f32 %v2343_v16, %v1159_v8  ;;  %v1163_v19 = vmul.f32 %v2347_v28, %v1159_v8  ;;  %v1154_v32 = vadd.f32 %v1150_v52, %v1144_v14  ;;  %v1155_v43 = vadd.f32 %v1151_v29, %v1145_v49 }
  0xe4   : > { %v1156_v53 = vadd.f32 %v1152_v37, %v1146_v63  ;;  %v1157_v38 = vadd.f32 %v1153_v23, %v1147_v36  ;;  %v1170_v55 = vmul.f32 %v2351_v15, %v1169_v31  ;;  %v1171_v45 = vmul.f32 %v2355_v47, %v1169_v31 }
  0xe5   : > { %v1172_v17 = vmul.f32 %v2359_v59, %v1169_v31  ;;  %v1173_v50 = vmul.f32 %v2363_v62, %v1169_v31  ;;  %v1164_v2 = vadd.f32 %v1160_v33, %v1154_v32  ;;  %v1165_v18 = vadd.f32 %v1161_v35, %v1155_v43 }
  0xe6   : > { %v1166_v16 = vadd.f32 %v1162_v10, %v1156_v53  ;;  %v1167_v28 = vadd.f32 %v1163_v19, %v1157_v38  ;;  %v1180_v3 = vmul.f32 %v2367_v5, %v1179_v56  ;;  %v1181_v15 = vmul.f32 %v2371_v13, %v1179_v56 }
  0xe7   : > { %v1182_v47 = vmul.f32 %v2375_v27, %v1179_v56  ;;  %v1183_v59 = vmul.f32 %v2379_v25, %v1179_v56  ;;  %v1174_v24 = vadd.f32 %v1170_v55, %v1164_v2  ;;  %v1175_v62 = vadd.f32 %v1171_v45, %v1165_v18 }
  0xe8   : > { %v1176_v60 = vadd.f32 %v1172_v17, %v1166_v16  ;;  %v1177_v9 = vadd.f32 %v1173_v50, %v1167_v28  ;;  %v1110_v26 = vmax.f32 %v2554_v11, 0.0  ;;  %v1111_v48 = vmax.f32 %v2556_v46, 0.0 }
  0xe9   : > { %v1189_v42 = vstv %s2572_s6  ;;  %v1199_v12 = vstv %s2574_s7  ;;  %v1184_v5 = vadd.f32 %v1180_v3, %v1174_v24  ;;  %v1185_v8 = vadd.f32 %v1181_v15, %v1175_v62 }
  0xea   : > { %v1186_v13 = vadd.f32 %v1182_v47, %v1176_v60  ;;  %v1187_v31 = vadd.f32 %v1183_v59, %v1177_v9  ;;  %v1190_v27 = vmul.f32 %v2393_v57, %v1189_v42  ;;  %v1191_v25 = vmul.f32 %v2397_v30, %v1189_v42 }
  0xeb   : > { %v1192_v56 = vmul.f32 %v2733_v1, %v1189_v42  ;;  %v1193_v14 = vmul.f32 %v2734_v34, %v1189_v42  ;;  %v1200_v11 = vmul.f32 %v2735_v6, %v1199_v12  ;;  %v1201_v49 = vmul.f32 %v2736_v54, %v1199_v12 }
  0xec   : > { %v1202_v46 = vmul.f32 %v2739_v58, %v1199_v12  ;;  %v1203_v63 = vmul.f32 %v2423_v21, %v1199_v12  ;;  %v1194_v36 = vadd.f32 %v1190_v27, %v1184_v5  ;;  %v1195_v52 = vadd.f32 %v1191_v25, %v1185_v8 }
  0xed   : > { %v1196_v61 = vadd.f32 %v1192_v56, %v1186_v13  ;;  %v1197_v57 = vadd.f32 %v1193_v14, %v1187_v31  ;;  %v1112_v30 = vadd.f32 %v1108_v20, %v2521_v4  ;;  %v1113_v1 = vadd.f32 %v1109_v7, %v2526_v0 }
  0xee   : > { %v1114_v34 = vadd.f32 %v1110_v26, %v2547_v51  ;;  %v1115_v6 = vadd.f32 %v1111_v48, %v2550_v22  ;;  %v1204_v54 = vadd.f32 %v1200_v11, %v1194_v36  ;;  %v1205_v21 = vadd.f32 %v1201_v49, %v1195_v52 }
  0xef   : > { %v1206_v58 = vadd.f32 %v1202_v46, %v1196_v61  ;;  %v1207_v29 = vadd.f32 %v1203_v63, %v1197_v57 }
  0xf0   : > { %v1208_v39 = vmax.f32 %v1204_v54, 0.0  ;;  %v1209_v37 = vmax.f32 %v1205_v21, 0.0 }
  0xf1   : > { %v1210_v44 = vmax.f32 %v1206_v58, 0.0  ;;  %v1211_v23 = vmax.f32 %v1207_v29, 0.0 }
  0xf2   : > { %v1212_v33 = vadd.f32 %v1208_v39, %v1112_v30  ;;  %v1213_v40 = vadd.f32 %v1209_v37, %v1113_v1 }
  0xf3   : > { %v1214_v4 = vadd.f32 %v1210_v44, %v1114_v34  ;;  %v1215_v20 = vadd.f32 %v1211_v23, %v1115_v6 }
  0xf4   : > { %v1216_v0 = vmul.f32 0.125, %v1212_v33  ;;  %v1217_v41 = vmul.f32 0.125, %v1213_v40 }
  0xf5   : > { %v1218_v51 = vmul.f32 0.125, %v1214_v4  ;;  %v1219_v22 = vmul.f32 0.125, %v1215_v20 }
  0xf6   : > { %1221 = vst.msk [vmem:[%s382_s10] sm:$0xf] %vm1220_vm0, %v1216_v0 }
  0xf7   : > { %1222 = vst.msk [vmem:[%s382_s10 + $0x4] sm:$0xf] %vm1220_vm0, %v1217_v41 }
  0xf8   : > { %1223 = vst.msk [vmem:[%s382_s10 + $0x8] sm:$0xf] %vm1220_vm0, %v1218_v51 }
  0xf9   : > { %1224 = vst.msk [vmem:[%s382_s10 + $0xc] sm:$0xf] %vm1220_vm0, %v1219_v22 }
  0xfa PF: > { %p12_p12 = scmp.ge.s32.totalorder %s1587_s16, 4   ;;  %s2744_s12 = smov %s1542_s13 }
  0xfb   : > { %s2745_s13 = smov %s1597_s19  ;;  %s2746_s14 = smov %s1587_s16 }
  0xfc   :  { %14 = sbr.rel (!%p12_p12) target bundleno = 3 (0x3), region = 117 }
 0x101   :  { %1247 = vsyncpa [#allocation4], 1 }
 0x102   :  { %1249 = vsyncpa [#allocation4 + $0x1], 1 }
 0x103   :  { %1250 = vsyncpa [#allocation6], 1 }

// kernel: hms2d_v3_forward.3
= control target key start
LH: loop header
LB: loop body
LE: loop exit
PB: predicated region body
PF: predicated region fallthrough
CT: control target
= control target key end

     0   :  { %s4743_s0 = inlined_call_operand.vmem [shape: f32[9,2,32,128], index: 0, kind: input, shape index: {}]   ;;  %s4744_s1 = inlined_call_operand.vmem [shape: f32[16,9], index: 1, kind: input, shape index: {}]   ;;  %s4745_s2 = inlined_call_operand.vmem [shape: f32[16], index: 2, kind: input, shape index: {}]   ;;  %s4746_s3 = inlined_call_operand.vmem [shape: f32[16,32], index: 3, kind: input, shape index: {}]   ;;  %s4747_s4 = inlined_call_operand.vmem [shape: f32[1,32], index: 4, kind: input, shape index: {}]   ;;  %s4748_s5 = inlined_call_operand.vmem [shape: f32[1,32], index: 5, kind: input, shape index: {}]   ;;  %s4749_s6 = inlined_call_operand.vmem [shape: f32[1,32], index: 6, kind: input, shape index: {}]   ;;  %s4750_s7 = inlined_call_operand.vmem [shape: f32[1,32], index: 7, kind: input, shape index: {}]   ;;  %s4751_s8 = inlined_call_operand.vmem [shape: f32[1,32], index: 8, kind: input, shape index: {}]   ;;  %s4752_s9 = inlined_call_operand.vmem [shape: f32[32,2], index: 9, kind: input, shape index: {}]   ;;  %s4753_s10 = inlined_call_operand.vmem [shape: f32[1,2], index: 10, kind: input, shape index: {}]   ;;  %s4754_s11 = inlined_call_operand.hbm [shape: f32[2,1,2], index: 11, kind: output, shape index: {}]  }
   0x1   :  { %4767 = sst [smem:[#allocation16_spill]] %s4744_s1 }
   0x2   :  { %4768 = sst [smem:[#allocation17_spill]] %s4745_s2 }
   0x3   :  { %16 = vsyncpa [#allocation5], 0 }
   0x4   :  { %17 = vsyncpa [#allocation7], 0 }
   0x5   :  { %18 = vsyncpa [#allocation4], 0 }
   0x6   :  { %20 = vsyncpa [#allocation4 + $0x1], 0  ;;  %s3102_s17 = smov 0   ;;  %s3104_s18 = smov 0  }
   0x7   :  { %s3106_s19 = smov 0   ;;  %s3108_s20 = smov 0  }
   0x8 LB: > { %s3123_s21 = sadd.s32 4294967295, %s3036_s20   ;;  %s2593_s22 = sadd.s32 4294967294, %s3036_s20   ;;  %s3036_s20 = sphi %s3108_s20, %s4787_s20   ;;  %s3032_s19 = sphi %s3106_s19, %s4791_s19   ;;  %s3028_s18 = sphi %s3104_s18, %s4790_s18   ;;  %s3024_s17 = sphi %s3102_s17, %s4789_s17  }
   0x9   : > { %s3127_s23 = sadd.s32 1, %s3036_s20   ;;  %s33_s24 = sadd.s32 1, %s3032_s19 }
   0xa   : > { %4769 = sst [smem:[#allocation12_spill]] %s3127_s23  ;;  %s30_s25 = ssub.s32 %s3036_s20, %s3127_s23 }
   0xb   : > { %p40_p0 = scmp.ne.s32.totalorder %s3032_s19, %s3028_s18  ;;  %p31_p1 = scmp.eq.s32.totalorder %s30_s25, 0 }
   0xc   : > { %p41_p2 = scmp.eq.s32.totalorder %s3036_s20, 0  ;;  %p280_p3 = scmp.eq.s32.totalorder %s3123_s21, 1 }
   0xd   : > { %p285_p4 = scmp.ne.s32.totalorder %s3028_s18, %s3024_s17  ;;  %p286_p7 = scmp.eq.s32.totalorder %s2593_s22, 1 }
   0xe   : > { %s3139_s26 = scalar_select %p31_p1, %s3032_s19, %s33_s24  }
   0xf   : > { %p3141_p5 = por %p41_p2, %p40_p0  ;;  %p3145_p6 = por %p280_p3, %p40_p0 }
  0x10   : > { %4770 = sst [smem:[#allocation13_spill]] %s3139_s26  ;;  %p2594_p8 = scmp.ge.s32.totalorder %s3036_s20, 1 }
  0x11   : > { %p293_p9 = scmp.lt.s32.totalorder %s3036_s20, 3  ;;  %p3151_p10 = por %p286_p7, %p285_p4 }
  0x12   : > { %p2821_p11 = scmp.eq.s32.totalorder %s3123_s21, 0  ;;  %s4775_s1 = sld [smem:[#allocation16_spill]] }
  0x13   : > { %p3156_p12 = pnand %p2594_p8, %p293_p9  ;;  %s4776_s2 = sld [smem:[#allocation17_spill]] }
  0x14   : > { %s3038_s24 = smov [#allocation3]   ;;  %s3039_s25 = smov 128  }
  0x15   : > { %p2810_p13 = pneg %p3156_p12  ;;  %s3040_s26 = smov 8  }
  0x16   : > { %s3041_s23 = smov [#allocation6]   ;;  %p2597_p1 = scmp.ge.s32.totalorder %s3036_s20, 2 }
  0x17   : > { %p2811_p0 = pnand %p2821_p11, %p2810_p13 }
  0x18   : > { %s304_s14 = sshll.u32 %s4775_s1, 4  ;;  %348 = sbr.rel (%p2597_p1) target bundleno = 69 (0x45), region = 56  ;;  %s305_s14 = int_to_ptr.vmem [resolvable:$true] %s304_s14 }
  0x19   : > { %s317_s22 = sshll.u32 %s4776_s2, 4  ;;  %s318_s22 = int_to_ptr.vmem [resolvable:$true] %s317_s22 }
  0x1a   : > { %2813 = dma.vmem_to_smem (!%p2811_p0), %s305_s14, 256, %s3038_s24, [#allocation5], %s3039_s25, %s3039_s25, %s3040_s26  }
  0x1b   : > { %2816 = dma.vmem_to_smem (!%p2811_p0), %s318_s22, 16, %s3041_s23, [#allocation7]  }
  0x1d   : > { %351 = sbr.rel (!%p3141_p5) target bundleno = 69 (0x45), region = 60  ;;  %s353_s12 = sand.u32 (%p3141_p5), 1, %s3032_s19  }
  0x1e   : > { %s2765_s13 = sshll.u32 (%p3141_p5), %s3036_s20, 5  ;;  %s2766_s15 = smul.u32 (%p3141_p5), 288, %s353_s12 }
  0x1f   : > { %s3180_s2 = scalar_lea.vmem (%p3141_p5), %s4743_s0, %s2765_s13 }
  0x20   : > { %v457_v0 = vld [vmem:[%s3180_s2] sm:$0xff] (%p3141_p5)  ;;  %v459_v1 = vld [vmem:[%s3180_s2 + $0x8] sm:$0xff] (%p3141_p5)  ;;  %v461_v2 = vld [vmem:[%s3180_s2 + $0x10] sm:$0xff] (%p3141_p5)  ;;  %s3185_s23 = scalar_lea.vmem (%p3141_p5), [#allocation2], %s2766_s15 }
  0x21   : > { %458 = vst [vmem:[%s3185_s23] sm:$0xff] (%p3141_p5), %v457_v0  ;;  %v463_v3 = vld [vmem:[%s3180_s2 + $0x18] sm:$0xff] (%p3141_p5)  ;;  %v465_v4 = vld [vmem:[%s3180_s2 + $0x40] sm:$0xff] (%p3141_p5)  ;;  %v467_v5 = vld [vmem:[%s3180_s2 + $0x48] sm:$0xff] (%p3141_p5) }
  0x22   : > { %460 = vst [vmem:[%s3185_s23 + $0x8] sm:$0xff] %v459_v1  ;;  %v469_v6 = vld [vmem:[%s3180_s2 + $0x50] sm:$0xff]  ;;  %v471_v7 = vld [vmem:[%s3180_s2 + $0x58] sm:$0xff]  ;;  %v473_v8 = vld [vmem:[%s3180_s2 + $0x80] sm:$0xff] }
  0x23   : > { %462 = vst [vmem:[%s3185_s23 + $0x10] sm:$0xff] %v461_v2  ;;  %v475_v9 = vld [vmem:[%s3180_s2 + $0x88] sm:$0xff]  ;;  %v477_v10 = vld [vmem:[%s3180_s2 + $0x90] sm:$0xff]  ;;  %v479_v11 = vld [vmem:[%s3180_s2 + $0x98] sm:$0xff] }
  0x24   : > { %464 = vst [vmem:[%s3185_s23 + $0x18] sm:$0xff] %v463_v3  ;;  %v481_v12 = vld [vmem:[%s3180_s2 + $0xc0] sm:$0xff]  ;;  %v483_v13 = vld [vmem:[%s3180_s2 + $0xc8] sm:$0xff]  ;;  %v485_v14 = vld [vmem:[%s3180_s2 + $0xd0] sm:$0xff] }
  0x25   : > { %466 = vst [vmem:[%s3185_s23 + $0x20] sm:$0xff] %v465_v4  ;;  %v487_v15 = vld [vmem:[%s3180_s2 + $0xd8] sm:$0xff]  ;;  %v489_v16 = vld [vmem:[%s3180_s2 + $0x100] sm:$0xff]  ;;  %v491_v17 = vld [vmem:[%s3180_s2 + $0x108] sm:$0xff] }
  0x26   : > { %468 = vst [vmem:[%s3185_s23 + $0x28] sm:$0xff] %v467_v5  ;;  %v493_v18 = vld [vmem:[%s3180_s2 + $0x110] sm:$0xff]  ;;  %v495_v19 = vld [vmem:[%s3180_s2 + $0x118] sm:$0xff]  ;;  %v497_v20 = vld [vmem:[%s3180_s2 + $0x140] sm:$0xff] }
  0x27   : > { %470 = vst [vmem:[%s3185_s23 + $0x30] sm:$0xff] %v469_v6  ;;  %v499_v21 = vld [vmem:[%s3180_s2 + $0x148] sm:$0xff]  ;;  %v501_v22 = vld [vmem:[%s3180_s2 + $0x150] sm:$0xff]  ;;  %v503_v23 = vld [vmem:[%s3180_s2 + $0x158] sm:$0xff] }
  0x28   : > { %472 = vst [vmem:[%s3185_s23 + $0x38] sm:$0xff] %v471_v7  ;;  %v505_v24 = vld [vmem:[%s3180_s2 + $0x180] sm:$0xff]  ;;  %v507_v25 = vld [vmem:[%s3180_s2 + $0x188] sm:$0xff]  ;;  %v509_v26 = vld [vmem:[%s3180_s2 + $0x190] sm:$0xff] }
  0x29   : > { %474 = vst [vmem:[%s3185_s23 + $0x40] sm:$0xff] %v473_v8  ;;  %v511_v27 = vld [vmem:[%s3180_s2 + $0x198] sm:$0xff]  ;;  %v513_v28 = vld [vmem:[%s3180_s2 + $0x1c0] sm:$0xff]  ;;  %v515_v29 = vld [vmem:[%s3180_s2 + $0x1c8] sm:$0xff] }
  0x2a   : > { %476 = vst [vmem:[%s3185_s23 + $0x48] sm:$0xff] %v475_v9  ;;  %v517_v30 = vld [vmem:[%s3180_s2 + $0x1d0] sm:$0xff]  ;;  %v519_v31 = vld [vmem:[%s3180_s2 + $0x1d8] sm:$0xff]  ;;  %v521_v32 = vld [vmem:[%s3180_s2 + $0x200] sm:$0xff] }
  0x2b   : > { %478 = vst [vmem:[%s3185_s23 + $0x50] sm:$0xff] %v477_v10  ;;  %v523_v33 = vld [vmem:[%s3180_s2 + $0x208] sm:$0xff]  ;;  %v525_v34 = vld [vmem:[%s3180_s2 + $0x210] sm:$0xff]  ;;  %v527_v35 = vld [vmem:[%s3180_s2 + $0x218] sm:$0xff] }
  0x2c   : > { %480 = vst [vmem:[%s3185_s23 + $0x58] sm:$0xff] %v479_v11 }
  0x2d   : > { %482 = vst [vmem:[%s3185_s23 + $0x60] sm:$0xff] %v481_v12 }
  0x2e   : > { %484 = vst [vmem:[%s3185_s23 + $0x68] sm:$0xff] %v483_v13 }
  0x2f   : > { %486 = vst [vmem:[%s3185_s23 + $0x70] sm:$0xff] %v485_v14 }
  0x30   : > { %488 = vst [vmem:[%s3185_s23 + $0x78] sm:$0xff] %v487_v15 }
  0x31   : > { %490 = vst [vmem:[%s3185_s23 + $0x80] sm:$0xff] %v489_v16 }
  0x32   : > { %492 = vst [vmem:[%s3185_s23 + $0x88] sm:$0xff] %v491_v17 }
  0x33   : > { %494 = vst [vmem:[%s3185_s23 + $0x90] sm:$0xff] %v493_v18 }
  0x34   : > { %496 = vst [vmem:[%s3185_s23 + $0x98] sm:$0xff] %v495_v19 }
  0x35   : > { %498 = vst [vmem:[%s3185_s23 + $0xa0] sm:$0xff] %v497_v20 }
  0x36   : > { %500 = vst [vmem:[%s3185_s23 + $0xa8] sm:$0xff] %v499_v21 }
  0x37   : > { %502 = vst [vmem:[%s3185_s23 + $0xb0] sm:$0xff] %v501_v22 }
  0x38   : > { %504 = vst [vmem:[%s3185_s23 + $0xb8] sm:$0xff] %v503_v23 }
  0x39   : > { %506 = vst [vmem:[%s3185_s23 + $0xc0] sm:$0xff] %v505_v24 }
  0x3a   : > { %508 = vst [vmem:[%s3185_s23 + $0xc8] sm:$0xff] %v507_v25 }
  0x3b   : > { %510 = vst [vmem:[%s3185_s23 + $0xd0] sm:$0xff] %v509_v26 }
  0x3c   : > { %512 = vst [vmem:[%s3185_s23 + $0xd8] sm:$0xff] %v511_v27 }
  0x3d   : > { %514 = vst [vmem:[%s3185_s23 + $0xe0] sm:$0xff] %v513_v28 }
  0x3e   : > { %516 = vst [vmem:[%s3185_s23 + $0xe8] sm:$0xff] %v515_v29 }
  0x3f   : > { %518 = vst [vmem:[%s3185_s23 + $0xf0] sm:$0xff] %v517_v30 }
  0x40   : > { %520 = vst [vmem:[%s3185_s23 + $0xf8] sm:$0xff] %v519_v31 }
  0x41   : > { %522 = vst [vmem:[%s3185_s23 + $0x100] sm:$0xff] %v521_v32 }
  0x42   : > { %524 = vst [vmem:[%s3185_s23 + $0x108] sm:$0xff] %v523_v33 }
  0x43   : > { %526 = vst [vmem:[%s3185_s23 + $0x110] sm:$0xff] %v525_v34 }
  0x44   : > { %528 = vst [vmem:[%s3185_s23 + $0x118] sm:$0xff] %v527_v35 }
  0x45 PF: > { %537 = sbr.rel (%p3156_p12) target bundleno = 906 (0x38a), region = 98 }
  0x4a   : > { %s3259_s1 = sand.u32 1, %s3028_s18  }
  0x4b   : > { %s2767_s26 = smul.u32 288, %s3259_s1 }
  0x4d   : > { %s3262_s27 = scalar_lea.vmem [#allocation2], %s2767_s26 }
  0x4e   : > { %3011 = dma.done.wait (%p2821_p11), [#allocation5], 256  }
  0x4f   : > { %3013 = vsyncadd (%p2821_p11), [#allocation5], 4294967040 }
  0x50   : > { %3015 = dma.done.wait (%p2821_p11), [#allocation7], 16  }
  0x51   : > { %3017 = vsyncadd (%p2821_p11), [#allocation7], 4294967280 }
  0x52   : > { %556 = sfence }
  0x53   : > { %s2621_s2 = sld [smem:[#allocation3 + $0x100]]  ;;  %v3273_v36 = vld [vmem:[%s3262_s27] sm:$0xff]  ;;  %v3278_v37 = vld [vmem:[%s3262_s27 + $0x8] sm:$0xff]  ;;  %v3281_v38 = vld [vmem:[%s3262_s27 + $0x10] sm:$0xff] }
  0x54   : > { %s2622_s30 = sld [smem:[#allocation6 + $0x2]]  ;;  %v3284_v39 = vld [vmem:[%s3262_s27 + $0x18] sm:$0xff]  ;;  %v3293_v41 = vld [vmem:[%s3262_s27 + $0x20] sm:$0xff]  ;;  %v3300_v46 = vld [vmem:[%s3262_s27 + $0x28] sm:$0xff] }
  0x55   : > { %s2623_s14 = sld [smem:[#allocation3 + $0x101]]  ;;  %v3303_v47 = vld [vmem:[%s3262_s27 + $0x30] sm:$0xff]  ;;  %v3306_v48 = vld [vmem:[%s3262_s27 + $0x38] sm:$0xff]  ;;  %v3309_v50 = vld [vmem:[%s3262_s27 + $0x40] sm:$0xff] }
  0x56   : > { %s3275_s22 = sld [smem:[#allocation3 + $0x102]]  ;;  %v3312_v51 = vld [vmem:[%s3262_s27 + $0x48] sm:$0xff]  ;;  %v3315_v56 = vld [vmem:[%s3262_s27 + $0x50] sm:$0xff]  ;;  %v3318_v57 = vld [vmem:[%s3262_s27 + $0x58] sm:$0xff] }
  0x57   : > { %s3286_s24 = sld [smem:[#allocation3 + $0x103]]  ;;  %v3321_v58 = vld [vmem:[%s3262_s27 + $0x60] sm:$0xff]  ;;  %v3326_v60 = vld [vmem:[%s3262_s27 + $0x68] sm:$0xff]  ;;  %v3329_v61 = vld [vmem:[%s3262_s27 + $0x70] sm:$0xff] }
  0x58   : > { %s3288_s25 = sld [smem:[#allocation3 + $0x104]]  ;;  %v3332_v62 = vld [vmem:[%s3262_s27 + $0x78] sm:$0xff]  ;;  %v3347_v7 = vld [vmem:[%s3262_s27 + $0x80] sm:$0xff]  ;;  %v3352_v12 = vld [vmem:[%s3262_s27 + $0x88] sm:$0xff] }
  0x59   : > { %v852_v40 = vstv %s2621_s2  ;;  %s3290_s12 = sld [smem:[#allocation3 + $0x105]]  ;;  %v3355_v13 = vld [vmem:[%s3262_s27 + $0x90] sm:$0xff]  ;;  %v3358_v14 = vld [vmem:[%s3262_s27 + $0x98] sm:$0xff]  ;;  %v3365_v19 = vld [vmem:[%s3262_s27 + $0xa0] sm:$0xff] }
  0x5a   : > { %v853_v42 = vmul.f32 %v852_v40, %v3273_v36  ;;  %v854_v43 = vmul.f32 %v852_v40, %v3278_v37  ;;  %v855_v44 = vmul.f32 %v852_v40, %v3281_v38  ;;  %v856_v45 = vmul.f32 %v852_v40, %v3284_v39  ;;  %s3323_s13 = sld [smem:[#allocation3 + $0x106]]  ;;  %v3372_v24 = vld [vmem:[%s3262_s27 + $0xa8] sm:$0xff]  ;;  %v3375_v25 = vld [vmem:[%s3262_s27 + $0xb0] sm:$0xff]  ;;  %v3378_v26 = vld [vmem:[%s3262_s27 + $0xb8] sm:$0xff] }
  0x5b   : > { %v858_v49 = vstv %s2622_s30  ;;  %v864_v59 = vstv %s2623_s14  ;;  %s3338_s15 = sld [smem:[#allocation3 + $0x107]]  ;;  %v3385_v35 = vld [vmem:[%s3262_s27 + $0xc0] sm:$0xff]  ;;  %v3388_v40 = vld [vmem:[%s3262_s27 + $0xc8] sm:$0xff] }
  0x5c   : > { %v859_v52 = vadd.f32 %v858_v49, %v853_v42  ;;  %v860_v53 = vadd.f32 %v858_v49, %v854_v43  ;;  %v861_v54 = vadd.f32 %v858_v49, %v855_v44  ;;  %v862_v55 = vadd.f32 %v858_v49, %v856_v45  ;;  %s3344_s16 = sld [smem:[#allocation3 + $0x108]]  ;;  %v3391_v49 = vld [vmem:[%s3262_s27 + $0xd0] sm:$0xff] }
  0x5d   : > { %v865_v63 = vmul.f32 %v864_v59, %v3293_v41  ;;  %v866_v0 = vmul.f32 %v864_v59, %v3300_v46  ;;  %v867_v1 = vmul.f32 %v864_v59, %v3303_v47  ;;  %v868_v2 = vmul.f32 %v864_v59, %v3306_v48  ;;  %s3349_s23 = sld [smem:[#allocation3]] }
  0x5e   : > { %v874_v3 = vstv %s3275_s22  ;;  %v884_v4 = vstv %s3286_s24  ;;  %v894_v5 = vstv %s3288_s25  ;;  %s3403_s26 = sld [smem:[#allocation6]] }
  0x5f   : > { %v904_v6 = vstv %s3290_s12  ;;  %v869_v8 = vadd.f32 %v865_v63, %v859_v52  ;;  %v870_v9 = vadd.f32 %v866_v0, %v860_v53  ;;  %v871_v10 = vadd.f32 %v867_v1, %v861_v54  ;;  %v3394_v52 = vld [vmem:[%s3262_s27 + $0xd8] sm:$0xff]  ;;  %v3397_v53 = vld [vmem:[%s3262_s27 + $0xe0] sm:$0xff]  ;;  %v3406_v0 = vld [vmem:[%s3262_s27 + $0xe8] sm:$0xff]  ;;  %s3414_s2 = sld [smem:[#allocation3 + $0x1]] }
  0x60   : > { %v872_v11 = vadd.f32 %v868_v2, %v862_v55  ;;  %v875_v15 = vmul.f32 %v874_v3, %v3309_v50  ;;  %v876_v16 = vmul.f32 %v874_v3, %v3312_v51  ;;  %v877_v17 = vmul.f32 %v874_v3, %v3315_v56  ;;  %v3409_v1 = vld [vmem:[%s3262_s27 + $0xf0] sm:$0xff]  ;;  %v3412_v2 = vld [vmem:[%s3262_s27 + $0xf8] sm:$0xff]  ;;  %s3420_s30 = sld [smem:[#allocation3 + $0x2]] }
  0x61   : > { %v878_v18 = vmul.f32 %v874_v3, %v3318_v57  ;;  %v885_v20 = vmul.f32 %v884_v4, %v3321_v58  ;;  %v886_v21 = vmul.f32 %v884_v4, %v3326_v60  ;;  %v887_v22 = vmul.f32 %v884_v4, %v3329_v61  ;;  %s3425_s14 = sld [smem:[#allocation3 + $0x3]] }
  0x62   : > { %v888_v23 = vmul.f32 %v884_v4, %v3332_v62  ;;  %v879_v27 = vadd.f32 %v875_v15, %v869_v8  ;;  %v880_v28 = vadd.f32 %v876_v16, %v870_v9  ;;  %v881_v29 = vadd.f32 %v877_v17, %v871_v10  ;;  %v3423_v15 = vld [vmem:[%s3262_s27 + $0x100] sm:$0xff]  ;;  %s3456_s22 = sld [smem:[#allocation3 + $0x4]] }
  0x63   : > { %v882_v30 = vadd.f32 %v878_v18, %v872_v11  ;;  %v895_v31 = vmul.f32 %v894_v5, %v3347_v7  ;;  %v896_v32 = vmul.f32 %v894_v5, %v3352_v12  ;;  %v897_v33 = vmul.f32 %v894_v5, %v3355_v13  ;;  %s3458_s24 = sld [smem:[#allocation3 + $0x5]] }
  0x64   : > { %v898_v34 = vmul.f32 %v894_v5, %v3358_v14  ;;  %v889_v42 = vadd.f32 %v885_v20, %v879_v27  ;;  %v890_v43 = vadd.f32 %v886_v21, %v880_v28  ;;  %v891_v44 = vadd.f32 %v887_v22, %v881_v29  ;;  %v3428_v21 = vld [vmem:[%s3262_s27 + $0x108] sm:$0xff]  ;;  %v3431_v22 = vld [vmem:[%s3262_s27 + $0x110] sm:$0xff]  ;;  %s3463_s25 = sld [smem:[#allocation3 + $0x6]] }
  0x65   : > { %v892_v45 = vadd.f32 %v888_v23, %v882_v30  ;;  %v905_v54 = vmul.f32 %v904_v6, %v3365_v19  ;;  %v906_v55 = vmul.f32 %v904_v6, %v3372_v24  ;;  %v907_v59 = vmul.f32 %v904_v6, %v3375_v25  ;;  %v3434_v23 = vld [vmem:[%s3262_s27 + $0x118] sm:$0xff]  ;;  %s3472_s12 = sld [smem:[#allocation3 + $0x7]] }
  0x66   : > { %v908_v63 = vmul.f32 %v904_v6, %v3378_v26  ;;  %v899_v3 = vadd.f32 %v895_v31, %v889_v42  ;;  %v900_v4 = vadd.f32 %v896_v32, %v890_v43  ;;  %v901_v5 = vadd.f32 %v897_v33, %v891_v44  ;;  %4777 = vst [vmem:[#allocation14_spill] sm:$0xff] %v3434_v23 }
  0x67   : > { %v902_v8 = vadd.f32 %v898_v34, %v892_v45  ;;  %v914_v9 = vstv %s3323_s13  ;;  %v924_v10 = vstv %s3338_s15  ;;  %v934_v6 = vstv %s3344_s16  ;;  %s3474_s13 = sld [smem:[#allocation3 + $0x8]] }
  0x68   : > { %v628_v11 = vstv %s3349_s23  ;;  %v909_v16 = vadd.f32 %v905_v54, %v899_v3  ;;  %v910_v17 = vadd.f32 %v906_v55, %v900_v4  ;;  %v911_v18 = vadd.f32 %v907_v59, %v901_v5  ;;  %s3485_s15 = sld [smem:[#allocation3 + $0x200]] }
  0x69   : > { %v912_v20 = vadd.f32 %v908_v63, %v902_v8  ;;  %v915_v27 = vmul.f32 %v914_v9, %v3385_v35  ;;  %v916_v28 = vmul.f32 %v914_v9, %v3388_v40  ;;  %v917_v29 = vmul.f32 %v914_v9, %v3391_v49  ;;  %s3489_s16 = sld [smem:[#allocation6 + $0x4]] }
  0x6a   : > { %v918_v30 = vmul.f32 %v914_v9, %v3394_v52  ;;  %v925_v31 = vmul.f32 %v924_v10, %v3397_v53  ;;  %v926_v32 = vmul.f32 %v924_v10, %v3406_v0  ;;  %v927_v33 = vmul.f32 %v924_v10, %v3409_v1  ;;  %s3499_s23 = sld [smem:[#allocation3 + $0x201]] }
  0x6b   : > { %v928_v34 = vmul.f32 %v924_v10, %v3412_v2  ;;  %v919_v42 = vadd.f32 %v915_v27, %v909_v16  ;;  %v920_v43 = vadd.f32 %v916_v28, %v910_v17  ;;  %v921_v44 = vadd.f32 %v917_v29, %v911_v18 }
  0x6c   : > { %v922_v45 = vadd.f32 %v918_v30, %v912_v20  ;;  %v935_v54 = vmul.f32 %v934_v6, %v3423_v15  ;;  %v936_v55 = vmul.f32 %v934_v6, %v3428_v21  ;;  %v937_v59 = vmul.f32 %v934_v6, %v3431_v22 }
  0x6d   : > { %v938_v63 = vmul.f32 %v934_v6, %v3434_v23  ;;  %v929_v3 = vadd.f32 %v925_v31, %v919_v42  ;;  %v930_v4 = vadd.f32 %v926_v32, %v920_v43  ;;  %v931_v5 = vadd.f32 %v927_v33, %v921_v44 }
  0x6e   : > { %v932_v8 = vadd.f32 %v928_v34, %v922_v45  ;;  %v629_v9 = vmul.f32 %v628_v11, %v3273_v36  ;;  %v630_v10 = vmul.f32 %v628_v11, %v3278_v37  ;;  %v631_v16 = vmul.f32 %v628_v11, %v3281_v38 }
  0x6f   : > { %v632_v17 = vmul.f32 %v628_v11, %v3284_v39  ;;  %v939_v18 = vadd.f32 %v935_v54, %v929_v3  ;;  %v940_v20 = vadd.f32 %v936_v55, %v930_v4  ;;  %v941_v27 = vadd.f32 %v937_v59, %v931_v5 }
  0x70   : > { %v942_v28 = vadd.f32 %v938_v63, %v932_v8  ;;  %v634_v29 = vstv %s3403_s26  ;;  %v640_v30 = vstv %s3414_s2  ;;  %v650_v6 = vstv %s3420_s30  ;;  %s3503_s26 = sld [smem:[#allocation3 + $0x202]] }
  0x71   : > { %v660_v23 = vstv %s3425_s14  ;;  %v943_v31 = vmax.f32 %v939_v18, 0.0  ;;  %v944_v32 = vmax.f32 %v940_v20, 0.0  ;;  %v945_v33 = vmax.f32 %v941_v27, 0.0  ;;  %s3507_s2 = sld [smem:[#allocation3 + $0x203]] }
  0x72   : > { %v946_v34 = vmax.f32 %v942_v28, 0.0  ;;  %v635_v42 = vadd.f32 %v634_v29, %v629_v9  ;;  %v636_v43 = vadd.f32 %v634_v29, %v630_v10  ;;  %v637_v44 = vadd.f32 %v634_v29, %v631_v16  ;;  %s3511_s30 = sld [smem:[#allocation3 + $0x204]] }
  0x73   : > { %v638_v45 = vadd.f32 %v634_v29, %v632_v17  ;;  %v947_v11 = vadd.f32 %v944_v32, %v943_v31  ;;  %v641_v54 = vmul.f32 %v640_v30, %v3293_v41  ;;  %v642_v55 = vmul.f32 %v640_v30, %v3300_v46  ;;  %s3521_s14 = sld [smem:[#allocation3 + $0x205]] }
  0x74   : > { %v643_v59 = vmul.f32 %v640_v30, %v3303_v47  ;;  %v644_v63 = vmul.f32 %v640_v30, %v3306_v48  ;;  %v651_v3 = vmul.f32 %v650_v6, %v3309_v50  ;;  %v652_v4 = vmul.f32 %v650_v6, %v3312_v51 }
  0x75   : > { %v653_v5 = vmul.f32 %v650_v6, %v3315_v56  ;;  %v948_v8 = vadd.f32 %v947_v11, %v945_v33  ;;  %v645_v9 = vadd.f32 %v641_v54, %v635_v42  ;;  %v646_v10 = vadd.f32 %v642_v55, %v636_v43 }
  0x76   : > { %v647_v16 = vadd.f32 %v643_v59, %v637_v44  ;;  %v648_v17 = vadd.f32 %v644_v63, %v638_v45  ;;  %v654_v18 = vmul.f32 %v650_v6, %v3318_v57  ;;  %v661_v20 = vmul.f32 %v660_v23, %v3321_v58 }
  0x77   : > { %v662_v27 = vmul.f32 %v660_v23, %v3326_v60  ;;  %v949_v28 = vadd.f32 %v948_v8, %v946_v34  ;;  %v655_v29 = vadd.f32 %v651_v3, %v645_v9  ;;  %v656_v30 = vadd.f32 %v652_v4, %v646_v10 }
  0x78   : > { %v657_v31 = vadd.f32 %v653_v5, %v647_v16  ;;  %v658_v32 = vadd.f32 %v654_v18, %v648_v17  ;;  %v663_v33 = vmul.f32 %v660_v23, %v3329_v61  ;;  %v664_v42 = vmul.f32 %v660_v23, %v3332_v62 }
  0x79   : > { %v670_v6 = vstv %s3456_s22  ;;  %950 = vadd.xlane.f32.xlu1 %v949_v28  ;;  %v665_v43 = vadd.f32 %v661_v20, %v655_v29  ;;  %v666_v44 = vadd.f32 %v662_v27, %v656_v30  ;;  %v680_v4 = vstv %s3458_s24  ;;  %s3524_s22 = sld [smem:[#allocation3 + $0x206]] }
  0x7a   : > { %v671_v45 = vmul.f32 %v670_v6, %v3347_v7  ;;  %v672_v34 = vmul.f32 %v670_v6, %v3352_v12  ;;  %v667_v11 = vadd.f32 %v663_v33, %v657_v31  ;;  %v668_v54 = vadd.f32 %v664_v42, %v658_v32  ;;  %s3530_s24 = sld [smem:[#allocation3 + $0x207]] }
  0x7b   : > { %v673_v55 = vmul.f32 %v670_v6, %v3355_v13  ;;  %v674_v59 = vmul.f32 %v670_v6, %v3358_v14  ;;  %v690_v5 = vstv %s3463_s25  ;;  %v681_v9 = vmul.f32 %v680_v4, %v3365_v19  ;;  %s3543_s25 = sld [smem:[#allocation3 + $0x208]] }
  0x7c   : > { %v675_v63 = vadd.f32 %v671_v45, %v665_v43  ;;  %v676_v3 = vadd.f32 %v672_v34, %v666_v44  ;;  %v682_v10 = vmul.f32 %v680_v4, %v3372_v24  ;;  %v683_v16 = vmul.f32 %v680_v4, %v3375_v25 }
  0x7d   : > { %v677_v23 = vadd.f32 %v673_v55, %v667_v11  ;;  %v678_v8 = vadd.f32 %v674_v59, %v668_v54  ;;  %v684_v17 = vmul.f32 %v680_v4, %v3378_v26  ;;  %v691_v18 = vmul.f32 %v690_v5, %v3385_v35 }
  0x7e   : > { %v692_v20 = vmul.f32 %v690_v5, %v3388_v40  ;;  %v685_v27 = vadd.f32 %v681_v9, %v675_v63  ;;  %v686_v28 = vadd.f32 %v682_v10, %v676_v3  ;;  %v693_v29 = vmul.f32 %v690_v5, %v3391_v49  ;;  %v4778_v9 = vld [vmem:[#allocation14_spill] sm:$0xff] }
  0x7f   : > { %v694_v30 = vmul.f32 %v690_v5, %v3394_v52  ;;  %v687_v31 = vadd.f32 %v683_v16, %v677_v23  ;;  %v688_v32 = vadd.f32 %v684_v17, %v678_v8  ;;  %v700_v33 = vstv %s3472_s12  ;;  %s3548_s12 = sld [smem:[#allocation3 + $0x180]] }
  0x80   : > { %v710_v42 = vstv %s3474_s13  ;;  %v695_v6 = vadd.f32 %v691_v18, %v685_v27  ;;  %v696_v43 = vadd.f32 %v692_v20, %v686_v28  ;;  %v701_v44 = vmul.f32 %v700_v33, %v3397_v53  ;;  %s3551_s13 = sld [smem:[#allocation6 + $0x3]] }
  0x81   : > { %v702_v45 = vmul.f32 %v700_v33, %v3406_v0  ;;  %v697_v34 = vadd.f32 %v693_v29, %v687_v31  ;;  %v698_v11 = vadd.f32 %v694_v30, %v688_v32  ;;  %v703_v54 = vmul.f32 %v700_v33, %v3409_v1 }
  0x82   : > { %v704_v55 = vmul.f32 %v700_v33, %v3412_v2  ;;  %v705_v59 = vadd.f32 %v701_v44, %v695_v6  ;;  %v711_v3 = vmul.f32 %v710_v42, %v3423_v15  ;;  %v712_v4 = vmul.f32 %v710_v42, %v3428_v21 }
  0x83   : > { %v706_v63 = vadd.f32 %v702_v45, %v696_v43  ;;  %v707_v5 = vadd.f32 %v703_v54, %v697_v34  ;;  %v713_v8 = vmul.f32 %v710_v42, %v3431_v22  ;;  %v714_v10 = vmul.f32 %v710_v42, %v4778_v9 }
  0x84   : > { %v708_v23 = vadd.f32 %v704_v55, %v698_v11  ;;  %v715_v16 = vadd.f32 %v711_v3, %v705_v59  ;;  %v1076_v18 = vstv %s3485_s15  ;;  %v1082_v20 = vstv %s3489_s16  ;;  %s3564_s15 = sld [smem:[#allocation3 + $0x181]] }
  0x85   : > { %v716_v17 = vadd.f32 %v712_v4, %v706_v63  ;;  %v717_v27 = vadd.f32 %v713_v8, %v707_v5  ;;  %v1077_v29 = vmul.f32 %v1076_v18, %v3273_v36  ;;  %v1078_v30 = vmul.f32 %v1076_v18, %v3278_v37  ;;  %s3569_s16 = sld [smem:[#allocation3 + $0x182]] }
  0x86   : > { %v718_v28 = vadd.f32 %v714_v10, %v708_v23  ;;  %v719_v31 = vmax.f32 %v715_v16, 0.0  ;;  %v1079_v33 = vmul.f32 %v1076_v18, %v3281_v38  ;;  %v1080_v6 = vmul.f32 %v1076_v18, %v3284_v39 }
  0x87   : > { %v720_v32 = vmax.f32 %v716_v17, 0.0  ;;  %v721_v43 = vmax.f32 %v717_v27, 0.0  ;;  %v1083_v44 = vadd.f32 %v1082_v20, %v1077_v29  ;;  %v1084_v45 = vadd.f32 %v1082_v20, %v1078_v30 }
  0x88   : > { %v722_v42 = vmax.f32 %v718_v28, 0.0  ;;  %v1085_v11 = vadd.f32 %v1082_v20, %v1079_v33  ;;  %v1086_v54 = vadd.f32 %v1082_v20, %v1080_v6  ;;  %v1088_v55 = vstv %s3499_s23  ;;  %s3572_s23 = sld [smem:[#allocation3 + $0x183]] }
  0x89   : > { %v723_v34 = vadd.f32 %v720_v32, %v719_v31  ;;  %v1089_v59 = vmul.f32 %v1088_v55, %v3293_v41  ;;  %v1090_v63 = vmul.f32 %v1088_v55, %v3300_v46  ;;  %v1091_v3 = vmul.f32 %v1088_v55, %v3303_v47 }
  0x8a   : > { %v1092_v4 = vmul.f32 %v1088_v55, %v3306_v48  ;;  %v1098_v23 = vstv %s3503_s26  ;;  %v1108_v8 = vstv %s3507_s2  ;;  %v1118_v10 = vstv %s3511_s30  ;;  %s3577_s26 = sld [smem:[#allocation3 + $0x184]] }
  0x8b   : > { %v724_v5 = vadd.f32 %v723_v34, %v721_v43  ;;  %v1093_v16 = vadd.f32 %v1089_v59, %v1083_v44  ;;  %v1094_v17 = vadd.f32 %v1090_v63, %v1084_v45  ;;  %v1095_v18 = vadd.f32 %v1091_v3, %v1085_v11  ;;  %s3588_s2 = sld [smem:[#allocation3 + $0x185]] }
  0x8c   : > { %v1096_v20 = vadd.f32 %v1092_v4, %v1086_v54  ;;  %v1099_v28 = vmul.f32 %v1098_v23, %v3309_v50  ;;  %v1100_v29 = vmul.f32 %v1098_v23, %v3312_v51  ;;  %v1101_v30 = vmul.f32 %v1098_v23, %v3315_v56  ;;  %s3594_s30 = sld [smem:[#allocation3 + $0x186]] }
  0x8d   : > { %v725_v27 = vadd.f32 %v724_v5, %v722_v42  ;;  %v1102_v31 = vmul.f32 %v1098_v23, %v3318_v57  ;;  %v1109_v32 = vmul.f32 %v1108_v8, %v3321_v58  ;;  %v1110_v33 = vmul.f32 %v1108_v8, %v3326_v60 }
  0x8e   : > { %v1111_v6 = vmul.f32 %v1108_v8, %v3329_v61  ;;  %v1103_v43 = vadd.f32 %v1099_v28, %v1093_v16  ;;  %v1104_v44 = vadd.f32 %v1100_v29, %v1094_v17  ;;  %v1105_v42 = vadd.f32 %v1101_v30, %v1095_v18 }
  0x8f   : > { %726 = vadd.xlane.f32.xlu0 %v725_v27  ;;  %v1112_v45 = vmul.f32 %v1108_v8, %v3332_v62  ;;  %v1106_v34 = vadd.f32 %v1102_v31, %v1096_v20  ;;  %v1119_v11 = vmul.f32 %v1118_v10, %v3347_v7  ;;  %v1120_v54 = vmul.f32 %v1118_v10, %v3352_v12 }
  0x90   : > { %v1121_v55 = vmul.f32 %v1118_v10, %v3355_v13  ;;  %v1113_v59 = vadd.f32 %v1109_v32, %v1103_v43  ;;  %v1114_v63 = vadd.f32 %v1110_v33, %v1104_v44  ;;  %v1115_v3 = vadd.f32 %v1111_v6, %v1105_v42 }
  0x91   : > { %v1122_v4 = vmul.f32 %v1118_v10, %v3358_v14  ;;  %v1116_v5 = vadd.f32 %v1112_v45, %v1106_v34  ;;  %v1128_v23 = vstv %s3521_s14  ;;  %v1138_v8 = vstv %s3524_s22  ;;  %s3602_s14 = sld [smem:[#allocation3 + $0x187]] }
  0x92   : > { %v1148_v16 = vstv %s3530_s24  ;;  %v1123_v17 = vadd.f32 %v1119_v11, %v1113_v59  ;;  %v1124_v18 = vadd.f32 %v1120_v54, %v1114_v63  ;;  %v1125_v20 = vadd.f32 %v1121_v55, %v1115_v3  ;;  %s3608_s22 = sld [smem:[#allocation3 + $0x188]] }
  0x93   : > { %v1129_v27 = vmul.f32 %v1128_v23, %v3365_v19  ;;  %v1126_v28 = vadd.f32 %v1122_v4, %v1116_v5  ;;  %v1130_v29 = vmul.f32 %v1128_v23, %v3372_v24  ;;  %v1131_v30 = vmul.f32 %v1128_v23, %v3375_v25  ;;  %s3610_s24 = sld [smem:[#allocation3 + $0x80]] }
  0x94   : > { %v1132_v31 = vmul.f32 %v1128_v23, %v3378_v26  ;;  %v1139_v10 = vmul.f32 %v1138_v8, %v3385_v35  ;;  %v1140_v33 = vmul.f32 %v1138_v8, %v3388_v40  ;;  %v1141_v6 = vmul.f32 %v1138_v8, %v3391_v49 }
  0x95   : > { %v1133_v32 = vadd.f32 %v1129_v27, %v1123_v17  ;;  %v1134_v43 = vadd.f32 %v1130_v29, %v1124_v18  ;;  %v1135_v44 = vadd.f32 %v1131_v30, %v1125_v20  ;;  %v1142_v45 = vmul.f32 %v1138_v8, %v3394_v52 }
  0x96   : > { %v1136_v42 = vadd.f32 %v1132_v31, %v1126_v28  ;;  %v1149_v11 = vmul.f32 %v1148_v16, %v3397_v53  ;;  %v1150_v54 = vmul.f32 %v1148_v16, %v3406_v0  ;;  %v1151_v55 = vmul.f32 %v1148_v16, %v3409_v1 }
  0x97   : > { %v1143_v34 = vadd.f32 %v1139_v10, %v1133_v32  ;;  %v1144_v59 = vadd.f32 %v1140_v33, %v1134_v43  ;;  %v1145_v63 = vadd.f32 %v1141_v6, %v1135_v44  ;;  %v1152_v4 = vmul.f32 %v1148_v16, %v3412_v2 }
  0x98   : > { %v1146_v3 = vadd.f32 %v1142_v45, %v1136_v42  ;;  %v1158_v23 = vstv %s3543_s25  ;;  %v964_v8 = vstv %s3548_s12  ;;  %v970_v17 = vstv %s3551_s13  ;;  %s3623_s25 = sld [smem:[#allocation6 + $0x1]] }
  0x99   : > { %v1153_v5 = vadd.f32 %v1149_v11, %v1143_v34  ;;  %v1154_v18 = vadd.f32 %v1150_v54, %v1144_v59  ;;  %v1155_v20 = vadd.f32 %v1151_v55, %v1145_v63  ;;  %v1159_v28 = vmul.f32 %v1158_v23, %v3423_v15  ;;  %s3628_s12 = sld [smem:[#allocation3 + $0x81]] }
  0x9a   : > { %v1156_v27 = vadd.f32 %v1152_v4, %v1146_v3  ;;  %v1160_v29 = vmul.f32 %v1158_v23, %v3428_v21  ;;  %v1161_v30 = vmul.f32 %v1158_v23, %v3431_v22  ;;  %v1162_v31 = vmul.f32 %v1158_v23, %v4778_v9  ;;  %s3631_s13 = sld [smem:[#allocation3 + $0x82]] }
  0x9b   : > { %v965_v16 = vmul.f32 %v964_v8, %v3273_v36  ;;  %v1163_v32 = vadd.f32 %v1159_v28, %v1153_v5  ;;  %v966_v10 = vmul.f32 %v964_v8, %v3278_v37  ;;  %v967_v33 = vmul.f32 %v964_v8, %v3281_v38 }
  0x9c   : > { %v968_v6 = vmul.f32 %v964_v8, %v3284_v39  ;;  %v1164_v43 = vadd.f32 %v1160_v29, %v1154_v18  ;;  %v1165_v44 = vadd.f32 %v1161_v30, %v1155_v20  ;;  %v1166_v42 = vadd.f32 %v1162_v31, %v1156_v27 }
  0x9d   : > { %v971_v45 = vadd.f32 %v970_v17, %v965_v16  ;;  %v1167_v34 = vmax.f32 %v1163_v32, 0.0  ;;  %v972_v11 = vadd.f32 %v970_v17, %v966_v10  ;;  %v973_v54 = vadd.f32 %v970_v17, %v967_v33 }
  0x9e   : > { %v974_v55 = vadd.f32 %v970_v17, %v968_v6  ;;  %v1168_v59 = vmax.f32 %v1164_v43, 0.0  ;;  %v1169_v63 = vmax.f32 %v1165_v44, 0.0  ;;  %v1170_v3 = vmax.f32 %v1166_v42, 0.0 }
  0x9f   : > { %v976_v4 = vstv %s3564_s15  ;;  %v986_v27 = vstv %s3569_s16  ;;  %v996_v28 = vstv %s3572_s23  ;;  %v1006_v17 = vstv %s3577_s26  ;;  %s3636_s15 = sld [smem:[#allocation3 + $0x83]] }
  0xa0   : > { %v977_v5 = vmul.f32 %v976_v4, %v3293_v41  ;;  %v978_v23 = vmul.f32 %v976_v4, %v3300_v46  ;;  %v979_v8 = vmul.f32 %v976_v4, %v3303_v47  ;;  %v980_v18 = vmul.f32 %v976_v4, %v3306_v48  ;;  %s3639_s16 = sld [smem:[#allocation3 + $0x84]] }
  0xa1   : > { %v1171_v20 = vadd.f32 %v1168_v59, %v1167_v34  ;;  %v987_v10 = vmul.f32 %v986_v27, %v3309_v50  ;;  %v988_v33 = vmul.f32 %v986_v27, %v3312_v51  ;;  %v989_v6 = vmul.f32 %v986_v27, %v3315_v56  ;;  %s3657_s23 = sld [smem:[#allocation3 + $0x85]] }
  0xa2   : > { %v981_v29 = vadd.f32 %v977_v5, %v971_v45  ;;  %v982_v30 = vadd.f32 %v978_v23, %v972_v11  ;;  %v983_v31 = vadd.f32 %v979_v8, %v973_v54  ;;  %v984_v16 = vadd.f32 %v980_v18, %v974_v55  ;;  %s3666_s26 = sld [smem:[#allocation3 + $0x86]] }
  0xa3   : > { %v1172_v32 = vadd.f32 %v1171_v20, %v1169_v63  ;;  %v990_v43 = vmul.f32 %v986_v27, %v3318_v57  ;;  %v997_v44 = vmul.f32 %v996_v28, %v3321_v58  ;;  %v998_v42 = vmul.f32 %v996_v28, %v3326_v60 }
  0xa4   : > { %v999_v45 = vmul.f32 %v996_v28, %v3329_v61  ;;  %v991_v11 = vadd.f32 %v987_v10, %v981_v29  ;;  %v992_v54 = vadd.f32 %v988_v33, %v982_v30  ;;  %v993_v55 = vadd.f32 %v989_v6, %v983_v31 }
  0xa5   : > { %v1173_v34 = vadd.f32 %v1172_v32, %v1170_v3  ;;  %v994_v59 = vadd.f32 %v990_v43, %v984_v16  ;;  %v1000_v63 = vmul.f32 %v996_v28, %v3332_v62  ;;  %v1007_v4 = vmul.f32 %v1006_v17, %v3347_v7 }
  0xa6   : > { %v1008_v5 = vmul.f32 %v1006_v17, %v3352_v12  ;;  %v1001_v23 = vadd.f32 %v997_v44, %v991_v11  ;;  %v1002_v8 = vadd.f32 %v998_v42, %v992_v54  ;;  %v1003_v18 = vadd.f32 %v999_v45, %v993_v55 }
  0xa7   : > { %1174 = vadd.xlane.f32.xlu2 %v1173_v34  ;;  %v1009_v3 = vmul.f32 %v1006_v17, %v3355_v13  ;;  %v1004_v20 = vadd.f32 %v1000_v63, %v994_v59  ;;  %v1010_v27 = vmul.f32 %v1006_v17, %v3358_v14  ;;  %v1016_v29 = vstv %s3588_s2  ;;  %s3668_s2 = sld [smem:[#allocation3 + $0x87]] }
  0xa8   : > { %v1026_v30 = vstv %s3594_s30  ;;  %v1011_v31 = vadd.f32 %v1007_v4, %v1001_v23  ;;  %v1012_v32 = vadd.f32 %v1008_v5, %v1002_v8  ;;  %v1017_v28 = vmul.f32 %v1016_v29, %v3365_v19  ;;  %s3676_s30 = sld [smem:[#allocation3 + $0x88]] }
  0xa9   : > { %v1013_v16 = vadd.f32 %v1009_v3, %v1003_v18  ;;  %v1014_v10 = vadd.f32 %v1010_v27, %v1004_v20  ;;  %v1018_v33 = vmul.f32 %v1016_v29, %v3372_v24  ;;  %v1019_v6 = vmul.f32 %v1016_v29, %v3375_v25 }
  0xaa   : > { %v1020_v43 = vmul.f32 %v1016_v29, %v3378_v26  ;;  %v1021_v17 = vadd.f32 %v1017_v28, %v1011_v31  ;;  %v1027_v44 = vmul.f32 %v1026_v30, %v3385_v35  ;;  %v1028_v42 = vmul.f32 %v1026_v30, %v3388_v40 }
  0xab   : > { %v1029_v45 = vmul.f32 %v1026_v30, %v3391_v49  ;;  %v1022_v34 = vadd.f32 %v1018_v33, %v1012_v32  ;;  %v1023_v11 = vadd.f32 %v1019_v6, %v1013_v16  ;;  %v1030_v55 = vmul.f32 %v1026_v30, %v3394_v52 }
  0xac   : > { %v1024_v54 = vadd.f32 %v1020_v43, %v1014_v10  ;;  %v1031_v59 = vadd.f32 %v1027_v44, %v1021_v17  ;;  %v1036_v63 = vstv %s3602_s14  ;;  %v1046_v4 = vstv %s3608_s22  ;;  %s3680_s14 = sld [smem:[#allocation3 + $0x280]] }
  0xad   : > { %v740_v5 = vstv %s3610_s24  ;;  %v1032_v23 = vadd.f32 %v1028_v42, %v1022_v34  ;;  %v1033_v8 = vadd.f32 %v1029_v45, %v1023_v11  ;;  %v1037_v3 = vmul.f32 %v1036_v63, %v3397_v53  ;;  %s3690_s22 = sld [smem:[#allocation6 + $0x5]] }
  0xae   : > { %v1034_v18 = vadd.f32 %v1030_v55, %v1024_v54  ;;  %v1038_v20 = vmul.f32 %v1036_v63, %v3406_v0  ;;  %v1039_v27 = vmul.f32 %v1036_v63, %v3409_v1  ;;  %v1040_v29 = vmul.f32 %v1036_v63, %v3412_v2  ;;  %s3694_s24 = sld [smem:[#allocation3 + $0x281]] }
  0xaf   : > { %v1047_v30 = vmul.f32 %v1046_v4, %v3423_v15  ;;  %v1041_v31 = vadd.f32 %v1037_v3, %v1031_v59  ;;  %v1048_v32 = vmul.f32 %v1046_v4, %v3428_v21  ;;  %v1049_v16 = vmul.f32 %v1046_v4, %v3431_v22 }
  0xb0   : > { %v1050_v28 = vmul.f32 %v1046_v4, %v4778_v9  ;;  %v1042_v10 = vadd.f32 %v1038_v20, %v1032_v23  ;;  %v1043_v33 = vadd.f32 %v1039_v27, %v1033_v8  ;;  %v1044_v6 = vadd.f32 %v1040_v29, %v1034_v18 }
  0xb1   : > { %v741_v43 = vmul.f32 %v740_v5, %v3273_v36  ;;  %v1051_v17 = vadd.f32 %v1047_v30, %v1041_v31  ;;  %v742_v44 = vmul.f32 %v740_v5, %v3278_v37  ;;  %v743_v42 = vmul.f32 %v740_v5, %v3281_v38 }
  0xb2   : > { %v744_v45 = vmul.f32 %v740_v5, %v3284_v39  ;;  %v1052_v34 = vadd.f32 %v1048_v32, %v1042_v10  ;;  %v1053_v11 = vadd.f32 %v1049_v16, %v1043_v33  ;;  %v1054_v54 = vadd.f32 %v1050_v28, %v1044_v6 }
  0xb3   : > { %v746_v55 = vstv %s3623_s25  ;;  %v1055_v59 = vmax.f32 %v1051_v17, 0.0  ;;  %v752_v37 = vstv %s3628_s12  ;;  %v762_v20 = vstv %s3631_s13  ;;  %s3704_s25 = sld [smem:[#allocation3 + $0x282]] }
  0xb4   : > { %v747_v63 = vadd.f32 %v746_v55, %v741_v43  ;;  %v748_v4 = vadd.f32 %v746_v55, %v742_v44  ;;  %v749_v23 = vadd.f32 %v746_v55, %v743_v42  ;;  %v1056_v36 = vmax.f32 %v1052_v34, 0.0  ;;  %s3718_s12 = sld [smem:[#allocation3 + $0x283]] }
  0xb5   : > { %v1057_v8 = vmax.f32 %v1053_v11, 0.0  ;;  %v1058_v18 = vmax.f32 %v1054_v54, 0.0  ;;  %v750_v3 = vadd.f32 %v746_v55, %v744_v45  ;;  %v772_v27 = vstv %s3636_s15  ;;  %s3730_s13 = sld [smem:[#allocation3 + $0x284]] }
  0xb6   : > { %v782_v38 = vstv %s3639_s16  ;;  %v1059_v39 = vadd.f32 %v1056_v36, %v1055_v59  ;;  %v753_v5 = vmul.f32 %v752_v37, %v3293_v41  ;;  %v754_v29 = vmul.f32 %v752_v37, %v3300_v46  ;;  %s3736_s15 = sld [smem:[#allocation3 + $0x285]] }
  0xb7   : > { %v755_v30 = vmul.f32 %v752_v37, %v3303_v47  ;;  %v756_v31 = vmul.f32 %v752_v37, %v3306_v48  ;;  %v763_v32 = vmul.f32 %v762_v20, %v3309_v50  ;;  %v764_v16 = vmul.f32 %v762_v20, %v3312_v51  ;;  %s3751_s16 = sld [smem:[#allocation3 + $0x286]] }
  0xb8   : > { %v765_v28 = vmul.f32 %v762_v20, %v3315_v56  ;;  %v1060_v10 = vadd.f32 %v1059_v39, %v1057_v8  ;;  %v757_v33 = vadd.f32 %v753_v5, %v747_v63  ;;  %v758_v6 = vadd.f32 %v754_v29, %v748_v4 }
  0xb9   : > { %v759_v43 = vadd.f32 %v755_v30, %v749_v23  ;;  %v760_v41 = vadd.f32 %v756_v31, %v750_v3  ;;  %v766_v46 = vmul.f32 %v762_v20, %v3318_v57  ;;  %v773_v47 = vmul.f32 %v772_v27, %v3321_v58 }
  0xba   : > { %v774_v48 = vmul.f32 %v772_v27, %v3326_v60  ;;  %v1061_v50 = vadd.f32 %v1060_v10, %v1058_v18  ;;  %v767_v17 = vadd.f32 %v763_v32, %v757_v33  ;;  %v768_v51 = vadd.f32 %v764_v16, %v758_v6  ;;  %v3711_v6 = vld [vmem:[%s3262_s27] sm:$0xff] }
  0xbb   : > { %v769_v56 = vadd.f32 %v765_v28, %v759_v43  ;;  %v770_v44 = vadd.f32 %v766_v46, %v760_v41  ;;  %v775_v42 = vmul.f32 %v772_v27, %v3329_v61  ;;  %v776_v45 = vmul.f32 %v772_v27, %v3332_v62  ;;  %v3715_v41 = vld [vmem:[%s3262_s27 + $0x8] sm:$0xff] }
  0xbc   : > { %v783_v34 = vmul.f32 %v782_v38, %v3347_v7  ;;  %1062 = vadd.xlane.f32.xlu1 %v1061_v50  ;;  %v777_v57 = vadd.f32 %v773_v47, %v767_v17  ;;  %v778_v11 = vadd.f32 %v774_v48, %v768_v51  ;;  %v784_v58 = vmul.f32 %v782_v38, %v3352_v12  ;;  %v3721_v47 = vld [vmem:[%s3262_s27 + $0x10] sm:$0xff] }
  0xbd   : > { %v785_v60 = vmul.f32 %v782_v38, %v3355_v13  ;;  %v779_v54 = vadd.f32 %v775_v42, %v769_v56  ;;  %v780_v55 = vadd.f32 %v776_v45, %v770_v44  ;;  %v786_v61 = vmul.f32 %v782_v38, %v3358_v14 }
  0xbe   : > { %v792_v62 = vstv %s3657_s23  ;;  %v787_v59 = vadd.f32 %v783_v34, %v777_v57  ;;  %v788_v7 = vadd.f32 %v784_v58, %v778_v11  ;;  %v802_v3 = vstv %s3666_s26  ;;  %s3770_s23 = sld [smem:[#allocation3 + $0x287]] }
  0xbf   : > { %v793_v63 = vmul.f32 %v792_v62, %v3365_v19  ;;  %v794_v4 = vmul.f32 %v792_v62, %v3372_v24  ;;  %v789_v23 = vadd.f32 %v785_v60, %v779_v54  ;;  %v790_v36 = vadd.f32 %v786_v61, %v780_v55  ;;  %v3733_v60 = vld [vmem:[%s3262_s27 + $0x20] sm:$0xff]  ;;  %v3739_v55 = vld [vmem:[%s3262_s27 + $0x28] sm:$0xff]  ;;  %s3780_s26 = sld [smem:[#allocation3 + $0x288]] }
  0xc0   : > { %v795_v12 = vmul.f32 %v792_v62, %v3375_v25  ;;  %v796_v13 = vmul.f32 %v792_v62, %v3378_v26  ;;  %v812_v37 = vstv %s3668_s2  ;;  %v803_v19 = vmul.f32 %v802_v3, %v3385_v35  ;;  %v3743_v62 = vld [vmem:[%s3262_s27 + $0x30] sm:$0xff]  ;;  %s3809_s2 = sld [smem:[#allocation3 + $0x380]] }
  0xc1   : > { %v797_v8 = vadd.f32 %v793_v63, %v787_v59  ;;  %v798_v18 = vadd.f32 %v794_v4, %v788_v7  ;;  %v804_v24 = vmul.f32 %v802_v3, %v3388_v40  ;;  %v805_v25 = vmul.f32 %v802_v3, %v3391_v49  ;;  %v3747_v7 = vld [vmem:[%s3262_s27 + $0x38] sm:$0xff] }
  0xc2   : > { %v799_v14 = vadd.f32 %v795_v12, %v789_v23  ;;  %v800_v20 = vadd.f32 %v796_v13, %v790_v36  ;;  %v806_v26 = vmul.f32 %v802_v3, %v3394_v52  ;;  %v813_v27 = vmul.f32 %v812_v37, %v3397_v53  ;;  %v3754_v12 = vld [vmem:[%s3262_s27 + $0x40] sm:$0xff] }
  0xc3   : > { %v814_v38 = vmul.f32 %v812_v37, %v3406_v0  ;;  %v807_v39 = vadd.f32 %v803_v19, %v797_v8  ;;  %v808_v5 = vadd.f32 %v804_v24, %v798_v18  ;;  %v815_v29 = vmul.f32 %v812_v37, %v3409_v1  ;;  %v3758_v8 = vld [vmem:[%s3262_s27 + $0x48] sm:$0xff] }
  0xc4   : > { %v816_v30 = vmul.f32 %v812_v37, %v3412_v2  ;;  %v809_v35 = vadd.f32 %v805_v25, %v799_v14  ;;  %v810_v31 = vadd.f32 %v806_v26, %v800_v20  ;;  %v822_v40 = vstv %s3676_s30  ;;  %4779 = vst [vmem:[#allocation14_spill] sm:$0xff] %v3758_v8  ;;  %v3762_v20 = vld [vmem:[%s3262_s27 + $0x50] sm:$0xff]  ;;  %v3766_v25 = vld [vmem:[%s3262_s27 + $0x58] sm:$0xff]  ;;  %s3819_s30 = sld [smem:[#allocation6 + $0x7]] }
  0xc5   : > { %v1188_v32 = vstv %s3680_s14  ;;  %v817_v49 = vadd.f32 %v813_v27, %v807_v39  ;;  %v818_v52 = vadd.f32 %v814_v38, %v808_v5  ;;  %v823_v53 = vmul.f32 %v822_v40, %v3423_v15  ;;  %4780 = vst [vmem:[#allocation15_spill] sm:$0xff] %v3762_v20  ;;  %s3847_s14 = sld [smem:[#allocation3 + $0x381]] }
  0xc6   : > { %v824_v0 = vmul.f32 %v822_v40, %v3428_v21  ;;  %v819_v16 = vadd.f32 %v815_v29, %v809_v35  ;;  %v820_v1 = vadd.f32 %v816_v30, %v810_v31  ;;  %v825_v2 = vmul.f32 %v822_v40, %v3431_v22  ;;  %v3773_v29 = vld [vmem:[%s3262_s27 + $0x60] sm:$0xff]  ;;  %v3777_v35 = vld [vmem:[%s3262_s27 + $0x68] sm:$0xff] }
  0xc7   : > { %v826_v28 = vmul.f32 %v822_v40, %v4778_v9  ;;  %v827_v10 = vadd.f32 %v823_v53, %v817_v49  ;;  %v1189_v43 = vmul.f32 %v3711_v6, %v1188_v32  ;;  %v1190_v15 = vmul.f32 %v3715_v41, %v1188_v32  ;;  %v3725_v9 = vld [vmem:[%s3262_s27 + $0x18] sm:$0xff] }
  0xc8   : > { %v828_v33 = vadd.f32 %v824_v0, %v818_v52  ;;  %v829_v21 = vadd.f32 %v825_v2, %v819_v16  ;;  %v1191_v22 = vmul.f32 %v3721_v47, %v1188_v32  ;;  %v1192_v48 = vmul.f32 %v3725_v9, %v1188_v32  ;;  %v3783_v32 = vld [vmem:[%s3262_s27 + $0x70] sm:$0xff]  ;;  %v3787_v52 = vld [vmem:[%s3262_s27 + $0x78] sm:$0xff]  ;;  %v3792_v2 = vld [vmem:[%s3262_s27 + $0x80] sm:$0xff] }
  0xc9   : > { %v830_v46 = vadd.f32 %v826_v28, %v820_v1  ;;  %v831_v50 = vmax.f32 %v827_v10, 0.0  ;;  %v1194_v51 = vstv %s3690_s22  ;;  %v1200_v56 = vstv %s3694_s24  ;;  %v3796_v10 = vld [vmem:[%s3262_s27 + $0x88] sm:$0xff]  ;;  %s3857_s22 = sld [smem:[#allocation3 + $0x382]] }
  0xca   : > { %v832_v17 = vmax.f32 %v828_v33, 0.0  ;;  %v833_v44 = vmax.f32 %v829_v21, 0.0  ;;  %v1195_v45 = vadd.f32 %v1194_v51, %v1189_v43  ;;  %v1196_v34 = vadd.f32 %v1194_v51, %v1190_v15  ;;  %v3800_v21 = vld [vmem:[%s3262_s27 + $0x90] sm:$0xff]  ;;  %s3867_s24 = sld [smem:[#allocation3 + $0x383]] }
  0xcb   : > { %v834_v42 = vmax.f32 %v830_v46, 0.0  ;;  %v1197_v11 = vadd.f32 %v1194_v51, %v1191_v22  ;;  %v1198_v58 = vadd.f32 %v1194_v51, %v1192_v48  ;;  %v1201_v54 = vmul.f32 %v3733_v60, %v1200_v56  ;;  %v3804_v22 = vld [vmem:[%s3262_s27 + $0x98] sm:$0xff] }
  0xcc   : > { %v835_v57 = vadd.f32 %v832_v17, %v831_v50  ;;  %v1202_v61 = vmul.f32 %v3739_v55, %v1200_v56  ;;  %v1203_v59 = vmul.f32 %v3743_v62, %v1200_v56  ;;  %v1204_v63 = vmul.f32 %v3747_v7, %v1200_v56 }
  0xcd   : > { %v1210_v4 = vstv %s3704_s25  ;;  %v1205_v36 = vadd.f32 %v1201_v54, %v1195_v45  ;;  %v1220_v38 = vstv %s3718_s12  ;;  %v1230_v0 = vstv %s3730_s13  ;;  %v3812_v45 = vld [vmem:[%s3262_s27 + $0xa0] sm:$0xff]  ;;  %s3877_s25 = sld [smem:[#allocation3 + $0x384]] }
  0xce   : > { %v836_v23 = vadd.f32 %v835_v57, %v833_v44  ;;  %v1211_v13 = vmul.f32 %v3754_v12, %v1210_v4  ;;  %v1212_v18 = vmul.f32 %v3758_v8, %v1210_v4  ;;  %v1206_v3 = vadd.f32 %v1202_v61, %v1196_v34  ;;  %v3816_v57 = vld [vmem:[%s3262_s27 + $0xa8] sm:$0xff]  ;;  %v3826_v61 = vld [vmem:[%s3262_s27 + $0xb8] sm:$0xff]  ;;  %s3893_s12 = sld [smem:[#allocation3 + $0x385]] }
  0xcf   : > { %v1207_v37 = vadd.f32 %v1203_v59, %v1197_v11  ;;  %v1208_v14 = vadd.f32 %v1204_v63, %v1198_v58  ;;  %v1213_v19 = vmul.f32 %v3762_v20, %v1210_v4  ;;  %v1214_v26 = vmul.f32 %v3766_v25, %v1210_v4  ;;  %v3822_v58 = vld [vmem:[%s3262_s27 + $0xb0] sm:$0xff]  ;;  %v3830_v63 = vld [vmem:[%s3262_s27 + $0xc0] sm:$0xff]  ;;  %s3896_s13 = sld [smem:[#allocation3 + $0x386]] }
  0xd0   : > { %v837_v24 = vadd.f32 %v836_v23, %v834_v42  ;;  %v1215_v27 = vadd.f32 %v1211_v13, %v1205_v36  ;;  %v1216_v39 = vadd.f32 %v1212_v18, %v1206_v3  ;;  %v1221_v30 = vmul.f32 %v3773_v29, %v1220_v38  ;;  %v3834_v23 = vld [vmem:[%s3262_s27 + $0xc8] sm:$0xff]  ;;  %v3838_v3 = vld [vmem:[%s3262_s27 + $0xd0] sm:$0xff] }
  0xd1   : > { %v1217_v5 = vadd.f32 %v1213_v19, %v1207_v37  ;;  %v1222_v31 = vmul.f32 %v3777_v35, %v1220_v38  ;;  %v1218_v40 = vadd.f32 %v1214_v26, %v1208_v14  ;;  %v1223_v49 = vmul.f32 %v3783_v32, %v1220_v38  ;;  %v3842_v14 = vld [vmem:[%s3262_s27 + $0xd8] sm:$0xff] }
  0xd2   : > { %838 = vadd.xlane.f32.xlu0 %v837_v24  ;;  %v1224_v53 = vmul.f32 %v3787_v52, %v1220_v38  ;;  %v1225_v16 = vadd.f32 %v1221_v30, %v1215_v27  ;;  %v1231_v28 = vmul.f32 %v3792_v2, %v1230_v0  ;;  %v1232_v33 = vmul.f32 %v3796_v10, %v1230_v0  ;;  %v3850_v30 = vld [vmem:[%s3262_s27 + $0xe0] sm:$0xff] }
  0xd3   : > { %v1226_v1 = vadd.f32 %v1222_v31, %v1216_v39  ;;  %v1227_v43 = vadd.f32 %v1223_v49, %v1217_v5  ;;  %v1233_v46 = vmul.f32 %v3800_v21, %v1230_v0  ;;  %v1234_v48 = vmul.f32 %v3804_v22, %v1230_v0 }
  0xd4   : > { %v1228_v15 = vadd.f32 %v1224_v53, %v1218_v40  ;;  %v1235_v50 = vadd.f32 %v1231_v28, %v1225_v16  ;;  %v1240_v51 = vstv %s3736_s15  ;;  %v1250_v56 = vstv %s3751_s16  ;;  %v3854_v40 = vld [vmem:[%s3262_s27 + $0xe8] sm:$0xff]  ;;  %v3860_v16 = vld [vmem:[%s3262_s27 + $0xf0] sm:$0xff]  ;;  %s3902_s15 = sld [smem:[#allocation3 + $0x387]] }
  0xd5   : > { %v1236_v17 = vadd.f32 %v1232_v33, %v1226_v1  ;;  %v1237_v44 = vadd.f32 %v1233_v46, %v1227_v43  ;;  %v1241_v34 = vmul.f32 %v3812_v45, %v1240_v51  ;;  %v1242_v11 = vmul.f32 %v3816_v57, %v1240_v51  ;;  %v3864_v28 = vld [vmem:[%s3262_s27 + $0xf8] sm:$0xff]  ;;  %v3870_v46 = vld [vmem:[%s3262_s27 + $0x100] sm:$0xff]  ;;  %s3915_s16 = sld [smem:[#allocation3 + $0x388]] }
  0xd6   : > { %v1238_v42 = vadd.f32 %v1234_v48, %v1228_v15  ;;  %v1243_v54 = vmul.f32 %v3822_v58, %v1240_v51  ;;  %v1244_v59 = vmul.f32 %v3826_v61, %v1240_v51  ;;  %v1251_v4 = vmul.f32 %v3830_v63, %v1250_v56 }
  0xd7   : > { %v1252_v36 = vmul.f32 %v3834_v23, %v1250_v56  ;;  %v1245_v13 = vadd.f32 %v1241_v34, %v1235_v50  ;;  %v1246_v18 = vadd.f32 %v1242_v11, %v1236_v17  ;;  %v1253_v37 = vmul.f32 %v3838_v3, %v1250_v56  ;;  %v3874_v50 = vld [vmem:[%s3262_s27 + $0x108] sm:$0xff]  ;;  %v3884_v34 = vld [vmem:[%s3262_s27 + $0x118] sm:$0xff] }
  0xd8   : > { %v1254_v19 = vmul.f32 %v3842_v14, %v1250_v56  ;;  %v1247_v24 = vadd.f32 %v1243_v54, %v1237_v44  ;;  %v1248_v26 = vadd.f32 %v1244_v59, %v1238_v42  ;;  %v1260_v27 = vstv %s3770_s23  ;;  %v3880_v44 = vld [vmem:[%s3262_s27 + $0x110] sm:$0xff]  ;;  %s3920_s23 = sld [smem:[#allocation3 + $0x300]] }
  0xd9   : > { %v1270_v38 = vstv %s3780_s26  ;;  %v1255_v39 = vadd.f32 %v1251_v4, %v1245_v13  ;;  %v1256_v5 = vadd.f32 %v1252_v36, %v1246_v18  ;;  %v1261_v31 = vmul.f32 %v3850_v30, %v1260_v27  ;;  %s3923_s26 = sld [smem:[#allocation6 + $0x6]] }
  0xda   : > { %v1262_v49 = vmul.f32 %v3854_v40, %v1260_v27  ;;  %v1257_v53 = vadd.f32 %v1253_v37, %v1247_v24  ;;  %v1258_v0 = vadd.f32 %v1254_v19, %v1248_v26  ;;  %v1263_v1 = vmul.f32 %v3860_v16, %v1260_v27 }
  0xdb   : > { %v1264_v33 = vmul.f32 %v3864_v28, %v1260_v27  ;;  %v1265_v43 = vadd.f32 %v1261_v31, %v1255_v39  ;;  %v1271_v48 = vmul.f32 %v3870_v46, %v1270_v38  ;;  %v1272_v17 = vmul.f32 %v3874_v50, %v1270_v38 }
  0xdc   : > { %v1266_v15 = vadd.f32 %v1262_v49, %v1256_v5  ;;  %v1267_v51 = vadd.f32 %v1263_v1, %v1257_v53  ;;  %v1273_v42 = vmul.f32 %v3880_v44, %v1270_v38  ;;  %v1274_v11 = vmul.f32 %v3884_v34, %v1270_v38 }
  0xdd   : > { %v1268_v56 = vadd.f32 %v1264_v33, %v1258_v0  ;;  %v1275_v54 = vadd.f32 %v1271_v48, %v1265_v43  ;;  %v1412_v4 = vstv %s3809_s2  ;;  %v1418_v36 = vstv %s3819_s30  ;;  %s3936_s2 = sld [smem:[#allocation3 + $0x301]] }
  0xde   : > { %v1276_v59 = vadd.f32 %v1272_v17, %v1266_v15  ;;  %v1277_v13 = vadd.f32 %v1273_v42, %v1267_v51  ;;  %v1413_v37 = vmul.f32 %v3711_v6, %v1412_v4  ;;  %v1414_v19 = vmul.f32 %v3715_v41, %v1412_v4  ;;  %s3941_s30 = sld [smem:[#allocation3 + $0x302]] }
  0xdf   : > { %v1278_v18 = vadd.f32 %v1274_v11, %v1268_v56  ;;  %v1279_v24 = vmax.f32 %v1275_v54, 0.0  ;;  %v1415_v27 = vmul.f32 %v3721_v47, %v1412_v4  ;;  %v1416_v39 = vmul.f32 %v3725_v9, %v1412_v4 }
  0xe0   : > { %v1280_v26 = vmax.f32 %v1276_v59, 0.0  ;;  %v1281_v5 = vmax.f32 %v1277_v13, 0.0  ;;  %v1419_v31 = vadd.f32 %v1418_v36, %v1413_v37  ;;  %v1420_v49 = vadd.f32 %v1418_v36, %v1414_v19 }
  0xe1   : > { %v1282_v38 = vmax.f32 %v1278_v18, 0.0  ;;  %v1421_v0 = vadd.f32 %v1418_v36, %v1415_v27  ;;  %v1422_v1 = vadd.f32 %v1418_v36, %v1416_v39  ;;  %v1424_v33 = vstv %s3847_s14  ;;  %s3944_s14 = sld [smem:[#allocation3 + $0x303]] }
  0xe2   : > { %v1283_v53 = vadd.f32 %v1280_v26, %v1279_v24  ;;  %v1425_v43 = vmul.f32 %v3733_v60, %v1424_v33  ;;  %v1426_v15 = vmul.f32 %v3739_v55, %v1424_v33  ;;  %v1427_v48 = vmul.f32 %v3743_v62, %v1424_v33 }
  0xe3   : > { %v1428_v17 = vmul.f32 %v3747_v7, %v1424_v33  ;;  %v1434_v56 = vstv %s3857_s22  ;;  %v1444_v42 = vstv %s3867_s24  ;;  %v1454_v11 = vstv %s3877_s25  ;;  %s3949_s22 = sld [smem:[#allocation3 + $0x304]] }
  0xe4   : > { %v1284_v51 = vadd.f32 %v1283_v53, %v1281_v5  ;;  %v1429_v54 = vadd.f32 %v1425_v43, %v1419_v31  ;;  %v1430_v59 = vadd.f32 %v1426_v15, %v1420_v49  ;;  %v1431_v4 = vadd.f32 %v1427_v48, %v1421_v0  ;;  %s3960_s24 = sld [smem:[#allocation3 + $0x305]] }
  0xe5   : > { %v1432_v36 = vadd.f32 %v1428_v17, %v1422_v1  ;;  %v1435_v18 = vmul.f32 %v3754_v12, %v1434_v56  ;;  %v1436_v37 = vmul.f32 %v3758_v8, %v1434_v56  ;;  %v1437_v19 = vmul.f32 %v3762_v20, %v1434_v56  ;;  %s3966_s25 = sld [smem:[#allocation3 + $0x306]] }
  0xe6   : > { %v1285_v13 = vadd.f32 %v1284_v51, %v1282_v38  ;;  %v1438_v24 = vmul.f32 %v3766_v25, %v1434_v56  ;;  %v1445_v26 = vmul.f32 %v3773_v29, %v1444_v42  ;;  %v1446_v27 = vmul.f32 %v3777_v35, %v1444_v42 }
  0xe7   : > { %v1447_v39 = vmul.f32 %v3783_v32, %v1444_v42  ;;  %v1439_v5 = vadd.f32 %v1435_v18, %v1429_v54  ;;  %v1440_v31 = vadd.f32 %v1436_v37, %v1430_v59  ;;  %v1441_v38 = vadd.f32 %v1437_v19, %v1431_v4 }
  0xe8   : > { %1286 = vadd.xlane.f32.xlu2 %v1285_v13  ;;  %v1448_v49 = vmul.f32 %v3787_v52, %v1444_v42  ;;  %v1442_v53 = vadd.f32 %v1438_v24, %v1432_v36  ;;  %v1455_v0 = vmul.f32 %v3792_v2, %v1454_v11  ;;  %v1456_v1 = vmul.f32 %v3796_v10, %v1454_v11 }
  0xe9   : > { %v1457_v33 = vmul.f32 %v3800_v21, %v1454_v11  ;;  %v1449_v43 = vadd.f32 %v1445_v26, %v1439_v5  ;;  %v1450_v15 = vadd.f32 %v1446_v27, %v1440_v31  ;;  %v1451_v48 = vadd.f32 %v1447_v39, %v1441_v38 }
  0xea   : > { %v1458_v17 = vmul.f32 %v3804_v22, %v1454_v11  ;;  %v1452_v51 = vadd.f32 %v1448_v49, %v1442_v53  ;;  %v1464_v56 = vstv %s3893_s12  ;;  %v1474_v42 = vstv %s3896_s13  ;;  %s3974_s12 = sld [smem:[#allocation3 + $0x307]] }
  0xeb   : > { %v1484_v54 = vstv %s3902_s15  ;;  %v1459_v59 = vadd.f32 %v1455_v0, %v1449_v43  ;;  %v1460_v4 = vadd.f32 %v1456_v1, %v1450_v15  ;;  %v1461_v36 = vadd.f32 %v1457_v33, %v1451_v48  ;;  %s3980_s13 = sld [smem:[#allocation3 + $0x308]] }
  0xec   : > { %v1465_v13 = vmul.f32 %v3812_v45, %v1464_v56  ;;  %v1462_v18 = vadd.f32 %v1458_v17, %v1452_v51  ;;  %v1466_v37 = vmul.f32 %v3816_v57, %v1464_v56  ;;  %v1467_v19 = vmul.f32 %v3822_v58, %v1464_v56  ;;  %s3982_s15 = sld [smem:[#allocation3 + $0x400]] }
  0xed   : > { %v1468_v24 = vmul.f32 %v3826_v61, %v1464_v56  ;;  %v1475_v11 = vmul.f32 %v3830_v63, %v1474_v42  ;;  %v1476_v27 = vmul.f32 %v3834_v23, %v1474_v42  ;;  %v1477_v39 = vmul.f32 %v3838_v3, %v1474_v42 }
  0xee   : > { %v1469_v26 = vadd.f32 %v1465_v13, %v1459_v59  ;;  %v1470_v5 = vadd.f32 %v1466_v37, %v1460_v4  ;;  %v1471_v31 = vadd.f32 %v1467_v19, %v1461_v36  ;;  %v1478_v49 = vmul.f32 %v3842_v14, %v1474_v42 }
  0xef   : > { %v1472_v38 = vadd.f32 %v1468_v24, %v1462_v18  ;;  %v1485_v0 = vmul.f32 %v3850_v30, %v1484_v54  ;;  %v1486_v1 = vmul.f32 %v3854_v40, %v1484_v54  ;;  %v1487_v33 = vmul.f32 %v3860_v16, %v1484_v54 }
  0xf0   : > { %v1479_v53 = vadd.f32 %v1475_v11, %v1469_v26  ;;  %v1480_v43 = vadd.f32 %v1476_v27, %v1470_v5  ;;  %v1481_v15 = vadd.f32 %v1477_v39, %v1471_v31  ;;  %v1488_v17 = vmul.f32 %v3864_v28, %v1484_v54 }
  0xf1   : > { %v1482_v48 = vadd.f32 %v1478_v49, %v1472_v38  ;;  %v1494_v56 = vstv %s3915_s16  ;;  %v1300_v42 = vstv %s3920_s23  ;;  %v1306_v59 = vstv %s3923_s26  ;;  %s3995_s16 = sld [smem:[#allocation6 + $0x8]] }
  0xf2   : > { %v1489_v51 = vadd.f32 %v1485_v0, %v1479_v53  ;;  %v1490_v4 = vadd.f32 %v1486_v1, %v1480_v43  ;;  %v1491_v36 = vadd.f32 %v1487_v33, %v1481_v15  ;;  %v1495_v18 = vmul.f32 %v3870_v46, %v1494_v56  ;;  %s4000_s23 = sld [smem:[#allocation3 + $0x401]] }
  0xf3   : > { %v1492_v13 = vadd.f32 %v1488_v17, %v1482_v48  ;;  %v1496_v37 = vmul.f32 %v3874_v50, %v1494_v56  ;;  %v1497_v19 = vmul.f32 %v3880_v44, %v1494_v56  ;;  %v1498_v24 = vmul.f32 %v3884_v34, %v1494_v56  ;;  %s4003_s26 = sld [smem:[#allocation3 + $0x402]] }
  0xf4   : > { %v1301_v54 = vmul.f32 %v3711_v6, %v1300_v42  ;;  %v1499_v26 = vadd.f32 %v1495_v18, %v1489_v51  ;;  %v1302_v11 = vmul.f32 %v3715_v41, %v1300_v42  ;;  %v1303_v27 = vmul.f32 %v3721_v47, %v1300_v42 }
  0xf5   : > { %v1304_v39 = vmul.f32 %v3725_v9, %v1300_v42  ;;  %v1500_v5 = vadd.f32 %v1496_v37, %v1490_v4  ;;  %v1501_v31 = vadd.f32 %v1497_v19, %v1491_v36  ;;  %v1502_v38 = vadd.f32 %v1498_v24, %v1492_v13 }
  0xf6   : > { %v1307_v49 = vadd.f32 %v1306_v59, %v1301_v54  ;;  %v1503_v53 = vmax.f32 %v1499_v26, 0.0  ;;  %v1308_v0 = vadd.f32 %v1306_v59, %v1302_v11  ;;  %v1309_v1 = vadd.f32 %v1306_v59, %v1303_v27 }
  0xf7   : > { %v1310_v33 = vadd.f32 %v1306_v59, %v1304_v39  ;;  %v1504_v43 = vmax.f32 %v1500_v5, 0.0  ;;  %v1505_v15 = vmax.f32 %v1501_v31, 0.0  ;;  %v1506_v48 = vmax.f32 %v1502_v38, 0.0 }
  0xf8   : > { %v1312_v17 = vstv %s3936_s2  ;;  %v1322_v13 = vstv %s3941_s30  ;;  %v1332_v18 = vstv %s3944_s14  ;;  %v1342_v59 = vstv %s3949_s22  ;;  %s4008_s2 = sld [smem:[#allocation3 + $0x403]] }
  0xf9   : > { %v1313_v51 = vmul.f32 %v3733_v60, %v1312_v17  ;;  %v1314_v56 = vmul.f32 %v3739_v55, %v1312_v17  ;;  %v1315_v42 = vmul.f32 %v3743_v62, %v1312_v17  ;;  %v1316_v4 = vmul.f32 %v3747_v7, %v1312_v17  ;;  %s4011_s30 = sld [smem:[#allocation3 + $0x404]] }
  0xfa   : > { %v1507_v36 = vadd.f32 %v1504_v43, %v1503_v53  ;;  %v1323_v11 = vmul.f32 %v3754_v12, %v1322_v13  ;;  %v1324_v27 = vmul.f32 %v3758_v8, %v1322_v13  ;;  %v1325_v39 = vmul.f32 %v3762_v20, %v1322_v13  ;;  %s4029_s14 = sld [smem:[#allocation3 + $0x405]] }
  0xfb   : > { %v1317_v37 = vadd.f32 %v1313_v51, %v1307_v49  ;;  %v1318_v19 = vadd.f32 %v1314_v56, %v1308_v0  ;;  %v1319_v24 = vadd.f32 %v1315_v42, %v1309_v1  ;;  %v1320_v54 = vadd.f32 %v1316_v4, %v1310_v33  ;;  %s4038_s22 = sld [smem:[#allocation3 + $0x406]] }
  0xfc   : > { %v1508_v26 = vadd.f32 %v1507_v36, %v1505_v15  ;;  %v1326_v5 = vmul.f32 %v3766_v25, %v1322_v13  ;;  %v1333_v31 = vmul.f32 %v3773_v29, %v1332_v18  ;;  %v1334_v38 = vmul.f32 %v3777_v35, %v1332_v18 }
  0xfd   : > { %v1335_v49 = vmul.f32 %v3783_v32, %v1332_v18  ;;  %v1327_v0 = vadd.f32 %v1323_v11, %v1317_v37  ;;  %v1328_v1 = vadd.f32 %v1324_v27, %v1318_v19  ;;  %v1329_v33 = vadd.f32 %v1325_v39, %v1319_v24 }
  0xfe   : > { %v1509_v53 = vadd.f32 %v1508_v26, %v1506_v48  ;;  %v1330_v43 = vadd.f32 %v1326_v5, %v1320_v54  ;;  %v1336_v15 = vmul.f32 %v3787_v52, %v1332_v18  ;;  %v1343_v17 = vmul.f32 %v3792_v2, %v1342_v59 }
  0xff   : > { %v1344_v51 = vmul.f32 %v3796_v10, %v1342_v59  ;;  %v1337_v56 = vadd.f32 %v1333_v31, %v1327_v0  ;;  %v1338_v42 = vadd.f32 %v1334_v38, %v1328_v1  ;;  %v1339_v4 = vadd.f32 %v1335_v49, %v1329_v33 }
 0x100   : > { %1510 = vadd.xlane.f32.xlu1 %v1509_v53  ;;  %v1345_v48 = vmul.f32 %v3800_v21, %v1342_v59  ;;  %v1340_v36 = vadd.f32 %v1336_v15, %v1330_v43  ;;  %v1346_v13 = vmul.f32 %v3804_v22, %v1342_v59  ;;  %v1352_v37 = vstv %s3960_s24  ;;  %s4040_s24 = sld [smem:[#allocation3 + $0x407]] }
 0x101   : > { %v1362_v19 = vstv %s3966_s25  ;;  %v1347_v24 = vadd.f32 %v1343_v17, %v1337_v56  ;;  %v1348_v26 = vadd.f32 %v1344_v51, %v1338_v42  ;;  %v1353_v18 = vmul.f32 %v3812_v45, %v1352_v37  ;;  %s4048_s25 = sld [smem:[#allocation3 + $0x408]] }
 0x102   : > { %v1349_v54 = vadd.f32 %v1345_v48, %v1339_v4  ;;  %v1350_v11 = vadd.f32 %v1346_v13, %v1340_v36  ;;  %v1354_v27 = vmul.f32 %v3816_v57, %v1352_v37  ;;  %v1355_v39 = vmul.f32 %v3822_v58, %v1352_v37 }
 0x103   : > { %v1356_v5 = vmul.f32 %v3826_v61, %v1352_v37  ;;  %v1357_v59 = vadd.f32 %v1353_v18, %v1347_v24  ;;  %v1363_v31 = vmul.f32 %v3830_v63, %v1362_v19  ;;  %v1364_v38 = vmul.f32 %v3834_v23, %v1362_v19 }
 0x104   : > { %v1365_v49 = vmul.f32 %v3838_v3, %v1362_v19  ;;  %v1358_v53 = vadd.f32 %v1354_v27, %v1348_v26  ;;  %v1359_v0 = vadd.f32 %v1355_v39, %v1349_v54  ;;  %v1366_v33 = vmul.f32 %v3842_v14, %v1362_v19 }
 0x105   : > { %v1360_v1 = vadd.f32 %v1356_v5, %v1350_v11  ;;  %v1367_v43 = vadd.f32 %v1363_v31, %v1357_v59  ;;  %v1372_v15 = vstv %s3974_s12  ;;  %v1382_v17 = vstv %s3980_s13  ;;  %s4052_s12 = sld [smem:[#allocation3 + $0x500]] }
 0x106   : > { %v1524_v51 = vstv %s3982_s15  ;;  %v1368_v56 = vadd.f32 %v1364_v38, %v1358_v53  ;;  %v1369_v42 = vadd.f32 %v1365_v49, %v1359_v0  ;;  %v1373_v48 = vmul.f32 %v3850_v30, %v1372_v15  ;;  %s4062_s13 = sld [smem:[#allocation6 + $0xa]] }
 0x107   : > { %v1370_v4 = vadd.f32 %v1366_v33, %v1360_v1  ;;  %v1374_v36 = vmul.f32 %v3854_v40, %v1372_v15  ;;  %v1375_v13 = vmul.f32 %v3860_v16, %v1372_v15  ;;  %v1376_v37 = vmul.f32 %v3864_v28, %v1372_v15  ;;  %s4066_s15 = sld [smem:[#allocation3 + $0x501]] }
 0x108   : > { %v1383_v19 = vmul.f32 %v3870_v46, %v1382_v17  ;;  %v1377_v24 = vadd.f32 %v1373_v48, %v1367_v43  ;;  %v1384_v26 = vmul.f32 %v3874_v50, %v1382_v17  ;;  %v1385_v54 = vmul.f32 %v3880_v44, %v1382_v17 }
 0x109   : > { %v1386_v18 = vmul.f32 %v3884_v34, %v1382_v17  ;;  %v1378_v11 = vadd.f32 %v1374_v36, %v1368_v56  ;;  %v1379_v27 = vadd.f32 %v1375_v13, %v1369_v42  ;;  %v1380_v39 = vadd.f32 %v1376_v37, %v1370_v4 }
 0x10a   : > { %v1525_v5 = vmul.f32 %v3711_v6, %v1524_v51  ;;  %v1387_v59 = vadd.f32 %v1383_v19, %v1377_v24  ;;  %v1526_v31 = vmul.f32 %v3715_v41, %v1524_v51  ;;  %v1527_v38 = vmul.f32 %v3721_v47, %v1524_v51 }
 0x10b   : > { %v1528_v49 = vmul.f32 %v3725_v9, %v1524_v51  ;;  %v1388_v53 = vadd.f32 %v1384_v26, %v1378_v11  ;;  %v1389_v0 = vadd.f32 %v1385_v54, %v1379_v27  ;;  %v1390_v1 = vadd.f32 %v1386_v18, %v1380_v39 }
 0x10c   : > { %v1530_v33 = vstv %s3995_s16  ;;  %v1391_v43 = vmax.f32 %v1387_v59, 0.0  ;;  %v1536_v13 = vstv %s4000_s23  ;;  %v1546_v37 = vstv %s4003_s26  ;;  %s4076_s16 = sld [smem:[#allocation3 + $0x502]] }
 0x10d   : > { %v1531_v15 = vadd.f32 %v1530_v33, %v1525_v5  ;;  %v1532_v17 = vadd.f32 %v1530_v33, %v1526_v31  ;;  %v1533_v56 = vadd.f32 %v1530_v33, %v1527_v38  ;;  %v1392_v42 = vmax.f32 %v1388_v53, 0.0  ;;  %s4084_s23 = sld [smem:[#allocation3 + $0x503]] }
 0x10e   : > { %v1393_v4 = vmax.f32 %v1389_v0, 0.0  ;;  %v1394_v48 = vmax.f32 %v1390_v1, 0.0  ;;  %v1534_v36 = vadd.f32 %v1530_v33, %v1528_v49  ;;  %v1556_v19 = vstv %s4008_s2  ;;  %s4090_s26 = sld [smem:[#allocation3 + $0x504]] }
 0x10f   : > { %v1566_v24 = vstv %s4011_s30  ;;  %v1395_v51 = vadd.f32 %v1392_v42, %v1391_v43  ;;  %v1537_v26 = vmul.f32 %v3733_v60, %v1536_v13  ;;  %v1538_v54 = vmul.f32 %v3739_v55, %v1536_v13  ;;  %s4093_s2 = sld [smem:[#allocation3 + $0x505]] }
 0x110   : > { %v1539_v18 = vmul.f32 %v3743_v62, %v1536_v13  ;;  %v1540_v11 = vmul.f32 %v3747_v7, %v1536_v13  ;;  %v1547_v27 = vmul.f32 %v3754_v12, %v1546_v37  ;;  %v1548_v39 = vmul.f32 %v3758_v8, %v1546_v37  ;;  %s4099_s30 = sld [smem:[#allocation3 + $0x506]] }
 0x111   : > { %v1549_v5 = vmul.f32 %v3762_v20, %v1546_v37  ;;  %v1396_v59 = vadd.f32 %v1395_v51, %v1393_v4  ;;  %v1541_v31 = vadd.f32 %v1537_v26, %v1531_v15  ;;  %v1542_v38 = vadd.f32 %v1538_v54, %v1532_v17 }
 0x112   : > { %v1543_v49 = vadd.f32 %v1539_v18, %v1533_v56  ;;  %v1544_v53 = vadd.f32 %v1540_v11, %v1534_v36  ;;  %v1550_v0 = vmul.f32 %v3766_v25, %v1546_v37  ;;  %v1557_v1 = vmul.f32 %v3773_v29, %v1556_v19 }
 0x113   : > { %v1558_v33 = vmul.f32 %v3777_v35, %v1556_v19  ;;  %v1397_v43 = vadd.f32 %v1396_v59, %v1394_v48  ;;  %v1551_v42 = vadd.f32 %v1547_v27, %v1541_v31  ;;  %v1552_v13 = vadd.f32 %v1548_v39, %v1542_v38 }
 0x114   : > { %v1553_v20 = vadd.f32 %v1549_v5, %v1543_v49  ;;  %v1554_v8 = vadd.f32 %v1550_v0, %v1544_v53  ;;  %v1559_v4 = vmul.f32 %v3783_v32, %v1556_v19  ;;  %v1560_v15 = vmul.f32 %v3787_v52, %v1556_v19 }
 0x115   : > { %v1567_v17 = vmul.f32 %v3792_v2, %v1566_v24  ;;  %1398 = vadd.xlane.f32.xlu0 %v1397_v43  ;;  %v1561_v56 = vadd.f32 %v1557_v1, %v1551_v42  ;;  %v1562_v36 = vadd.f32 %v1558_v33, %v1552_v13  ;;  %v1568_v37 = vmul.f32 %v3796_v10, %v1566_v24 }
 0x116   : > { %v1569_v48 = vmul.f32 %v3800_v21, %v1566_v24  ;;  %v1563_v51 = vadd.f32 %v1559_v4, %v1553_v20  ;;  %v1564_v26 = vadd.f32 %v1560_v15, %v1554_v8  ;;  %v1570_v54 = vmul.f32 %v3804_v22, %v1566_v24 }
 0x117   : > { %v1576_v19 = vstv %s4029_s14  ;;  %v1571_v18 = vadd.f32 %v1567_v17, %v1561_v56  ;;  %v1572_v11 = vadd.f32 %v1568_v37, %v1562_v36  ;;  %v1586_v0 = vstv %s4038_s22  ;;  %s4106_s14 = sld [smem:[#allocation3 + $0x507]] }
 0x118   : > { %v1577_v27 = vmul.f32 %v3812_v45, %v1576_v19  ;;  %v1578_v39 = vmul.f32 %v3816_v57, %v1576_v19  ;;  %v1573_v5 = vadd.f32 %v1569_v48, %v1563_v51  ;;  %v1574_v59 = vadd.f32 %v1570_v54, %v1564_v26  ;;  %s4110_s22 = sld [smem:[#allocation3 + $0x508]] }
 0x119   : > { %v1579_v31 = vmul.f32 %v3822_v58, %v1576_v19  ;;  %v1580_v38 = vmul.f32 %v3826_v61, %v1576_v19  ;;  %v1596_v20 = vstv %s4040_s24  ;;  %v1587_v1 = vmul.f32 %v3830_v63, %v1586_v0  ;;  %s4121_s24 = sld [smem:[#allocation3 + $0x480]] }
 0x11a   : > { %v1581_v49 = vadd.f32 %v1577_v27, %v1571_v18  ;;  %v1582_v53 = vadd.f32 %v1578_v39, %v1572_v11  ;;  %v1588_v33 = vmul.f32 %v3834_v23, %v1586_v0  ;;  %v1589_v43 = vmul.f32 %v3838_v3, %v1586_v0 }
 0x11b   : > { %v1583_v8 = vadd.f32 %v1579_v31, %v1573_v5  ;;  %v1584_v24 = vadd.f32 %v1580_v38, %v1574_v59  ;;  %v1590_v42 = vmul.f32 %v3842_v14, %v1586_v0  ;;  %v1597_v13 = vmul.f32 %v3850_v30, %v1596_v20 }
 0x11c   : > { %v1598_v4 = vmul.f32 %v3854_v40, %v1596_v20  ;;  %v1591_v15 = vadd.f32 %v1587_v1, %v1581_v49  ;;  %v1592_v17 = vadd.f32 %v1588_v33, %v1582_v53  ;;  %v1599_v56 = vmul.f32 %v3860_v16, %v1596_v20 }
 0x11d   : > { %v1600_v36 = vmul.f32 %v3864_v28, %v1596_v20  ;;  %v1593_v37 = vadd.f32 %v1589_v43, %v1583_v8  ;;  %v1594_v48 = vadd.f32 %v1590_v42, %v1584_v24  ;;  %v1606_v51 = vstv %s4048_s25  ;;  %s4125_s25 = sld [smem:[#allocation6 + $0x9]] }
 0x11e   : > { %v1748_v26 = vstv %s4052_s12  ;;  %v1601_v54 = vadd.f32 %v1597_v13, %v1591_v15  ;;  %v1602_v19 = vadd.f32 %v1598_v4, %v1592_v17  ;;  %v1607_v18 = vmul.f32 %v3870_v46, %v1606_v51  ;;  %s4135_s12 = sld [smem:[#allocation3 + $0x481]] }
 0x11f   : > { %v1608_v11 = vmul.f32 %v3874_v50, %v1606_v51  ;;  %v1603_v27 = vadd.f32 %v1599_v56, %v1593_v37  ;;  %v1604_v39 = vadd.f32 %v1600_v36, %v1594_v48  ;;  %v1609_v5 = vmul.f32 %v3880_v44, %v1606_v51 }
 0x120   : > { %v1610_v59 = vmul.f32 %v3884_v34, %v1606_v51  ;;  %v1611_v31 = vadd.f32 %v1607_v18, %v1601_v54  ;;  %v1749_v49 = vmul.f32 %v3711_v6, %v1748_v26  ;;  %v1750_v53 = vmul.f32 %v3715_v41, %v1748_v26 }
 0x121   : > { %v1612_v38 = vadd.f32 %v1608_v11, %v1602_v19  ;;  %v1613_v0 = vadd.f32 %v1609_v5, %v1603_v27  ;;  %v1751_v8 = vmul.f32 %v3721_v47, %v1748_v26  ;;  %v1752_v24 = vmul.f32 %v3725_v9, %v1748_v26 }
 0x122   : > { %v1614_v20 = vadd.f32 %v1610_v59, %v1604_v39  ;;  %v1615_v1 = vmax.f32 %v1611_v31, 0.0  ;;  %v1754_v43 = vstv %s4062_s13  ;;  %v1760_v42 = vstv %s4066_s15  ;;  %v4781_v39 = vld [vmem:[#allocation14_spill] sm:$0xff]  ;;  %s4139_s13 = sld [smem:[#allocation3 + $0x482]] }
 0x123   : > { %v1616_v33 = vmax.f32 %v1612_v38, 0.0  ;;  %v1617_v13 = vmax.f32 %v1613_v0, 0.0  ;;  %v1755_v15 = vadd.f32 %v1754_v43, %v1749_v49  ;;  %v1756_v17 = vadd.f32 %v1754_v43, %v1750_v53  ;;  %v4782_v49 = vld [vmem:[#allocation15_spill] sm:$0xff]  ;;  %s4143_s15 = sld [smem:[#allocation3 + $0x483]] }
 0x124   : > { %v1618_v4 = vmax.f32 %v1614_v20, 0.0  ;;  %v1757_v36 = vadd.f32 %v1754_v43, %v1751_v8  ;;  %v1758_v37 = vadd.f32 %v1754_v43, %v1752_v24  ;;  %v1761_v48 = vmul.f32 %v3733_v60, %v1760_v42 }
 0x125   : > { %v1619_v56 = vadd.f32 %v1616_v33, %v1615_v1  ;;  %v1762_v51 = vmul.f32 %v3739_v55, %v1760_v42  ;;  %v1763_v26 = vmul.f32 %v3743_v62, %v1760_v42  ;;  %v1764_v54 = vmul.f32 %v3747_v7, %v1760_v42 }
 0x126   : > { %v1770_v19 = vstv %s4076_s16  ;;  %v1765_v11 = vadd.f32 %v1761_v48, %v1755_v15  ;;  %v1780_v24 = vstv %s4084_s23  ;;  %s4147_s16 = sld [smem:[#allocation3 + $0x484]] }
 0x127   : > { %v1620_v18 = vadd.f32 %v1619_v56, %v1617_v13  ;;  %v1771_v27 = vmul.f32 %v3754_v12, %v1770_v19  ;;  %v1772_v5 = vmul.f32 %v4781_v39, %v1770_v19  ;;  %v1766_v59 = vadd.f32 %v1762_v51, %v1756_v17  ;;  %s4157_s23 = sld [smem:[#allocation3 + $0x485]] }
 0x128   : > { %v1767_v31 = vadd.f32 %v1763_v26, %v1757_v36  ;;  %v1768_v38 = vadd.f32 %v1764_v54, %v1758_v37  ;;  %v1773_v53 = vmul.f32 %v4782_v49, %v1770_v19  ;;  %v1774_v20 = vmul.f32 %v3766_v25, %v1770_v19 }
 0x129   : > { %v1621_v0 = vadd.f32 %v1620_v18, %v1618_v4  ;;  %v1775_v8 = vadd.f32 %v1771_v27, %v1765_v11  ;;  %v1776_v1 = vadd.f32 %v1772_v5, %v1766_v59  ;;  %v1781_v43 = vmul.f32 %v3773_v29, %v1780_v24 }
 0x12a   : > { %v1777_v33 = vadd.f32 %v1773_v53, %v1767_v31  ;;  %v1782_v42 = vmul.f32 %v3777_v35, %v1780_v24  ;;  %v1778_v13 = vadd.f32 %v1774_v20, %v1768_v38  ;;  %v1783_v4 = vmul.f32 %v3783_v32, %v1780_v24 }
 0x12b   : > { %1622 = vadd.xlane.f32.xlu2 %v1621_v0  ;;  %v1784_v15 = vmul.f32 %v3787_v52, %v1780_v24  ;;  %v1790_v17 = vstv %s4090_s26  ;;  %v1785_v56 = vadd.f32 %v1781_v43, %v1775_v8  ;;  %v1800_v27 = vstv %s4093_s2  ;;  %s4160_s26 = sld [smem:[#allocation3 + $0x486]] }
 0x12c   : > { %v1786_v36 = vadd.f32 %v1782_v42, %v1776_v1  ;;  %v1791_v37 = vmul.f32 %v3792_v2, %v1790_v17  ;;  %v1792_v48 = vmul.f32 %v3796_v10, %v1790_v17  ;;  %v1787_v51 = vadd.f32 %v1783_v4, %v1777_v33  ;;  %s4166_s2 = sld [smem:[#allocation3 + $0x487]] }
 0x12d   : > { %v1788_v26 = vadd.f32 %v1784_v15, %v1778_v13  ;;  %v1793_v54 = vmul.f32 %v3800_v21, %v1790_v17  ;;  %v1794_v19 = vmul.f32 %v3804_v22, %v1790_v17  ;;  %v1810_v5 = vstv %s4099_s30  ;;  %s4179_s30 = sld [smem:[#allocation3 + $0x580]] }
 0x12e   : > { %v1795_v18 = vadd.f32 %v1791_v37, %v1785_v56  ;;  %v1796_v11 = vadd.f32 %v1792_v48, %v1786_v36  ;;  %v1801_v38 = vmul.f32 %v3812_v45, %v1800_v27  ;;  %v1802_v53 = vmul.f32 %v3816_v57, %v1800_v27 }
 0x12f   : > { %v1797_v59 = vadd.f32 %v1793_v54, %v1787_v51  ;;  %v1798_v31 = vadd.f32 %v1794_v19, %v1788_v26  ;;  %v1803_v0 = vmul.f32 %v3822_v58, %v1800_v27  ;;  %v1804_v20 = vmul.f32 %v3826_v61, %v1800_v27 }
 0x130   : > { %v1811_v8 = vmul.f32 %v3830_v63, %v1810_v5  ;;  %v1812_v24 = vmul.f32 %v3834_v23, %v1810_v5  ;;  %v1805_v1 = vadd.f32 %v1801_v38, %v1795_v18  ;;  %v1806_v33 = vadd.f32 %v1802_v53, %v1796_v11 }
 0x131   : > { %v1813_v43 = vmul.f32 %v3838_v3, %v1810_v5  ;;  %v1814_v42 = vmul.f32 %v3842_v14, %v1810_v5  ;;  %v1807_v13 = vadd.f32 %v1803_v0, %v1797_v59  ;;  %v1808_v4 = vadd.f32 %v1804_v20, %v1798_v31 }
 0x132   : > { %v1820_v15 = vstv %s4106_s14  ;;  %v1830_v17 = vstv %s4110_s22  ;;  %v1815_v56 = vadd.f32 %v1811_v8, %v1805_v1  ;;  %v1816_v36 = vadd.f32 %v1812_v24, %v1806_v33  ;;  %s4184_s14 = sld [smem:[#allocation3 + $0x488]] }
 0x133   : > { %v1821_v37 = vmul.f32 %v3850_v30, %v1820_v15  ;;  %v1822_v48 = vmul.f32 %v3854_v40, %v1820_v15  ;;  %v1817_v51 = vadd.f32 %v1813_v43, %v1807_v13  ;;  %v1818_v26 = vadd.f32 %v1814_v42, %v1808_v4  ;;  %s4187_s22 = sld [smem:[#allocation6 + $0xb]] }
 0x134   : > { %v1823_v54 = vmul.f32 %v3860_v16, %v1820_v15  ;;  %v1824_v19 = vmul.f32 %v3864_v28, %v1820_v15  ;;  %v1831_v27 = vmul.f32 %v3870_v46, %v1830_v17  ;;  %v1832_v5 = vmul.f32 %v3874_v50, %v1830_v17 }
 0x135   : > { %v1825_v18 = vadd.f32 %v1821_v37, %v1815_v56  ;;  %v1826_v11 = vadd.f32 %v1822_v48, %v1816_v36  ;;  %v1833_v38 = vmul.f32 %v3880_v44, %v1830_v17  ;;  %v1834_v53 = vmul.f32 %v3884_v34, %v1830_v17 }
 0x136   : > { %v1827_v59 = vadd.f32 %v1823_v54, %v1817_v51  ;;  %v1828_v31 = vadd.f32 %v1824_v19, %v1818_v26  ;;  %v1636_v8 = vstv %s4121_s24  ;;  %v1642_v24 = vstv %s4125_s25  ;;  %s4200_s24 = sld [smem:[#allocation3 + $0x581]] }
 0x137   : > { %v1835_v0 = vadd.f32 %v1831_v27, %v1825_v18  ;;  %v1836_v20 = vadd.f32 %v1832_v5, %v1826_v11  ;;  %v1637_v43 = vmul.f32 %v3711_v6, %v1636_v8  ;;  %v1638_v42 = vmul.f32 %v3715_v41, %v1636_v8  ;;  %s4205_s25 = sld [smem:[#allocation3 + $0x582]] }
 0x138   : > { %v1837_v1 = vadd.f32 %v1833_v38, %v1827_v59  ;;  %v1838_v33 = vadd.f32 %v1834_v53, %v1828_v31  ;;  %v1639_v15 = vmul.f32 %v3721_v47, %v1636_v8  ;;  %v1640_v56 = vmul.f32 %v3725_v9, %v1636_v8 }
 0x139   : > { %v1839_v13 = vmax.f32 %v1835_v0, 0.0  ;;  %v1840_v4 = vmax.f32 %v1836_v20, 0.0  ;;  %v1643_v37 = vadd.f32 %v1642_v24, %v1637_v43  ;;  %v1644_v48 = vadd.f32 %v1642_v24, %v1638_v42 }
 0x13a   : > { %v1841_v36 = vmax.f32 %v1837_v1, 0.0  ;;  %v1842_v17 = vmax.f32 %v1838_v33, 0.0  ;;  %v1645_v26 = vadd.f32 %v1642_v24, %v1639_v15  ;;  %v1646_v6 = vadd.f32 %v1642_v24, %v1640_v56 }
 0x13b   : > { %v1843_v51 = vadd.f32 %v1840_v4, %v1839_v13  ;;  %v1648_v54 = vstv %s4135_s12  ;;  %v1658_v11 = vstv %s4139_s13  ;;  %v1668_v27 = vstv %s4143_s15  ;;  %s4208_s12 = sld [smem:[#allocation3 + $0x583]] }
 0x13c   : > { %v1649_v41 = vmul.f32 %v3733_v60, %v1648_v54  ;;  %v1650_v47 = vmul.f32 %v3739_v55, %v1648_v54  ;;  %v1651_v9 = vmul.f32 %v3743_v62, %v1648_v54  ;;  %v1652_v19 = vmul.f32 %v3747_v7, %v1648_v54  ;;  %s4213_s13 = sld [smem:[#allocation3 + $0x584]] }
 0x13d   : > { %v1844_v18 = vadd.f32 %v1843_v51, %v1841_v36  ;;  %v1678_v5 = vstv %s4147_s16  ;;  %v1659_v20 = vmul.f32 %v3754_v12, %v1658_v11  ;;  %v1660_v60 = vmul.f32 %v4781_v39, %v1658_v11  ;;  %s4236_s15 = sld [smem:[#allocation3 + $0x585]] }
 0x13e   : > { %v1653_v59 = vadd.f32 %v1649_v41, %v1643_v37  ;;  %v1654_v31 = vadd.f32 %v1650_v47, %v1644_v48  ;;  %v1655_v38 = vadd.f32 %v1651_v9, %v1645_v26  ;;  %v1656_v53 = vadd.f32 %v1652_v19, %v1646_v6  ;;  %s4254_s16 = sld [smem:[#allocation3 + $0x586]] }
 0x13f   : > { %v1845_v0 = vadd.f32 %v1844_v18, %v1842_v17  ;;  %v1661_v55 = vmul.f32 %v4782_v49, %v1658_v11  ;;  %v1662_v62 = vmul.f32 %v3766_v25, %v1658_v11  ;;  %v1669_v7 = vmul.f32 %v3773_v29, %v1668_v27 }
 0x140   : > { %v1670_v8 = vmul.f32 %v3777_v35, %v1668_v27  ;;  %v1671_v24 = vmul.f32 %v3783_v32, %v1668_v27  ;;  %v1663_v1 = vadd.f32 %v1659_v20, %v1653_v59  ;;  %v1664_v33 = vadd.f32 %v1660_v60, %v1654_v31  ;;  %v4224_v60 = vld [vmem:[%s3262_s27 + $0x8] sm:$0xff] }
 0x141   : > { %1846 = vadd.xlane.f32.xlu1 %v1845_v0  ;;  %v1665_v43 = vadd.f32 %v1661_v55, %v1655_v38  ;;  %v1672_v12 = vmul.f32 %v3787_v52, %v1668_v27  ;;  %v1666_v39 = vadd.f32 %v1662_v62, %v1656_v53  ;;  %v1679_v25 = vmul.f32 %v3792_v2, %v1678_v5  ;;  %v4220_v53 = vld [vmem:[%s3262_s27] sm:$0xff]  ;;  %v4228_v62 = vld [vmem:[%s3262_s27 + $0x10] sm:$0xff] }
 0x142   : > { %v1680_v29 = vmul.f32 %v3796_v10, %v1678_v5  ;;  %v1681_v35 = vmul.f32 %v3800_v21, %v1678_v5  ;;  %v1673_v32 = vadd.f32 %v1669_v7, %v1663_v1  ;;  %v1674_v49 = vadd.f32 %v1670_v8, %v1664_v33 }
 0x143   : > { %v1675_v42 = vadd.f32 %v1671_v24, %v1665_v43  ;;  %v1682_v13 = vmul.f32 %v3804_v22, %v1678_v5  ;;  %v1676_v4 = vadd.f32 %v1672_v12, %v1666_v39  ;;  %v1688_v52 = vstv %s4157_s23  ;;  %s4271_s23 = sld [smem:[#allocation3 + $0x680]] }
 0x144   : > { %v1698_v15 = vstv %s4160_s26  ;;  %v1708_v56 = vstv %s4166_s2  ;;  %v1683_v36 = vadd.f32 %v1679_v25, %v1673_v32  ;;  %v1684_v17 = vadd.f32 %v1680_v29, %v1674_v49  ;;  %v4239_v32 = vld [vmem:[%s3262_s27 + $0x20] sm:$0xff]  ;;  %s4289_s26 = sld [smem:[#allocation3 + $0x587]] }
 0x145   : > { %v1685_v2 = vadd.f32 %v1681_v35, %v1675_v42  ;;  %v1689_v10 = vmul.f32 %v3812_v45, %v1688_v52  ;;  %v1686_v37 = vadd.f32 %v1682_v13, %v1676_v4  ;;  %v1690_v21 = vmul.f32 %v3816_v57, %v1688_v52  ;;  %v4243_v42 = vld [vmem:[%s3262_s27 + $0x28] sm:$0xff]  ;;  %v4247_v4 = vld [vmem:[%s3262_s27 + $0x30] sm:$0xff]  ;;  %s4291_s2 = sld [smem:[#allocation3 + $0x588]] }
 0x146   : > { %v1691_v48 = vmul.f32 %v3822_v58, %v1688_v52  ;;  %v1692_v51 = vmul.f32 %v3826_v61, %v1688_v52  ;;  %v1699_v22 = vmul.f32 %v3830_v63, %v1698_v15  ;;  %v1700_v6 = vmul.f32 %v3834_v23, %v1698_v15 }
 0x147   : > { %v1693_v26 = vadd.f32 %v1689_v10, %v1683_v36  ;;  %v1701_v54 = vmul.f32 %v3838_v3, %v1698_v15  ;;  %v1694_v41 = vadd.f32 %v1690_v21, %v1684_v17  ;;  %v1702_v45 = vmul.f32 %v3842_v14, %v1698_v15  ;;  %v4251_v15 = vld [vmem:[%s3262_s27 + $0x38] sm:$0xff] }
 0x148   : > { %v1695_v47 = vadd.f32 %v1691_v48, %v1685_v2  ;;  %v1696_v9 = vadd.f32 %v1692_v51, %v1686_v37  ;;  %v1709_v58 = vmul.f32 %v3850_v30, %v1708_v56  ;;  %v1710_v61 = vmul.f32 %v3854_v40, %v1708_v56 }
 0x149   : > { %v1703_v57 = vadd.f32 %v1699_v22, %v1693_v26  ;;  %v1711_v63 = vmul.f32 %v3860_v16, %v1708_v56  ;;  %v1704_v23 = vadd.f32 %v1700_v6, %v1694_v41  ;;  %v1712_v18 = vmul.f32 %v3864_v28, %v1708_v56  ;;  %v4260_v22 = vld [vmem:[%s3262_s27 + $0x40] sm:$0xff] }
 0x14a   : > { %v1705_v3 = vadd.f32 %v1701_v54, %v1695_v47  ;;  %v1706_v19 = vadd.f32 %v1702_v45, %v1696_v9  ;;  %v1718_v11 = vstv %s4184_s14  ;;  %v1860_v27 = vstv %s4179_s30  ;;  %v4264_v54 = vld [vmem:[%s3262_s27 + $0x48] sm:$0xff]  ;;  %v4268_v47 = vld [vmem:[%s3262_s27 + $0x50] sm:$0xff]  ;;  %s4331_s30 = sld [smem:[#allocation6 + $0xd]] }
 0x14b   : > { %v1713_v14 = vadd.f32 %v1709_v58, %v1703_v57  ;;  %v1866_v30 = vstv %s4187_s22  ;;  %v1714_v40 = vadd.f32 %v1710_v61, %v1704_v23  ;;  %v1719_v59 = vmul.f32 %v3870_v46, %v1718_v11  ;;  %4783 = vst [vmem:[#allocation14_spill] sm:$0xff] %v4264_v54  ;;  %v4274_v45 = vld [vmem:[%s3262_s27 + $0x58] sm:$0xff]  ;;  %v4278_v58 = vld [vmem:[%s3262_s27 + $0x60] sm:$0xff]  ;;  %s4345_s14 = sld [smem:[#allocation3 + $0x681]] }
 0x14c   : > { %v1715_v16 = vadd.f32 %v1711_v63, %v1705_v3  ;;  %v1716_v5 = vadd.f32 %v1712_v18, %v1706_v19  ;;  %v1720_v31 = vmul.f32 %v3874_v50, %v1718_v11  ;;  %v1721_v28 = vmul.f32 %v3880_v44, %v1718_v11  ;;  %v4232_v50 = vld [vmem:[%s3262_s27 + $0x18] sm:$0xff]  ;;  %4784 = vst [vmem:[#allocation15_spill] sm:$0xff] %v4268_v47  ;;  %v4282_v63 = vld [vmem:[%s3262_s27 + $0x68] sm:$0xff]  ;;  %v4286_v3 = vld [vmem:[%s3262_s27 + $0x70] sm:$0xff]  ;;  %s4351_s22 = sld [smem:[#allocation3 + $0x682]] }
 0x14d   : > { %v1722_v38 = vmul.f32 %v3884_v34, %v1718_v11  ;;  %v1861_v0 = vmul.f32 %v4220_v53, %v1860_v27  ;;  %v1723_v20 = vadd.f32 %v1719_v59, %v1713_v14  ;;  %v1862_v55 = vmul.f32 %v4224_v60, %v1860_v27 }
 0x14e   : > { %v1863_v46 = vmul.f32 %v4228_v62, %v1860_v27  ;;  %v1864_v44 = vmul.f32 %v4232_v50, %v1860_v27  ;;  %v1724_v34 = vadd.f32 %v1720_v31, %v1714_v40  ;;  %v1725_v7 = vadd.f32 %v1721_v28, %v1715_v16  ;;  %v4294_v40 = vld [vmem:[%s3262_s27 + $0x78] sm:$0xff]  ;;  %v4302_v31 = vld [vmem:[%s3262_s27 + $0x88] sm:$0xff] }
 0x14f   : > { %v1726_v8 = vadd.f32 %v1722_v38, %v1716_v5  ;;  %v1867_v24 = vadd.f32 %v1866_v30, %v1861_v0  ;;  %v1727_v1 = vmax.f32 %v1723_v20, 0.0  ;;  %v1868_v33 = vadd.f32 %v1866_v30, %v1862_v55  ;;  %v4298_v5 = vld [vmem:[%s3262_s27 + $0x80] sm:$0xff]  ;;  %v4306_v55 = vld [vmem:[%s3262_s27 + $0x90] sm:$0xff] }
 0x150   : > { %v1869_v43 = vadd.f32 %v1866_v30, %v1863_v46  ;;  %v1870_v12 = vadd.f32 %v1866_v30, %v1864_v44  ;;  %v1728_v39 = vmax.f32 %v1724_v34, 0.0  ;;  %v1729_v25 = vmax.f32 %v1725_v7, 0.0  ;;  %v4310_v34 = vld [vmem:[%s3262_s27 + $0x98] sm:$0xff] }
 0x151   : > { %v1730_v29 = vmax.f32 %v1726_v8, 0.0  ;;  %v1872_v35 = vstv %s4200_s24  ;;  %v1882_v17 = vstv %s4205_s25  ;;  %v1892_v2 = vstv %s4208_s12  ;;  %s4356_s24 = sld [smem:[#allocation3 + $0x683]] }
 0x152   : > { %v1873_v49 = vmul.f32 %v4239_v32, %v1872_v35  ;;  %v1874_v13 = vmul.f32 %v4243_v42, %v1872_v35  ;;  %v1875_v52 = vmul.f32 %v4247_v4, %v1872_v35  ;;  %v1876_v56 = vmul.f32 %v4251_v15, %v1872_v35  ;;  %s4362_s25 = sld [smem:[#allocation3 + $0x684]] }
 0x153   : > { %v1731_v36 = vadd.f32 %v1728_v39, %v1727_v1  ;;  %v1902_v10 = vstv %s4213_s13  ;;  %v1883_v6 = vmul.f32 %v4260_v22, %v1882_v17  ;;  %v1884_v41 = vmul.f32 %v4264_v54, %v1882_v17  ;;  %s4410_s12 = sld [smem:[#allocation3 + $0x686]] }
 0x154   : > { %v1877_v37 = vadd.f32 %v1873_v49, %v1867_v24  ;;  %v1878_v21 = vadd.f32 %v1874_v13, %v1868_v33  ;;  %v1879_v48 = vadd.f32 %v1875_v52, %v1869_v43  ;;  %v1880_v51 = vadd.f32 %v1876_v56, %v1870_v12  ;;  %v4316_v12 = vld [vmem:[%s3262_s27 + $0xa0] sm:$0xff]  ;;  %v4324_v49 = vld [vmem:[%s3262_s27 + $0xb0] sm:$0xff]  ;;  %v4328_v52 = vld [vmem:[%s3262_s27 + $0xb8] sm:$0xff]  ;;  %s4412_s13 = sld [smem:[#allocation3 + $0x687]] }
 0x155   : > { %v1732_v26 = vadd.f32 %v1731_v36, %v1729_v25  ;;  %v1885_v9 = vmul.f32 %v4268_v47, %v1882_v17  ;;  %v1886_v57 = vmul.f32 %v4274_v45, %v1882_v17  ;;  %v1893_v61 = vmul.f32 %v4278_v58, %v1892_v2  ;;  %v4334_v17 = vld [vmem:[%s3262_s27 + $0xc0] sm:$0xff] }
 0x156   : > { %v1894_v23 = vmul.f32 %v4282_v63, %v1892_v2  ;;  %v1895_v19 = vmul.f32 %v4286_v3, %v1892_v2  ;;  %v1887_v14 = vadd.f32 %v1883_v6, %v1877_v37  ;;  %v1888_v11 = vadd.f32 %v1884_v41, %v1878_v21  ;;  %v4342_v21 = vld [vmem:[%s3262_s27 + $0xd0] sm:$0xff]  ;;  %v4348_v41 = vld [vmem:[%s3262_s27 + $0xd8] sm:$0xff] }
 0x157   : > { %v1733_v18 = vadd.f32 %v1732_v26, %v1730_v29  ;;  %v1889_v27 = vadd.f32 %v1885_v9, %v1879_v48  ;;  %v1890_v30 = vadd.f32 %v1886_v57, %v1880_v51  ;;  %v1896_v16 = vmul.f32 %v4294_v40, %v1892_v2  ;;  %v4320_v29 = vld [vmem:[%s3262_s27 + $0xa8] sm:$0xff] }
 0x158   : > { %v1903_v59 = vmul.f32 %v4298_v5, %v1902_v10  ;;  %v1904_v28 = vmul.f32 %v4302_v31, %v1902_v10  ;;  %v1897_v38 = vadd.f32 %v1893_v61, %v1887_v14  ;;  %v1898_v0 = vadd.f32 %v1894_v23, %v1888_v11 }
 0x159   : > { %1734 = vadd.xlane.f32.xlu0 %v1733_v18  ;;  %v1899_v20 = vadd.f32 %v1895_v19, %v1889_v27  ;;  %v1905_v46 = vmul.f32 %v4306_v55, %v1902_v10  ;;  %v1900_v44 = vadd.f32 %v1896_v16, %v1890_v30  ;;  %v1906_v7 = vmul.f32 %v4310_v34, %v1902_v10  ;;  %v4338_v10 = vld [vmem:[%s3262_s27 + $0xc8] sm:$0xff]  ;;  %v4359_v27 = vld [vmem:[%s3262_s27 + $0xe0] sm:$0xff] }
 0x15a   : > { %v1912_v8 = vstv %s4236_s15  ;;  %v1922_v24 = vstv %s4254_s16  ;;  %v1907_v1 = vadd.f32 %v1903_v59, %v1897_v38  ;;  %v1908_v33 = vadd.f32 %v1904_v28, %v1898_v0  ;;  %v4365_v16 = vld [vmem:[%s3262_s27 + $0xe8] sm:$0xff]  ;;  %v4369_v28 = vld [vmem:[%s3262_s27 + $0xf0] sm:$0xff]  ;;  %s4420_s15 = sld [smem:[#allocation3 + $0x600]] }
 0x15b   : > { %v1909_v43 = vadd.f32 %v1905_v46, %v1899_v20  ;;  %v1913_v39 = vmul.f32 %v4316_v12, %v1912_v8  ;;  %v1910_v25 = vadd.f32 %v1906_v7, %v1900_v44  ;;  %v1914_v35 = vmul.f32 %v4320_v29, %v1912_v8  ;;  %v4373_v0 = vld [vmem:[%s3262_s27 + $0xf8] sm:$0xff]  ;;  %v4377_v46 = vld [vmem:[%s3262_s27 + $0x100] sm:$0xff]  ;;  %s4424_s16 = sld [smem:[#allocation3 + $0x688]] }
 0x15c   : > { %v1915_v13 = vmul.f32 %v4324_v49, %v1912_v8  ;;  %v1916_v56 = vmul.f32 %v4328_v52, %v1912_v8  ;;  %v1923_v2 = vmul.f32 %v4334_v17, %v1922_v24  ;;  %v1924_v37 = vmul.f32 %v4338_v10, %v1922_v24  ;;  %v4381_v8 = vld [vmem:[%s3262_s27 + $0x108] sm:$0xff] }
 0x15d   : > { %v1917_v36 = vadd.f32 %v1913_v39, %v1907_v1  ;;  %v1925_v48 = vmul.f32 %v4342_v21, %v1922_v24  ;;  %v1918_v51 = vadd.f32 %v1914_v35, %v1908_v33  ;;  %v1926_v9 = vmul.f32 %v4348_v41, %v1922_v24  ;;  %v4385_v1 = vld [vmem:[%s3262_s27 + $0x110] sm:$0xff] }
 0x15e   : > { %v1919_v26 = vadd.f32 %v1915_v13, %v1909_v43  ;;  %v1920_v6 = vadd.f32 %v1916_v56, %v1910_v25  ;;  %v1932_v61 = vstv %s4289_s26  ;;  %v1942_v23 = vstv %s4291_s2  ;;  %v4389_v43 = vld [vmem:[%s3262_s27 + $0x118] sm:$0xff]  ;;  %s4401_s27 = sld [smem:[#allocation3 + $0x685]] }
 0x15f   : > { %v1927_v57 = vadd.f32 %v1923_v2, %v1917_v36  ;;  %v2084_v19 = vstv %s4271_s23  ;;  %v1928_v18 = vadd.f32 %v1924_v37, %v1918_v51  ;;  %v1933_v30 = vmul.f32 %v4359_v27, %v1932_v61  ;;  %s4434_s23 = sld [smem:[#allocation6 + $0xc]] }
 0x160   : > { %v1929_v14 = vadd.f32 %v1925_v48, %v1919_v26  ;;  %v1930_v11 = vadd.f32 %v1926_v9, %v1920_v6  ;;  %v1934_v59 = vmul.f32 %v4365_v16, %v1932_v61  ;;  %v1935_v38 = vmul.f32 %v4369_v28, %v1932_v61  ;;  %s4438_s26 = sld [smem:[#allocation3 + $0x601]] }
 0x161   : > { %v1936_v20 = vmul.f32 %v4373_v0, %v1932_v61  ;;  %v1943_v44 = vmul.f32 %v4377_v46, %v1942_v23  ;;  %v1937_v7 = vadd.f32 %v1933_v30, %v1927_v57  ;;  %v1944_v24 = vmul.f32 %v4381_v8, %v1942_v23  ;;  %s4448_s2 = sld [smem:[#allocation3 + $0x602]] }
 0x162   : > { %v1945_v33 = vmul.f32 %v4385_v1, %v1942_v23  ;;  %v1946_v39 = vmul.f32 %v4389_v43, %v1942_v23  ;;  %v1938_v25 = vadd.f32 %v1934_v59, %v1928_v18  ;;  %v1939_v35 = vadd.f32 %v1935_v38, %v1929_v14 }
 0x163   : > { %v1940_v13 = vadd.f32 %v1936_v20, %v1930_v11  ;;  %v2085_v56 = vmul.f32 %v4220_v53, %v2084_v19  ;;  %v1947_v36 = vadd.f32 %v1943_v44, %v1937_v7  ;;  %v2086_v2 = vmul.f32 %v4224_v60, %v2084_v19 }
 0x164   : > { %v2087_v37 = vmul.f32 %v4228_v62, %v2084_v19  ;;  %v2088_v48 = vmul.f32 %v4232_v50, %v2084_v19  ;;  %v1948_v51 = vadd.f32 %v1944_v24, %v1938_v25  ;;  %v1949_v26 = vadd.f32 %v1945_v33, %v1939_v35 }
 0x165   : > { %v1950_v6 = vadd.f32 %v1946_v39, %v1940_v13  ;;  %v2090_v9 = vstv %s4331_s30  ;;  %v1951_v57 = vmax.f32 %v1947_v36, 0.0  ;;  %v2096_v38 = vstv %s4345_s14  ;;  %s4456_s30 = sld [smem:[#allocation3 + $0x603]] }
 0x166   : > { %v2091_v61 = vadd.f32 %v2090_v9, %v2085_v56  ;;  %v2092_v23 = vadd.f32 %v2090_v9, %v2086_v2  ;;  %v2093_v18 = vadd.f32 %v2090_v9, %v2087_v37  ;;  %v1952_v14 = vmax.f32 %v1948_v51, 0.0  ;;  %s4462_s14 = sld [smem:[#allocation3 + $0x604]] }
 0x167   : > { %v1953_v11 = vmax.f32 %v1949_v26, 0.0  ;;  %v1954_v30 = vmax.f32 %v1950_v6, 0.0  ;;  %v2094_v59 = vadd.f32 %v2090_v9, %v2088_v48  ;;  %v2106_v20 = vstv %s4351_s22  ;;  %s4465_s22 = sld [smem:[#allocation3 + $0x605]] }
 0x168   : > { %v2116_v44 = vstv %s4356_s24  ;;  %v2126_v7 = vstv %s4362_s25  ;;  %v1955_v19 = vadd.f32 %v1952_v14, %v1951_v57  ;;  %v2097_v24 = vmul.f32 %v4239_v32, %v2096_v38  ;;  %s4471_s24 = sld [smem:[#allocation3 + $0x606]] }
 0x169   : > { %v2098_v33 = vmul.f32 %v4243_v42, %v2096_v38  ;;  %v2099_v39 = vmul.f32 %v4247_v4, %v2096_v38  ;;  %v2100_v25 = vmul.f32 %v4251_v15, %v2096_v38  ;;  %v2107_v35 = vmul.f32 %v4260_v22, %v2106_v20  ;;  %s4478_s25 = sld [smem:[#allocation3 + $0x607]] }
 0x16a   : > { %v2108_v13 = vmul.f32 %v4264_v54, %v2106_v20  ;;  %v2109_v56 = vmul.f32 %v4268_v47, %v2106_v20  ;;  %v1956_v36 = vadd.f32 %v1955_v19, %v1953_v11  ;;  %v2101_v2 = vadd.f32 %v2097_v24, %v2091_v61 }
 0x16b   : > { %v2102_v37 = vadd.f32 %v2098_v33, %v2092_v23  ;;  %v2103_v48 = vadd.f32 %v2099_v39, %v2093_v18  ;;  %v2104_v51 = vadd.f32 %v2100_v25, %v2094_v59  ;;  %v2110_v26 = vmul.f32 %v4274_v45, %v2106_v20 }
 0x16c   : > { %v2117_v6 = vmul.f32 %v4278_v58, %v2116_v44  ;;  %v2118_v9 = vmul.f32 %v4282_v63, %v2116_v44  ;;  %v1957_v57 = vadd.f32 %v1956_v36, %v1954_v30  ;;  %v2111_v14 = vadd.f32 %v2107_v35, %v2101_v2 }
 0x16d   : > { %v2112_v38 = vadd.f32 %v2108_v13, %v2102_v37  ;;  %v2113_v47 = vadd.f32 %v2109_v56, %v2103_v48  ;;  %v2114_v54 = vadd.f32 %v2110_v26, %v2104_v51  ;;  %v2119_v11 = vmul.f32 %v4286_v3, %v2116_v44 }
 0x16e   : > { %v2120_v61 = vmul.f32 %v4294_v40, %v2116_v44  ;;  %v2127_v23 = vmul.f32 %v4298_v5, %v2126_v7  ;;  %1958 = vadd.xlane.f32.xlu2 %v1957_v57  ;;  %v2121_v18 = vadd.f32 %v2117_v6, %v2111_v14  ;;  %v2128_v20 = vmul.f32 %v4302_v31, %v2126_v7 }
 0x16f   : > { %v2122_v59 = vadd.f32 %v2118_v9, %v2112_v38  ;;  %v2129_v30 = vmul.f32 %v4306_v55, %v2126_v7  ;;  %v2123_v19 = vadd.f32 %v2119_v11, %v2113_v47  ;;  %v2130_v33 = vmul.f32 %v4310_v34, %v2126_v7 }
 0x170   : > { %v2124_v24 = vadd.f32 %v2120_v61, %v2114_v54  ;;  %v2136_v44 = vstv %s4401_s27  ;;  %v2131_v39 = vadd.f32 %v2127_v23, %v2121_v18  ;;  %v2146_v26 = vstv %s4410_s12  ;;  %s4482_s27 = sld [smem:[#allocation3 + $0x608]] }
 0x171   : > { %v2132_v25 = vadd.f32 %v2128_v20, %v2122_v59  ;;  %v2137_v35 = vmul.f32 %v4316_v12, %v2136_v44  ;;  %v2138_v13 = vmul.f32 %v4320_v29, %v2136_v44  ;;  %v2133_v56 = vadd.f32 %v2129_v30, %v2123_v19  ;;  %s4493_s12 = sld [smem:[#allocation3 + $0x700]] }
 0x172   : > { %v2134_v36 = vadd.f32 %v2130_v33, %v2124_v24  ;;  %v2139_v2 = vmul.f32 %v4324_v49, %v2136_v44  ;;  %v2140_v37 = vmul.f32 %v4328_v52, %v2136_v44  ;;  %v2156_v47 = vstv %s4412_s13  ;;  %s4497_s13 = sld [smem:[#allocation6 + $0xe]] }
 0x173   : > { %v2141_v48 = vadd.f32 %v2137_v35, %v2131_v39  ;;  %v2142_v51 = vadd.f32 %v2138_v13, %v2132_v25  ;;  %v2147_v6 = vmul.f32 %v4334_v17, %v2146_v26  ;;  %v2148_v9 = vmul.f32 %v4338_v10, %v2146_v26 }
 0x174   : > { %v2143_v54 = vadd.f32 %v2139_v2, %v2133_v56  ;;  %v2144_v7 = vadd.f32 %v2140_v37, %v2134_v36  ;;  %v2149_v57 = vmul.f32 %v4342_v21, %v2146_v26  ;;  %v2150_v14 = vmul.f32 %v4348_v41, %v2146_v26 }
 0x175   : > { %v2157_v38 = vmul.f32 %v4359_v27, %v2156_v47  ;;  %v2158_v11 = vmul.f32 %v4365_v16, %v2156_v47  ;;  %v2151_v61 = vadd.f32 %v2147_v6, %v2141_v48  ;;  %v2152_v23 = vadd.f32 %v2148_v9, %v2142_v51 }
 0x176   : > { %v2159_v18 = vmul.f32 %v4369_v28, %v2156_v47  ;;  %v2160_v59 = vmul.f32 %v4373_v0, %v2156_v47  ;;  %v2153_v20 = vadd.f32 %v2149_v57, %v2143_v54  ;;  %v2154_v30 = vadd.f32 %v2150_v14, %v2144_v7 }
 0x177   : > { %v2166_v19 = vstv %s4424_s16  ;;  %v1972_v24 = vstv %s4420_s15  ;;  %v2161_v33 = vadd.f32 %v2157_v38, %v2151_v61  ;;  %v2162_v44 = vadd.f32 %v2158_v11, %v2152_v23  ;;  %s4507_s15 = sld [smem:[#allocation3 + $0x701]] }
 0x178   : > { %v2167_v39 = vmul.f32 %v4377_v46, %v2166_v19  ;;  %v2168_v25 = vmul.f32 %v4381_v8, %v2166_v19  ;;  %v2163_v35 = vadd.f32 %v2159_v18, %v2153_v20  ;;  %v2164_v13 = vadd.f32 %v2160_v59, %v2154_v30  ;;  %s4511_s16 = sld [smem:[#allocation3 + $0x702]] }
 0x179   : > { %v2169_v56 = vmul.f32 %v4385_v1, %v2166_v19  ;;  %v2170_v36 = vmul.f32 %v4389_v43, %v2166_v19  ;;  %v1973_v48 = vmul.f32 %v4220_v53, %v1972_v24  ;;  %v1974_v51 = vmul.f32 %v4224_v60, %v1972_v24 }
 0x17a   : > { %v2171_v2 = vadd.f32 %v2167_v39, %v2161_v33  ;;  %v2172_v37 = vadd.f32 %v2168_v25, %v2162_v44  ;;  %v1975_v54 = vmul.f32 %v4228_v62, %v1972_v24  ;;  %v1976_v7 = vmul.f32 %v4232_v50, %v1972_v24 }
 0x17b   : > { %v2173_v26 = vadd.f32 %v2169_v56, %v2163_v35  ;;  %v2174_v47 = vadd.f32 %v2170_v36, %v2164_v13  ;;  %v1978_v57 = vstv %s4434_s23  ;;  %v1984_v14 = vstv %s4438_s26  ;;  %v4785_v13 = vld [vmem:[#allocation14_spill] sm:$0xff]  ;;  %s4515_s23 = sld [smem:[#allocation3 + $0x703]] }
 0x17c   : > { %v2175_v6 = vmax.f32 %v2171_v2, 0.0  ;;  %v2176_v9 = vmax.f32 %v2172_v37, 0.0  ;;  %v1979_v61 = vadd.f32 %v1978_v57, %v1973_v48  ;;  %v1980_v23 = vadd.f32 %v1978_v57, %v1974_v51  ;;  %v4786_v48 = vld [vmem:[#allocation15_spill] sm:$0xff]  ;;  %s4519_s26 = sld [smem:[#allocation3 + $0x704]] }
 0x17d   : > { %v2177_v38 = vmax.f32 %v2173_v26, 0.0  ;;  %v2178_v11 = vmax.f32 %v2174_v47, 0.0  ;;  %v1981_v59 = vadd.f32 %v1978_v57, %v1975_v54  ;;  %v1982_v20 = vadd.f32 %v1978_v57, %v1976_v7 }
 0x17e   : > { %v2179_v18 = vadd.f32 %v2176_v9, %v2175_v6  ;;  %v1985_v30 = vmul.f32 %v4239_v32, %v1984_v14  ;;  %v1986_v19 = vmul.f32 %v4243_v42, %v1984_v14  ;;  %v1987_v24 = vmul.f32 %v4247_v4, %v1984_v14 }
 0x17f   : > { %v1988_v33 = vmul.f32 %v4251_v15, %v1984_v14  ;;  %v1994_v44 = vstv %s4448_s2  ;;  %v2004_v7 = vstv %s4456_s30  ;;  %s4529_s2 = sld [smem:[#allocation3 + $0x705]] }
 0x180   : > { %v2180_v39 = vadd.f32 %v2179_v18, %v2177_v38  ;;  %v1989_v25 = vadd.f32 %v1985_v30, %v1979_v61  ;;  %v1995_v35 = vmul.f32 %v4260_v22, %v1994_v44  ;;  %v1996_v56 = vmul.f32 %v4785_v13, %v1994_v44  ;;  %s4532_s30 = sld [smem:[#allocation3 + $0x706]] }
 0x181   : > { %v1990_v36 = vadd.f32 %v1986_v19, %v1980_v23  ;;  %v1991_v2 = vadd.f32 %v1987_v24, %v1981_v59  ;;  %v1992_v37 = vadd.f32 %v1988_v33, %v1982_v20  ;;  %v1997_v51 = vmul.f32 %v4786_v48, %v1994_v44 }
 0x182   : > { %v2181_v26 = vadd.f32 %v2180_v39, %v2178_v11  ;;  %v1998_v47 = vmul.f32 %v4274_v45, %v1994_v44  ;;  %v1999_v54 = vadd.f32 %v1995_v35, %v1989_v25  ;;  %v2005_v57 = vmul.f32 %v4278_v58, %v2004_v7 }
 0x183   : > { %v2000_v6 = vadd.f32 %v1996_v56, %v1990_v36  ;;  %v2001_v9 = vadd.f32 %v1997_v51, %v1991_v2  ;;  %v2006_v14 = vmul.f32 %v4282_v63, %v2004_v7  ;;  %v2007_v11 = vmul.f32 %v4286_v3, %v2004_v7 }
 0x184   : > { %2182 = vadd.xlane.f32.xlu1 %v2181_v26  ;;  %v2002_v38 = vadd.f32 %v1998_v47, %v1992_v37  ;;  %v2008_v61 = vmul.f32 %v4294_v40, %v2004_v7  ;;  %v2014_v23 = vstv %s4462_s14  ;;  %v2009_v18 = vadd.f32 %v2005_v57, %v1999_v54  ;;  %s4538_s14 = sld [smem:[#allocation3 + $0x707]] }
 0x185   : > { %v2010_v59 = vadd.f32 %v2006_v14, %v2000_v6  ;;  %v2015_v20 = vmul.f32 %v4298_v5, %v2014_v23  ;;  %v2016_v30 = vmul.f32 %v4302_v31, %v2014_v23  ;;  %v2011_v19 = vadd.f32 %v2007_v11, %v2001_v9 }
 0x186   : > { %v2012_v24 = vadd.f32 %v2008_v61, %v2002_v38  ;;  %v2017_v33 = vmul.f32 %v4306_v55, %v2014_v23  ;;  %v2018_v44 = vmul.f32 %v4310_v34, %v2014_v23  ;;  %v2024_v35 = vstv %s4465_s22  ;;  %s4551_s22 = sld [smem:[#allocation3 + $0x780]] }
 0x187   : > { %v2019_v39 = vadd.f32 %v2015_v20, %v2009_v18  ;;  %v2020_v25 = vadd.f32 %v2016_v30, %v2010_v59  ;;  %v2034_v56 = vstv %s4471_s24  ;;  %v2025_v37 = vmul.f32 %v4316_v12, %v2024_v35  ;;  %s4556_s24 = sld [smem:[#allocation3 + $0x708]] }
 0x188   : > { %v2021_v36 = vadd.f32 %v2017_v33, %v2011_v19  ;;  %v2022_v2 = vadd.f32 %v2018_v44, %v2012_v24  ;;  %v2026_v51 = vmul.f32 %v4320_v29, %v2024_v35  ;;  %v2027_v26 = vmul.f32 %v4324_v49, %v2024_v35 }
 0x189   : > { %v2028_v47 = vmul.f32 %v4328_v52, %v2024_v35  ;;  %v2035_v54 = vmul.f32 %v4334_v17, %v2034_v56  ;;  %v2036_v7 = vmul.f32 %v4338_v10, %v2034_v56  ;;  %v2029_v6 = vadd.f32 %v2025_v37, %v2019_v39 }
 0x18a   : > { %v2030_v9 = vadd.f32 %v2026_v51, %v2020_v25  ;;  %v2037_v57 = vmul.f32 %v4342_v21, %v2034_v56  ;;  %v2038_v14 = vmul.f32 %v4348_v41, %v2034_v56  ;;  %v2031_v38 = vadd.f32 %v2027_v26, %v2021_v36 }
 0x18b   : > { %v2032_v11 = vadd.f32 %v2028_v47, %v2022_v2  ;;  %v2044_v61 = vstv %s4478_s25  ;;  %v2054_v23 = vstv %s4482_s27  ;;  %v2039_v18 = vadd.f32 %v2035_v54, %v2029_v6  ;;  %s4559_s25 = sld [smem:[#allocation6 + $0xf]] }
 0x18c   : > { %v2040_v59 = vadd.f32 %v2036_v7, %v2030_v9  ;;  %v2045_v20 = vmul.f32 %v4359_v27, %v2044_v61  ;;  %v2046_v30 = vmul.f32 %v4365_v16, %v2044_v61  ;;  %v2041_v19 = vadd.f32 %v2037_v57, %v2031_v38  ;;  %s4572_s27 = sld [smem:[#allocation3 + $0x781]] }
 0x18d   : > { %v2042_v24 = vadd.f32 %v2038_v14, %v2032_v11  ;;  %v2047_v33 = vmul.f32 %v4369_v28, %v2044_v61  ;;  %v2048_v44 = vmul.f32 %v4373_v0, %v2044_v61  ;;  %v2055_v35 = vmul.f32 %v4377_v46, %v2054_v23 }
 0x18e   : > { %v2049_v39 = vadd.f32 %v2045_v20, %v2039_v18  ;;  %v2050_v25 = vadd.f32 %v2046_v30, %v2040_v59  ;;  %v2056_v56 = vmul.f32 %v4381_v8, %v2054_v23  ;;  %v2057_v37 = vmul.f32 %v4385_v1, %v2054_v23 }
 0x18f   : > { %v2051_v36 = vadd.f32 %v2047_v33, %v2041_v19  ;;  %v2052_v2 = vadd.f32 %v2048_v44, %v2042_v24  ;;  %v2058_v51 = vmul.f32 %v4389_v43, %v2054_v23  ;;  %v2196_v54 = vstv %s4493_s12  ;;  %s4577_s12 = sld [smem:[#allocation3 + $0x782]] }
 0x190   : > { %v2059_v26 = vadd.f32 %v2055_v35, %v2049_v39  ;;  %v2060_v47 = vadd.f32 %v2056_v56, %v2050_v25  ;;  %v2202_v7 = vstv %s4497_s13  ;;  %v2197_v57 = vmul.f32 %v4220_v53, %v2196_v54  ;;  %s4580_s13 = sld [smem:[#allocation3 + $0x783]] }
 0x191   : > { %v2061_v6 = vadd.f32 %v2057_v37, %v2051_v36  ;;  %v2062_v9 = vadd.f32 %v2058_v51, %v2052_v2  ;;  %v2198_v14 = vmul.f32 %v4224_v60, %v2196_v54  ;;  %v2199_v61 = vmul.f32 %v4228_v62, %v2196_v54 }
 0x192   : > { %v2063_v38 = vmax.f32 %v2059_v26, 0.0  ;;  %v2064_v11 = vmax.f32 %v2060_v47, 0.0  ;;  %v2200_v18 = vmul.f32 %v4232_v50, %v2196_v54  ;;  %v2203_v20 = vadd.f32 %v2202_v7, %v2197_v57 }
 0x193   : > { %v2065_v59 = vmax.f32 %v2061_v6, 0.0  ;;  %v2066_v23 = vmax.f32 %v2062_v9, 0.0  ;;  %v2204_v30 = vadd.f32 %v2202_v7, %v2198_v14  ;;  %v2205_v24 = vadd.f32 %v2202_v7, %v2199_v61 }
 0x194   : > { %v2067_v19 = vadd.f32 %v2064_v11, %v2063_v38  ;;  %v2206_v33 = vadd.f32 %v2202_v7, %v2200_v18  ;;  %v2208_v44 = vstv %s4507_s15  ;;  %v2218_v2 = vstv %s4511_s16  ;;  %s4585_s15 = sld [smem:[#allocation3 + $0x784]] }
 0x195   : > { %v2209_v39 = vmul.f32 %v4239_v32, %v2208_v44  ;;  %v2210_v25 = vmul.f32 %v4243_v42, %v2208_v44  ;;  %v2211_v35 = vmul.f32 %v4247_v4, %v2208_v44  ;;  %v2212_v56 = vmul.f32 %v4251_v15, %v2208_v44  ;;  %s4596_s16 = sld [smem:[#allocation3 + $0x785]] }
 0x196   : > { %v2068_v36 = vadd.f32 %v2067_v19, %v2065_v59  ;;  %v2228_v37 = vstv %s4515_s23  ;;  %v2238_v51 = vstv %s4519_s26  ;;  %v2219_v9 = vmul.f32 %v4260_v22, %v2218_v2  ;;  %s4602_s23 = sld [smem:[#allocation3 + $0x786]] }
 0x197   : > { %v2213_v26 = vadd.f32 %v2209_v39, %v2203_v20  ;;  %v2214_v47 = vadd.f32 %v2210_v25, %v2204_v30  ;;  %v2215_v54 = vadd.f32 %v2211_v35, %v2205_v24  ;;  %v2216_v7 = vadd.f32 %v2212_v56, %v2206_v33  ;;  %s4620_s26 = sld [smem:[#allocation3 + $0x787]] }
 0x198   : > { %v2069_v6 = vadd.f32 %v2068_v36, %v2066_v23  ;;  %v2220_v57 = vmul.f32 %v4785_v13, %v2218_v2  ;;  %v2221_v14 = vmul.f32 %v4786_v48, %v2218_v2  ;;  %v2222_v38 = vmul.f32 %v4274_v45, %v2218_v2 }
 0x199   : > { %v2229_v11 = vmul.f32 %v4278_v58, %v2228_v37  ;;  %v2230_v61 = vmul.f32 %v4282_v63, %v2228_v37  ;;  %v2231_v18 = vmul.f32 %v4286_v3, %v2228_v37  ;;  %v2223_v59 = vadd.f32 %v2219_v9, %v2213_v26 }
 0x19a   : > { %2070 = vadd.xlane.f32.xlu0 %v2069_v6  ;;  %v2224_v20 = vadd.f32 %v2220_v57, %v2214_v47  ;;  %v2225_v23 = vadd.f32 %v2221_v14, %v2215_v54  ;;  %v2232_v30 = vmul.f32 %v4294_v40, %v2228_v37  ;;  %v2226_v19 = vadd.f32 %v2222_v38, %v2216_v7 }
 0x19b   : > { %v2239_v24 = vmul.f32 %v4298_v5, %v2238_v51  ;;  %v2240_v33 = vmul.f32 %v4302_v31, %v2238_v51  ;;  %v2241_v44 = vmul.f32 %v4306_v55, %v2238_v51  ;;  %v2233_v39 = vadd.f32 %v2229_v11, %v2223_v59 }
 0x19c   : > { %v2234_v25 = vadd.f32 %v2230_v61, %v2224_v20  ;;  %v2235_v35 = vadd.f32 %v2231_v18, %v2225_v23  ;;  %v2242_v56 = vmul.f32 %v4310_v34, %v2238_v51  ;;  %v2236_v36 = vadd.f32 %v2232_v30, %v2226_v19 }
 0x19d   : > { %v2248_v2 = vstv %s4529_s2  ;;  %v2258_v37 = vstv %s4532_s30  ;;  %v2268_v26 = vstv %s4538_s14  ;;  %v2243_v47 = vadd.f32 %v2239_v24, %v2233_v39  ;;  %s4622_s2 = sld [smem:[#allocation3 + $0x788]] }
 0x19e   : > { %v2244_v54 = vadd.f32 %v2240_v33, %v2234_v25  ;;  %v2245_v7 = vadd.f32 %v2241_v44, %v2235_v35  ;;  %v2249_v6 = vmul.f32 %v4316_v12, %v2248_v2  ;;  %v2246_v9 = vadd.f32 %v2242_v56, %v2236_v36 }
 0x19f   : > { %v2250_v57 = vmul.f32 %v4320_v29, %v2248_v2  ;;  %v2251_v14 = vmul.f32 %v4324_v49, %v2248_v2  ;;  %v2252_v38 = vmul.f32 %v4328_v52, %v2248_v2  ;;  %v2259_v51 = vmul.f32 %v4334_v17, %v2258_v37 }
 0x1a0   : > { %v2253_v11 = vadd.f32 %v2249_v6, %v2243_v47  ;;  %v2260_v61 = vmul.f32 %v4338_v10, %v2258_v37  ;;  %v2261_v18 = vmul.f32 %v4342_v21, %v2258_v37  ;;  %v2262_v30 = vmul.f32 %v4348_v41, %v2258_v37 }
 0x1a1   : > { %v2254_v59 = vadd.f32 %v2250_v57, %v2244_v54  ;;  %v2255_v20 = vadd.f32 %v2251_v14, %v2245_v7  ;;  %v2256_v23 = vadd.f32 %v2252_v38, %v2246_v9  ;;  %v2269_v24 = vmul.f32 %v4359_v27, %v2268_v26 }
 0x1a2   : > { %v2263_v19 = vadd.f32 %v2259_v51, %v2253_v11  ;;  %v2270_v33 = vmul.f32 %v4365_v16, %v2268_v26  ;;  %v2271_v44 = vmul.f32 %v4369_v28, %v2268_v26  ;;  %v2272_v56 = vmul.f32 %v4373_v0, %v2268_v26 }
 0x1a3   : > { %v2264_v39 = vadd.f32 %v2260_v61, %v2254_v59  ;;  %v2265_v25 = vadd.f32 %v2261_v18, %v2255_v20  ;;  %v2266_v35 = vadd.f32 %v2262_v30, %v2256_v23  ;;  %v2278_v2 = vstv %s4556_s24 }
 0x1a4   : > { %v2273_v36 = vadd.f32 %v2269_v24, %v2263_v19  ;;  %v2308_v37 = vstv %s4551_s22  ;;  %v2314_v47 = vstv %s4559_s25  ;;  %v2279_v9 = vmul.f32 %v4377_v46, %v2278_v2 }
 0x1a5   : > { %v2274_v54 = vadd.f32 %v2270_v33, %v2264_v39  ;;  %v2275_v7 = vadd.f32 %v2271_v44, %v2265_v25  ;;  %v2276_v6 = vadd.f32 %v2272_v56, %v2266_v35  ;;  %v2280_v57 = vmul.f32 %v4381_v8, %v2278_v2 }
 0x1a6   : > { %v2281_v14 = vmul.f32 %v4385_v1, %v2278_v2  ;;  %v2282_v38 = vmul.f32 %v4389_v43, %v2278_v2  ;;  %v2309_v26 = vmul.f32 %v4220_v53, %v2308_v37  ;;  %v2283_v11 = vadd.f32 %v2279_v9, %v2273_v36  ;;  %v4604_v36 = vpop.xlane.xlu1 %950  ;;  %v4606_v2 = vpop.xlane.xlu0 %726 }
 0x1a7   : > { %v2310_v51 = vmul.f32 %v4224_v60, %v2308_v37  ;;  %v2311_v61 = vmul.f32 %v4228_v62, %v2308_v37  ;;  %v2312_v18 = vmul.f32 %v4232_v50, %v2308_v37  ;;  %v2284_v59 = vadd.f32 %v2280_v57, %v2274_v54 }
 0x1a8   : > { %v2285_v20 = vadd.f32 %v2281_v14, %v2275_v7  ;;  %v2286_v23 = vadd.f32 %v2282_v38, %v2276_v6  ;;  %v2315_v30 = vadd.f32 %v2314_v47, %v2309_v26  ;;  %v2287_v19 = vmax.f32 %v2283_v11, 0.0  ;;  %v4611_v6 = vpop.xlane.xlu2 %1174 }
 0x1a9   : > { %v2316_v24 = vadd.f32 %v2314_v47, %v2310_v51  ;;  %v2317_v33 = vadd.f32 %v2314_v47, %v2311_v61  ;;  %v2318_v44 = vadd.f32 %v2314_v47, %v2312_v18  ;;  %v2288_v53 = vmax.f32 %v2284_v59, 0.0 }
 0x1aa   : > { %v2289_v39 = vmax.f32 %v2285_v20, 0.0  ;;  %v2290_v25 = vmax.f32 %v2286_v23, 0.0  ;;  %v2320_v35 = vstv %s4572_s27  ;;  %v2330_v47 = vstv %s4577_s12 }
 0x1ab   : > { %v2321_v60 = vmul.f32 %v4239_v32, %v2320_v35  ;;  %v2322_v62 = vmul.f32 %v4243_v42, %v2320_v35  ;;  %v2323_v50 = vmul.f32 %v4247_v4, %v2320_v35  ;;  %v2324_v56 = vmul.f32 %v4251_v15, %v2320_v35 }
 0x1ac   : > { %v2291_v37 = vadd.f32 %v2288_v53, %v2287_v19  ;;  %v2340_v54 = vstv %s4580_s13  ;;  %v2350_v7 = vstv %s4585_s15  ;;  %v2331_v4 = vmul.f32 %v4260_v22, %v2330_v47 }
 0x1ad   : > { %v2325_v9 = vadd.f32 %v2321_v60, %v2315_v30  ;;  %v2326_v32 = vadd.f32 %v2322_v62, %v2316_v24  ;;  %v2327_v57 = vadd.f32 %v2323_v50, %v2317_v33  ;;  %v2328_v42 = vadd.f32 %v2324_v56, %v2318_v44 }
 0x1ae   : > { %v2292_v14 = vadd.f32 %v2291_v37, %v2289_v39  ;;  %v2332_v15 = vmul.f32 %v4785_v13, %v2330_v47  ;;  %v2333_v38 = vmul.f32 %v4786_v48, %v2330_v47  ;;  %v2334_v26 = vmul.f32 %v4274_v45, %v2330_v47  ;;  %v839_v62 = vpop.xlane.xlu0 %838 }
 0x1af   : > { %v2341_v11 = vmul.f32 %v4278_v58, %v2340_v54  ;;  %v2342_v51 = vmul.f32 %v4282_v63, %v2340_v54  ;;  %v2343_v61 = vmul.f32 %v4286_v3, %v2340_v54  ;;  %v2335_v59 = vadd.f32 %v2331_v4, %v2325_v9 }
 0x1b0   : > { %v2293_v18 = vadd.f32 %v2292_v14, %v2290_v25  ;;  %v2336_v20 = vadd.f32 %v2332_v15, %v2326_v32  ;;  %v2337_v22 = vadd.f32 %v2333_v38, %v2327_v57  ;;  %v2338_v13 = vadd.f32 %v2334_v26, %v2328_v42  ;;  %v1287_v47 = vpop.xlane.xlu2 %1286 }
 0x1b1   : > { %v2344_v48 = vmul.f32 %v4294_v40, %v2340_v54  ;;  %v2351_v45 = vmul.f32 %v4298_v5, %v2350_v7  ;;  %v2352_v58 = vmul.f32 %v4302_v31, %v2350_v7  ;;  %v2345_v63 = vadd.f32 %v2341_v11, %v2335_v59 }
 0x1b2   : > { %2294 = vadd.xlane.f32.xlu2 %v2293_v18  ;;  %v2346_v3 = vadd.f32 %v2342_v51, %v2336_v20  ;;  %v2347_v23 = vadd.f32 %v2343_v61, %v2337_v22  ;;  %v2353_v30 = vmul.f32 %v4306_v55, %v2350_v7  ;;  %v2354_v24 = vmul.f32 %v4310_v34, %v2350_v7  ;;  %v1063_v55 = vpop.xlane.xlu1 %1062 }
 0x1b3   : > { %v2348_v19 = vadd.f32 %v2344_v48, %v2338_v13  ;;  %v2360_v33 = vstv %s4596_s16  ;;  %v2370_v44 = vstv %s4602_s23  ;;  %v2355_v53 = vadd.f32 %v2351_v45, %v2345_v63 }
 0x1b4   : > { %v2356_v39 = vadd.f32 %v2352_v58, %v2346_v3  ;;  %v2357_v25 = vadd.f32 %v2353_v30, %v2347_v23  ;;  %v2361_v40 = vmul.f32 %v4316_v12, %v2360_v33  ;;  %v2362_v5 = vmul.f32 %v4320_v29, %v2360_v33 }
 0x1b5   : > { %v2358_v35 = vadd.f32 %v2354_v24, %v2348_v19  ;;  %v2363_v31 = vmul.f32 %v4324_v49, %v2360_v33  ;;  %v2364_v60 = vmul.f32 %v4328_v52, %v2360_v33  ;;  %v2371_v34 = vmul.f32 %v4334_v17, %v2370_v44 }
 0x1b6   : > { %v2365_v50 = vadd.f32 %v2361_v40, %v2355_v53  ;;  %v2372_v56 = vmul.f32 %v4338_v10, %v2370_v44  ;;  %v2373_v37 = vmul.f32 %v4342_v21, %v2370_v44  ;;  %v2366_v12 = vadd.f32 %v2362_v5, %v2356_v39  ;;  %v1399_v58 = vpop.xlane.xlu0 %1398 }
 0x1b7   : > { %v2367_v54 = vadd.f32 %v2363_v31, %v2357_v25  ;;  %v2368_v7 = vadd.f32 %v2364_v60, %v2358_v35  ;;  %v2374_v29 = vmul.f32 %v4348_v41, %v2370_v44  ;;  %v2380_v32 = vstv %s4620_s26 }
 0x1b8   : > { %v2375_v9 = vadd.f32 %v2371_v34, %v2365_v50  ;;  %v2390_v49 = vstv %s4622_s2  ;;  %v952_v52 = vrot.slane %v4604_v36, 4  ;;  %v2376_v57 = vadd.f32 %v2372_v56, %v2366_v12  ;;  %v1623_v30 = vpop.xlane.xlu2 %1622 }
 0x1b9   : > { %v2377_v42 = vadd.f32 %v2373_v37, %v2367_v54  ;;  %v2378_v14 = vadd.f32 %v2374_v29, %v2368_v7  ;;  %v2381_v17 = vmul.f32 %v4359_v27, %v2380_v32  ;;  %v2382_v10 = vmul.f32 %v4365_v16, %v2380_v32 }
 0x1ba   : > { %v2383_v21 = vmul.f32 %v4369_v28, %v2380_v32  ;;  %v2384_v4 = vmul.f32 %v4373_v0, %v2380_v32  ;;  %v2391_v15 = vmul.f32 %v4377_v46, %v2390_v49  ;;  %v2392_v41 = vmul.f32 %v4381_v8, %v2390_v49  ;;  %v1511_v45 = vpop.xlane.xlu1 %1510 }
 0x1bb   : > { %v2385_v38 = vadd.f32 %v2381_v17, %v2375_v9  ;;  %v2393_v26 = vmul.f32 %v4385_v1, %v2390_v49  ;;  %v2394_v11 = vmul.f32 %v4389_v43, %v2390_v49  ;;  %v2386_v51 = vadd.f32 %v2382_v10, %v2376_v57 }
 0x1bc   : > { %v2387_v61 = vadd.f32 %v2383_v21, %v2377_v42  ;;  %v2388_v18 = vadd.f32 %v2384_v4, %v2378_v14  ;;  %v953_v27 = vadd.f32 %v952_v52, %v4604_v36  ;;  %v728_v16 = vrot.slane %v4606_v2, 4 }
 0x1bd   : > { %v2395_v59 = vadd.f32 %v2391_v15, %v2385_v38  ;;  %v1176_v28 = vrot.slane %v4611_v6, 4  ;;  %v1064_v0 = vrot.slane %v1063_v55, 4  ;;  %v2396_v20 = vadd.f32 %v2392_v41, %v2386_v51 }
 0x1be   : > { %v2397_v46 = vadd.f32 %v2393_v26, %v2387_v61  ;;  %v2398_v22 = vadd.f32 %v2394_v11, %v2388_v18  ;;  %v954_v13 = vrot.slane %v953_v27, 2  ;;  %v729_v1 = vadd.f32 %v728_v16, %v4606_v2 }
 0x1bf   : > { %v2399_v8 = vmax.f32 %v2395_v59, 0.0  ;;  %v1177_v43 = vadd.f32 %v1176_v28, %v4611_v6  ;;  %v1065_v48 = vadd.f32 %v1064_v0, %v1063_v55  ;;  %v2400_v63 = vmax.f32 %v2396_v20, 0.0 }
 0x1c0   : > { %v2401_v36 = vmax.f32 %v2397_v46, 0.0  ;;  %v2402_v3 = vmax.f32 %v2398_v22, 0.0  ;;  %v840_v23 = vrot.slane %v839_v62, 4  ;;  %v730_v19 = vrot.slane %v729_v1, 2 }
 0x1c1   : > { %v1178_v24 = vrot.slane %v1177_v43, 2  ;;  %v1066_v33 = vrot.slane %v1065_v48, 2  ;;  %v1288_v44 = vrot.slane %v1287_v47, 4  ;;  %v2403_v53 = vadd.f32 %v2400_v63, %v2399_v8 }
 0x1c2   : > { %v841_v39 = vadd.f32 %v840_v23, %v839_v62  ;;  %v1512_v25 = vrot.slane %v1511_v45, 4  ;;  %v1400_v40 = vrot.slane %v1399_v58, 4  ;;  %v731_v2 = vadd.f32 %v730_v19, %v729_v1  ;;  %v1847_v28 = vpop.xlane.xlu1 %1846 }
 0x1c3   : > { %v1289_v35 = vadd.f32 %v1288_v44, %v1287_v47  ;;  %v1624_v5 = vrot.slane %v1623_v30, 4  ;;  %v955_v6 = vadd.f32 %v954_v13, %v953_v27  ;;  %v2404_v31 = vadd.f32 %v2403_v53, %v2401_v36 }
 0x1c4   : > { %v842_v60 = vrot.slane %v841_v39, 2  ;;  %v1513_v55 = vadd.f32 %v1512_v25, %v1511_v45  ;;  %v1401_v50 = vadd.f32 %v1400_v40, %v1399_v58  ;;  %v732_v56 = vrot.slane %v731_v2, 1 }
 0x1c5   : > { %v1290_v34 = vrot.slane %v1289_v35, 2  ;;  %v1625_v37 = vadd.f32 %v1624_v5, %v1623_v30  ;;  %v956_v12 = vrot.slane %v955_v6, 1  ;;  %v2405_v54 = vadd.f32 %v2404_v31, %v2402_v3 }
 0x1c6   : > { %v1514_v7 = vrot.slane %v1513_v55, 2  ;;  %v1402_v29 = vrot.slane %v1401_v50, 2  ;;  %v843_v9 = vadd.f32 %v842_v60, %v841_v39  ;;  %v733_v32 = vadd.f32 %v732_v56, %v731_v2 }
 0x1c7   : > { %v1626_v62 = vrot.slane %v1625_v37, 2  ;;  %v1067_v49 = vadd.f32 %v1066_v33, %v1065_v48  ;;  %2406 = vadd.xlane.f32.xlu0 %v2405_v54  ;;  %v1179_v52 = vadd.f32 %v1178_v24, %v1177_v43  ;;  %v1291_v57 = vadd.f32 %v1290_v34, %v1289_v35 }
 0x1c8   : > { %v844_v47 = vrot.slane %v843_v9, 1  ;;  %2768 = vpush %v733_v32  ;;  %v1403_v14 = vadd.f32 %v1402_v29, %v1401_v50  ;;  %v1515_v17 = vadd.f32 %v1514_v7, %v1513_v55  ;;  %v957_v4 = vadd.f32 %v956_v12, %v955_v6 }
 0x1c9   : > { %v1068_v42 = vrot.slane %v1067_v49, 1  ;;  %v1627_v10 = vadd.f32 %v1626_v62, %v1625_v37  ;;  %v1180_v15 = vrot.slane %v1179_v52, 1  ;;  %v1292_v38 = vrot.slane %v1291_v57, 1 }
 0x1ca   : > { %v845_v21 = vadd.f32 %v844_v47, %v843_v9  ;;  %v1404_v26 = vrot.slane %v1403_v14, 1  ;;  %v1516_v11 = vrot.slane %v1515_v17, 1  ;;  %v1848_v46 = vrot.slane %v1847_v28, 4 }
 0x1cb   : > { %v1069_v41 = vadd.f32 %v1068_v42, %v1067_v49  ;;  %v1628_v51 = vrot.slane %v1627_v10, 1  ;;  %v1293_v61 = vadd.f32 %v1292_v38, %v1291_v57  ;;  %v1181_v18 = vadd.f32 %v1180_v15, %v1179_v52  ;;  %v2420_v38 = vld [vmem:[%s4746_s3 + $0x8] sm:$0xff] }
 0x1cc   : > { %2770 = vpush %v845_v21  ;;  %v1405_v27 = vadd.f32 %v1404_v26, %v1403_v14  ;;  %v1517_v59 = vadd.f32 %v1516_v11, %v1515_v17  ;;  %v1735_v0 = vpop.xlane.xlu0 %1734  ;;  %v1849_v8 = vadd.f32 %v1848_v46, %v1847_v28  ;;  %v625_v17 = vlaneseq  ;;  %2440 = vmatpush.msra.mxu0 %v2420_v38  ;;  %v2419_v11 = vld [vmem:[%s4746_s3] sm:$0xff] }
 0x1cd   : > { %2772 = vpush %v957_v4  ;;  %v1629_v16 = vadd.f32 %v1628_v51, %v1627_v10  ;;  %v1736_v22 = vrot.slane %v1735_v0, 4 }
 0x1ce   : > { %2774 = vpush %v1069_v41  ;;  %v1850_v48 = vrot.slane %v1849_v8, 2  ;;  %v4655_v10 = vand.u32 127, %v625_v17  ;;  %2441 = vmatpush.msra.mxu0 %v2419_v11 }
 0x1cf   : > { %2776 = vpush %v1181_v18  ;;  %v1737_v1 = vadd.f32 %v1736_v22, %v1735_v0 }
 0x1d0   : > { %2778 = vpush %v1293_v61  ;;  %v1851_v23 = vadd.f32 %v1850_v48, %v1849_v8  ;;  %vm736_vm0 = vcmp.eq.s32.totalorder %v4655_v10, 0  ;;  %vm848_vm1 = vcmp.eq.s32.totalorder %v4655_v10, 1  ;;  %vm960_vm2 = vcmp.eq.s32.totalorder %v4655_v10, 2 }
 0x1d1   : > { %2780 = vpush %v1405_v27  ;;  %v1738_v45 = vrot.slane %v1737_v1, 2  ;;  %vm1072_vm3 = vcmp.eq.s32.totalorder %v4655_v10, 3  ;;  %vm1184_vm4 = vcmp.eq.s32.totalorder %v4655_v10, 4  ;;  %vm1296_vm5 = vcmp.eq.s32.totalorder %v4655_v10, 5 }
 0x1d2   : > { %2782 = vpush %v1517_v59  ;;  %v1852_v44 = vrot.slane %v1851_v23, 1  ;;  %vm1408_vm6 = vcmp.eq.s32.totalorder %v4655_v10, 6  ;;  %vm1520_vm7 = vcmp.eq.s32.totalorder %v4655_v10, 7  ;;  %vm1632_vm8 = vcmp.eq.s32.totalorder %v4655_v10, 8 }
 0x1d3   : > { %2784 = vpush %v1629_v16  ;;  %v1739_v3 = vadd.f32 %v1738_v45, %v1737_v1  ;;  %vm1744_vm9 = vcmp.eq.s32.totalorder %v4655_v10, 9  ;;  %vm1856_vm10 = vcmp.eq.s32.totalorder %v4655_v10, 10  ;;  %vm1968_vm11 = vcmp.eq.s32.totalorder %v4655_v10, 11 }
 0x1d4   : > { %v1853_v40 = vadd.f32 %v1852_v44, %v1851_v23  ;;  %vm2080_vm12 = vcmp.eq.s32.totalorder %v4655_v10, 12  ;;  %vm2192_vm13 = vcmp.eq.s32.totalorder %v4655_v10, 13  ;;  %vm2304_vm14 = vcmp.eq.s32.totalorder %v4655_v10, 14 }
 0x1d5   : > { %v1740_v33 = vrot.slane %v1739_v3, 1  ;;  %vm2416_vm15 = vcmp.eq.s32.totalorder %v4655_v10, 15 }
 0x1d7   : > { %v1741_v25 = vadd.f32 %v1740_v33, %v1739_v3 }
 0x1d9   : > { %2786 = vpush %v1741_v25  ;;  %v2469_v25 = vld [vmem:[%s4752_s9 + $0x18] sm:$0xff] }
 0x1da   : > { %2788 = vpush %v1853_v40  ;;  %v2468_v40 = vld [vmem:[%s4752_s9 + $0x10] sm:$0xff]  ;;  %2487 = vmatpush.msra.mxu1 %v2469_v25 }
 0x1dc   : > { %2488 = vmatpush.msra.mxu1 %v2468_v40 }
 0x1e1   : > { %v1959_v20 = vpop.xlane.xlu2 %1958 }
 0x1e2   : > { %v1960_v13 = vrot.slane %v1959_v20, 4 }
 0x1e4   : > { %v1961_v43 = vadd.f32 %v1960_v13, %v1959_v20 }
 0x1e6   : > { %v1962_v58 = vrot.slane %v1961_v43, 2 }
 0x1e8   : > { %v1963_v30 = vadd.f32 %v1962_v58, %v1961_v43 }
 0x1ea   : > { %v1964_v53 = vrot.slane %v1963_v30, 1 }
 0x1ec   : > { %v1965_v35 = vadd.f32 %v1964_v53, %v1963_v30  ;;  %v2448_v53 = vld [vmem:[%s4751_s8] sm:$0x1] }
 0x1ee   : > { %2790 = vpush %v1965_v35  ;;  %v2467_v35 = vld [vmem:[%s4752_s9 + $0x8] sm:$0xff] }
 0x1ef   : > { %2489 = vmatpush.msra.mxu1 %v2467_v35 }
 0x1f7   : > { %v2183_v63 = vpop.xlane.xlu1 %2182 }
 0x1f8   : > { %v2184_v36 = vrot.slane %v2183_v63, 4 }
 0x1f9   : > { %s2769_s30 = spop %2768 }
 0x1fa   : > { %v2185_v39 = vadd.f32 %v2184_v36, %v2183_v63  ;;  %s735_s22 = smul.f32 0.00024414063, %s2769_s30 }
 0x1fc   : > { %v2186_v5 = vrot.slane %v2185_v39, 2  ;;  %v737_v21 = vstv %s735_s22 }
 0x1fd   : > { %s2771_s14 = spop %2770  ;;  %v738_v15 = vsel %vm736_vm0, %v737_v21, 0.0  ;;  %vm2422_vm0 = vcmask 130048  }
 0x1fe   : > { %v2187_v31 = vadd.f32 %v2186_v5, %v2185_v39  ;;  %s847_s24 = smul.f32 0.00024414063, %s2771_s14  ;;  %s2773_s25 = spop %2772  ;;  %v2449_v39 = vadd.f32 1e-05, %v2448_v53 }
 0x1ff   : > { %s959_s27 = smul.f32 0.00024414063, %s2773_s25  ;;  %s2775_s12 = spop %2774 }
 0x200   : > { %v2188_v50 = vrot.slane %v2187_v31, 1  ;;  %v849_v4 = vstv %s847_s24  ;;  %s2777_s16 = spop %2776  ;;  %s1071_s23 = smul.f32 0.00024414063, %s2775_s12  ;;  %2862 = vrsqrt.f32 %v2449_v39 }
 0x201   : > { %v850_v41 = vsel %vm848_vm1, %v849_v4, %v738_v15  ;;  %v961_v26 = vstv %s959_s27  ;;  %s2779_s30 = spop %2778  ;;  %s1183_s22 = smul.f32 0.00024414063, %s2777_s16  ;;  %vm2456_vm1 = vweird.f32 %v2449_v39 }
 0x202   : > { %v2189_v56 = vadd.f32 %v2188_v50, %v2187_v31  ;;  %v962_v51 = vsel %vm960_vm2, %v961_v26, %v850_v41  ;;  %s2781_s14 = spop %2780  ;;  %v1073_v61 = vstv %s1071_s23  ;;  %s1295_s27 = smul.f32 0.00024414063, %s2779_s30  ;;  %v2421_v50 = vld [vmem:[%s4747_s4] sm:$0x1] }
 0x203   : > { %v1074_v18 = vsel %vm1072_vm3, %v1073_v61, %v962_v51  ;;  %s1407_s24 = smul.f32 0.00024414063, %s2781_s14  ;;  %s2783_s25 = spop %2782  ;;  %v1185_v27 = vstv %s1183_s22 }
 0x204   : > { %v1186_v59 = vsel %vm1184_vm4, %v1185_v27, %v1074_v18  ;;  %s1519_s12 = smul.f32 0.00024414063, %s2783_s25  ;;  %s2785_s13 = spop %2784  ;;  %v1297_v28 = vstv %s1295_s27  ;;  %vm2471_vm4 = vcmask 261120  }
 0x205   : > { %v1409_v16 = vstv %s1407_s24  ;;  %v1298_v0 = vsel %vm1296_vm5, %v1297_v28, %v1186_v59  ;;  %s1631_s16 = smul.f32 0.00024414063, %s2785_s13  ;;  %vm2495_vm5 = vcmask 8192  }
 0x206   : > { %v1410_v20 = vsel %vm1408_vm6, %v1409_v16, %v1298_v0  ;;  %v1521_v46 = vstv %s1519_s12  ;;  %v2863_v5 = vpop.eup %2862 }
 0x207   : > { %v1522_v22 = vsel %vm1520_vm7, %v1521_v46, %v1410_v20  ;;  %v1633_v13 = vstv %s1631_s16  ;;  %vm2457_vm2 = vweird.f32 %v2863_v5 }
 0x208   : > { %v1634_v1 = vsel %vm1632_vm8, %v1633_v13, %v1522_v22  ;;  %vm2458_vm3 = vmor %vm2456_vm1, %vm2457_vm2 }
 0x20a   : > { %s2787_s15 = spop %2786 }
 0x20b   : > { %s1743_s23 = smul.f32 0.00024414063, %s2787_s15  ;;  %s2789_s26 = spop %2788 }
 0x20c   : > { %s1855_s2 = smul.f32 0.00024414063, %s2789_s26 }
 0x20d   : > { %v2071_v19 = vpop.xlane.xlu0 %2070  ;;  %v1745_v8 = vstv %s1743_s23  ;;  %s2498_s23 = scalar_lea.sflag [#allocation4], %s3259_s1 }
 0x20e   : > { %v2072_v24 = vrot.slane %v2071_v19, 4  ;;  %v1746_v43 = vsel %vm1744_vm9, %v1745_v8, %v1634_v1  ;;  %v1857_v48 = vstv %s1855_s2 }
 0x20f   : > { %v1858_v45 = vsel %vm1856_vm10, %v1857_v48, %v1746_v43 }
 0x210   : > { %v2073_v2 = vadd.f32 %v2072_v24, %v2071_v19 }
 0x212   : > { %v2074_v6 = vrot.slane %v2073_v2, 2 }
 0x214   : > { %v2075_v60 = vadd.f32 %v2074_v6, %v2073_v2  ;;  %v2466_v2 = vld [vmem:[%s4752_s9] sm:$0xff]  ;;  %v2451_v6 = vmul.f32 %v2863_v5, %v2449_v39 }
 0x215   : > { %2490 = vmatpush.msra.mxu1 %v2466_v2 }
 0x216   : > { %v2076_v55 = vrot.slane %v2075_v60, 1  ;;  %v2452_v31 = vmul.f32 %v2863_v5, %v2451_v6 }
 0x218   : > { %v2077_v34 = vadd.f32 %v2076_v55, %v2075_v60  ;;  %v2453_v60 = vmul.f32 0.5, %v2452_v31 }
 0x21a   : > { %2792 = vpush %v2077_v34  ;;  %v2454_v55 = vsub.f32 1.5, %v2453_v60 }
 0x21b   : > { %2794 = vpush %v2189_v56 }
 0x21c   : > { %v2455_v34 = vmul.f32 %v2863_v5, %v2454_v55 }
 0x21f   : > { %s2791_s30 = spop %2790 }
 0x220   : > { %s1967_s22 = smul.f32 0.00024414063, %s2791_s30 }
 0x222   : > { %v1969_v58 = vstv %s1967_s22 }
 0x223   : > { %v1970_v36 = vsel %vm1968_vm11, %v1969_v58, %v1858_v45 }
 0x225   : > { %v2295_v37 = vpop.xlane.xlu2 %2294 }
 0x226   : > { %v2296_v12 = vrot.slane %v2295_v37, 4 }
 0x228   : > { %v2297_v54 = vadd.f32 %v2296_v12, %v2295_v37  ;;  %v2446_v37 = vld [vmem:[%s4750_s7] sm:$0x1] }
 0x22a   : > { %v2298_v7 = vrot.slane %v2297_v54, 2 }
 0x22c   : > { %v2299_v29 = vadd.f32 %v2298_v7, %v2297_v54  ;;  %v2459_v54 = vsel %vm2458_vm3, %v2863_v5, %v2455_v34 }
 0x22e   : > { %v2300_v9 = vrot.slane %v2299_v29, 1 }
 0x230   : > { %v2301_v32 = vadd.f32 %v2300_v9, %v2299_v29  ;;  %v2461_v29 = vld [vmem:[%s4748_s5] sm:$0x1] }
 0x232   : > { %2796 = vpush %v2301_v32  ;;  %v2463_v32 = vld [vmem:[%s4749_s6] sm:$0x1] }
 0x23a   : > { %v2407_v62 = vpop.xlane.xlu0 %2406 }
 0x23b   : > { %v2408_v49 = vrot.slane %v2407_v62, 4 }
 0x23d   : > { %v2409_v47 = vadd.f32 %v2408_v49, %v2407_v62 }
 0x23f   : > { %v2410_v52 = vrot.slane %v2409_v47, 2 }
 0x241   : > { %v2411_v57 = vadd.f32 %v2410_v52, %v2409_v47  ;;  %v2470_v52 = vld [vmem:[%s4753_s10] sm:$0x1] }
 0x243   : > { %v2412_v42 = vrot.slane %v2411_v57, 1 }
 0x245   : > { %v2413_v14 = vadd.f32 %v2412_v42, %v2411_v57 }
 0x247   : > { %2798 = vpush %v2413_v14 }
 0x24b   : > { %s2793_s14 = spop %2792 }
 0x24c   : > { %s2079_s24 = smul.f32 0.00024414063, %s2793_s14  ;;  %s2795_s25 = spop %2794 }
 0x24d   : > { %s2191_s27 = smul.f32 0.00024414063, %s2795_s25  ;;  %s2506_s25 = scalar_lea.hbm %s4754_s11, %s3123_s21 }
 0x24e   : > { %v2081_v63 = vstv %s2079_s24  ;;  %s2986_s14 = scalar_lea.hbm %s4754_s11, 2 }
 0x24f   : > { %v2082_v3 = vsel %vm2080_vm12, %v2081_v63, %v1970_v36  ;;  %v2193_v23 = vstv %s2191_s27 }
 0x250   : > { %v2194_v30 = vsel %vm2192_vm13, %v2193_v23, %v2082_v3 }
 0x263   : > { %s2797_s12 = spop %2796 }
 0x264   : > { %s2303_s13 = smul.f32 0.00024414063, %s2797_s12 }
 0x266   : > { %v2305_v19 = vstv %s2303_s13  ;;  %s588_s13 = scalar_lea.vmem [#allocation8], %s3259_s1 }
 0x267   : > { %v2306_v24 = vsel %vm2304_vm14, %v2305_v19, %v2194_v30 }
 0x278   : > { %s2799_s15 = spop %2798 }
 0x279   : > { %s2415_s16 = smul.f32 0.00024414063, %s2799_s15  ;;  %s2508_s15 = sshll.u32 %s588_s13, 4  ;;  %s2509_s15 = int_to_ptr.vmem [resolvable:$true] %s2508_s15 }
 0x27b   : > { %v2417_v33 = vstv %s2415_s16  ;;  %s2510_s16 = sshll.u32 %s2506_s25, 4  ;;  %s2511_s16 = int_to_ptr.hbm [resolvable:$true] %s2510_s16 }
 0x27c   : > { %v2418_v44 = vsel %vm2416_vm15, %v2417_v33, %v2306_v24  ;;  %s2980_s26 = sshra.s32 %s2511_s16, 4  ;;  %s2981_s26 = int_to_ptr.hbm [resolvable:$true] %s2980_s26 }
 0x27d   : > { %2761 = vmatmul.msk.f32.vlgmr.msra.gmra.mxu0 %vm2422_vm0, %v2418_v44  ;;  %s2982_s2 = scalar_lea.hbm %s2981_s26, 1  ;;  %p2987_p5 = scmp.lt.s32.totalorder %s2981_s26, %s4754_s11 }
 0x27e   : > { %p2983_p2 = scmp.ne.s32.totalorder %s2981_s26, %s2982_s2  ;;  %p2988_p7 = scmp.lt.s32.totalorder %s2986_s14, %s2982_s2 }
 0x280   : > { %p2984_p3 = pnand %p2983_p2, %p3145_p6  ;;  %p2989_p8 = por %p2988_p7, %p2987_p5 }
 0x282   : > { %p2985_p4 = pneg %p2984_p3 }
 0x284   : > { %p2990_p9 = pnand %p2989_p8, %p2985_p4 }
 0x2fa   : > { %v2443_v56 = vpop.f32.mrf.mxu0 }
 0x2fb   : > { %v2444_v12 = vadd.f32 %v2443_v56, %v2421_v50 }
 0x2fd   : > { %v2447_v7 = vsub.f32 %v2444_v12, %v2446_v37 }
 0x2ff   : > { %v2460_v9 = vmul.f32 %v2459_v54, %v2447_v7 }
 0x301   : > { %v2462_v62 = vmul.f32 %v2461_v29, %v2460_v9 }
 0x303   : > { %v2464_v49 = vadd.f32 %v2463_v32, %v2462_v62 }
 0x305   : > { %v2465_v47 = vmax.f32 %v2464_v49, 0.0 }
 0x307   : > { %2762 = vmatmul.msk.f32.vlgmr.msra.gmra.mxu1 %vm2471_vm4, %v2465_v47 }
 0x384   : > { %v2492_v57 = vpop.f32.mrf.mxu1 }
 0x385   : > { %v2493_v42 = vadd.f32 %v2492_v57, %v2470_v52 }
 0x387   : > { %2496 = vst.msk [vmem:[%s588_s13] sm:$0x1] %vm2495_vm5, %v2493_v42 }
 0x388   : > { %2993 = shalt.err (!%p2990_p9)
}
 0x389   : > { %2808 = dma.vmem_to_hbm [thread:$0]  (%p3145_p6), %s2509_s15, 16, %s2511_s16, %s2498_s23  }
 0x38a PF: > { %s2522_s1 = sand.u32 1, %s3024_s17   ;;  %p2818_p11 = pnand %p2597_p1, %p3151_p10 }
 0x38b   : > { %s2523_s25 = scalar_lea.sflag [#allocation4], %s2522_s1 }
 0x38c   : > { %p2819_p12 = pneg %p2818_p11 }
 0x38e   : > { %3019 = dma.done.wait (%p2819_p12), %s2523_s25, 16  }
 0x38f   : > { %3021 = vsyncadd (%p2819_p12), %s2523_s25, 4294967280  ;;  %s4787_s20 = sld [smem:[#allocation12_spill]]  ;;  %s4789_s17 = smov %s3028_s18 }
 0x390   : > { %s4788_s27 = sld [smem:[#allocation13_spill]]  ;;  %s4790_s18 = smov %s3032_s19 }
 0x395   : > { %p23_p13 = scmp.ge.s32.totalorder %s4787_s20, 4  }
 0x396   : > { %s4791_s19 = smov %s4788_s27 }
 0x397   :  { %25 = sbr.rel (!%p23_p13) target bundleno = 8 (0x8), region = 151 }
 0x39c   :  { %2528 = vsyncpa [#allocation4], 1 }
 0x39d   :  { %2530 = vsyncpa [#allocation4 + $0x1], 1 }
 0x39e   :  { %2531 = vsyncpa [#allocation5], 1 }
 0x39f   :  { %2533 = vsyncpa [#allocation5 + $0x1], 1 }
 0x3a0   :  { %2534 = vsyncpa [#allocation7], 1 }

</bundles_post_ra>
